<compile_context>
chip_gen: v7x
topology: tpu7x:2x2x1
jax: 0.10.0
libtpu: 0.0.40
codegen_flags: <defaults>
</compile_context>

<pallas_src>
import math

import jax
import jax.numpy as jnp
from jax import lax
from jax.experimental import pallas as pl
from jax.experimental.pallas import tpu as pltpu

# ----------------------------- configuration ------------------------------ #
# Encoder (stand-in for the frozen vision model)
IMG_C, IMG_H, IMG_W = 3, 32, 32
PATCH = 8
ENC_DIM = 256          # "encoder_output_dim"
ENC_HEADS = 4
ENC_FF = 512

# Decoder (TransformerDecoder hyper-params from __init__)
VOCAB = 512            # decoder_vocab_size
DEC_EMBED = 128        # decoder_embed_dim
DEC_HEADS = 4          # decoder_heads
DEC_LAYERS = 2         # decoder_layers
DEC_FF = 256           # decoder_ff_dim
MAX_SEQ = 16           # decoder_max_seq_len
DEC_DROPOUT = 0.1      # decoder_dropout (eval-mode forward -> identity)
PAD_IDX = 0            # decoder_pad_idx

GRID_H, GRID_W = IMG_H // PATCH, IMG_W // PATCH
N_PATCH = GRID_H * GRID_W                 # 16
PATCH_DIM = IMG_C * PATCH * PATCH         # 192
ENC_T = N_PATCH + 1                       # 17 (patches + CLS)

MM_DTYPE = jnp.bfloat16                   # MXU operand dtype (f32 accumulate)
NEG_INF = -1e30
EMB_SCALE = math.sqrt(DEC_EMBED)


# --------------------------- in-kernel helpers ----------------------------- #
def _mm(a, b):
    """a @ b on the MXU: bf16 operands, f32 accumulation."""
    return jnp.dot(a.astype(MM_DTYPE), b.astype(MM_DTYPE),
                   preferred_element_type=jnp.float32)


def _mm_nt(a, b):
    """a @ b.T (contract last dims), bf16 operands, f32 accumulation."""
    return lax.dot_general(a.astype(MM_DTYPE), b.astype(MM_DTYPE),
                           (((1,), (1,)), ((), ())),
                           preferred_element_type=jnp.float32)


def _layernorm(x, g, b, eps=1e-5):
    """LayerNorm over the last dim, f32 math. g/b are (1, E)."""
    mean = jnp.mean(x, axis=-1, keepdims=True)
    c = x - mean
    var = jnp.mean(c * c, axis=-1, keepdims=True)
    return c * lax.rsqrt(var + eps) * g + b


def _softmax_lastdim(s):
    """Numerically stable softmax over the last dim, f32."""
    s = s - jnp.max(s, axis=-1, keepdims=True)
    p = jnp.exp(s)
    return p * pl.reciprocal(jnp.sum(p, axis=-1, keepdims=True), approx=True)


def _mha_self(x, w_qkv, b_qkv, w_o, b_o, num_heads, mask=None):
    """Fused multi-head self-attention on a single (T, E) block.

    One wide QKV matmul; per-head scores/softmax/PV via static lane slices;
    the output projection is folded into the head loop so every matmul result
    is E lanes wide (lane-dense, no head-dim-last stores, no concatenation).
    NOTE: if an entire query row is masked (all-PAD key row) the softmax
    degrades to uniform rather than NaN — matches the previous implementation,
    not triggered by the test inputs.
    """
    T, E = x.shape
    dh = E // num_heads
    scale = 1.0 / math.sqrt(dh)
    qkv = _mm(x, w_qkv) + b_qkv                       # (T, 3E) f32
    acc = None
    for h in range(num_heads):
        q = qkv[:, h * dh:(h + 1) * dh]
        k = qkv[:, E + h * dh:E + (h + 1) * dh]
        v = qkv[:, 2 * E + h * dh:2 * E + (h + 1) * dh]
        s = _mm_nt(q, k) * scale                      # (T, T) f32
        if mask is not None:
            s = jnp.where(mask, s, NEG_INF)
        p = _softmax_lastdim(s)
        o_h = _mm(p, v)                               # (T, dh)
        # concat_h(o_h) @ W_o == sum_h o_h @ W_o[h*dh:(h+1)*dh, :]
        contrib = _mm(o_h, w_o[h * dh:(h + 1) * dh, :])   # (T, E)
        acc = contrib if acc is None else acc + contrib
    return acc + b_o


# --------------------------- fused encoder kernel --------------------------- #
def _encoder_kernel(patches_ref, w_patch_ref, b_patch_ref, cls_ref, pos_ref,
                    w_qkv_ref, b_qkv_ref, w_o_ref, b_o_ref,
                    ln1_g_ref, ln1_b_ref, w1_ref, b1_ref, w2_ref, b2_ref,
                    ln2_g_ref, ln2_b_ref, cls_out_ref):
    # Patch embedding for this batch element: (N_PATCH, PATCH_DIM) @ (PATCH_DIM, ENC_DIM)
    emb = _mm(patches_ref[0], w_patch_ref[...]) + b_patch_ref[...]      # (16, 256)

    # The CLS token is kept as the LAST row inside the kernel so all slices /
    # concatenations stay sublane-aligned (offset 16 is a multiple of 8).  It
    # still attends over every patch token and is the row extracted as the
    # last_hidden_state[:, 0, :] equivalent.  pos_ref[N_PATCH] is its pos-emb.
    x = jnp.concatenate([emb, cls_ref[...]], axis=0) + pos_ref[...]     # (17, 256)

    # One post-LN transformer encoder block; no mask (all tokens valid).
    a = _mha_self(x, w_qkv_ref[...], b_qkv_ref[...], w_o_ref[...], b_o_ref[...],
                  ENC_HEADS)
    x = _layernorm(x + a, ln1_g_ref[...], ln1_b_ref[...])
    h = jnp.maximum(_mm(x, w1_ref[...]) + b1_ref[...], 0.0)
    h = _mm(h, w2_ref[...]) + b2_ref[...]
    x = _layernorm(x + h, ln2_g_ref[...], ln2_b_ref[...])

    cls_out_ref[0] = x[N_PATCH:N_PATCH + 1, :]          # CLS feature (1, 256)


def encoder_forward(p, images):
    """Frozen ViT-style encoder; returns the CLS feature (B, ENC_DIM)."""
    B = images.shape[0]
    # Unfold NCHW -> (B, N_PATCH, C*P*P): pure data-movement glue.
    patches = (images.reshape(B, IMG_C, GRID_H, PATCH, GRID_W, PATCH)
                     .transpose(0, 2, 4, 1, 3, 5)
                     .reshape(B, N_PATCH, PATCH_DIM))

    rep2 = lambda b: (0, 0)                      # weights: same block every step
    full2d = lambda a: pl.BlockSpec(a.shape, rep2)

    args = (patches, p["w_patch"], p["b_patch"], p["cls"], p["pos"],
            p["w_qkv"], p["b_qkv"], p["w_o"], p["b_o"],
            p["ln1_g"], p["ln1_b"], p["w1"], p["b1"], p["w2"], p["b2"],
            p["ln2_g"], p["ln2_b"])

    dh = ENC_DIM // ENC_HEADS
    flops = 2 * B * (N_PATCH * PATCH_DIM * ENC_DIM
                     + ENC_T * ENC_DIM * 3 * ENC_DIM
                     + 2 * ENC_HEADS * ENC_T * ENC_T * dh
                     + ENC_T * ENC_DIM * ENC_DIM
                     + 2 * ENC_T * ENC_DIM * ENC_FF)
    transcendentals = B * (ENC_HEADS * ENC_T * ENC_T + 4 * ENC_T)
    bytes_accessed = 4 * (sum(int(a.size) for a in args) + B * ENC_DIM)

    cls_feat = pl.pallas_call(
        _encoder_kernel,
        out_shape=jax.ShapeDtypeStruct((B, 1, ENC_DIM), jnp.float32),
        grid=(B,),
        in_specs=[pl.BlockSpec((1, N_PATCH, PATCH_DIM), lambda b: (b, 0, 0))]
                 + [full2d(a) for a in args[1:]],
        out_specs=pl.BlockSpec((1, 1, ENC_DIM), lambda b: (b, 0, 0)),
        compiler_params=pltpu.CompilerParams(dimension_semantics=("parallel",)),
        cost_estimate=pl.CostEstimate(flops=flops,
                                      transcendentals=transcendentals,
                                      bytes_accessed=bytes_accessed),
    )(*args)
    return cls_feat[:, 0, :]                                  # (B, ENC_DIM)


# --------------------------- fused decoder kernel --------------------------- #
def _decoder_kernel(x_ref, npad_ref, cls_ref, pos_ref, w_proj_ref, b_proj_ref,
                    w_qkv_ref, b_qkv_ref, w_so_ref, b_so_ref,
                    w_cv_ref, b_cv_ref, w_co_ref, b_co_ref,
                    ln1_g_ref, ln1_b_ref, ln2_g_ref, ln2_b_ref,
                    ln3_g_ref, ln3_b_ref,
                    w1_ref, b1_ref, w2_ref, b2_ref,
                    w_out_ref, b_out_ref, out_ref):
    T, E = x_ref.shape[1], x_ref.shape[2]

    # memory = projection(frozen CLS feature); memory sequence length == 1.
    mem = _mm(cls_ref[0], w_proj_ref[...]) + b_proj_ref[...]           # (1, E)

    # Causal + key-padding mask built in-kernel (no (B*H,T,T) HBM tensor).
    row = lax.broadcasted_iota(jnp.int32, (T, T), 0)
    col = lax.broadcasted_iota(jnp.int32, (T, T), 1)
    allow = (col <= row) & (npad_ref[0] > 0.5)                         # (T, T)

    # Token embedding scale + positional embedding (dropout: eval -> identity).
    x = x_ref[0] * EMB_SCALE + pos_ref[...]                            # (T, E) f32

    for l in range(DEC_LAYERS):                                        # unrolled (2)
        # --- masked multi-head self-attention + residual + LN ---
        a = _mha_self(x, w_qkv_ref[l], b_qkv_ref[l], w_so_ref[l], b_so_ref[l],
                      DEC_HEADS, mask=allow)
        x = _layernorm(x + a, ln1_g_ref[l], ln1_b_ref[l])

        # --- cross-attention over the single memory token ---
        # With exactly one (unmasked) key the softmax is identically 1, so the
        # attention output equals the V-projection of the memory token
        # broadcast to every query position; the Q/K projections cancel
        # mathematically and are omitted (numerically identical result).
        v_mem = _mm(mem, w_cv_ref[l]) + b_cv_ref[l]                    # (1, E)
        c = _mm(v_mem, w_co_ref[l]) + b_co_ref[l]                      # (1, E)
        x = _layernorm(x + c, ln2_g_ref[l], ln2_b_ref[l])

        # --- feed-forward + residual + LN ---
        h = jnp.maximum(_mm(x, w1_ref[l]) + b1_ref[l], 0.0)
        h = _mm(h, w2_ref[l]) + b2_ref[l]
        x = _layernorm(x + h, ln3_g_ref[l], ln3_b_ref[l])

    # Vocab head -> lane-dense (T, VOCAB) store.
    out_ref[0] = _mm(x, w_out_ref[...]) + b_out_ref[...]


def decoder_forward(p, tgt_tokens, cls_feat):
    """Projection + TransformerDecoder + vocab head in one fused pallas_call."""
    B, T = tgt_tokens.shape
    E = DEC_EMBED

    x_tok = p["tok_emb"][tgt_tokens]                                   # gather (glue)
    not_pad = (tgt_tokens != PAD_IDX).astype(jnp.float32).reshape(B, 1, T)
    pos = p["pos_emb"][:T]                                             # (T, E)
    cls3 = cls_feat.reshape(B, 1, ENC_DIM)

    rep2 = lambda b: (0, 0)
    rep3 = lambda b: (0, 0, 0)

    def full_spec(a):
        return pl.BlockSpec(a.shape, rep2 if a.ndim == 2 else rep3)

    args = (x_tok, not_pad, cls3, pos,
            p["w_proj"], p["b_proj"],
            p["w_self_qkv"], p["b_self_qkv"], p["w_self_o"], p["b_self_o"],
            p["w_cross_v"], p["b_cross_v"], p["w_cross_o"], p["b_cross_o"],
            p["ln1_g"], p["ln1_b"], p["ln2_g"], p["ln2_b"],
            p["ln3_g"], p["ln3_b"],
            p["w1"], p["b1"], p["w2"], p["b2"],
            p["w_out"], p["b_out"])

    in_specs = [
        pl.BlockSpec((1, T, E), lambda b: (b, 0, 0)),          # token embeddings
        pl.BlockSpec((1, 1, T), lambda b: (b, 0, 0)),          # not-pad vector
        pl.BlockSpec((1, 1, ENC_DIM), lambda b: (b, 0, 0)),    # CLS feature
    ] + [full_spec(a) for a in args[3:]]

    dh = E // DEC_HEADS
    per_b = (ENC_DIM * E
             + DEC_LAYERS * (T * E * 3 * E
                             + 2 * DEC_HEADS * T * T * dh
                             + T * E * E
                             + 2 * E * E
                             + 2 * T * E * DEC_FF)
             + T * E * VOCAB)
    flops = 2 * B * per_b
    transcendentals = B * DEC_LAYERS * (DEC_HEADS * T * T + 3 * T)
    bytes_accessed = 4 * (sum(int(a.size) for a in args) + B * T * VOCAB)

    return pl.pallas_call(
        _decoder_kernel,
        out_shape=jax.ShapeDtypeStruct((B, T, VOCAB), jnp.float32),
        grid=(B,),
        in_specs=in_specs,
        out_specs=pl.BlockSpec((1, T, VOCAB), lambda b: (b, 0, 0)),
        compiler_params=pltpu.CompilerParams(dimension_semantics=("parallel",)),
        cost_estimate=pl.CostEstimate(flops=flops,
                                      transcendentals=transcendentals,
                                      bytes_accessed=bytes_accessed),
    )(*args)


# ------------------------------ full forward ------------------------------- #
@jax.jit
def image_to_text_forward(params, image_tensors, tgt_tokens):
    # Frozen encoder (torch.no_grad -> stop_gradient): one fused Pallas call.
    cls_feat = jax.lax.stop_gradient(
        encoder_forward(params["encoder"], image_tensors))
    # Projection + full TransformerDecoder + vocab head: one fused Pallas call.
    return decoder_forward(params["decoder"], tgt_tokens, cls_feat)


# ---------------------------- parameter init ------------------------------- #
def init_params(key):
    ks = iter(jax.random.split(key, 64))

    def normal(shape, scale=0.02):
        return scale * jax.random.normal(next(ks), shape, jnp.float32)

    encoder = {
        "w_patch": normal((PATCH_DIM, ENC_DIM)),
        "b_patch": jnp.zeros((1, ENC_DIM), jnp.float32),
        "cls": normal((1, ENC_DIM)),
        "pos": normal((ENC_T, ENC_DIM)),            # pos[N_PATCH] = CLS position
        "w_qkv": normal((ENC_DIM, 3 * ENC_DIM)),    # fused Wq | Wk | Wv
        "b_qkv": jnp.zeros((1, 3 * ENC_DIM), jnp.float32),
        "w_o": normal((ENC_DIM, ENC_DIM)),
        "b_o": jnp.zeros((1, ENC_DIM), jnp.float32),
        "ln1_g": jnp.ones((1, ENC_DIM), jnp.float32),
        "ln1_b": jnp.zeros((1, ENC_DIM), jnp.float32),
        "w1": normal((ENC_DIM, ENC_FF)),
        "b1": jnp.zeros((1, ENC_FF), jnp.float32),
        "w2": normal((ENC_FF, ENC_DIM)),
        "b2": jnp.zeros((1, ENC_DIM), jnp.float32),
        "ln2_g": jnp.ones((1, ENC_DIM), jnp.float32),
        "ln2_b": jnp.zeros((1, ENC_DIM), jnp.float32),
    }

    L, E = DEC_LAYERS, DEC_EMBED
    tok_emb = normal((VOCAB, E)).at[PAD_IDX].set(0.0)   # padding_idx row = 0
    decoder = {
        "tok_emb": tok_emb,
        "pos_emb": normal((MAX_SEQ, E)),
        # projection layer of ImageToTextModel (encoder_output_dim -> embed_dim)
        "w_proj": normal((ENC_DIM, E)),
        "b_proj": jnp.zeros((1, E), jnp.float32),
        # per-layer weights stacked on a leading layer axis (indexed in-kernel)
        "w_self_qkv": normal((L, E, 3 * E)),            # fused Wq | Wk | Wv
        "b_self_qkv": jnp.zeros((L, 1, 3 * E), jnp.float32),
        "w_self_o": normal((L, E, E)),
        "b_self_o": jnp.zeros((L, 1, E), jnp.float32),
        # cross-attention: only V and O projections are used (memory length 1
        # makes softmax == 1, so Q/K projections cancel mathematically)
        "w_cross_v": normal((L, E, E)),
        "b_cross_v": jnp.zeros((L, 1, E), jnp.float32),
        "w_cross_o": normal((L, E, E)),
        "b_cross_o": jnp.zeros((L, 1, E), jnp.float32),
        "ln1_g": jnp.ones((L, 1, E), jnp.float32),
        "ln1_b": jnp.zeros((L, 1, E), jnp.float32),
        "ln2_g": jnp.ones((L, 1, E), jnp.float32),
        "ln2_b": jnp.zeros((L, 1, E), jnp.float32),
        "ln3_g": jnp.ones((L, 1, E), jnp.float32),
        "ln3_b": jnp.zeros((L, 1, E), jnp.float32),
        "w1": normal((L, E, DEC_FF)),
        "b1": jnp.zeros((L, 1, DEC_FF), jnp.float32),
        "w2": normal((L, DEC_FF, E)),
        "b2": jnp.zeros((L, 1, E), jnp.float32),
        "w_out": normal((E, VOCAB)),
        "b_out": jnp.zeros((1, VOCAB), jnp.float32),
    }
    return {"encoder": encoder, "decoder": decoder}


# --------------------------------- main ------------------------------------ #
if __name__ == "__main__":
    key = jax.random.PRNGKey(0)
    k_param, k_img, k_tok = jax.random.split(key, 3)

    params = init_params(k_param)

    B, T = 2, 8
    image_tensors = jax.random.normal(k_img, (B, IMG_C, IMG_H, IMG_W), jnp.float32)
    tgt_tokens = jax.random.randint(k_tok, (B, T), 1, VOCAB, jnp.int32)  # non-pad

    logits = image_to_text_forward(params, image_tensors, tgt_tokens)
    logits = jax.block_until_ready(logits)

    assert logits.shape == (B, T, VOCAB), logits.shape
    assert bool(jnp.all(jnp.isfinite(logits)))
    print("KERNEL_OK")
</pallas_src>

<mosaic_0001>
module attributes {stable_mosaic.version = 11 : i64} {
  func.func @_encoder_kernel(%arg0: i32, %arg1: memref<1x16x192xf32, #tpu.memory_space<vmem>>, %arg2: memref<192x256xf32, #tpu.memory_space<vmem>>, %arg3: memref<1x256xf32, #tpu.memory_space<vmem>>, %arg4: memref<1x256xf32, #tpu.memory_space<vmem>>, %arg5: memref<17x256xf32, #tpu.memory_space<vmem>>, %arg6: memref<256x768xf32, #tpu.memory_space<vmem>>, %arg7: memref<1x768xf32, #tpu.memory_space<vmem>>, %arg8: memref<256x256xf32, #tpu.memory_space<vmem>>, %arg9: memref<1x256xf32, #tpu.memory_space<vmem>>, %arg10: memref<1x256xf32, #tpu.memory_space<vmem>>, %arg11: memref<1x256xf32, #tpu.memory_space<vmem>>, %arg12: memref<256x512xf32, #tpu.memory_space<vmem>>, %arg13: memref<1x512xf32, #tpu.memory_space<vmem>>, %arg14: memref<512x256xf32, #tpu.memory_space<vmem>>, %arg15: memref<1x256xf32, #tpu.memory_space<vmem>>, %arg16: memref<1x256xf32, #tpu.memory_space<vmem>>, %arg17: memref<1x256xf32, #tpu.memory_space<vmem>>, %arg18: memref<1x1x256xf32, #tpu.memory_space<vmem>>) attributes {dimension_semantics = [#tpu.dimension_semantics<parallel>], iteration_bounds = array<i64: 2>, scalar_prefetch = 0 : i64, scratch_operands = 0 : i64, tpu.core_type = #tpu.core_type<tc>, window_params = [{transform_indices = @transform_0, window_bounds = array<i64: 1, 16, 192>}, {pipeline_mode = #tpu.pipeline_mode<synchronous>, transform_indices = @transform_1, window_bounds = array<i64: 192, 256>}, {pipeline_mode = #tpu.pipeline_mode<synchronous>, transform_indices = @transform_2, window_bounds = array<i64: 1, 256>}, {pipeline_mode = #tpu.pipeline_mode<synchronous>, transform_indices = @transform_3, window_bounds = array<i64: 1, 256>}, {pipeline_mode = #tpu.pipeline_mode<synchronous>, transform_indices = @transform_4, window_bounds = array<i64: 17, 256>}, {pipeline_mode = #tpu.pipeline_mode<synchronous>, transform_indices = @transform_5, window_bounds = array<i64: 256, 768>}, {pipeline_mode = #tpu.pipeline_mode<synchronous>, transform_indices = @transform_6, window_bounds = array<i64: 1, 768>}, {pipeline_mode = #tpu.pipeline_mode<synchronous>, transform_indices = @transform_7, window_bounds = array<i64: 256, 256>}, {pipeline_mode = #tpu.pipeline_mode<synchronous>, transform_indices = @transform_8, window_bounds = array<i64: 1, 256>}, {pipeline_mode = #tpu.pipeline_mode<synchronous>, transform_indices = @transform_9, window_bounds = array<i64: 1, 256>}, {pipeline_mode = #tpu.pipeline_mode<synchronous>, transform_indices = @transform_10, window_bounds = array<i64: 1, 256>}, {pipeline_mode = #tpu.pipeline_mode<synchronous>, transform_indices = @transform_11, window_bounds = array<i64: 256, 512>}, {pipeline_mode = #tpu.pipeline_mode<synchronous>, transform_indices = @transform_12, window_bounds = array<i64: 1, 512>}, {pipeline_mode = #tpu.pipeline_mode<synchronous>, transform_indices = @transform_13, window_bounds = array<i64: 512, 256>}, {pipeline_mode = #tpu.pipeline_mode<synchronous>, transform_indices = @transform_14, window_bounds = array<i64: 1, 256>}, {pipeline_mode = #tpu.pipeline_mode<synchronous>, transform_indices = @transform_15, window_bounds = array<i64: 1, 256>}, {pipeline_mode = #tpu.pipeline_mode<synchronous>, transform_indices = @transform_16, window_bounds = array<i64: 1, 256>}, {transform_indices = @transform_17, window_bounds = array<i64: 1, 1, 256>}]} {
    %c0 = arith.constant 0 : index
    %c0_0 = arith.constant 0 : index
    %c0_1 = arith.constant 0 : index
    %0 = vector.load %arg1[%c0, %c0_0, %c0_1] : memref<1x16x192xf32, #tpu.memory_space<vmem>>, vector<1x16x192xf32>
    %1 = vector.shape_cast %0 : vector<1x16x192xf32> to vector<16x192xf32>
    %c0_2 = arith.constant 0 : index
    %c0_3 = arith.constant 0 : index
    %2 = vector.load %arg2[%c0_2, %c0_3] : memref<192x256xf32, #tpu.memory_space<vmem>>, vector<192x256xf32>
    %3 = arith.truncf %1 : vector<16x192xf32> to vector<16x192xbf16>
    %4 = arith.truncf %2 : vector<192x256xf32> to vector<192x256xbf16>
    %cst = arith.constant dense<0.000000e+00> : vector<16x256xf32>
    %5 = tpu.matmul %3, %4, %cst {dimension_numbers = #tpu.dot_dimension_numbers<[1], [0], [0], [1], [0, 0, 1, 1], [], []>} : vector<16x192xbf16>, vector<192x256xbf16>, vector<16x256xf32> -> vector<16x256xf32>
    %c0_4 = arith.constant 0 : index
    %c0_5 = arith.constant 0 : index
    %6 = vector.load %arg3[%c0_4, %c0_5] : memref<1x256xf32, #tpu.memory_space<vmem>>, vector<1x256xf32>
    %7 = vector.broadcast %6 : vector<1x256xf32> to vector<16x256xf32>
    %8 = arith.addf %5, %7 : vector<16x256xf32>
    %c0_6 = arith.constant 0 : index
    %c0_7 = arith.constant 0 : index
    %9 = vector.load %arg4[%c0_6, %c0_7] : memref<1x256xf32, #tpu.memory_space<vmem>>, vector<1x256xf32>
    %10 = tpu.concatenate %8, %9 in 0 : vector<16x256xf32>, vector<1x256xf32> -> vector<17x256xf32>
    %c0_8 = arith.constant 0 : index
    %c0_9 = arith.constant 0 : index
    %11 = vector.load %arg5[%c0_8, %c0_9] : memref<17x256xf32, #tpu.memory_space<vmem>>, vector<17x256xf32>
    %12 = arith.addf %10, %11 : vector<17x256xf32>
    %c0_10 = arith.constant 0 : index
    %c0_11 = arith.constant 0 : index
    %13 = vector.load %arg6[%c0_10, %c0_11] : memref<256x768xf32, #tpu.memory_space<vmem>>, vector<256x768xf32>
    %c0_12 = arith.constant 0 : index
    %c0_13 = arith.constant 0 : index
    %14 = vector.load %arg7[%c0_12, %c0_13] : memref<1x768xf32, #tpu.memory_space<vmem>>, vector<1x768xf32>
    %c0_14 = arith.constant 0 : index
    %c0_15 = arith.constant 0 : index
    %15 = vector.load %arg8[%c0_14, %c0_15] : memref<256x256xf32, #tpu.memory_space<vmem>>, vector<256x256xf32>
    %c0_16 = arith.constant 0 : index
    %c0_17 = arith.constant 0 : index
    %16 = vector.load %arg9[%c0_16, %c0_17] : memref<1x256xf32, #tpu.memory_space<vmem>>, vector<1x256xf32>
    %17 = arith.truncf %12 : vector<17x256xf32> to vector<17x256xbf16>
    %18 = arith.truncf %13 : vector<256x768xf32> to vector<256x768xbf16>
    %cst_18 = arith.constant dense<0.000000e+00> : vector<17x768xf32>
    %19 = tpu.matmul %17, %18, %cst_18 {dimension_numbers = #tpu.dot_dimension_numbers<[1], [0], [0], [1], [0, 0, 1, 1], [], []>} : vector<17x256xbf16>, vector<256x768xbf16>, vector<17x768xf32> -> vector<17x768xf32>
    %20 = vector.broadcast %14 : vector<1x768xf32> to vector<17x768xf32>
    %21 = arith.addf %19, %20 : vector<17x768xf32>
    %22 = vector.extract_strided_slice %21 {offsets = [0, 0], sizes = [17, 64], strides = [1, 1]} : vector<17x768xf32> to vector<17x64xf32>
    %23 = vector.extract_strided_slice %21 {offsets = [0, 256], sizes = [17, 64], strides = [1, 1]} : vector<17x768xf32> to vector<17x64xf32>
    %24 = vector.extract_strided_slice %21 {offsets = [0, 512], sizes = [17, 64], strides = [1, 1]} : vector<17x768xf32> to vector<17x64xf32>
    %25 = arith.truncf %22 : vector<17x64xf32> to vector<17x64xbf16>
    %26 = arith.truncf %23 : vector<17x64xf32> to vector<17x64xbf16>
    %cst_19 = arith.constant dense<0.000000e+00> : vector<17x17xf32>
    %27 = tpu.matmul %25, %26, %cst_19 {dimension_numbers = #tpu.dot_dimension_numbers<[1], [1], [0], [0], [0, 0, 1, 0], [], []>} : vector<17x64xbf16>, vector<17x64xbf16>, vector<17x17xf32> -> vector<17x17xf32>
    %cst_20 = arith.constant 1.250000e-01 : f32
    %28 = vector.broadcast %cst_20 : f32 to vector<17x17xf32>
    %29 = arith.mulf %27, %28 : vector<17x17xf32>
    %cst_21 = arith.constant dense<0xFF800000> : vector<17xf32>
    %30 = vector.multi_reduction <maximumf>, %29, %cst_21 [1] : vector<17x17xf32> to vector<17xf32>
    %31 = vector.shape_cast %30 : vector<17xf32> to vector<17x1xf32>
    %32 = vector.broadcast %31 : vector<17x1xf32> to vector<17x17xf32>
    %33 = arith.subf %29, %32 : vector<17x17xf32>
    %34 = math.exp %33 : vector<17x17xf32>
    %cst_22 = arith.constant dense<0.000000e+00> : vector<17xf32>
    %35 = vector.multi_reduction <add>, %34, %cst_22 [1] : vector<17x17xf32> to vector<17xf32>
    %36 = vector.shape_cast %35 : vector<17xf32> to vector<17x1xf32>
    %37 = tpu.reciprocal %36 {approx = true} : vector<17x1xf32> -> vector<17x1xf32>
    %38 = vector.broadcast %37 : vector<17x1xf32> to vector<17x17xf32>
    %39 = arith.mulf %34, %38 : vector<17x17xf32>
    %40 = arith.truncf %39 : vector<17x17xf32> to vector<17x17xbf16>
    %41 = arith.truncf %24 : vector<17x64xf32> to vector<17x64xbf16>
    %cst_23 = arith.constant dense<0.000000e+00> : vector<17x64xf32>
    %42 = tpu.matmul %40, %41, %cst_23 {dimension_numbers = #tpu.dot_dimension_numbers<[1], [0], [0], [1], [0, 0, 1, 1], [], []>} : vector<17x17xbf16>, vector<17x64xbf16>, vector<17x64xf32> -> vector<17x64xf32>
    %43 = vector.extract_strided_slice %15 {offsets = [0, 0], sizes = [64, 256], strides = [1, 1]} : vector<256x256xf32> to vector<64x256xf32>
    %44 = arith.truncf %42 : vector<17x64xf32> to vector<17x64xbf16>
    %45 = arith.truncf %43 : vector<64x256xf32> to vector<64x256xbf16>
    %cst_24 = arith.constant dense<0.000000e+00> : vector<17x256xf32>
    %46 = tpu.matmul %44, %45, %cst_24 {dimension_numbers = #tpu.dot_dimension_numbers<[1], [0], [0], [1], [0, 0, 1, 1], [], []>} : vector<17x64xbf16>, vector<64x256xbf16>, vector<17x256xf32> -> vector<17x256xf32>
    %47 = vector.extract_strided_slice %21 {offsets = [0, 64], sizes = [17, 64], strides = [1, 1]} : vector<17x768xf32> to vector<17x64xf32>
    %48 = vector.extract_strided_slice %21 {offsets = [0, 320], sizes = [17, 64], strides = [1, 1]} : vector<17x768xf32> to vector<17x64xf32>
    %49 = vector.extract_strided_slice %21 {offsets = [0, 576], sizes = [17, 64], strides = [1, 1]} : vector<17x768xf32> to vector<17x64xf32>
    %50 = arith.truncf %47 : vector<17x64xf32> to vector<17x64xbf16>
    %51 = arith.truncf %48 : vector<17x64xf32> to vector<17x64xbf16>
    %cst_25 = arith.constant dense<0.000000e+00> : vector<17x17xf32>
    %52 = tpu.matmul %50, %51, %cst_25 {dimension_numbers = #tpu.dot_dimension_numbers<[1], [1], [0], [0], [0, 0, 1, 0], [], []>} : vector<17x64xbf16>, vector<17x64xbf16>, vector<17x17xf32> -> vector<17x17xf32>
    %cst_26 = arith.constant 1.250000e-01 : f32
    %53 = vector.broadcast %cst_26 : f32 to vector<17x17xf32>
    %54 = arith.mulf %52, %53 : vector<17x17xf32>
    %cst_27 = arith.constant dense<0xFF800000> : vector<17xf32>
    %55 = vector.multi_reduction <maximumf>, %54, %cst_27 [1] : vector<17x17xf32> to vector<17xf32>
    %56 = vector.shape_cast %55 : vector<17xf32> to vector<17x1xf32>
    %57 = vector.broadcast %56 : vector<17x1xf32> to vector<17x17xf32>
    %58 = arith.subf %54, %57 : vector<17x17xf32>
    %59 = math.exp %58 : vector<17x17xf32>
    %cst_28 = arith.constant dense<0.000000e+00> : vector<17xf32>
    %60 = vector.multi_reduction <add>, %59, %cst_28 [1] : vector<17x17xf32> to vector<17xf32>
    %61 = vector.shape_cast %60 : vector<17xf32> to vector<17x1xf32>
    %62 = tpu.reciprocal %61 {approx = true} : vector<17x1xf32> -> vector<17x1xf32>
    %63 = vector.broadcast %62 : vector<17x1xf32> to vector<17x17xf32>
    %64 = arith.mulf %59, %63 : vector<17x17xf32>
    %65 = arith.truncf %64 : vector<17x17xf32> to vector<17x17xbf16>
    %66 = arith.truncf %49 : vector<17x64xf32> to vector<17x64xbf16>
    %cst_29 = arith.constant dense<0.000000e+00> : vector<17x64xf32>
    %67 = tpu.matmul %65, %66, %cst_29 {dimension_numbers = #tpu.dot_dimension_numbers<[1], [0], [0], [1], [0, 0, 1, 1], [], []>} : vector<17x17xbf16>, vector<17x64xbf16>, vector<17x64xf32> -> vector<17x64xf32>
    %68 = vector.extract_strided_slice %15 {offsets = [64, 0], sizes = [64, 256], strides = [1, 1]} : vector<256x256xf32> to vector<64x256xf32>
    %69 = arith.truncf %67 : vector<17x64xf32> to vector<17x64xbf16>
    %70 = arith.truncf %68 : vector<64x256xf32> to vector<64x256xbf16>
    %cst_30 = arith.constant dense<0.000000e+00> : vector<17x256xf32>
    %71 = tpu.matmul %69, %70, %cst_30 {dimension_numbers = #tpu.dot_dimension_numbers<[1], [0], [0], [1], [0, 0, 1, 1], [], []>} : vector<17x64xbf16>, vector<64x256xbf16>, vector<17x256xf32> -> vector<17x256xf32>
    %72 = arith.addf %46, %71 : vector<17x256xf32>
    %73 = vector.extract_strided_slice %21 {offsets = [0, 128], sizes = [17, 64], strides = [1, 1]} : vector<17x768xf32> to vector<17x64xf32>
    %74 = vector.extract_strided_slice %21 {offsets = [0, 384], sizes = [17, 64], strides = [1, 1]} : vector<17x768xf32> to vector<17x64xf32>
    %75 = vector.extract_strided_slice %21 {offsets = [0, 640], sizes = [17, 64], strides = [1, 1]} : vector<17x768xf32> to vector<17x64xf32>
    %76 = arith.truncf %73 : vector<17x64xf32> to vector<17x64xbf16>
    %77 = arith.truncf %74 : vector<17x64xf32> to vector<17x64xbf16>
    %cst_31 = arith.constant dense<0.000000e+00> : vector<17x17xf32>
    %78 = tpu.matmul %76, %77, %cst_31 {dimension_numbers = #tpu.dot_dimension_numbers<[1], [1], [0], [0], [0, 0, 1, 0], [], []>} : vector<17x64xbf16>, vector<17x64xbf16>, vector<17x17xf32> -> vector<17x17xf32>
    %cst_32 = arith.constant 1.250000e-01 : f32
    %79 = vector.broadcast %cst_32 : f32 to vector<17x17xf32>
    %80 = arith.mulf %78, %79 : vector<17x17xf32>
    %cst_33 = arith.constant dense<0xFF800000> : vector<17xf32>
    %81 = vector.multi_reduction <maximumf>, %80, %cst_33 [1] : vector<17x17xf32> to vector<17xf32>
    %82 = vector.shape_cast %81 : vector<17xf32> to vector<17x1xf32>
    %83 = vector.broadcast %82 : vector<17x1xf32> to vector<17x17xf32>
    %84 = arith.subf %80, %83 : vector<17x17xf32>
    %85 = math.exp %84 : vector<17x17xf32>
    %cst_34 = arith.constant dense<0.000000e+00> : vector<17xf32>
    %86 = vector.multi_reduction <add>, %85, %cst_34 [1] : vector<17x17xf32> to vector<17xf32>
    %87 = vector.shape_cast %86 : vector<17xf32> to vector<17x1xf32>
    %88 = tpu.reciprocal %87 {approx = true} : vector<17x1xf32> -> vector<17x1xf32>
    %89 = vector.broadcast %88 : vector<17x1xf32> to vector<17x17xf32>
    %90 = arith.mulf %85, %89 : vector<17x17xf32>
    %91 = arith.truncf %90 : vector<17x17xf32> to vector<17x17xbf16>
    %92 = arith.truncf %75 : vector<17x64xf32> to vector<17x64xbf16>
    %cst_35 = arith.constant dense<0.000000e+00> : vector<17x64xf32>
    %93 = tpu.matmul %91, %92, %cst_35 {dimension_numbers = #tpu.dot_dimension_numbers<[1], [0], [0], [1], [0, 0, 1, 1], [], []>} : vector<17x17xbf16>, vector<17x64xbf16>, vector<17x64xf32> -> vector<17x64xf32>
    %94 = vector.extract_strided_slice %15 {offsets = [128, 0], sizes = [64, 256], strides = [1, 1]} : vector<256x256xf32> to vector<64x256xf32>
    %95 = arith.truncf %93 : vector<17x64xf32> to vector<17x64xbf16>
    %96 = arith.truncf %94 : vector<64x256xf32> to vector<64x256xbf16>
    %cst_36 = arith.constant dense<0.000000e+00> : vector<17x256xf32>
    %97 = tpu.matmul %95, %96, %cst_36 {dimension_numbers = #tpu.dot_dimension_numbers<[1], [0], [0], [1], [0, 0, 1, 1], [], []>} : vector<17x64xbf16>, vector<64x256xbf16>, vector<17x256xf32> -> vector<17x256xf32>
    %98 = arith.addf %72, %97 : vector<17x256xf32>
    %99 = vector.extract_strided_slice %21 {offsets = [0, 192], sizes = [17, 64], strides = [1, 1]} : vector<17x768xf32> to vector<17x64xf32>
    %100 = vector.extract_strided_slice %21 {offsets = [0, 448], sizes = [17, 64], strides = [1, 1]} : vector<17x768xf32> to vector<17x64xf32>
    %101 = vector.extract_strided_slice %21 {offsets = [0, 704], sizes = [17, 64], strides = [1, 1]} : vector<17x768xf32> to vector<17x64xf32>
    %102 = arith.truncf %99 : vector<17x64xf32> to vector<17x64xbf16>
    %103 = arith.truncf %100 : vector<17x64xf32> to vector<17x64xbf16>
    %cst_37 = arith.constant dense<0.000000e+00> : vector<17x17xf32>
    %104 = tpu.matmul %102, %103, %cst_37 {dimension_numbers = #tpu.dot_dimension_numbers<[1], [1], [0], [0], [0, 0, 1, 0], [], []>} : vector<17x64xbf16>, vector<17x64xbf16>, vector<17x17xf32> -> vector<17x17xf32>
    %cst_38 = arith.constant 1.250000e-01 : f32
    %105 = vector.broadcast %cst_38 : f32 to vector<17x17xf32>
    %106 = arith.mulf %104, %105 : vector<17x17xf32>
    %cst_39 = arith.constant dense<0xFF800000> : vector<17xf32>
    %107 = vector.multi_reduction <maximumf>, %106, %cst_39 [1] : vector<17x17xf32> to vector<17xf32>
    %108 = vector.shape_cast %107 : vector<17xf32> to vector<17x1xf32>
    %109 = vector.broadcast %108 : vector<17x1xf32> to vector<17x17xf32>
    %110 = arith.subf %106, %109 : vector<17x17xf32>
    %111 = math.exp %110 : vector<17x17xf32>
    %cst_40 = arith.constant dense<0.000000e+00> : vector<17xf32>
    %112 = vector.multi_reduction <add>, %111, %cst_40 [1] : vector<17x17xf32> to vector<17xf32>
    %113 = vector.shape_cast %112 : vector<17xf32> to vector<17x1xf32>
    %114 = tpu.reciprocal %113 {approx = true} : vector<17x1xf32> -> vector<17x1xf32>
    %115 = vector.broadcast %114 : vector<17x1xf32> to vector<17x17xf32>
    %116 = arith.mulf %111, %115 : vector<17x17xf32>
    %117 = arith.truncf %116 : vector<17x17xf32> to vector<17x17xbf16>
    %118 = arith.truncf %101 : vector<17x64xf32> to vector<17x64xbf16>
    %cst_41 = arith.constant dense<0.000000e+00> : vector<17x64xf32>
    %119 = tpu.matmul %117, %118, %cst_41 {dimension_numbers = #tpu.dot_dimension_numbers<[1], [0], [0], [1], [0, 0, 1, 1], [], []>} : vector<17x17xbf16>, vector<17x64xbf16>, vector<17x64xf32> -> vector<17x64xf32>
    %120 = vector.extract_strided_slice %15 {offsets = [192, 0], sizes = [64, 256], strides = [1, 1]} : vector<256x256xf32> to vector<64x256xf32>
    %121 = arith.truncf %119 : vector<17x64xf32> to vector<17x64xbf16>
    %122 = arith.truncf %120 : vector<64x256xf32> to vector<64x256xbf16>
    %cst_42 = arith.constant dense<0.000000e+00> : vector<17x256xf32>
    %123 = tpu.matmul %121, %122, %cst_42 {dimension_numbers = #tpu.dot_dimension_numbers<[1], [0], [0], [1], [0, 0, 1, 1], [], []>} : vector<17x64xbf16>, vector<64x256xbf16>, vector<17x256xf32> -> vector<17x256xf32>
    %124 = arith.addf %98, %123 : vector<17x256xf32>
    %125 = vector.broadcast %16 : vector<1x256xf32> to vector<17x256xf32>
    %126 = arith.addf %124, %125 : vector<17x256xf32>
    %127 = arith.addf %12, %126 : vector<17x256xf32>
    %c0_43 = arith.constant 0 : index
    %c0_44 = arith.constant 0 : index
    %128 = vector.load %arg10[%c0_43, %c0_44] : memref<1x256xf32, #tpu.memory_space<vmem>>, vector<1x256xf32>
    %c0_45 = arith.constant 0 : index
    %c0_46 = arith.constant 0 : index
    %129 = vector.load %arg11[%c0_45, %c0_46] : memref<1x256xf32, #tpu.memory_space<vmem>>, vector<1x256xf32>
    %cst_47 = arith.constant dense<0.000000e+00> : vector<17xf32>
    %130 = vector.multi_reduction <add>, %127, %cst_47 [1] : vector<17x256xf32> to vector<17xf32>
    %131 = vector.shape_cast %130 : vector<17xf32> to vector<17x1xf32>
    %cst_48 = arith.constant 2.560000e+02 : f32
    %132 = vector.broadcast %cst_48 : f32 to vector<17x1xf32>
    %133 = arith.divf %131, %132 : vector<17x1xf32>
    %134 = vector.broadcast %133 : vector<17x1xf32> to vector<17x256xf32>
    %135 = arith.subf %127, %134 : vector<17x256xf32>
    %136 = arith.mulf %135, %135 : vector<17x256xf32>
    %cst_49 = arith.constant dense<0.000000e+00> : vector<17xf32>
    %137 = vector.multi_reduction <add>, %136, %cst_49 [1] : vector<17x256xf32> to vector<17xf32>
    %138 = vector.shape_cast %137 : vector<17xf32> to vector<17x1xf32>
    %cst_50 = arith.constant 2.560000e+02 : f32
    %139 = vector.broadcast %cst_50 : f32 to vector<17x1xf32>
    %140 = arith.divf %138, %139 : vector<17x1xf32>
    %cst_51 = arith.constant 9.99999974E-6 : f32
    %141 = vector.broadcast %cst_51 : f32 to vector<17x1xf32>
    %142 = arith.addf %140, %141 : vector<17x1xf32>
    %143 = math.rsqrt %142 : vector<17x1xf32>
    %144 = vector.broadcast %143 : vector<17x1xf32> to vector<17x256xf32>
    %145 = arith.mulf %135, %144 : vector<17x256xf32>
    %146 = vector.broadcast %128 : vector<1x256xf32> to vector<17x256xf32>
    %147 = arith.mulf %145, %146 : vector<17x256xf32>
    %148 = vector.broadcast %129 : vector<1x256xf32> to vector<17x256xf32>
    %149 = arith.addf %147, %148 : vector<17x256xf32>
    %c0_52 = arith.constant 0 : index
    %c0_53 = arith.constant 0 : index
    %150 = vector.load %arg12[%c0_52, %c0_53] : memref<256x512xf32, #tpu.memory_space<vmem>>, vector<256x512xf32>
    %151 = arith.truncf %149 : vector<17x256xf32> to vector<17x256xbf16>
    %152 = arith.truncf %150 : vector<256x512xf32> to vector<256x512xbf16>
    %cst_54 = arith.constant dense<0.000000e+00> : vector<17x512xf32>
    %153 = tpu.matmul %151, %152, %cst_54 {dimension_numbers = #tpu.dot_dimension_numbers<[1], [0], [0], [1], [0, 0, 1, 1], [], []>} : vector<17x256xbf16>, vector<256x512xbf16>, vector<17x512xf32> -> vector<17x512xf32>
    %c0_55 = arith.constant 0 : index
    %c0_56 = arith.constant 0 : index
    %154 = vector.load %arg13[%c0_55, %c0_56] : memref<1x512xf32, #tpu.memory_space<vmem>>, vector<1x512xf32>
    %155 = vector.broadcast %154 : vector<1x512xf32> to vector<17x512xf32>
    %156 = arith.addf %153, %155 : vector<17x512xf32>
    %cst_57 = arith.constant 0.000000e+00 : f32
    %157 = vector.broadcast %cst_57 : f32 to vector<17x512xf32>
    %158 = arith.maximumf %156, %157 : vector<17x512xf32>
    %c0_58 = arith.constant 0 : index
    %c0_59 = arith.constant 0 : index
    %159 = vector.load %arg14[%c0_58, %c0_59] : memref<512x256xf32, #tpu.memory_space<vmem>>, vector<512x256xf32>
    %160 = arith.truncf %158 : vector<17x512xf32> to vector<17x512xbf16>
    %161 = arith.truncf %159 : vector<512x256xf32> to vector<512x256xbf16>
    %cst_60 = arith.constant dense<0.000000e+00> : vector<17x256xf32>
    %162 = tpu.matmul %160, %161, %cst_60 {dimension_numbers = #tpu.dot_dimension_numbers<[1], [0], [0], [1], [0, 0, 1, 1], [], []>} : vector<17x512xbf16>, vector<512x256xbf16>, vector<17x256xf32> -> vector<17x256xf32>
    %c0_61 = arith.constant 0 : index
    %c0_62 = arith.constant 0 : index
    %163 = vector.load %arg15[%c0_61, %c0_62] : memref<1x256xf32, #tpu.memory_space<vmem>>, vector<1x256xf32>
    %164 = vector.broadcast %163 : vector<1x256xf32> to vector<17x256xf32>
    %165 = arith.addf %162, %164 : vector<17x256xf32>
    %166 = arith.addf %149, %165 : vector<17x256xf32>
    %c0_63 = arith.constant 0 : index
    %c0_64 = arith.constant 0 : index
    %167 = vector.load %arg16[%c0_63, %c0_64] : memref<1x256xf32, #tpu.memory_space<vmem>>, vector<1x256xf32>
    %c0_65 = arith.constant 0 : index
    %c0_66 = arith.constant 0 : index
    %168 = vector.load %arg17[%c0_65, %c0_66] : memref<1x256xf32, #tpu.memory_space<vmem>>, vector<1x256xf32>
    %cst_67 = arith.constant dense<0.000000e+00> : vector<17xf32>
    %169 = vector.multi_reduction <add>, %166, %cst_67 [1] : vector<17x256xf32> to vector<17xf32>
    %170 = vector.shape_cast %169 : vector<17xf32> to vector<17x1xf32>
    %cst_68 = arith.constant 2.560000e+02 : f32
    %171 = vector.broadcast %cst_68 : f32 to vector<17x1xf32>
    %172 = arith.divf %170, %171 : vector<17x1xf32>
    %173 = vector.broadcast %172 : vector<17x1xf32> to vector<17x256xf32>
    %174 = arith.subf %166, %173 : vector<17x256xf32>
    %175 = arith.mulf %174, %174 : vector<17x256xf32>
    %cst_69 = arith.constant dense<0.000000e+00> : vector<17xf32>
    %176 = vector.multi_reduction <add>, %175, %cst_69 [1] : vector<17x256xf32> to vector<17xf32>
    %177 = vector.shape_cast %176 : vector<17xf32> to vector<17x1xf32>
    %cst_70 = arith.constant 2.560000e+02 : f32
    %178 = vector.broadcast %cst_70 : f32 to vector<17x1xf32>
    %179 = arith.divf %177, %178 : vector<17x1xf32>
    %cst_71 = arith.constant 9.99999974E-6 : f32
    %180 = vector.broadcast %cst_71 : f32 to vector<17x1xf32>
    %181 = arith.addf %179, %180 : vector<17x1xf32>
    %182 = math.rsqrt %181 : vector<17x1xf32>
    %183 = vector.broadcast %182 : vector<17x1xf32> to vector<17x256xf32>
    %184 = arith.mulf %174, %183 : vector<17x256xf32>
    %185 = vector.broadcast %167 : vector<1x256xf32> to vector<17x256xf32>
    %186 = arith.mulf %184, %185 : vector<17x256xf32>
    %187 = vector.broadcast %168 : vector<1x256xf32> to vector<17x256xf32>
    %188 = arith.addf %186, %187 : vector<17x256xf32>
    %189 = vector.extract_strided_slice %188 {offsets = [16, 0], sizes = [1, 256], strides = [1, 1]} : vector<17x256xf32> to vector<1x256xf32>
    %c0_72 = arith.constant 0 : index
    %c0_73 = arith.constant 0 : index
    %c0_74 = arith.constant 0 : index
    %190 = vector.load %arg18[%c0_72, %c0_73, %c0_74] : memref<1x1x256xf32, #tpu.memory_space<vmem>>, vector<1x1x256xf32>
    %191 = vector.shape_cast %190 : vector<1x1x256xf32> to vector<1x256xf32>
    %192 = vector.shape_cast %189 : vector<1x256xf32> to vector<1x1x256xf32>
    tpu.vector_store %arg18[%c0_72, %c0_73, %c0_74], %192 {strides = array<i32>} : memref<1x1x256xf32, #tpu.memory_space<vmem>>, vector<1x1x256xf32>,
    return
  }
  func.func @transform_0(%arg0: i32) -> (i32, i32, i32) {
    %c0_i32 = arith.constant 0 : i32
    %c0_i32_0 = arith.constant 0 : i32
    %c0_i32_1 = arith.constant 0 : i32
    return %arg0, %c0_i32, %c0_i32_0 : i32, i32, i32
  }
  func.func @transform_1(%arg0: i32) -> (i32, i32) {
    %c0_i32 = arith.constant 0 : i32
    %c0_i32_0 = arith.constant 0 : i32
    %c0_i32_1 = arith.constant 0 : i32
    return %c0_i32, %c0_i32_0 : i32, i32
  }
  func.func @transform_2(%arg0: i32) -> (i32, i32) {
    %c0_i32 = arith.constant 0 : i32
    %c0_i32_0 = arith.constant 0 : i32
    %c0_i32_1 = arith.constant 0 : i32
    return %c0_i32, %c0_i32_0 : i32, i32
  }
  func.func @transform_3(%arg0: i32) -> (i32, i32) {
    %c0_i32 = arith.constant 0 : i32
    %c0_i32_0 = arith.constant 0 : i32
    %c0_i32_1 = arith.constant 0 : i32
    return %c0_i32, %c0_i32_0 : i32, i32
  }
  func.func @transform_4(%arg0: i32) -> (i32, i32) {
    %c0_i32 = arith.constant 0 : i32
    %c0_i32_0 = arith.constant 0 : i32
    %c0_i32_1 = arith.constant 0 : i32
    return %c0_i32, %c0_i32_0 : i32, i32
  }
  func.func @transform_5(%arg0: i32) -> (i32, i32) {
    %c0_i32 = arith.constant 0 : i32
    %c0_i32_0 = arith.constant 0 : i32
    %c0_i32_1 = arith.constant 0 : i32
    return %c0_i32, %c0_i32_0 : i32, i32
  }
  func.func @transform_6(%arg0: i32) -> (i32, i32) {
    %c0_i32 = arith.constant 0 : i32
    %c0_i32_0 = arith.constant 0 : i32
    %c0_i32_1 = arith.constant 0 : i32
    return %c0_i32, %c0_i32_0 : i32, i32
  }
  func.func @transform_7(%arg0: i32) -> (i32, i32) {
    %c0_i32 = arith.constant 0 : i32
    %c0_i32_0 = arith.constant 0 : i32
    %c0_i32_1 = arith.constant 0 : i32
    return %c0_i32, %c0_i32_0 : i32, i32
  }
  func.func @transform_8(%arg0: i32) -> (i32, i32) {
    %c0_i32 = arith.constant 0 : i32
    %c0_i32_0 = arith.constant 0 : i32
    %c0_i32_1 = arith.constant 0 : i32
    return %c0_i32, %c0_i32_0 : i32, i32
  }
  func.func @transform_9(%arg0: i32) -> (i32, i32) {
    %c0_i32 = arith.constant 0 : i32
    %c0_i32_0 = arith.constant 0 : i32
    %c0_i32_1 = arith.constant 0 : i32
    return %c0_i32, %c0_i32_0 : i32, i32
  }
  func.func @transform_10(%arg0: i32) -> (i32, i32) {
    %c0_i32 = arith.constant 0 : i32
    %c0_i32_0 = arith.constant 0 : i32
    %c0_i32_1 = arith.constant 0 : i32
    return %c0_i32, %c0_i32_0 : i32, i32
  }
  func.func @transform_11(%arg0: i32) -> (i32, i32) {
    %c0_i32 = arith.constant 0 : i32
    %c0_i32_0 = arith.constant 0 : i32
    %c0_i32_1 = arith.constant 0 : i32
    return %c0_i32, %c0_i32_0 : i32, i32
  }
  func.func @transform_12(%arg0: i32) -> (i32, i32) {
    %c0_i32 = arith.constant 0 : i32
    %c0_i32_0 = arith.constant 0 : i32
    %c0_i32_1 = arith.constant 0 : i32
    return %c0_i32, %c0_i32_0 : i32, i32
  }
  func.func @transform_13(%arg0: i32) -> (i32, i32) {
    %c0_i32 = arith.constant 0 : i32
    %c0_i32_0 = arith.constant 0 : i32
    %c0_i32_1 = arith.constant 0 : i32
    return %c0_i32, %c0_i32_0 : i32, i32
  }
  func.func @transform_14(%arg0: i32) -> (i32, i32) {
    %c0_i32 = arith.constant 0 : i32
    %c0_i32_0 = arith.constant 0 : i32
    %c0_i32_1 = arith.constant 0 : i32
    return %c0_i32, %c0_i32_0 : i32, i32
  }
  func.func @transform_15(%arg0: i32) -> (i32, i32) {
    %c0_i32 = arith.constant 0 : i32
    %c0_i32_0 = arith.constant 0 : i32
    %c0_i32_1 = arith.constant 0 : i32
    return %c0_i32, %c0_i32_0 : i32, i32
  }
  func.func @transform_16(%arg0: i32) -> (i32, i32) {
    %c0_i32 = arith.constant 0 : i32
    %c0_i32_0 = arith.constant 0 : i32
    %c0_i32_1 = arith.constant 0 : i32
    return %c0_i32, %c0_i32_0 : i32, i32
  }
  func.func @transform_17(%arg0: i32) -> (i32, i32, i32) {
    %c0_i32 = arith.constant 0 : i32
    %c0_i32_0 = arith.constant 0 : i32
    %c0_i32_1 = arith.constant 0 : i32
    return %arg0, %c0_i32, %c0_i32_0 : i32, i32, i32
  }
}

module attributes {stable_mosaic.version = 11 : i64} {
  func.func @_decoder_kernel(%arg0: i32, %arg1: memref<1x8x128xf32, #tpu.memory_space<vmem>>, %arg2: memref<1x1x8xf32, #tpu.memory_space<vmem>>, %arg3: memref<1x1x256xf32, #tpu.memory_space<vmem>>, %arg4: memref<8x128xf32, #tpu.memory_space<vmem>>, %arg5: memref<256x128xf32, #tpu.memory_space<vmem>>, %arg6: memref<1x128xf32, #tpu.memory_space<vmem>>, %arg7: memref<2x128x384xf32, #tpu.memory_space<vmem>>, %arg8: memref<2x1x384xf32, #tpu.memory_space<vmem>>, %arg9: memref<2x128x128xf32, #tpu.memory_space<vmem>>, %arg10: memref<2x1x128xf32, #tpu.memory_space<vmem>>, %arg11: memref<2x128x128xf32, #tpu.memory_space<vmem>>, %arg12: memref<2x1x128xf32, #tpu.memory_space<vmem>>, %arg13: memref<2x128x128xf32, #tpu.memory_space<vmem>>, %arg14: memref<2x1x128xf32, #tpu.memory_space<vmem>>, %arg15: memref<2x1x128xf32, #tpu.memory_space<vmem>>, %arg16: memref<2x1x128xf32, #tpu.memory_space<vmem>>, %arg17: memref<2x1x128xf32, #tpu.memory_space<vmem>>, %arg18: memref<2x1x128xf32, #tpu.memory_space<vmem>>, %arg19: memref<2x1x128xf32, #tpu.memory_space<vmem>>, %arg20: memref<2x1x128xf32, #tpu.memory_space<vmem>>, %arg21: memref<2x128x256xf32, #tpu.memory_space<vmem>>, %arg22: memref<2x1x256xf32, #tpu.memory_space<vmem>>, %arg23: memref<2x256x128xf32, #tpu.memory_space<vmem>>, %arg24: memref<2x1x128xf32, #tpu.memory_space<vmem>>, %arg25: memref<128x512xf32, #tpu.memory_space<vmem>>, %arg26: memref<1x512xf32, #tpu.memory_space<vmem>>, %arg27: memref<1x8x512xf32, #tpu.memory_space<vmem>>) attributes {dimension_semantics = [#tpu.dimension_semantics<parallel>], iteration_bounds = array<i64: 2>, scalar_prefetch = 0 : i64, scratch_operands = 0 : i64, tpu.core_type = #tpu.core_type<tc>, window_params = [{transform_indices = @transform_0, window_bounds = array<i64: 1, 8, 128>}, {transform_indices = @transform_1, window_bounds = array<i64: 1, 1, 8>}, {transform_indices = @transform_2, window_bounds = array<i64: 1, 1, 256>}, {pipeline_mode = #tpu.pipeline_mode<synchronous>, transform_indices = @transform_3, window_bounds = array<i64: 8, 128>}, {pipeline_mode = #tpu.pipeline_mode<synchronous>, transform_indices = @transform_4, window_bounds = array<i64: 256, 128>}, {pipeline_mode = #tpu.pipeline_mode<synchronous>, transform_indices = @transform_5, window_bounds = array<i64: 1, 128>}, {pipeline_mode = #tpu.pipeline_mode<synchronous>, transform_indices = @transform_6, window_bounds = array<i64: 2, 128, 384>}, {pipeline_mode = #tpu.pipeline_mode<synchronous>, transform_indices = @transform_7, window_bounds = array<i64: 2, 1, 384>}, {pipeline_mode = #tpu.pipeline_mode<synchronous>, transform_indices = @transform_8, window_bounds = array<i64: 2, 128, 128>}, {pipeline_mode = #tpu.pipeline_mode<synchronous>, transform_indices = @transform_9, window_bounds = array<i64: 2, 1, 128>}, {pipeline_mode = #tpu.pipeline_mode<synchronous>, transform_indices = @transform_10, window_bounds = array<i64: 2, 128, 128>}, {pipeline_mode = #tpu.pipeline_mode<synchronous>, transform_indices = @transform_11, window_bounds = array<i64: 2, 1, 128>}, {pipeline_mode = #tpu.pipeline_mode<synchronous>, transform_indices = @transform_12, window_bounds = array<i64: 2, 128, 128>}, {pipeline_mode = #tpu.pipeline_mode<synchronous>, transform_indices = @transform_13, window_bounds = array<i64: 2, 1, 128>}, {pipeline_mode = #tpu.pipeline_mode<synchronous>, transform_indices = @transform_14, window_bounds = array<i64: 2, 1, 128>}, {pipeline_mode = #tpu.pipeline_mode<synchronous>, transform_indices = @transform_15, window_bounds = array<i64: 2, 1, 128>}, {pipeline_mode = #tpu.pipeline_mode<synchronous>, transform_indices = @transform_16, window_bounds = array<i64: 2, 1, 128>}, {pipeline_mode = #tpu.pipeline_mode<synchronous>, transform_indices = @transform_17, window_bounds = array<i64: 2, 1, 128>}, {pipeline_mode = #tpu.pipeline_mode<synchronous>, transform_indices = @transform_18, window_bounds = array<i64: 2, 1, 128>}, {pipeline_mode = #tpu.pipeline_mode<synchronous>, transform_indices = @transform_19, window_bounds = array<i64: 2, 1, 128>}, {pipeline_mode = #tpu.pipeline_mode<synchronous>, transform_indices = @transform_20, window_bounds = array<i64: 2, 128, 256>}, {pipeline_mode = #tpu.pipeline_mode<synchronous>, transform_indices = @transform_21, window_bounds = array<i64: 2, 1, 256>}, {pipeline_mode = #tpu.pipeline_mode<synchronous>, transform_indices = @transform_22, window_bounds = array<i64: 2, 256, 128>}, {pipeline_mode = #tpu.pipeline_mode<synchronous>, transform_indices = @transform_23, window_bounds = array<i64: 2, 1, 128>}, {pipeline_mode = #tpu.pipeline_mode<synchronous>, transform_indices = @transform_24, window_bounds = array<i64: 128, 512>}, {pipeline_mode = #tpu.pipeline_mode<synchronous>, transform_indices = @transform_25, window_bounds = array<i64: 1, 512>}, {transform_indices = @transform_26, window_bounds = array<i64: 1, 8, 512>}]} {
    %c0 = arith.constant 0 : index
    %c0_0 = arith.constant 0 : index
    %c0_1 = arith.constant 0 : index
    %0 = vector.load %arg3[%c0, %c0_0, %c0_1] : memref<1x1x256xf32, #tpu.memory_space<vmem>>, vector<1x1x256xf32>
    %1 = vector.shape_cast %0 : vector<1x1x256xf32> to vector<1x256xf32>
    %c0_2 = arith.constant 0 : index
    %c0_3 = arith.constant 0 : index
    %2 = vector.load %arg5[%c0_2, %c0_3] : memref<256x128xf32, #tpu.memory_space<vmem>>, vector<256x128xf32>
    %3 = arith.truncf %1 : vector<1x256xf32> to vector<1x256xbf16>
    %4 = arith.truncf %2 : vector<256x128xf32> to vector<256x128xbf16>
    %cst = arith.constant dense<0.000000e+00> : vector<1x128xf32>
    %5 = tpu.matmul %3, %4, %cst {dimension_numbers = #tpu.dot_dimension_numbers<[1], [0], [0], [1], [0, 0, 1, 1], [], []>} : vector<1x256xbf16>, vector<256x128xbf16>, vector<1x128xf32> -> vector<1x128xf32>
    %c0_4 = arith.constant 0 : index
    %c0_5 = arith.constant 0 : index
    %6 = vector.load %arg6[%c0_4, %c0_5] : memref<1x128xf32, #tpu.memory_space<vmem>>, vector<1x128xf32>
    %7 = arith.addf %5, %6 : vector<1x128xf32>
    %8 = tpu.iota {dimensions = array<i32: 0>} : vector<8x8xi32>
    %9 = tpu.iota {dimensions = array<i32: 1>} : vector<8x8xi32>
    %10 = arith.cmpi sle, %9, %8 : vector<8x8xi32>
    %c0_6 = arith.constant 0 : index
    %c0_7 = arith.constant 0 : index
    %c0_8 = arith.constant 0 : index
    %11 = vector.load %arg2[%c0_6, %c0_7, %c0_8] : memref<1x1x8xf32, #tpu.memory_space<vmem>>, vector<1x1x8xf32>
    %12 = vector.shape_cast %11 : vector<1x1x8xf32> to vector<1x8xf32>
    %cst_9 = arith.constant 5.000000e-01 : f32
    %13 = vector.broadcast %cst_9 : f32 to vector<1x8xf32>
    %14 = arith.cmpf ogt, %12, %13 : vector<1x8xf32>
    %15 = vector.broadcast %14 : vector<1x8xi1> to vector<8x8xi1>
    %16 = arith.andi %10, %15 : vector<8x8xi1>
    %c0_10 = arith.constant 0 : index
    %c0_11 = arith.constant 0 : index
    %c0_12 = arith.constant 0 : index
    %17 = vector.load %arg1[%c0_10, %c0_11, %c0_12] : memref<1x8x128xf32, #tpu.memory_space<vmem>>, vector<1x8x128xf32>
    %18 = vector.shape_cast %17 : vector<1x8x128xf32> to vector<8x128xf32>
    %cst_13 = arith.constant 11.3137083 : f32
    %19 = vector.broadcast %cst_13 : f32 to vector<8x128xf32>
    %20 = arith.mulf %18, %19 : vector<8x128xf32>
    %c0_14 = arith.constant 0 : index
    %c0_15 = arith.constant 0 : index
    %21 = vector.load %arg4[%c0_14, %c0_15] : memref<8x128xf32, #tpu.memory_space<vmem>>, vector<8x128xf32>
    %22 = arith.addf %20, %21 : vector<8x128xf32>
    %c0_16 = arith.constant 0 : index
    %c0_17 = arith.constant 0 : index
    %c0_18 = arith.constant 0 : index
    %23 = vector.load %arg7[%c0_16, %c0_17, %c0_18] : memref<2x128x384xf32, #tpu.memory_space<vmem>>, vector<1x128x384xf32>
    %24 = vector.shape_cast %23 : vector<1x128x384xf32> to vector<128x384xf32>
    %c0_19 = arith.constant 0 : index
    %c0_20 = arith.constant 0 : index
    %c0_21 = arith.constant 0 : index
    %25 = vector.load %arg8[%c0_19, %c0_20, %c0_21] : memref<2x1x384xf32, #tpu.memory_space<vmem>>, vector<1x1x384xf32>
    %26 = vector.shape_cast %25 : vector<1x1x384xf32> to vector<1x384xf32>
    %c0_22 = arith.constant 0 : index
    %c0_23 = arith.constant 0 : index
    %c0_24 = arith.constant 0 : index
    %27 = vector.load %arg9[%c0_22, %c0_23, %c0_24] : memref<2x128x128xf32, #tpu.memory_space<vmem>>, vector<1x128x128xf32>
    %28 = vector.shape_cast %27 : vector<1x128x128xf32> to vector<128x128xf32>
    %c0_25 = arith.constant 0 : index
    %c0_26 = arith.constant 0 : index
    %c0_27 = arith.constant 0 : index
    %29 = vector.load %arg10[%c0_25, %c0_26, %c0_27] : memref<2x1x128xf32, #tpu.memory_space<vmem>>, vector<1x1x128xf32>
    %30 = vector.shape_cast %29 : vector<1x1x128xf32> to vector<1x128xf32>
    %31 = arith.truncf %22 : vector<8x128xf32> to vector<8x128xbf16>
    %32 = arith.truncf %24 : vector<128x384xf32> to vector<128x384xbf16>
    %cst_28 = arith.constant dense<0.000000e+00> : vector<8x384xf32>
    %33 = tpu.matmul %31, %32, %cst_28 {dimension_numbers = #tpu.dot_dimension_numbers<[1], [0], [0], [1], [0, 0, 1, 1], [], []>} : vector<8x128xbf16>, vector<128x384xbf16>, vector<8x384xf32> -> vector<8x384xf32>
    %34 = vector.broadcast %26 : vector<1x384xf32> to vector<8x384xf32>
    %35 = arith.addf %33, %34 : vector<8x384xf32>
    %36 = vector.extract_strided_slice %35 {offsets = [0, 0], sizes = [8, 32], strides = [1, 1]} : vector<8x384xf32> to vector<8x32xf32>
    %37 = vector.extract_strided_slice %35 {offsets = [0, 128], sizes = [8, 32], strides = [1, 1]} : vector<8x384xf32> to vector<8x32xf32>
    %38 = vector.extract_strided_slice %35 {offsets = [0, 256], sizes = [8, 32], strides = [1, 1]} : vector<8x384xf32> to vector<8x32xf32>
    %39 = arith.truncf %36 : vector<8x32xf32> to vector<8x32xbf16>
    %40 = arith.truncf %37 : vector<8x32xf32> to vector<8x32xbf16>
    %cst_29 = arith.constant dense<0.000000e+00> : vector<8x8xf32>
    %41 = tpu.matmul %39, %40, %cst_29 {dimension_numbers = #tpu.dot_dimension_numbers<[1], [1], [0], [0], [0, 0, 1, 0], [], []>} : vector<8x32xbf16>, vector<8x32xbf16>, vector<8x8xf32> -> vector<8x8xf32>
    %cst_30 = arith.constant 0.176776692 : f32
    %42 = vector.broadcast %cst_30 : f32 to vector<8x8xf32>
    %43 = arith.mulf %41, %42 : vector<8x8xf32>
    %cst_31 = arith.constant -1.000000e+30 : f32
    %44 = vector.broadcast %cst_31 : f32 to vector<8x8xf32>
    %45 = arith.select %16, %43, %44 : vector<8x8xi1>, vector<8x8xf32>
    %cst_32 = arith.constant dense<0xFF800000> : vector<8xf32>
    %46 = vector.multi_reduction <maximumf>, %45, %cst_32 [1] : vector<8x8xf32> to vector<8xf32>
    %47 = vector.shape_cast %46 : vector<8xf32> to vector<8x1xf32>
    %48 = vector.broadcast %47 : vector<8x1xf32> to vector<8x8xf32>
    %49 = arith.subf %45, %48 : vector<8x8xf32>
    %50 = math.exp %49 : vector<8x8xf32>
    %cst_33 = arith.constant dense<0.000000e+00> : vector<8xf32>
    %51 = vector.multi_reduction <add>, %50, %cst_33 [1] : vector<8x8xf32> to vector<8xf32>
    %52 = vector.shape_cast %51 : vector<8xf32> to vector<8x1xf32>
    %53 = tpu.reciprocal %52 {approx = true} : vector<8x1xf32> -> vector<8x1xf32>
    %54 = vector.broadcast %53 : vector<8x1xf32> to vector<8x8xf32>
    %55 = arith.mulf %50, %54 : vector<8x8xf32>
    %56 = arith.truncf %55 : vector<8x8xf32> to vector<8x8xbf16>
    %57 = arith.truncf %38 : vector<8x32xf32> to vector<8x32xbf16>
    %cst_34 = arith.constant dense<0.000000e+00> : vector<8x32xf32>
    %58 = tpu.matmul %56, %57, %cst_34 {dimension_numbers = #tpu.dot_dimension_numbers<[1], [0], [0], [1], [0, 0, 1, 1], [], []>} : vector<8x8xbf16>, vector<8x32xbf16>, vector<8x32xf32> -> vector<8x32xf32>
    %59 = vector.extract_strided_slice %28 {offsets = [0, 0], sizes = [32, 128], strides = [1, 1]} : vector<128x128xf32> to vector<32x128xf32>
    %60 = arith.truncf %58 : vector<8x32xf32> to vector<8x32xbf16>
    %61 = arith.truncf %59 : vector<32x128xf32> to vector<32x128xbf16>
    %cst_35 = arith.constant dense<0.000000e+00> : vector<8x128xf32>
    %62 = tpu.matmul %60, %61, %cst_35 {dimension_numbers = #tpu.dot_dimension_numbers<[1], [0], [0], [1], [0, 0, 1, 1], [], []>} : vector<8x32xbf16>, vector<32x128xbf16>, vector<8x128xf32> -> vector<8x128xf32>
    %63 = vector.extract_strided_slice %35 {offsets = [0, 32], sizes = [8, 32], strides = [1, 1]} : vector<8x384xf32> to vector<8x32xf32>
    %64 = vector.extract_strided_slice %35 {offsets = [0, 160], sizes = [8, 32], strides = [1, 1]} : vector<8x384xf32> to vector<8x32xf32>
    %65 = vector.extract_strided_slice %35 {offsets = [0, 288], sizes = [8, 32], strides = [1, 1]} : vector<8x384xf32> to vector<8x32xf32>
    %66 = arith.truncf %63 : vector<8x32xf32> to vector<8x32xbf16>
    %67 = arith.truncf %64 : vector<8x32xf32> to vector<8x32xbf16>
    %cst_36 = arith.constant dense<0.000000e+00> : vector<8x8xf32>
    %68 = tpu.matmul %66, %67, %cst_36 {dimension_numbers = #tpu.dot_dimension_numbers<[1], [1], [0], [0], [0, 0, 1, 0], [], []>} : vector<8x32xbf16>, vector<8x32xbf16>, vector<8x8xf32> -> vector<8x8xf32>
    %cst_37 = arith.constant 0.176776692 : f32
    %69 = vector.broadcast %cst_37 : f32 to vector<8x8xf32>
    %70 = arith.mulf %68, %69 : vector<8x8xf32>
    %cst_38 = arith.constant -1.000000e+30 : f32
    %71 = vector.broadcast %cst_38 : f32 to vector<8x8xf32>
    %72 = arith.select %16, %70, %71 : vector<8x8xi1>, vector<8x8xf32>
    %cst_39 = arith.constant dense<0xFF800000> : vector<8xf32>
    %73 = vector.multi_reduction <maximumf>, %72, %cst_39 [1] : vector<8x8xf32> to vector<8xf32>
    %74 = vector.shape_cast %73 : vector<8xf32> to vector<8x1xf32>
    %75 = vector.broadcast %74 : vector<8x1xf32> to vector<8x8xf32>
    %76 = arith.subf %72, %75 : vector<8x8xf32>
    %77 = math.exp %76 : vector<8x8xf32>
    %cst_40 = arith.constant dense<0.000000e+00> : vector<8xf32>
    %78 = vector.multi_reduction <add>, %77, %cst_40 [1] : vector<8x8xf32> to vector<8xf32>
    %79 = vector.shape_cast %78 : vector<8xf32> to vector<8x1xf32>
    %80 = tpu.reciprocal %79 {approx = true} : vector<8x1xf32> -> vector<8x1xf32>
    %81 = vector.broadcast %80 : vector<8x1xf32> to vector<8x8xf32>
    %82 = arith.mulf %77, %81 : vector<8x8xf32>
    %83 = arith.truncf %82 : vector<8x8xf32> to vector<8x8xbf16>
    %84 = arith.truncf %65 : vector<8x32xf32> to vector<8x32xbf16>
    %cst_41 = arith.constant dense<0.000000e+00> : vector<8x32xf32>
    %85 = tpu.matmul %83, %84, %cst_41 {dimension_numbers = #tpu.dot_dimension_numbers<[1], [0], [0], [1], [0, 0, 1, 1], [], []>} : vector<8x8xbf16>, vector<8x32xbf16>, vector<8x32xf32> -> vector<8x32xf32>
    %86 = vector.extract_strided_slice %28 {offsets = [32, 0], sizes = [32, 128], strides = [1, 1]} : vector<128x128xf32> to vector<32x128xf32>
    %87 = arith.truncf %85 : vector<8x32xf32> to vector<8x32xbf16>
    %88 = arith.truncf %86 : vector<32x128xf32> to vector<32x128xbf16>
    %cst_42 = arith.constant dense<0.000000e+00> : vector<8x128xf32>
    %89 = tpu.matmul %87, %88, %cst_42 {dimension_numbers = #tpu.dot_dimension_numbers<[1], [0], [0], [1], [0, 0, 1, 1], [], []>} : vector<8x32xbf16>, vector<32x128xbf16>, vector<8x128xf32> -> vector<8x128xf32>
    %90 = arith.addf %62, %89 : vector<8x128xf32>
    %91 = vector.extract_strided_slice %35 {offsets = [0, 64], sizes = [8, 32], strides = [1, 1]} : vector<8x384xf32> to vector<8x32xf32>
    %92 = vector.extract_strided_slice %35 {offsets = [0, 192], sizes = [8, 32], strides = [1, 1]} : vector<8x384xf32> to vector<8x32xf32>
    %93 = vector.extract_strided_slice %35 {offsets = [0, 320], sizes = [8, 32], strides = [1, 1]} : vector<8x384xf32> to vector<8x32xf32>
    %94 = arith.truncf %91 : vector<8x32xf32> to vector<8x32xbf16>
    %95 = arith.truncf %92 : vector<8x32xf32> to vector<8x32xbf16>
    %cst_43 = arith.constant dense<0.000000e+00> : vector<8x8xf32>
    %96 = tpu.matmul %94, %95, %cst_43 {dimension_numbers = #tpu.dot_dimension_numbers<[1], [1], [0], [0], [0, 0, 1, 0], [], []>} : vector<8x32xbf16>, vector<8x32xbf16>, vector<8x8xf32> -> vector<8x8xf32>
    %cst_44 = arith.constant 0.176776692 : f32
    %97 = vector.broadcast %cst_44 : f32 to vector<8x8xf32>
    %98 = arith.mulf %96, %97 : vector<8x8xf32>
    %cst_45 = arith.constant -1.000000e+30 : f32
    %99 = vector.broadcast %cst_45 : f32 to vector<8x8xf32>
    %100 = arith.select %16, %98, %99 : vector<8x8xi1>, vector<8x8xf32>
    %cst_46 = arith.constant dense<0xFF800000> : vector<8xf32>
    %101 = vector.multi_reduction <maximumf>, %100, %cst_46 [1] : vector<8x8xf32> to vector<8xf32>
    %102 = vector.shape_cast %101 : vector<8xf32> to vector<8x1xf32>
    %103 = vector.broadcast %102 : vector<8x1xf32> to vector<8x8xf32>
    %104 = arith.subf %100, %103 : vector<8x8xf32>
    %105 = math.exp %104 : vector<8x8xf32>
    %cst_47 = arith.constant dense<0.000000e+00> : vector<8xf32>
    %106 = vector.multi_reduction <add>, %105, %cst_47 [1] : vector<8x8xf32> to vector<8xf32>
    %107 = vector.shape_cast %106 : vector<8xf32> to vector<8x1xf32>
    %108 = tpu.reciprocal %107 {approx = true} : vector<8x1xf32> -> vector<8x1xf32>
    %109 = vector.broadcast %108 : vector<8x1xf32> to vector<8x8xf32>
    %110 = arith.mulf %105, %109 : vector<8x8xf32>
    %111 = arith.truncf %110 : vector<8x8xf32> to vector<8x8xbf16>
    %112 = arith.truncf %93 : vector<8x32xf32> to vector<8x32xbf16>
    %cst_48 = arith.constant dense<0.000000e+00> : vector<8x32xf32>
    %113 = tpu.matmul %111, %112, %cst_48 {dimension_numbers = #tpu.dot_dimension_numbers<[1], [0], [0], [1], [0, 0, 1, 1], [], []>} : vector<8x8xbf16>, vector<8x32xbf16>, vector<8x32xf32> -> vector<8x32xf32>
    %114 = vector.extract_strided_slice %28 {offsets = [64, 0], sizes = [32, 128], strides = [1, 1]} : vector<128x128xf32> to vector<32x128xf32>
    %115 = arith.truncf %113 : vector<8x32xf32> to vector<8x32xbf16>
    %116 = arith.truncf %114 : vector<32x128xf32> to vector<32x128xbf16>
    %cst_49 = arith.constant dense<0.000000e+00> : vector<8x128xf32>
    %117 = tpu.matmul %115, %116, %cst_49 {dimension_numbers = #tpu.dot_dimension_numbers<[1], [0], [0], [1], [0, 0, 1, 1], [], []>} : vector<8x32xbf16>, vector<32x128xbf16>, vector<8x128xf32> -> vector<8x128xf32>
    %118 = arith.addf %90, %117 : vector<8x128xf32>
    %119 = vector.extract_strided_slice %35 {offsets = [0, 96], sizes = [8, 32], strides = [1, 1]} : vector<8x384xf32> to vector<8x32xf32>
    %120 = vector.extract_strided_slice %35 {offsets = [0, 224], sizes = [8, 32], strides = [1, 1]} : vector<8x384xf32> to vector<8x32xf32>
    %121 = vector.extract_strided_slice %35 {offsets = [0, 352], sizes = [8, 32], strides = [1, 1]} : vector<8x384xf32> to vector<8x32xf32>
    %122 = arith.truncf %119 : vector<8x32xf32> to vector<8x32xbf16>
    %123 = arith.truncf %120 : vector<8x32xf32> to vector<8x32xbf16>
    %cst_50 = arith.constant dense<0.000000e+00> : vector<8x8xf32>
    %124 = tpu.matmul %122, %123, %cst_50 {dimension_numbers = #tpu.dot_dimension_numbers<[1], [1], [0], [0], [0, 0, 1, 0], [], []>} : vector<8x32xbf16>, vector<8x32xbf16>, vector<8x8xf32> -> vector<8x8xf32>
    %cst_51 = arith.constant 0.176776692 : f32
    %125 = vector.broadcast %cst_51 : f32 to vector<8x8xf32>
    %126 = arith.mulf %124, %125 : vector<8x8xf32>
    %cst_52 = arith.constant -1.000000e+30 : f32
    %127 = vector.broadcast %cst_52 : f32 to vector<8x8xf32>
    %128 = arith.select %16, %126, %127 : vector<8x8xi1>, vector<8x8xf32>
    %cst_53 = arith.constant dense<0xFF800000> : vector<8xf32>
    %129 = vector.multi_reduction <maximumf>, %128, %cst_53 [1] : vector<8x8xf32> to vector<8xf32>
    %130 = vector.shape_cast %129 : vector<8xf32> to vector<8x1xf32>
    %131 = vector.broadcast %130 : vector<8x1xf32> to vector<8x8xf32>
    %132 = arith.subf %128, %131 : vector<8x8xf32>
    %133 = math.exp %132 : vector<8x8xf32>
    %cst_54 = arith.constant dense<0.000000e+00> : vector<8xf32>
    %134 = vector.multi_reduction <add>, %133, %cst_54 [1] : vector<8x8xf32> to vector<8xf32>
    %135 = vector.shape_cast %134 : vector<8xf32> to vector<8x1xf32>
    %136 = tpu.reciprocal %135 {approx = true} : vector<8x1xf32> -> vector<8x1xf32>
    %137 = vector.broadcast %136 : vector<8x1xf32> to vector<8x8xf32>
    %138 = arith.mulf %133, %137 : vector<8x8xf32>
    %139 = arith.truncf %138 : vector<8x8xf32> to vector<8x8xbf16>
    %140 = arith.truncf %121 : vector<8x32xf32> to vector<8x32xbf16>
    %cst_55 = arith.constant dense<0.000000e+00> : vector<8x32xf32>
    %141 = tpu.matmul %139, %140, %cst_55 {dimension_numbers = #tpu.dot_dimension_numbers<[1], [0], [0], [1], [0, 0, 1, 1], [], []>} : vector<8x8xbf16>, vector<8x32xbf16>, vector<8x32xf32> -> vector<8x32xf32>
    %142 = vector.extract_strided_slice %28 {offsets = [96, 0], sizes = [32, 128], strides = [1, 1]} : vector<128x128xf32> to vector<32x128xf32>
    %143 = arith.truncf %141 : vector<8x32xf32> to vector<8x32xbf16>
    %144 = arith.truncf %142 : vector<32x128xf32> to vector<32x128xbf16>
    %cst_56 = arith.constant dense<0.000000e+00> : vector<8x128xf32>
    %145 = tpu.matmul %143, %144, %cst_56 {dimension_numbers = #tpu.dot_dimension_numbers<[1], [0], [0], [1], [0, 0, 1, 1], [], []>} : vector<8x32xbf16>, vector<32x128xbf16>, vector<8x128xf32> -> vector<8x128xf32>
    %146 = arith.addf %118, %145 : vector<8x128xf32>
    %147 = vector.broadcast %30 : vector<1x128xf32> to vector<8x128xf32>
    %148 = arith.addf %146, %147 : vector<8x128xf32>
    %149 = arith.addf %22, %148 : vector<8x128xf32>
    %c0_57 = arith.constant 0 : index
    %c0_58 = arith.constant 0 : index
    %c0_59 = arith.constant 0 : index
    %150 = vector.load %arg15[%c0_57, %c0_58, %c0_59] : memref<2x1x128xf32, #tpu.memory_space<vmem>>, vector<1x1x128xf32>
    %151 = vector.shape_cast %150 : vector<1x1x128xf32> to vector<1x128xf32>
    %c0_60 = arith.constant 0 : index
    %c0_61 = arith.constant 0 : index
    %c0_62 = arith.constant 0 : index
    %152 = vector.load %arg16[%c0_60, %c0_61, %c0_62] : memref<2x1x128xf32, #tpu.memory_space<vmem>>, vector<1x1x128xf32>
    %153 = vector.shape_cast %152 : vector<1x1x128xf32> to vector<1x128xf32>
    %cst_63 = arith.constant dense<0.000000e+00> : vector<8xf32>
    %154 = vector.multi_reduction <add>, %149, %cst_63 [1] : vector<8x128xf32> to vector<8xf32>
    %155 = vector.shape_cast %154 : vector<8xf32> to vector<8x1xf32>
    %cst_64 = arith.constant 1.280000e+02 : f32
    %156 = vector.broadcast %cst_64 : f32 to vector<8x1xf32>
    %157 = arith.divf %155, %156 : vector<8x1xf32>
    %158 = vector.broadcast %157 : vector<8x1xf32> to vector<8x128xf32>
    %159 = arith.subf %149, %158 : vector<8x128xf32>
    %160 = arith.mulf %159, %159 : vector<8x128xf32>
    %cst_65 = arith.constant dense<0.000000e+00> : vector<8xf32>
    %161 = vector.multi_reduction <add>, %160, %cst_65 [1] : vector<8x128xf32> to vector<8xf32>
    %162 = vector.shape_cast %161 : vector<8xf32> to vector<8x1xf32>
    %cst_66 = arith.constant 1.280000e+02 : f32
    %163 = vector.broadcast %cst_66 : f32 to vector<8x1xf32>
    %164 = arith.divf %162, %163 : vector<8x1xf32>
    %cst_67 = arith.constant 9.99999974E-6 : f32
    %165 = vector.broadcast %cst_67 : f32 to vector<8x1xf32>
    %166 = arith.addf %164, %165 : vector<8x1xf32>
    %167 = math.rsqrt %166 : vector<8x1xf32>
    %168 = vector.broadcast %167 : vector<8x1xf32> to vector<8x128xf32>
    %169 = arith.mulf %159, %168 : vector<8x128xf32>
    %170 = vector.broadcast %151 : vector<1x128xf32> to vector<8x128xf32>
    %171 = arith.mulf %169, %170 : vector<8x128xf32>
    %172 = vector.broadcast %153 : vector<1x128xf32> to vector<8x128xf32>
    %173 = arith.addf %171, %172 : vector<8x128xf32>
    %c0_68 = arith.constant 0 : index
    %c0_69 = arith.constant 0 : index
    %c0_70 = arith.constant 0 : index
    %174 = vector.load %arg11[%c0_68, %c0_69, %c0_70] : memref<2x128x128xf32, #tpu.memory_space<vmem>>, vector<1x128x128xf32>
    %175 = vector.shape_cast %174 : vector<1x128x128xf32> to vector<128x128xf32>
    %176 = arith.truncf %7 : vector<1x128xf32> to vector<1x128xbf16>
    %177 = arith.truncf %175 : vector<128x128xf32> to vector<128x128xbf16>
    %cst_71 = arith.constant dense<0.000000e+00> : vector<1x128xf32>
    %178 = tpu.matmul %176, %177, %cst_71 {dimension_numbers = #tpu.dot_dimension_numbers<[1], [0], [0], [1], [0, 0, 1, 1], [], []>} : vector<1x128xbf16>, vector<128x128xbf16>, vector<1x128xf32> -> vector<1x128xf32>
    %c0_72 = arith.constant 0 : index
    %c0_73 = arith.constant 0 : index
    %c0_74 = arith.constant 0 : index
    %179 = vector.load %arg12[%c0_72, %c0_73, %c0_74] : memref<2x1x128xf32, #tpu.memory_space<vmem>>, vector<1x1x128xf32>
    %180 = vector.shape_cast %179 : vector<1x1x128xf32> to vector<1x128xf32>
    %181 = arith.addf %178, %180 : vector<1x128xf32>
    %c0_75 = arith.constant 0 : index
    %c0_76 = arith.constant 0 : index
    %c0_77 = arith.constant 0 : index
    %182 = vector.load %arg13[%c0_75, %c0_76, %c0_77] : memref<2x128x128xf32, #tpu.memory_space<vmem>>, vector<1x128x128xf32>
    %183 = vector.shape_cast %182 : vector<1x128x128xf32> to vector<128x128xf32>
    %184 = arith.truncf %181 : vector<1x128xf32> to vector<1x128xbf16>
    %185 = arith.truncf %183 : vector<128x128xf32> to vector<128x128xbf16>
    %cst_78 = arith.constant dense<0.000000e+00> : vector<1x128xf32>
    %186 = tpu.matmul %184, %185, %cst_78 {dimension_numbers = #tpu.dot_dimension_numbers<[1], [0], [0], [1], [0, 0, 1, 1], [], []>} : vector<1x128xbf16>, vector<128x128xbf16>, vector<1x128xf32> -> vector<1x128xf32>
    %c0_79 = arith.constant 0 : index
    %c0_80 = arith.constant 0 : index
    %c0_81 = arith.constant 0 : index
    %187 = vector.load %arg14[%c0_79, %c0_80, %c0_81] : memref<2x1x128xf32, #tpu.memory_space<vmem>>, vector<1x1x128xf32>
    %188 = vector.shape_cast %187 : vector<1x1x128xf32> to vector<1x128xf32>
    %189 = arith.addf %186, %188 : vector<1x128xf32>
    %190 = vector.broadcast %189 : vector<1x128xf32> to vector<8x128xf32>
    %191 = arith.addf %173, %190 : vector<8x128xf32>
    %c0_82 = arith.constant 0 : index
    %c0_83 = arith.constant 0 : index
    %c0_84 = arith.constant 0 : index
    %192 = vector.load %arg17[%c0_82, %c0_83, %c0_84] : memref<2x1x128xf32, #tpu.memory_space<vmem>>, vector<1x1x128xf32>
    %193 = vector.shape_cast %192 : vector<1x1x128xf32> to vector<1x128xf32>
    %c0_85 = arith.constant 0 : index
    %c0_86 = arith.constant 0 : index
    %c0_87 = arith.constant 0 : index
    %194 = vector.load %arg18[%c0_85, %c0_86, %c0_87] : memref<2x1x128xf32, #tpu.memory_space<vmem>>, vector<1x1x128xf32>
    %195 = vector.shape_cast %194 : vector<1x1x128xf32> to vector<1x128xf32>
    %cst_88 = arith.constant dense<0.000000e+00> : vector<8xf32>
    %196 = vector.multi_reduction <add>, %191, %cst_88 [1] : vector<8x128xf32> to vector<8xf32>
    %197 = vector.shape_cast %196 : vector<8xf32> to vector<8x1xf32>
    %cst_89 = arith.constant 1.280000e+02 : f32
    %198 = vector.broadcast %cst_89 : f32 to vector<8x1xf32>
    %199 = arith.divf %197, %198 : vector<8x1xf32>
    %200 = vector.broadcast %199 : vector<8x1xf32> to vector<8x128xf32>
    %201 = arith.subf %191, %200 : vector<8x128xf32>
    %202 = arith.mulf %201, %201 : vector<8x128xf32>
    %cst_90 = arith.constant dense<0.000000e+00> : vector<8xf32>
    %203 = vector.multi_reduction <add>, %202, %cst_90 [1] : vector<8x128xf32> to vector<8xf32>
    %204 = vector.shape_cast %203 : vector<8xf32> to vector<8x1xf32>
    %cst_91 = arith.constant 1.280000e+02 : f32
    %205 = vector.broadcast %cst_91 : f32 to vector<8x1xf32>
    %206 = arith.divf %204, %205 : vector<8x1xf32>
    %cst_92 = arith.constant 9.99999974E-6 : f32
    %207 = vector.broadcast %cst_92 : f32 to vector<8x1xf32>
    %208 = arith.addf %206, %207 : vector<8x1xf32>
    %209 = math.rsqrt %208 : vector<8x1xf32>
    %210 = vector.broadcast %209 : vector<8x1xf32> to vector<8x128xf32>
    %211 = arith.mulf %201, %210 : vector<8x128xf32>
    %212 = vector.broadcast %193 : vector<1x128xf32> to vector<8x128xf32>
    %213 = arith.mulf %211, %212 : vector<8x128xf32>
    %214 = vector.broadcast %195 : vector<1x128xf32> to vector<8x128xf32>
    %215 = arith.addf %213, %214 : vector<8x128xf32>
    %c0_93 = arith.constant 0 : index
    %c0_94 = arith.constant 0 : index
    %c0_95 = arith.constant 0 : index
    %216 = vector.load %arg21[%c0_93, %c0_94, %c0_95] : memref<2x128x256xf32, #tpu.memory_space<vmem>>, vector<1x128x256xf32>
    %217 = vector.shape_cast %216 : vector<1x128x256xf32> to vector<128x256xf32>
    %218 = arith.truncf %215 : vector<8x128xf32> to vector<8x128xbf16>
    %219 = arith.truncf %217 : vector<128x256xf32> to vector<128x256xbf16>
    %cst_96 = arith.constant dense<0.000000e+00> : vector<8x256xf32>
    %220 = tpu.matmul %218, %219, %cst_96 {dimension_numbers = #tpu.dot_dimension_numbers<[1], [0], [0], [1], [0, 0, 1, 1], [], []>} : vector<8x128xbf16>, vector<128x256xbf16>, vector<8x256xf32> -> vector<8x256xf32>
    %c0_97 = arith.constant 0 : index
    %c0_98 = arith.constant 0 : index
    %c0_99 = arith.constant 0 : index
    %221 = vector.load %arg22[%c0_97, %c0_98, %c0_99] : memref<2x1x256xf32, #tpu.memory_space<vmem>>, vector<1x1x256xf32>
    %222 = vector.shape_cast %221 : vector<1x1x256xf32> to vector<1x256xf32>
    %223 = vector.broadcast %222 : vector<1x256xf32> to vector<8x256xf32>
    %224 = arith.addf %220, %223 : vector<8x256xf32>
    %cst_100 = arith.constant 0.000000e+00 : f32
    %225 = vector.broadcast %cst_100 : f32 to vector<8x256xf32>
    %226 = arith.maximumf %224, %225 : vector<8x256xf32>
    %c0_101 = arith.constant 0 : index
    %c0_102 = arith.constant 0 : index
    %c0_103 = arith.constant 0 : index
    %227 = vector.load %arg23[%c0_101, %c0_102, %c0_103] : memref<2x256x128xf32, #tpu.memory_space<vmem>>, vector<1x256x128xf32>
    %228 = vector.shape_cast %227 : vector<1x256x128xf32> to vector<256x128xf32>
    %229 = arith.truncf %226 : vector<8x256xf32> to vector<8x256xbf16>
    %230 = arith.truncf %228 : vector<256x128xf32> to vector<256x128xbf16>
    %cst_104 = arith.constant dense<0.000000e+00> : vector<8x128xf32>
    %231 = tpu.matmul %229, %230, %cst_104 {dimension_numbers = #tpu.dot_dimension_numbers<[1], [0], [0], [1], [0, 0, 1, 1], [], []>} : vector<8x256xbf16>, vector<256x128xbf16>, vector<8x128xf32> -> vector<8x128xf32>
    %c0_105 = arith.constant 0 : index
    %c0_106 = arith.constant 0 : index
    %c0_107 = arith.constant 0 : index
    %232 = vector.load %arg24[%c0_105, %c0_106, %c0_107] : memref<2x1x128xf32, #tpu.memory_space<vmem>>, vector<1x1x128xf32>
    %233 = vector.shape_cast %232 : vector<1x1x128xf32> to vector<1x128xf32>
    %234 = vector.broadcast %233 : vector<1x128xf32> to vector<8x128xf32>
    %235 = arith.addf %231, %234 : vector<8x128xf32>
    %236 = arith.addf %215, %235 : vector<8x128xf32>
    %c0_108 = arith.constant 0 : index
    %c0_109 = arith.constant 0 : index
    %c0_110 = arith.constant 0 : index
    %237 = vector.load %arg19[%c0_108, %c0_109, %c0_110] : memref<2x1x128xf32, #tpu.memory_space<vmem>>, vector<1x1x128xf32>
    %238 = vector.shape_cast %237 : vector<1x1x128xf32> to vector<1x128xf32>
    %c0_111 = arith.constant 0 : index
    %c0_112 = arith.constant 0 : index
    %c0_113 = arith.constant 0 : index
    %239 = vector.load %arg20[%c0_111, %c0_112, %c0_113] : memref<2x1x128xf32, #tpu.memory_space<vmem>>, vector<1x1x128xf32>
    %240 = vector.shape_cast %239 : vector<1x1x128xf32> to vector<1x128xf32>
    %cst_114 = arith.constant dense<0.000000e+00> : vector<8xf32>
    %241 = vector.multi_reduction <add>, %236, %cst_114 [1] : vector<8x128xf32> to vector<8xf32>
    %242 = vector.shape_cast %241 : vector<8xf32> to vector<8x1xf32>
    %cst_115 = arith.constant 1.280000e+02 : f32
    %243 = vector.broadcast %cst_115 : f32 to vector<8x1xf32>
    %244 = arith.divf %242, %243 : vector<8x1xf32>
    %245 = vector.broadcast %244 : vector<8x1xf32> to vector<8x128xf32>
    %246 = arith.subf %236, %245 : vector<8x128xf32>
    %247 = arith.mulf %246, %246 : vector<8x128xf32>
    %cst_116 = arith.constant dense<0.000000e+00> : vector<8xf32>
    %248 = vector.multi_reduction <add>, %247, %cst_116 [1] : vector<8x128xf32> to vector<8xf32>
    %249 = vector.shape_cast %248 : vector<8xf32> to vector<8x1xf32>
    %cst_117 = arith.constant 1.280000e+02 : f32
    %250 = vector.broadcast %cst_117 : f32 to vector<8x1xf32>
    %251 = arith.divf %249, %250 : vector<8x1xf32>
    %cst_118 = arith.constant 9.99999974E-6 : f32
    %252 = vector.broadcast %cst_118 : f32 to vector<8x1xf32>
    %253 = arith.addf %251, %252 : vector<8x1xf32>
    %254 = math.rsqrt %253 : vector<8x1xf32>
    %255 = vector.broadcast %254 : vector<8x1xf32> to vector<8x128xf32>
    %256 = arith.mulf %246, %255 : vector<8x128xf32>
    %257 = vector.broadcast %238 : vector<1x128xf32> to vector<8x128xf32>
    %258 = arith.mulf %256, %257 : vector<8x128xf32>
    %259 = vector.broadcast %240 : vector<1x128xf32> to vector<8x128xf32>
    %260 = arith.addf %258, %259 : vector<8x128xf32>
    %c1 = arith.constant 1 : index
    %c0_119 = arith.constant 0 : index
    %c0_120 = arith.constant 0 : index
    %261 = vector.load %arg7[%c1, %c0_119, %c0_120] : memref<2x128x384xf32, #tpu.memory_space<vmem>>, vector<1x128x384xf32>
    %262 = vector.shape_cast %261 : vector<1x128x384xf32> to vector<128x384xf32>
    %c1_121 = arith.constant 1 : index
    %c0_122 = arith.constant 0 : index
    %c0_123 = arith.constant 0 : index
    %263 = vector.load %arg8[%c1_121, %c0_122, %c0_123] : memref<2x1x384xf32, #tpu.memory_space<vmem>>, vector<1x1x384xf32>
    %264 = vector.shape_cast %263 : vector<1x1x384xf32> to vector<1x384xf32>
    %c1_124 = arith.constant 1 : index
    %c0_125 = arith.constant 0 : index
    %c0_126 = arith.constant 0 : index
    %265 = vector.load %arg9[%c1_124, %c0_125, %c0_126] : memref<2x128x128xf32, #tpu.memory_space<vmem>>, vector<1x128x128xf32>
    %266 = vector.shape_cast %265 : vector<1x128x128xf32> to vector<128x128xf32>
    %c1_127 = arith.constant 1 : index
    %c0_128 = arith.constant 0 : index
    %c0_129 = arith.constant 0 : index
    %267 = vector.load %arg10[%c1_127, %c0_128, %c0_129] : memref<2x1x128xf32, #tpu.memory_space<vmem>>, vector<1x1x128xf32>
    %268 = vector.shape_cast %267 : vector<1x1x128xf32> to vector<1x128xf32>
    %269 = arith.truncf %260 : vector<8x128xf32> to vector<8x128xbf16>
    %270 = arith.truncf %262 : vector<128x384xf32> to vector<128x384xbf16>
    %cst_130 = arith.constant dense<0.000000e+00> : vector<8x384xf32>
    %271 = tpu.matmul %269, %270, %cst_130 {dimension_numbers = #tpu.dot_dimension_numbers<[1], [0], [0], [1], [0, 0, 1, 1], [], []>} : vector<8x128xbf16>, vector<128x384xbf16>, vector<8x384xf32> -> vector<8x384xf32>
    %272 = vector.broadcast %264 : vector<1x384xf32> to vector<8x384xf32>
    %273 = arith.addf %271, %272 : vector<8x384xf32>
    %274 = vector.extract_strided_slice %273 {offsets = [0, 0], sizes = [8, 32], strides = [1, 1]} : vector<8x384xf32> to vector<8x32xf32>
    %275 = vector.extract_strided_slice %273 {offsets = [0, 128], sizes = [8, 32], strides = [1, 1]} : vector<8x384xf32> to vector<8x32xf32>
    %276 = vector.extract_strided_slice %273 {offsets = [0, 256], sizes = [8, 32], strides = [1, 1]} : vector<8x384xf32> to vector<8x32xf32>
    %277 = arith.truncf %274 : vector<8x32xf32> to vector<8x32xbf16>
    %278 = arith.truncf %275 : vector<8x32xf32> to vector<8x32xbf16>
    %cst_131 = arith.constant dense<0.000000e+00> : vector<8x8xf32>
    %279 = tpu.matmul %277, %278, %cst_131 {dimension_numbers = #tpu.dot_dimension_numbers<[1], [1], [0], [0], [0, 0, 1, 0], [], []>} : vector<8x32xbf16>, vector<8x32xbf16>, vector<8x8xf32> -> vector<8x8xf32>
    %cst_132 = arith.constant 0.176776692 : f32
    %280 = vector.broadcast %cst_132 : f32 to vector<8x8xf32>
    %281 = arith.mulf %279, %280 : vector<8x8xf32>
    %cst_133 = arith.constant -1.000000e+30 : f32
    %282 = vector.broadcast %cst_133 : f32 to vector<8x8xf32>
    %283 = arith.select %16, %281, %282 : vector<8x8xi1>, vector<8x8xf32>
    %cst_134 = arith.constant dense<0xFF800000> : vector<8xf32>
    %284 = vector.multi_reduction <maximumf>, %283, %cst_134 [1] : vector<8x8xf32> to vector<8xf32>
    %285 = vector.shape_cast %284 : vector<8xf32> to vector<8x1xf32>
    %286 = vector.broadcast %285 : vector<8x1xf32> to vector<8x8xf32>
    %287 = arith.subf %283, %286 : vector<8x8xf32>
    %288 = math.exp %287 : vector<8x8xf32>
    %cst_135 = arith.constant dense<0.000000e+00> : vector<8xf32>
    %289 = vector.multi_reduction <add>, %288, %cst_135 [1] : vector<8x8xf32> to vector<8xf32>
    %290 = vector.shape_cast %289 : vector<8xf32> to vector<8x1xf32>
    %291 = tpu.reciprocal %290 {approx = true} : vector<8x1xf32> -> vector<8x1xf32>
    %292 = vector.broadcast %291 : vector<8x1xf32> to vector<8x8xf32>
    %293 = arith.mulf %288, %292 : vector<8x8xf32>
    %294 = arith.truncf %293 : vector<8x8xf32> to vector<8x8xbf16>
    %295 = arith.truncf %276 : vector<8x32xf32> to vector<8x32xbf16>
    %cst_136 = arith.constant dense<0.000000e+00> : vector<8x32xf32>
    %296 = tpu.matmul %294, %295, %cst_136 {dimension_numbers = #tpu.dot_dimension_numbers<[1], [0], [0], [1], [0, 0, 1, 1], [], []>} : vector<8x8xbf16>, vector<8x32xbf16>, vector<8x32xf32> -> vector<8x32xf32>
    %297 = vector.extract_strided_slice %266 {offsets = [0, 0], sizes = [32, 128], strides = [1, 1]} : vector<128x128xf32> to vector<32x128xf32>
    %298 = arith.truncf %296 : vector<8x32xf32> to vector<8x32xbf16>
    %299 = arith.truncf %297 : vector<32x128xf32> to vector<32x128xbf16>
    %cst_137 = arith.constant dense<0.000000e+00> : vector<8x128xf32>
    %300 = tpu.matmul %298, %299, %cst_137 {dimension_numbers = #tpu.dot_dimension_numbers<[1], [0], [0], [1], [0, 0, 1, 1], [], []>} : vector<8x32xbf16>, vector<32x128xbf16>, vector<8x128xf32> -> vector<8x128xf32>
    %301 = vector.extract_strided_slice %273 {offsets = [0, 32], sizes = [8, 32], strides = [1, 1]} : vector<8x384xf32> to vector<8x32xf32>
    %302 = vector.extract_strided_slice %273 {offsets = [0, 160], sizes = [8, 32], strides = [1, 1]} : vector<8x384xf32> to vector<8x32xf32>
    %303 = vector.extract_strided_slice %273 {offsets = [0, 288], sizes = [8, 32], strides = [1, 1]} : vector<8x384xf32> to vector<8x32xf32>
    %304 = arith.truncf %301 : vector<8x32xf32> to vector<8x32xbf16>
    %305 = arith.truncf %302 : vector<8x32xf32> to vector<8x32xbf16>
    %cst_138 = arith.constant dense<0.000000e+00> : vector<8x8xf32>
    %306 = tpu.matmul %304, %305, %cst_138 {dimension_numbers = #tpu.dot_dimension_numbers<[1], [1], [0], [0], [0, 0, 1, 0], [], []>} : vector<8x32xbf16>, vector<8x32xbf16>, vector<8x8xf32> -> vector<8x8xf32>
    %cst_139 = arith.constant 0.176776692 : f32
    %307 = vector.broadcast %cst_139 : f32 to vector<8x8xf32>
    %308 = arith.mulf %306, %307 : vector<8x8xf32>
    %cst_140 = arith.constant -1.000000e+30 : f32
    %309 = vector.broadcast %cst_140 : f32 to vector<8x8xf32>
    %310 = arith.select %16, %308, %309 : vector<8x8xi1>, vector<8x8xf32>
    %cst_141 = arith.constant dense<0xFF800000> : vector<8xf32>
    %311 = vector.multi_reduction <maximumf>, %310, %cst_141 [1] : vector<8x8xf32> to vector<8xf32>
    %312 = vector.shape_cast %311 : vector<8xf32> to vector<8x1xf32>
    %313 = vector.broadcast %312 : vector<8x1xf32> to vector<8x8xf32>
    %314 = arith.subf %310, %313 : vector<8x8xf32>
    %315 = math.exp %314 : vector<8x8xf32>
    %cst_142 = arith.constant dense<0.000000e+00> : vector<8xf32>
    %316 = vector.multi_reduction <add>, %315, %cst_142 [1] : vector<8x8xf32> to vector<8xf32>
    %317 = vector.shape_cast %316 : vector<8xf32> to vector<8x1xf32>
    %318 = tpu.reciprocal %317 {approx = true} : vector<8x1xf32> -> vector<8x1xf32>
    %319 = vector.broadcast %318 : vector<8x1xf32> to vector<8x8xf32>
    %320 = arith.mulf %315, %319 : vector<8x8xf32>
    %321 = arith.truncf %320 : vector<8x8xf32> to vector<8x8xbf16>
    %322 = arith.truncf %303 : vector<8x32xf32> to vector<8x32xbf16>
    %cst_143 = arith.constant dense<0.000000e+00> : vector<8x32xf32>
    %323 = tpu.matmul %321, %322, %cst_143 {dimension_numbers = #tpu.dot_dimension_numbers<[1], [0], [0], [1], [0, 0, 1, 1], [], []>} : vector<8x8xbf16>, vector<8x32xbf16>, vector<8x32xf32> -> vector<8x32xf32>
    %324 = vector.extract_strided_slice %266 {offsets = [32, 0], sizes = [32, 128], strides = [1, 1]} : vector<128x128xf32> to vector<32x128xf32>
    %325 = arith.truncf %323 : vector<8x32xf32> to vector<8x32xbf16>
    %326 = arith.truncf %324 : vector<32x128xf32> to vector<32x128xbf16>
    %cst_144 = arith.constant dense<0.000000e+00> : vector<8x128xf32>
    %327 = tpu.matmul %325, %326, %cst_144 {dimension_numbers = #tpu.dot_dimension_numbers<[1], [0], [0], [1], [0, 0, 1, 1], [], []>} : vector<8x32xbf16>, vector<32x128xbf16>, vector<8x128xf32> -> vector<8x128xf32>
    %328 = arith.addf %300, %327 : vector<8x128xf32>
    %329 = vector.extract_strided_slice %273 {offsets = [0, 64], sizes = [8, 32], strides = [1, 1]} : vector<8x384xf32> to vector<8x32xf32>
    %330 = vector.extract_strided_slice %273 {offsets = [0, 192], sizes = [8, 32], strides = [1, 1]} : vector<8x384xf32> to vector<8x32xf32>
    %331 = vector.extract_strided_slice %273 {offsets = [0, 320], sizes = [8, 32], strides = [1, 1]} : vector<8x384xf32> to vector<8x32xf32>
    %332 = arith.truncf %329 : vector<8x32xf32> to vector<8x32xbf16>
    %333 = arith.truncf %330 : vector<8x32xf32> to vector<8x32xbf16>
    %cst_145 = arith.constant dense<0.000000e+00> : vector<8x8xf32>
    %334 = tpu.matmul %332, %333, %cst_145 {dimension_numbers = #tpu.dot_dimension_numbers<[1], [1], [0], [0], [0, 0, 1, 0], [], []>} : vector<8x32xbf16>, vector<8x32xbf16>, vector<8x8xf32> -> vector<8x8xf32>
    %cst_146 = arith.constant 0.176776692 : f32
    %335 = vector.broadcast %cst_146 : f32 to vector<8x8xf32>
    %336 = arith.mulf %334, %335 : vector<8x8xf32>
    %cst_147 = arith.constant -1.000000e+30 : f32
    %337 = vector.broadcast %cst_147 : f32 to vector<8x8xf32>
    %338 = arith.select %16, %336, %337 : vector<8x8xi1>, vector<8x8xf32>
    %cst_148 = arith.constant dense<0xFF800000> : vector<8xf32>
    %339 = vector.multi_reduction <maximumf>, %338, %cst_148 [1] : vector<8x8xf32> to vector<8xf32>
    %340 = vector.shape_cast %339 : vector<8xf32> to vector<8x1xf32>
    %341 = vector.broadcast %340 : vector<8x1xf32> to vector<8x8xf32>
    %342 = arith.subf %338, %341 : vector<8x8xf32>
    %343 = math.exp %342 : vector<8x8xf32>
    %cst_149 = arith.constant dense<0.000000e+00> : vector<8xf32>
    %344 = vector.multi_reduction <add>, %343, %cst_149 [1] : vector<8x8xf32> to vector<8xf32>
    %345 = vector.shape_cast %344 : vector<8xf32> to vector<8x1xf32>
    %346 = tpu.reciprocal %345 {approx = true} : vector<8x1xf32> -> vector<8x1xf32>
    %347 = vector.broadcast %346 : vector<8x1xf32> to vector<8x8xf32>
    %348 = arith.mulf %343, %347 : vector<8x8xf32>
    %349 = arith.truncf %348 : vector<8x8xf32> to vector<8x8xbf16>
    %350 = arith.truncf %331 : vector<8x32xf32> to vector<8x32xbf16>
    %cst_150 = arith.constant dense<0.000000e+00> : vector<8x32xf32>
    %351 = tpu.matmul %349, %350, %cst_150 {dimension_numbers = #tpu.dot_dimension_numbers<[1], [0], [0], [1], [0, 0, 1, 1], [], []>} : vector<8x8xbf16>, vector<8x32xbf16>, vector<8x32xf32> -> vector<8x32xf32>
    %352 = vector.extract_strided_slice %266 {offsets = [64, 0], sizes = [32, 128], strides = [1, 1]} : vector<128x128xf32> to vector<32x128xf32>
    %353 = arith.truncf %351 : vector<8x32xf32> to vector<8x32xbf16>
    %354 = arith.truncf %352 : vector<32x128xf32> to vector<32x128xbf16>
    %cst_151 = arith.constant dense<0.000000e+00> : vector<8x128xf32>
    %355 = tpu.matmul %353, %354, %cst_151 {dimension_numbers = #tpu.dot_dimension_numbers<[1], [0], [0], [1], [0, 0, 1, 1], [], []>} : vector<8x32xbf16>, vector<32x128xbf16>, vector<8x128xf32> -> vector<8x128xf32>
    %356 = arith.addf %328, %355 : vector<8x128xf32>
    %357 = vector.extract_strided_slice %273 {offsets = [0, 96], sizes = [8, 32], strides = [1, 1]} : vector<8x384xf32> to vector<8x32xf32>
    %358 = vector.extract_strided_slice %273 {offsets = [0, 224], sizes = [8, 32], strides = [1, 1]} : vector<8x384xf32> to vector<8x32xf32>
    %359 = vector.extract_strided_slice %273 {offsets = [0, 352], sizes = [8, 32], strides = [1, 1]} : vector<8x384xf32> to vector<8x32xf32>
    %360 = arith.truncf %357 : vector<8x32xf32> to vector<8x32xbf16>
    %361 = arith.truncf %358 : vector<8x32xf32> to vector<8x32xbf16>
    %cst_152 = arith.constant dense<0.000000e+00> : vector<8x8xf32>
    %362 = tpu.matmul %360, %361, %cst_152 {dimension_numbers = #tpu.dot_dimension_numbers<[1], [1], [0], [0], [0, 0, 1, 0], [], []>} : vector<8x32xbf16>, vector<8x32xbf16>, vector<8x8xf32> -> vector<8x8xf32>
    %cst_153 = arith.constant 0.176776692 : f32
    %363 = vector.broadcast %cst_153 : f32 to vector<8x8xf32>
    %364 = arith.mulf %362, %363 : vector<8x8xf32>
    %cst_154 = arith.constant -1.000000e+30 : f32
    %365 = vector.broadcast %cst_154 : f32 to vector<8x8xf32>
    %366 = arith.select %16, %364, %365 : vector<8x8xi1>, vector<8x8xf32>
    %cst_155 = arith.constant dense<0xFF800000> : vector<8xf32>
    %367 = vector.multi_reduction <maximumf>, %366, %cst_155 [1] : vector<8x8xf32> to vector<8xf32>
    %368 = vector.shape_cast %367 : vector<8xf32> to vector<8x1xf32>
    %369 = vector.broadcast %368 : vector<8x1xf32> to vector<8x8xf32>
    %370 = arith.subf %366, %369 : vector<8x8xf32>
    %371 = math.exp %370 : vector<8x8xf32>
    %cst_156 = arith.constant dense<0.000000e+00> : vector<8xf32>
    %372 = vector.multi_reduction <add>, %371, %cst_156 [1] : vector<8x8xf32> to vector<8xf32>
    %373 = vector.shape_cast %372 : vector<8xf32> to vector<8x1xf32>
    %374 = tpu.reciprocal %373 {approx = true} : vector<8x1xf32> -> vector<8x1xf32>
    %375 = vector.broadcast %374 : vector<8x1xf32> to vector<8x8xf32>
    %376 = arith.mulf %371, %375 : vector<8x8xf32>
    %377 = arith.truncf %376 : vector<8x8xf32> to vector<8x8xbf16>
    %378 = arith.truncf %359 : vector<8x32xf32> to vector<8x32xbf16>
    %cst_157 = arith.constant dense<0.000000e+00> : vector<8x32xf32>
    %379 = tpu.matmul %377, %378, %cst_157 {dimension_numbers = #tpu.dot_dimension_numbers<[1], [0], [0], [1], [0, 0, 1, 1], [], []>} : vector<8x8xbf16>, vector<8x32xbf16>, vector<8x32xf32> -> vector<8x32xf32>
    %380 = vector.extract_strided_slice %266 {offsets = [96, 0], sizes = [32, 128], strides = [1, 1]} : vector<128x128xf32> to vector<32x128xf32>
    %381 = arith.truncf %379 : vector<8x32xf32> to vector<8x32xbf16>
    %382 = arith.truncf %380 : vector<32x128xf32> to vector<32x128xbf16>
    %cst_158 = arith.constant dense<0.000000e+00> : vector<8x128xf32>
    %383 = tpu.matmul %381, %382, %cst_158 {dimension_numbers = #tpu.dot_dimension_numbers<[1], [0], [0], [1], [0, 0, 1, 1], [], []>} : vector<8x32xbf16>, vector<32x128xbf16>, vector<8x128xf32> -> vector<8x128xf32>
    %384 = arith.addf %356, %383 : vector<8x128xf32>
    %385 = vector.broadcast %268 : vector<1x128xf32> to vector<8x128xf32>
    %386 = arith.addf %384, %385 : vector<8x128xf32>
    %387 = arith.addf %260, %386 : vector<8x128xf32>
    %c1_159 = arith.constant 1 : index
    %c0_160 = arith.constant 0 : index
    %c0_161 = arith.constant 0 : index
    %388 = vector.load %arg15[%c1_159, %c0_160, %c0_161] : memref<2x1x128xf32, #tpu.memory_space<vmem>>, vector<1x1x128xf32>
    %389 = vector.shape_cast %388 : vector<1x1x128xf32> to vector<1x128xf32>
    %c1_162 = arith.constant 1 : index
    %c0_163 = arith.constant 0 : index
    %c0_164 = arith.constant 0 : index
    %390 = vector.load %arg16[%c1_162, %c0_163, %c0_164] : memref<2x1x128xf32, #tpu.memory_space<vmem>>, vector<1x1x128xf32>
    %391 = vector.shape_cast %390 : vector<1x1x128xf32> to vector<1x128xf32>
    %cst_165 = arith.constant dense<0.000000e+00> : vector<8xf32>
    %392 = vector.multi_reduction <add>, %387, %cst_165 [1] : vector<8x128xf32> to vector<8xf32>
    %393 = vector.shape_cast %392 : vector<8xf32> to vector<8x1xf32>
    %cst_166 = arith.constant 1.280000e+02 : f32
    %394 = vector.broadcast %cst_166 : f32 to vector<8x1xf32>
    %395 = arith.divf %393, %394 : vector<8x1xf32>
    %396 = vector.broadcast %395 : vector<8x1xf32> to vector<8x128xf32>
    %397 = arith.subf %387, %396 : vector<8x128xf32>
    %398 = arith.mulf %397, %397 : vector<8x128xf32>
    %cst_167 = arith.constant dense<0.000000e+00> : vector<8xf32>
    %399 = vector.multi_reduction <add>, %398, %cst_167 [1] : vector<8x128xf32> to vector<8xf32>
    %400 = vector.shape_cast %399 : vector<8xf32> to vector<8x1xf32>
    %cst_168 = arith.constant 1.280000e+02 : f32
    %401 = vector.broadcast %cst_168 : f32 to vector<8x1xf32>
    %402 = arith.divf %400, %401 : vector<8x1xf32>
    %cst_169 = arith.constant 9.99999974E-6 : f32
    %403 = vector.broadcast %cst_169 : f32 to vector<8x1xf32>
    %404 = arith.addf %402, %403 : vector<8x1xf32>
    %405 = math.rsqrt %404 : vector<8x1xf32>
    %406 = vector.broadcast %405 : vector<8x1xf32> to vector<8x128xf32>
    %407 = arith.mulf %397, %406 : vector<8x128xf32>
    %408 = vector.broadcast %389 : vector<1x128xf32> to vector<8x128xf32>
    %409 = arith.mulf %407, %408 : vector<8x128xf32>
    %410 = vector.broadcast %391 : vector<1x128xf32> to vector<8x128xf32>
    %411 = arith.addf %409, %410 : vector<8x128xf32>
    %c1_170 = arith.constant 1 : index
    %c0_171 = arith.constant 0 : index
    %c0_172 = arith.constant 0 : index
    %412 = vector.load %arg11[%c1_170, %c0_171, %c0_172] : memref<2x128x128xf32, #tpu.memory_space<vmem>>, vector<1x128x128xf32>
    %413 = vector.shape_cast %412 : vector<1x128x128xf32> to vector<128x128xf32>
    %414 = arith.truncf %7 : vector<1x128xf32> to vector<1x128xbf16>
    %415 = arith.truncf %413 : vector<128x128xf32> to vector<128x128xbf16>
    %cst_173 = arith.constant dense<0.000000e+00> : vector<1x128xf32>
    %416 = tpu.matmul %414, %415, %cst_173 {dimension_numbers = #tpu.dot_dimension_numbers<[1], [0], [0], [1], [0, 0, 1, 1], [], []>} : vector<1x128xbf16>, vector<128x128xbf16>, vector<1x128xf32> -> vector<1x128xf32>
    %c1_174 = arith.constant 1 : index
    %c0_175 = arith.constant 0 : index
    %c0_176 = arith.constant 0 : index
    %417 = vector.load %arg12[%c1_174, %c0_175, %c0_176] : memref<2x1x128xf32, #tpu.memory_space<vmem>>, vector<1x1x128xf32>
    %418 = vector.shape_cast %417 : vector<1x1x128xf32> to vector<1x128xf32>
    %419 = arith.addf %416, %418 : vector<1x128xf32>
    %c1_177 = arith.constant 1 : index
    %c0_178 = arith.constant 0 : index
    %c0_179 = arith.constant 0 : index
    %420 = vector.load %arg13[%c1_177, %c0_178, %c0_179] : memref<2x128x128xf32, #tpu.memory_space<vmem>>, vector<1x128x128xf32>
    %421 = vector.shape_cast %420 : vector<1x128x128xf32> to vector<128x128xf32>
    %422 = arith.truncf %419 : vector<1x128xf32> to vector<1x128xbf16>
    %423 = arith.truncf %421 : vector<128x128xf32> to vector<128x128xbf16>
    %cst_180 = arith.constant dense<0.000000e+00> : vector<1x128xf32>
    %424 = tpu.matmul %422, %423, %cst_180 {dimension_numbers = #tpu.dot_dimension_numbers<[1], [0], [0], [1], [0, 0, 1, 1], [], []>} : vector<1x128xbf16>, vector<128x128xbf16>, vector<1x128xf32> -> vector<1x128xf32>
    %c1_181 = arith.constant 1 : index
    %c0_182 = arith.constant 0 : index
    %c0_183 = arith.constant 0 : index
    %425 = vector.load %arg14[%c1_181, %c0_182, %c0_183] : memref<2x1x128xf32, #tpu.memory_space<vmem>>, vector<1x1x128xf32>
    %426 = vector.shape_cast %425 : vector<1x1x128xf32> to vector<1x128xf32>
    %427 = arith.addf %424, %426 : vector<1x128xf32>
    %428 = vector.broadcast %427 : vector<1x128xf32> to vector<8x128xf32>
    %429 = arith.addf %411, %428 : vector<8x128xf32>
    %c1_184 = arith.constant 1 : index
    %c0_185 = arith.constant 0 : index
    %c0_186 = arith.constant 0 : index
    %430 = vector.load %arg17[%c1_184, %c0_185, %c0_186] : memref<2x1x128xf32, #tpu.memory_space<vmem>>, vector<1x1x128xf32>
    %431 = vector.shape_cast %430 : vector<1x1x128xf32> to vector<1x128xf32>
    %c1_187 = arith.constant 1 : index
    %c0_188 = arith.constant 0 : index
    %c0_189 = arith.constant 0 : index
    %432 = vector.load %arg18[%c1_187, %c0_188, %c0_189] : memref<2x1x128xf32, #tpu.memory_space<vmem>>, vector<1x1x128xf32>
    %433 = vector.shape_cast %432 : vector<1x1x128xf32> to vector<1x128xf32>
    %cst_190 = arith.constant dense<0.000000e+00> : vector<8xf32>
    %434 = vector.multi_reduction <add>, %429, %cst_190 [1] : vector<8x128xf32> to vector<8xf32>
    %435 = vector.shape_cast %434 : vector<8xf32> to vector<8x1xf32>
    %cst_191 = arith.constant 1.280000e+02 : f32
    %436 = vector.broadcast %cst_191 : f32 to vector<8x1xf32>
    %437 = arith.divf %435, %436 : vector<8x1xf32>
    %438 = vector.broadcast %437 : vector<8x1xf32> to vector<8x128xf32>
    %439 = arith.subf %429, %438 : vector<8x128xf32>
    %440 = arith.mulf %439, %439 : vector<8x128xf32>
    %cst_192 = arith.constant dense<0.000000e+00> : vector<8xf32>
    %441 = vector.multi_reduction <add>, %440, %cst_192 [1] : vector<8x128xf32> to vector<8xf32>
    %442 = vector.shape_cast %441 : vector<8xf32> to vector<8x1xf32>
    %cst_193 = arith.constant 1.280000e+02 : f32
    %443 = vector.broadcast %cst_193 : f32 to vector<8x1xf32>
    %444 = arith.divf %442, %443 : vector<8x1xf32>
    %cst_194 = arith.constant 9.99999974E-6 : f32
    %445 = vector.broadcast %cst_194 : f32 to vector<8x1xf32>
    %446 = arith.addf %444, %445 : vector<8x1xf32>
    %447 = math.rsqrt %446 : vector<8x1xf32>
    %448 = vector.broadcast %447 : vector<8x1xf32> to vector<8x128xf32>
    %449 = arith.mulf %439, %448 : vector<8x128xf32>
    %450 = vector.broadcast %431 : vector<1x128xf32> to vector<8x128xf32>
    %451 = arith.mulf %449, %450 : vector<8x128xf32>
    %452 = vector.broadcast %433 : vector<1x128xf32> to vector<8x128xf32>
    %453 = arith.addf %451, %452 : vector<8x128xf32>
    %c1_195 = arith.constant 1 : index
    %c0_196 = arith.constant 0 : index
    %c0_197 = arith.constant 0 : index
    %454 = vector.load %arg21[%c1_195, %c0_196, %c0_197] : memref<2x128x256xf32, #tpu.memory_space<vmem>>, vector<1x128x256xf32>
    %455 = vector.shape_cast %454 : vector<1x128x256xf32> to vector<128x256xf32>
    %456 = arith.truncf %453 : vector<8x128xf32> to vector<8x128xbf16>
    %457 = arith.truncf %455 : vector<128x256xf32> to vector<128x256xbf16>
    %cst_198 = arith.constant dense<0.000000e+00> : vector<8x256xf32>
    %458 = tpu.matmul %456, %457, %cst_198 {dimension_numbers = #tpu.dot_dimension_numbers<[1], [0], [0], [1], [0, 0, 1, 1], [], []>} : vector<8x128xbf16>, vector<128x256xbf16>, vector<8x256xf32> -> vector<8x256xf32>
    %c1_199 = arith.constant 1 : index
    %c0_200 = arith.constant 0 : index
    %c0_201 = arith.constant 0 : index
    %459 = vector.load %arg22[%c1_199, %c0_200, %c0_201] : memref<2x1x256xf32, #tpu.memory_space<vmem>>, vector<1x1x256xf32>
    %460 = vector.shape_cast %459 : vector<1x1x256xf32> to vector<1x256xf32>
    %461 = vector.broadcast %460 : vector<1x256xf32> to vector<8x256xf32>
    %462 = arith.addf %458, %461 : vector<8x256xf32>
    %cst_202 = arith.constant 0.000000e+00 : f32
    %463 = vector.broadcast %cst_202 : f32 to vector<8x256xf32>
    %464 = arith.maximumf %462, %463 : vector<8x256xf32>
    %c1_203 = arith.constant 1 : index
    %c0_204 = arith.constant 0 : index
    %c0_205 = arith.constant 0 : index
    %465 = vector.load %arg23[%c1_203, %c0_204, %c0_205] : memref<2x256x128xf32, #tpu.memory_space<vmem>>, vector<1x256x128xf32>
    %466 = vector.shape_cast %465 : vector<1x256x128xf32> to vector<256x128xf32>
    %467 = arith.truncf %464 : vector<8x256xf32> to vector<8x256xbf16>
    %468 = arith.truncf %466 : vector<256x128xf32> to vector<256x128xbf16>
    %cst_206 = arith.constant dense<0.000000e+00> : vector<8x128xf32>
    %469 = tpu.matmul %467, %468, %cst_206 {dimension_numbers = #tpu.dot_dimension_numbers<[1], [0], [0], [1], [0, 0, 1, 1], [], []>} : vector<8x256xbf16>, vector<256x128xbf16>, vector<8x128xf32> -> vector<8x128xf32>
    %c1_207 = arith.constant 1 : index
    %c0_208 = arith.constant 0 : index
    %c0_209 = arith.constant 0 : index
    %470 = vector.load %arg24[%c1_207, %c0_208, %c0_209] : memref<2x1x128xf32, #tpu.memory_space<vmem>>, vector<1x1x128xf32>
    %471 = vector.shape_cast %470 : vector<1x1x128xf32> to vector<1x128xf32>
    %472 = vector.broadcast %471 : vector<1x128xf32> to vector<8x128xf32>
    %473 = arith.addf %469, %472 : vector<8x128xf32>
    %474 = arith.addf %453, %473 : vector<8x128xf32>
    %c1_210 = arith.constant 1 : index
    %c0_211 = arith.constant 0 : index
    %c0_212 = arith.constant 0 : index
    %475 = vector.load %arg19[%c1_210, %c0_211, %c0_212] : memref<2x1x128xf32, #tpu.memory_space<vmem>>, vector<1x1x128xf32>
    %476 = vector.shape_cast %475 : vector<1x1x128xf32> to vector<1x128xf32>
    %c1_213 = arith.constant 1 : index
    %c0_214 = arith.constant 0 : index
    %c0_215 = arith.constant 0 : index
    %477 = vector.load %arg20[%c1_213, %c0_214, %c0_215] : memref<2x1x128xf32, #tpu.memory_space<vmem>>, vector<1x1x128xf32>
    %478 = vector.shape_cast %477 : vector<1x1x128xf32> to vector<1x128xf32>
    %cst_216 = arith.constant dense<0.000000e+00> : vector<8xf32>
    %479 = vector.multi_reduction <add>, %474, %cst_216 [1] : vector<8x128xf32> to vector<8xf32>
    %480 = vector.shape_cast %479 : vector<8xf32> to vector<8x1xf32>
    %cst_217 = arith.constant 1.280000e+02 : f32
    %481 = vector.broadcast %cst_217 : f32 to vector<8x1xf32>
    %482 = arith.divf %480, %481 : vector<8x1xf32>
    %483 = vector.broadcast %482 : vector<8x1xf32> to vector<8x128xf32>
    %484 = arith.subf %474, %483 : vector<8x128xf32>
    %485 = arith.mulf %484, %484 : vector<8x128xf32>
    %cst_218 = arith.constant dense<0.000000e+00> : vector<8xf32>
    %486 = vector.multi_reduction <add>, %485, %cst_218 [1] : vector<8x128xf32> to vector<8xf32>
    %487 = vector.shape_cast %486 : vector<8xf32> to vector<8x1xf32>
    %cst_219 = arith.constant 1.280000e+02 : f32
    %488 = vector.broadcast %cst_219 : f32 to vector<8x1xf32>
    %489 = arith.divf %487, %488 : vector<8x1xf32>
    %cst_220 = arith.constant 9.99999974E-6 : f32
    %490 = vector.broadcast %cst_220 : f32 to vector<8x1xf32>
    %491 = arith.addf %489, %490 : vector<8x1xf32>
    %492 = math.rsqrt %491 : vector<8x1xf32>
    %493 = vector.broadcast %492 : vector<8x1xf32> to vector<8x128xf32>
    %494 = arith.mulf %484, %493 : vector<8x128xf32>
    %495 = vector.broadcast %476 : vector<1x128xf32> to vector<8x128xf32>
    %496 = arith.mulf %494, %495 : vector<8x128xf32>
    %497 = vector.broadcast %478 : vector<1x128xf32> to vector<8x128xf32>
    %498 = arith.addf %496, %497 : vector<8x128xf32>
    %c0_221 = arith.constant 0 : index
    %c0_222 = arith.constant 0 : index
    %499 = vector.load %arg25[%c0_221, %c0_222] : memref<128x512xf32, #tpu.memory_space<vmem>>, vector<128x512xf32>
    %500 = arith.truncf %498 : vector<8x128xf32> to vector<8x128xbf16>
    %501 = arith.truncf %499 : vector<128x512xf32> to vector<128x512xbf16>
    %cst_223 = arith.constant dense<0.000000e+00> : vector<8x512xf32>
    %502 = tpu.matmul %500, %501, %cst_223 {dimension_numbers = #tpu.dot_dimension_numbers<[1], [0], [0], [1], [0, 0, 1, 1], [], []>} : vector<8x128xbf16>, vector<128x512xbf16>, vector<8x512xf32> -> vector<8x512xf32>
    %c0_224 = arith.constant 0 : index
    %c0_225 = arith.constant 0 : index
    %503 = vector.load %arg26[%c0_224, %c0_225] : memref<1x512xf32, #tpu.memory_space<vmem>>, vector<1x512xf32>
    %504 = vector.broadcast %503 : vector<1x512xf32> to vector<8x512xf32>
    %505 = arith.addf %502, %504 : vector<8x512xf32>
    %c0_226 = arith.constant 0 : index
    %c0_227 = arith.constant 0 : index
    %c0_228 = arith.constant 0 : index
    %506 = vector.load %arg27[%c0_226, %c0_227, %c0_228] : memref<1x8x512xf32, #tpu.memory_space<vmem>>, vector<1x8x512xf32>
    %507 = vector.shape_cast %506 : vector<1x8x512xf32> to vector<8x512xf32>
    %508 = vector.shape_cast %505 : vector<8x512xf32> to vector<1x8x512xf32>
    tpu.vector_store %arg27[%c0_226, %c0_227, %c0_228], %508 {strides = array<i32>} : memref<1x8x512xf32, #tpu.memory_space<vmem>>, vector<1x8x512xf32>,
    return
  }
  func.func @transform_0(%arg0: i32) -> (i32, i32, i32) {
    %c0_i32 = arith.constant 0 : i32
    %c0_i32_0 = arith.constant 0 : i32
    %c0_i32_1 = arith.constant 0 : i32
    return %arg0, %c0_i32, %c0_i32_0 : i32, i32, i32
  }
  func.func @transform_1(%arg0: i32) -> (i32, i32, i32) {
    %c0_i32 = arith.constant 0 : i32
    %c0_i32_0 = arith.constant 0 : i32
    %c0_i32_1 = arith.constant 0 : i32
    return %arg0, %c0_i32, %c0_i32_0 : i32, i32, i32
  }
  func.func @transform_2(%arg0: i32) -> (i32, i32, i32) {
    %c0_i32 = arith.constant 0 : i32
    %c0_i32_0 = arith.constant 0 : i32
    %c0_i32_1 = arith.constant 0 : i32
    return %arg0, %c0_i32, %c0_i32_0 : i32, i32, i32
  }
  func.func @transform_3(%arg0: i32) -> (i32, i32) {
    %c0_i32 = arith.constant 0 : i32
    %c0_i32_0 = arith.constant 0 : i32
    %c0_i32_1 = arith.constant 0 : i32
    return %c0_i32, %c0_i32_0 : i32, i32
  }
  func.func @transform_4(%arg0: i32) -> (i32, i32) {
    %c0_i32 = arith.constant 0 : i32
    %c0_i32_0 = arith.constant 0 : i32
    %c0_i32_1 = arith.constant 0 : i32
    return %c0_i32, %c0_i32_0 : i32, i32
  }
  func.func @transform_5(%arg0: i32) -> (i32, i32) {
    %c0_i32 = arith.constant 0 : i32
    %c0_i32_0 = arith.constant 0 : i32
    %c0_i32_1 = arith.constant 0 : i32
    return %c0_i32, %c0_i32_0 : i32, i32
  }
  func.func @transform_6(%arg0: i32) -> (i32, i32, i32) {
    %c0_i32 = arith.constant 0 : i32
    %c0_i32_0 = arith.constant 0 : i32
    %c0_i32_1 = arith.constant 0 : i32
    %c0_i32_2 = arith.constant 0 : i32
    return %c0_i32, %c0_i32_0, %c0_i32_1 : i32, i32, i32
  }
  func.func @transform_7(%arg0: i32) -> (i32, i32, i32) {
    %c0_i32 = arith.constant 0 : i32
    %c0_i32_0 = arith.constant 0 : i32
    %c0_i32_1 = arith.constant 0 : i32
    %c0_i32_2 = arith.constant 0 : i32
    return %c0_i32, %c0_i32_0, %c0_i32_1 : i32, i32, i32
  }
  func.func @transform_8(%arg0: i32) -> (i32, i32, i32) {
    %c0_i32 = arith.constant 0 : i32
    %c0_i32_0 = arith.constant 0 : i32
    %c0_i32_1 = arith.constant 0 : i32
    %c0_i32_2 = arith.constant 0 : i32
    return %c0_i32, %c0_i32_0, %c0_i32_1 : i32, i32, i32
  }
  func.func @transform_9(%arg0: i32) -> (i32, i32, i32) {
    %c0_i32 = arith.constant 0 : i32
    %c0_i32_0 = arith.constant 0 : i32
    %c0_i32_1 = arith.constant 0 : i32
    %c0_i32_2 = arith.constant 0 : i32
    return %c0_i32, %c0_i32_0, %c0_i32_1 : i32, i32, i32
  }
  func.func @transform_10(%arg0: i32) -> (i32, i32, i32) {
    %c0_i32 = arith.constant 0 : i32
    %c0_i32_0 = arith.constant 0 : i32
    %c0_i32_1 = arith.constant 0 : i32
    %c0_i32_2 = arith.constant 0 : i32
    return %c0_i32, %c0_i32_0, %c0_i32_1 : i32, i32, i32
  }
  func.func @transform_11(%arg0: i32) -> (i32, i32, i32) {
    %c0_i32 = arith.constant 0 : i32
    %c0_i32_0 = arith.constant 0 : i32
    %c0_i32_1 = arith.constant 0 : i32
    %c0_i32_2 = arith.constant 0 : i32
    return %c0_i32, %c0_i32_0, %c0_i32_1 : i32, i32, i32
  }
  func.func @transform_12(%arg0: i32) -> (i32, i32, i32) {
    %c0_i32 = arith.constant 0 : i32
    %c0_i32_0 = arith.constant 0 : i32
    %c0_i32_1 = arith.constant 0 : i32
    %c0_i32_2 = arith.constant 0 : i32
    return %c0_i32, %c0_i32_0, %c0_i32_1 : i32, i32, i32
  }
  func.func @transform_13(%arg0: i32) -> (i32, i32, i32) {
    %c0_i32 = arith.constant 0 : i32
    %c0_i32_0 = arith.constant 0 : i32
    %c0_i32_1 = arith.constant 0 : i32
    %c0_i32_2 = arith.constant 0 : i32
    return %c0_i32, %c0_i32_0, %c0_i32_1 : i32, i32, i32
  }
  func.func @transform_14(%arg0: i32) -> (i32, i32, i32) {
    %c0_i32 = arith.constant 0 : i32
    %c0_i32_0 = arith.constant 0 : i32
    %c0_i32_1 = arith.constant 0 : i32
    %c0_i32_2 = arith.constant 0 : i32
    return %c0_i32, %c0_i32_0, %c0_i32_1 : i32, i32, i32
  }
  func.func @transform_15(%arg0: i32) -> (i32, i32, i32) {
    %c0_i32 = arith.constant 0 : i32
    %c0_i32_0 = arith.constant 0 : i32
    %c0_i32_1 = arith.constant 0 : i32
    %c0_i32_2 = arith.constant 0 : i32
    return %c0_i32, %c0_i32_0, %c0_i32_1 : i32, i32, i32
  }
  func.func @transform_16(%arg0: i32) -> (i32, i32, i32) {
    %c0_i32 = arith.constant 0 : i32
    %c0_i32_0 = arith.constant 0 : i32
    %c0_i32_1 = arith.constant 0 : i32
    %c0_i32_2 = arith.constant 0 : i32
    return %c0_i32, %c0_i32_0, %c0_i32_1 : i32, i32, i32
  }
  func.func @transform_17(%arg0: i32) -> (i32, i32, i32) {
    %c0_i32 = arith.constant 0 : i32
    %c0_i32_0 = arith.constant 0 : i32
    %c0_i32_1 = arith.constant 0 : i32
    %c0_i32_2 = arith.constant 0 : i32
    return %c0_i32, %c0_i32_0, %c0_i32_1 : i32, i32, i32
  }
  func.func @transform_18(%arg0: i32) -> (i32, i32, i32) {
    %c0_i32 = arith.constant 0 : i32
    %c0_i32_0 = arith.constant 0 : i32
    %c0_i32_1 = arith.constant 0 : i32
    %c0_i32_2 = arith.constant 0 : i32
    return %c0_i32, %c0_i32_0, %c0_i32_1 : i32, i32, i32
  }
  func.func @transform_19(%arg0: i32) -> (i32, i32, i32) {
    %c0_i32 = arith.constant 0 : i32
    %c0_i32_0 = arith.constant 0 : i32
    %c0_i32_1 = arith.constant 0 : i32
    %c0_i32_2 = arith.constant 0 : i32
    return %c0_i32, %c0_i32_0, %c0_i32_1 : i32, i32, i32
  }
  func.func @transform_20(%arg0: i32) -> (i32, i32, i32) {
    %c0_i32 = arith.constant 0 : i32
    %c0_i32_0 = arith.constant 0 : i32
    %c0_i32_1 = arith.constant 0 : i32
    %c0_i32_2 = arith.constant 0 : i32
    return %c0_i32, %c0_i32_0, %c0_i32_1 : i32, i32, i32
  }
  func.func @transform_21(%arg0: i32) -> (i32, i32, i32) {
    %c0_i32 = arith.constant 0 : i32
    %c0_i32_0 = arith.constant 0 : i32
    %c0_i32_1 = arith.constant 0 : i32
    %c0_i32_2 = arith.constant 0 : i32
    return %c0_i32, %c0_i32_0, %c0_i32_1 : i32, i32, i32
  }
  func.func @transform_22(%arg0: i32) -> (i32, i32, i32) {
    %c0_i32 = arith.constant 0 : i32
    %c0_i32_0 = arith.constant 0 : i32
    %c0_i32_1 = arith.constant 0 : i32
    %c0_i32_2 = arith.constant 0 : i32
    return %c0_i32, %c0_i32_0, %c0_i32_1 : i32, i32, i32
  }
  func.func @transform_23(%arg0: i32) -> (i32, i32, i32) {
    %c0_i32 = arith.constant 0 : i32
    %c0_i32_0 = arith.constant 0 : i32
    %c0_i32_1 = arith.constant 0 : i32
    %c0_i32_2 = arith.constant 0 : i32
    return %c0_i32, %c0_i32_0, %c0_i32_1 : i32, i32, i32
  }
  func.func @transform_24(%arg0: i32) -> (i32, i32) {
    %c0_i32 = arith.constant 0 : i32
    %c0_i32_0 = arith.constant 0 : i32
    %c0_i32_1 = arith.constant 0 : i32
    return %c0_i32, %c0_i32_0 : i32, i32
  }
  func.func @transform_25(%arg0: i32) -> (i32, i32) {
    %c0_i32 = arith.constant 0 : i32
    %c0_i32_0 = arith.constant 0 : i32
    %c0_i32_1 = arith.constant 0 : i32
    return %c0_i32, %c0_i32_0 : i32, i32
  }
  func.func @transform_26(%arg0: i32) -> (i32, i32, i32) {
    %c0_i32 = arith.constant 0 : i32
    %c0_i32_0 = arith.constant 0 : i32
    %c0_i32_1 = arith.constant 0 : i32
    return %arg0, %c0_i32, %c0_i32_0 : i32, i32, i32
  }
}

</mosaic_0001>

<bundles_post_ra>
// kernel: image_to_text_forward.3
= control target key start
LH: loop header
LB: loop body
LE: loop exit
PB: predicated region body
PF: predicated region fallthrough
CT: control target
= control target key end

     0   :  { %s6545_s0 = inlined_call_operand.vmem [shape: f32[2,8,128], index: 0, kind: input, shape index: {}]   ;;  %s6546_s1 = inlined_call_operand.vmem [shape: f32[2,1,8], index: 1, kind: input, shape index: {}]   ;;  %s6547_s2 = inlined_call_operand.vmem [shape: f32[2,1,256], index: 2, kind: input, shape index: {}]   ;;  %s6548_s3 = inlined_call_operand.vmem [shape: f32[8,128], index: 3, kind: input, shape index: {}]   ;;  %s6549_s4 = inlined_call_operand.vmem [shape: f32[256,128], index: 4, kind: input, shape index: {}]   ;;  %s6550_s5 = inlined_call_operand.vmem [shape: f32[1,128], index: 5, kind: input, shape index: {}]   ;;  %s6551_s6 = inlined_call_operand.vmem [shape: f32[2,128,384], index: 6, kind: input, shape index: {}]   ;;  %s6552_s7 = inlined_call_operand.vmem [shape: f32[2,1,384], index: 7, kind: input, shape index: {}]   ;;  %s6553_s8 = inlined_call_operand.vmem [shape: f32[2,128,128], index: 8, kind: input, shape index: {}]   ;;  %s6554_s9 = inlined_call_operand.vmem [shape: f32[2,1,128], index: 9, kind: input, shape index: {}]   ;;  %s6555_s10 = inlined_call_operand.vmem [shape: f32[2,128,128], index: 10, kind: input, shape index: {}]   ;;  %s6556_s11 = inlined_call_operand.vmem [shape: f32[2,1,128], index: 11, kind: input, shape index: {}]   ;;  %s6557_s12 = inlined_call_operand.vmem [shape: f32[2,128,128], index: 12, kind: input, shape index: {}]   ;;  %s6558_s13 = inlined_call_operand.vmem [shape: f32[2,1,128], index: 13, kind: input, shape index: {}]   ;;  %s6559_s14 = inlined_call_operand.vmem [shape: f32[2,1,128], index: 14, kind: input, shape index: {}]   ;;  %s6560_s15 = inlined_call_operand.vmem [shape: f32[2,1,128], index: 15, kind: input, shape index: {}]   ;;  %s6561_s16 = inlined_call_operand.vmem [shape: f32[2,1,128], index: 16, kind: input, shape index: {}]   ;;  %s6562_s17 = inlined_call_operand.vmem [shape: f32[2,1,128], index: 17, kind: input, shape index: {}]   ;;  %s6563_s18 = inlined_call_operand.vmem [shape: f32[2,1,128], index: 18, kind: input, shape index: {}]   ;;  %s6564_s19 = inlined_call_operand.vmem [shape: f32[2,1,128], index: 19, kind: input, shape index: {}]   ;;  %s6565_s20 = inlined_call_operand.vmem [shape: f32[2,128,256], index: 20, kind: input, shape index: {}]   ;;  %s6566_s21 = inlined_call_operand.vmem [shape: f32[2,1,256], index: 21, kind: input, shape index: {}]   ;;  %s6567_s22 = inlined_call_operand.vmem [shape: f32[2,256,128], index: 22, kind: input, shape index: {}]   ;;  %s6568_s23 = inlined_call_operand.vmem [shape: f32[2,1,128], index: 23, kind: input, shape index: {}]   ;;  %s6569_s24 = inlined_call_operand.vmem [shape: f32[128,512], index: 24, kind: input, shape index: {}]   ;;  %s6570_s25 = inlined_call_operand.vmem [shape: f32[1,512], index: 25, kind: input, shape index: {}]   ;;  %s6571_s26 = inlined_call_operand.hbm [shape: f32[2,8,512], index: 26, kind: output, shape index: {}]  }
   0x1   :  { %6597 = sst [smem:[#allocation14_spill]] %s6545_s0 }
   0x2   :  { %6598 = sst [smem:[#allocation15_spill]] %s6546_s1 }
   0x3   :  { %6599 = sst [smem:[#allocation16_spill]] %s6547_s2 }
   0x4   :  { %6600 = sst [smem:[#allocation17_spill]] %s6548_s3 }
   0x5   :  { %6601 = sst [smem:[#allocation18_spill]] %s6549_s4 }
   0x6   :  { %6602 = sst [smem:[#allocation19_spill]] %s6550_s5 }
   0x7   :  { %6603 = sst [smem:[#allocation20_spill]] %s6551_s6 }
   0x8   :  { %6604 = sst [smem:[#allocation21_spill]] %s6552_s7 }
   0x9   :  { %6605 = sst [smem:[#allocation22_spill]] %s6553_s8 }
   0xa   :  { %6606 = sst [smem:[#allocation23_spill]] %s6554_s9 }
   0xb   :  { %6607 = sst [smem:[#allocation24_spill]] %s6555_s10 }
   0xc   :  { %6608 = sst [smem:[#allocation25_spill]] %s6570_s25 }
   0xd   :  { %6609 = sst [smem:[#allocation26_spill]] %s6571_s26 }
   0xe   :  { %31 = vsyncpa [#allocation3], 0 }
   0xf   :  { %33 = vsyncpa [#allocation3 + $0x1], 0  ;;  %s4737_s27 = smov 0   ;;  %s4739_s3 = smov 0  }
  0x10   :  { %s4741_s7 = smov 0   ;;  %s4743_s28 = smov 0  }
  0x11 LB: > { %6610 = sst [smem:[#allocation5_spill]] %s4581_s27  ;;  %s4758_s8 = sadd.s32 4294967295, %s4593_s28   ;;  %s4593_s28 = sphi %s4743_s28, %s6646_s28   ;;  %s4589_s7 = sphi %s4741_s7, %s6649_s7   ;;  %s4585_s3 = sphi %s4739_s3, %s6648_s3   ;;  %s4581_s27 = sphi %s4737_s27, %s6647_s27  }
  0x12   : > { %6611 = sst [smem:[#allocation6_spill]] %s4585_s3  ;;  %s3761_s4 = sadd.s32 4294967294, %s4593_s28  }
  0x13   : > { %6612 = sst [smem:[#allocation7_spill]] %s4589_s7  ;;  %s4762_s29 = sadd.s32 1, %s4593_s28  }
  0x14   : > { %6613 = sst [smem:[#allocation8_spill]] %s4593_s28  ;;  %s607_s0 = sadd.s32 1, %s4589_s7 }
  0x15   : > { %6614 = sst [smem:[#allocation9_spill]] %s4758_s8  ;;  %s604_s9 = ssub.s32 %s4593_s28, %s4762_s29 }
  0x16   : > { %6615 = sst [smem:[#allocation10_spill]] %s4762_s29  ;;  %p617_p0 = scmp.ne.s32.totalorder %s4589_s7, %s4585_s3 }
  0x17   : > { %p605_p1 = scmp.eq.s32.totalorder %s604_s9, 0  ;;  %p618_p2 = scmp.eq.s32.totalorder %s4758_s8, 1 }
  0x18   : > { %p623_p3 = scmp.ne.s32.totalorder %s4585_s3, %s4581_s27  ;;  %p624_p4 = scmp.eq.s32.totalorder %s3761_s4, 1 }
  0x19   : > { %s4773_s30 = scalar_select %p605_p1, %s4589_s7, %s607_s0  }
  0x1a   : > { %p4775_p5 = por %p618_p2, %p617_p0  ;;  %p4779_p6 = por %p624_p4, %p623_p3 }
  0x1b   : > { %6616 = sst [smem:[#allocation11_spill]] %s4773_s30  ;;  %p3764_p7 = scmp.ge.s32.totalorder %s4593_s28, 1 }
  0x1c   : > { %s6617_s2 = scalar_select %p4775_p5, 1, 0 }
  0x1d   : > { %s6619_s5 = scalar_select %p4779_p6, 1, 0 }
  0x1e   : > { %6618 = sst [smem:[#allocation12_spill]] %s6617_s2  ;;  %p731_p8 = scmp.lt.s32.totalorder %s4593_s28, 3 }
  0x1f   : > { %6620 = sst [smem:[#allocation13_spill]] %s6619_s5 }
  0x20   : > { %p732_p9 = pnand %p3764_p7, %p731_p8 }
  0x21   : > { %s6621_s1 = sld [smem:[#allocation20_spill]] (!%p732_p9)  ;;  %v4595_v7 = vmov (!%p732_p9), 0   ;;  %p807_p10 = scmp.lt.s32.totalorder (!%p732_p9), %s4758_s8, 1  ;;  %v4596_v54 = vmov (!%p732_p9), 0.0   ;;  %vm4597_vm0 = vmmov (!%p732_p9), 0   ;;  %v853_v55 = vlaneseq (!%p732_p9) }
  0x22   : > { %735 = sbr.rel (%p732_p9) target bundleno = 8673 (0x21e1), region = 124  ;;  %1079 = vmatprep.mubr.bf16.mxu1 (!%p732_p9), %v4595_v7  ;;  %s6622_s4 = sld [smem:[#allocation14_spill]] (!%p732_p9)  ;;  %vm1130_vm1 = vcmask (!%p732_p9), 261120   ;;  %vm1179_vm6 = vcmask (!%p732_p9), 64512   ;;  %vm1196_vm7 = vcmask (!%p732_p9), 1043456  }
  0x23   : > { %v4904_v56 = vshrl.u32 (!%p732_p9), %v853_v55, 7  ;;  %s6587_s2 = smov (!%p732_p9), 96   ;;  %s6627_s6 = sld [smem:[#allocation15_spill]] (!%p732_p9) }
  0x24   : > { %s6593_s27 = smov (!%p732_p9), 64   ;;  %s6635_s0 = sld [smem:[#allocation23_spill]] (!%p732_p9) }
  0x25   : > { %v4907_v57 = vsub.s32 (!%p732_p9), 1, %v4904_v56  ;;  %v4915_v59 = vsub.s32 (!%p732_p9), 0, %v4904_v56  ;;  %s6637_s9 = smov (!%p732_p9), 32  }
  0x27   : > { %v941_v0 = vld [vmem:[%s6621_s1 + $0x8] sm:$0xff] (!%p732_p9)  ;;  %v944_v1 = vld [vmem:[%s6621_s1 + $0x20] sm:$0xff] (!%p732_p9)  ;;  %v943_v4 = vld [vmem:[%s6621_s1 + $0x18] sm:$0xff] (!%p732_p9) }
  0x28   : > { %v940_v2 = vld [vmem:[%s6621_s1] sm:$0xff] (!%p732_p9)  ;;  %v1008_v3 = vpack.c.bf16 (!%p732_p9), %v944_v1, %v941_v0  ;;  %v947_v5 = vld [vmem:[%s6621_s1 + $0x38] sm:$0xff] (!%p732_p9)  ;;  %v950_v6 = vld [vmem:[%s6621_s1 + $0x50] sm:$0xff] (!%p732_p9) }
  0x29   : > { %v1007_v8 = vpack.c.bf16 %v943_v4, %v940_v2  ;;  %v1011_v9 = vpack.c.bf16 %v950_v6, %v947_v5  ;;  %v946_v10 = vld [vmem:[%s6621_s1 + $0x30] sm:$0xff]  ;;  %v949_v11 = vld [vmem:[%s6621_s1 + $0x48] sm:$0xff]  ;;  %v956_v13 = vld [vmem:[%s6621_s1 + $0x80] sm:$0xff]  ;;  %s4842_s7 = scalar_select %p807_p10, %s4758_s8, 1 }
  0x2a   : > { %v953_v12 = vld [vmem:[%s6621_s1 + $0x68] sm:$0xff]  ;;  %1047 = vmatprep.subr.bf16.mxu1 %v1008_v3  ;;  %v1010_v14 = vpack.c.bf16 %v949_v11, %v946_v10  ;;  %v952_v16 = vld [vmem:[%s6621_s1 + $0x60] sm:$0xff]  ;;  %v955_v17 = vld [vmem:[%s6621_s1 + $0x78] sm:$0xff]  ;;  %s6626_s8 = sld [smem:[#allocation16_spill]] }
  0x2b   : > { %1048 = vmatpush1.bf16.msra.mxu1 %v1007_v8  ;;  %v1014_v15 = vpack.c.bf16 %v956_v13, %v953_v12  ;;  %v959_v18 = vld [vmem:[%s6621_s1 + $0x98] sm:$0xff]  ;;  %v962_v19 = vld [vmem:[%s6621_s1 + $0xb0] sm:$0xff]  ;;  %v1013_v20 = vpack.c.bf16 %v955_v17, %v952_v16  ;;  %v961_v23 = vld [vmem:[%s6621_s1 + $0xa8] sm:$0xff]  ;;  %s3766_s30 = sshll.u32 %s4842_s7, 3  ;;  %s3767_s28 = sshll.u32 %s4842_s7, 1 }
  0x2c   : > { %1049 = vmatprep.subr.bf16.mxu1 %v1011_v9  ;;  %v1017_v21 = vpack.c.bf16 %v962_v19, %v959_v18  ;;  %v958_v22 = vld [vmem:[%s6621_s1 + $0x90] sm:$0xff]  ;;  %v965_v24 = vld [vmem:[%s6621_s1 + $0xc8] sm:$0xff]  ;;  %v968_v25 = vld [vmem:[%s6621_s1 + $0xe0] sm:$0xff]  ;;  %s810_s26 = scalar_lea.vmem %s6622_s4, %s3766_s30  ;;  %s6623_s4 = sld [smem:[#allocation17_spill]] }
  0x2d   : > { %v1016_v26 = vpack.c.bf16 %v961_v23, %v958_v22  ;;  %v1020_v27 = vpack.c.bf16 %v968_v25, %v965_v24  ;;  %v964_v28 = vld [vmem:[%s6621_s1 + $0xc0] sm:$0xff]  ;;  %v967_v29 = vld [vmem:[%s6621_s1 + $0xd8] sm:$0xff]  ;;  %v974_v31 = vld [vmem:[%s6621_s1 + $0x110] sm:$0xff]  ;;  %s6624_s30 = sld [smem:[#allocation21_spill]]  ;;  %s813_s29 = scalar_lea.vmem %s6627_s6, %s4842_s7 }
  0x2e   : > { %v971_v30 = vld [vmem:[%s6621_s1 + $0xf8] sm:$0xff]  ;;  %v1019_v32 = vpack.c.bf16 %v967_v29, %v964_v28  ;;  %v970_v34 = vld [vmem:[%s6621_s1 + $0xf0] sm:$0xff]  ;;  %v973_v35 = vld [vmem:[%s6621_s1 + $0x108] sm:$0xff]  ;;  %s6630_s7 = smov 96   ;;  %s6642_s6 = sld [smem:[#allocation26_spill]] }
  0x2f   : > { %1050 = vmatpush1.bf16.msra.mxu1 %v1010_v14  ;;  %v1023_v33 = vpack.c.bf16 %v974_v31, %v971_v30  ;;  %v977_v36 = vld [vmem:[%s6621_s1 + $0x128] sm:$0xff]  ;;  %v980_v37 = vld [vmem:[%s6621_s1 + $0x140] sm:$0xff]  ;;  %v1022_v38 = vpack.c.bf16 %v973_v35, %v970_v34  ;;  %v979_v42 = vld [vmem:[%s6621_s1 + $0x138] sm:$0xff] }
  0x30   : > { %1051 = vmatprep.subr.bf16.mxu1 %v1014_v15  ;;  %v936_v39 = vld [vmem:[%s810_s26] sm:$0xff]  ;;  %v1026_v40 = vpack.c.bf16 %v980_v37, %v977_v36  ;;  %v983_v43 = vld [vmem:[%s6621_s1 + $0x158] sm:$0xff]  ;;  %v986_v44 = vld [vmem:[%s6621_s1 + $0x170] sm:$0xff]  ;;  %s6625_s26 = sld [smem:[#allocation18_spill]]  ;;  %s817_s3 = scalar_lea.vmem %s6626_s8, %s3767_s28 }
  0x31   : > { %v976_v41 = vld [vmem:[%s6621_s1 + $0x120] sm:$0xff]  ;;  %v937_v45 = vmul.f32 11.313708, %v936_v39  ;;  %v1029_v48 = vpack.c.bf16 %v986_v44, %v983_v43  ;;  %v982_v49 = vld [vmem:[%s6621_s1 + $0x150] sm:$0xff]  ;;  %v985_v50 = vld [vmem:[%s6621_s1 + $0x168] sm:$0xff]  ;;  %s6631_s28 = sld [smem:[#allocation22_spill]] }
  0x32   : > { %v1025_v46 = vpack.c.bf16 %v979_v42, %v976_v41  ;;  %v938_v47 = vld [vmem:[%s6623_s4] sm:$0xff]  ;;  %v1028_v52 = vpack.c.bf16 %v985_v50, %v982_v49  ;;  %s6591_s4 = smov 32   ;;  %s6633_s8 = sld [smem:[#allocation24_spill]] }
  0x33   : > { %1052 = vmatpush1.bf16.msra.mxu1 %v1013_v20  ;;  %v4893_v51 = vadd.f32 %v938_v47, %v937_v45  ;;  %v4912_v58 = vld [vmem:[%s6624_s30] sm:$0x7] }
  0x34   : > { %1053 = vmatprep.subr.bf16.mxu1 %v1017_v21  ;;  %v1039_v60 = vrot.slane %v4912_v58, %v4907_v57  ;;  %v1035_v61 = vrot.slane %v4912_v58, %v4915_v59 }
  0x35   : > { %v4897_v53 = vpack.c.bf16 %v4893_v51, %v4893_v51 }
  0x36   : > { %v836_v8 = vld [vmem:[%s6625_s26 + $0x80] sm:$0xff]  ;;  %v837_v9 = vld [vmem:[%s6625_s26 + $0x88] sm:$0xff]  ;;  %v838_v13 = vld [vmem:[%s6625_s26 + $0x90] sm:$0xff] }
  0x37   : > { %1054 = vmatpush1.bf16.msra.mxu1 %v1016_v26  ;;  %v820_v10 = vld [vmem:[%s6625_s26] sm:$0xff]  ;;  %v873_v11 = vpack.c.bf16 %v837_v9, %v836_v8  ;;  %v821_v12 = vld [vmem:[%s6625_s26 + $0x8] sm:$0xff]  ;;  %v839_v14 = vld [vmem:[%s6625_s26 + $0x98] sm:$0xff]  ;;  %s6632_s5 = smov %s6631_s28 }
  0x38   : > { %1055 = vmatprep.subr.bf16.mxu1 %v1020_v27  ;;  %v865_v15 = vpack.c.bf16 %v821_v12, %v820_v10  ;;  %v874_v16 = vpack.c.bf16 %v839_v14, %v838_v13  ;;  %v822_v17 = vld [vmem:[%s6625_s26 + $0x10] sm:$0xff]  ;;  %v823_v18 = vld [vmem:[%s6625_s26 + $0x18] sm:$0xff]  ;;  %v840_v19 = vld [vmem:[%s6625_s26 + $0xa0] sm:$0xff] }
  0x39   : > { %3986 = vmatprep.subr.bf16.mxu0 %v873_v11  ;;  %v841_v20 = vld [vmem:[%s6625_s26 + $0xa8] sm:$0xff]  ;;  %v866_v21 = vpack.c.bf16 %v823_v18, %v822_v17  ;;  %v824_v23 = vld [vmem:[%s6625_s26 + $0x20] sm:$0xff]  ;;  %v842_v25 = vld [vmem:[%s6625_s26 + $0xb0] sm:$0xff] }
  0x3a   : > { %3987 = vmatpush3.bf16.msra.mxu0 %v865_v15  ;;  %v875_v22 = vpack.c.bf16 %v841_v20, %v840_v19  ;;  %v825_v24 = vld [vmem:[%s6625_s26 + $0x28] sm:$0xff]  ;;  %v843_v26 = vld [vmem:[%s6625_s26 + $0xb8] sm:$0xff]  ;;  %v826_v29 = vld [vmem:[%s6625_s26 + $0x30] sm:$0xff] }
  0x3b   : > { %1056 = vmatpush1.bf16.msra.mxu1 %v1019_v32  ;;  %3988 = vmatprep.subr.bf16.mxu0 %v874_v16  ;;  %v867_v27 = vpack.c.bf16 %v825_v24, %v824_v23  ;;  %v876_v28 = vpack.c.bf16 %v843_v26, %v842_v25  ;;  %v827_v30 = vld [vmem:[%s6625_s26 + $0x38] sm:$0xff]  ;;  %v844_v31 = vld [vmem:[%s6625_s26 + $0xc0] sm:$0xff]  ;;  %v845_v32 = vld [vmem:[%s6625_s26 + $0xc8] sm:$0xff] }
  0x3c   : > { %1057 = vmatprep.subr.bf16.mxu1 %v1023_v33  ;;  %v819_v33 = vld [vmem:[%s817_s3] sm:$0x3]  ;;  %v868_v35 = vpack.c.bf16 %v827_v30, %v826_v29  ;;  %v877_v36 = vpack.c.bf16 %v845_v32, %v844_v31  ;;  %v847_v41 = vld [vmem:[%s6625_s26 + $0xd8] sm:$0xff]  ;;  %v830_v44 = vld [vmem:[%s6625_s26 + $0x50] sm:$0xff]  ;;  %s6634_s3 = sld [smem:[#allocation19_spill]] }
  0x3d   : > { %v860_v34 = vrot.slane %v819_v33, %v4907_v57  ;;  %v828_v37 = vld [vmem:[%s6625_s26 + $0x40] sm:$0xff]  ;;  %v831_v45 = vld [vmem:[%s6625_s26 + $0x58] sm:$0xff]  ;;  %v849_v47 = vld [vmem:[%s6625_s26 + $0xe8] sm:$0xff] }
  0x3e   : > { %3989 = vmatpush3.bf16.msra.mxu0 %v866_v21  ;;  %v832_v50 = vld [vmem:[%s6625_s26 + $0x60] sm:$0xff]  ;;  %v945_v8 = vld [vmem:[%s6621_s1 + $0x28] sm:$0xff]  ;;  %v951_v12 = vld [vmem:[%s6621_s1 + $0x58] sm:$0xff] }
  0x3f   : > { %1058 = vmatpush1.bf16.msra.mxu1 %v1022_v38  ;;  %3990 = vmatprep.subr.bf16.mxu0 %v875_v22  ;;  %v829_v38 = vld [vmem:[%s6625_s26 + $0x48] sm:$0xff]  ;;  %v864_v39 = vpack.c.bf16 %v860_v34, %v860_v34  ;;  %v948_v11 = vld [vmem:[%s6621_s1 + $0x40] sm:$0xff]  ;;  %v954_v14 = vld [vmem:[%s6621_s1 + $0x70] sm:$0xff]  ;;  %v925_v34 = vand.u32 127, %v853_v55 }
  0x40   : > { %1059 = vmatprep.subr.bf16.mxu1 %v1026_v40  ;;  %v846_v40 = vld [vmem:[%s6625_s26 + $0xd0] sm:$0xff]  ;;  %v869_v42 = vpack.c.bf16 %v829_v38, %v828_v37  ;;  %v1012_v13 = vpack.c.bf16 %v951_v12, %v948_v11  ;;  %v957_v15 = vld [vmem:[%s6621_s1 + $0x88] sm:$0xff]  ;;  %v960_v17 = vld [vmem:[%s6621_s1 + $0xa0] sm:$0xff] }
  0x41   : > { %914 = vmatprep.mubr.bf16.mxu0 %v864_v39  ;;  %v878_v43 = vpack.c.bf16 %v847_v41, %v846_v40  ;;  %v1015_v16 = vpack.c.bf16 %v957_v15, %v954_v14  ;;  %v963_v18 = vld [vmem:[%s6621_s1 + $0xb8] sm:$0xff]  ;;  %v966_v20 = vld [vmem:[%s6621_s1 + $0xd0] sm:$0xff]  ;;  %v969_v21 = vld [vmem:[%s6621_s1 + $0xe8] sm:$0xff]  ;;  %vm926_vm3 = vcmp.le.s32.totalorder %v925_v34, %v4904_v56 }
  0x42   : > { %3991 = vmatpush3.bf16.msra.mxu0 %v867_v27  ;;  %v1018_v19 = vpack.c.bf16 %v963_v18, %v960_v17  ;;  %v1021_v22 = vpack.c.bf16 %v969_v21, %v966_v20  ;;  %v972_v23 = vld [vmem:[%s6621_s1 + $0x100] sm:$0xff]  ;;  %v975_v24 = vld [vmem:[%s6621_s1 + $0x118] sm:$0xff]  ;;  %v978_v26 = vld [vmem:[%s6621_s1 + $0x130] sm:$0xff] }
  0x43   : > { %1060 = vmatpush1.bf16.msra.mxu1 %v1025_v46  ;;  %3992 = vmatprep.subr.bf16.mxu0 %v876_v28  ;;  %v848_v46 = vld [vmem:[%s6625_s26 + $0xe0] sm:$0xff]  ;;  %v1024_v25 = vpack.c.bf16 %v975_v24, %v972_v23  ;;  %v981_v27 = vld [vmem:[%s6621_s1 + $0x148] sm:$0xff]  ;;  %v987_v30 = vld [vmem:[%s6621_s1 + $0x178] sm:$0xff] }
  0x44   : > { %1061 = vmatprep.subr.bf16.mxu1 %v1029_v48  ;;  %v870_v48 = vpack.c.bf16 %v831_v45, %v830_v44  ;;  %v879_v49 = vpack.c.bf16 %v849_v47, %v848_v46  ;;  %v1027_v28 = vpack.c.bf16 %v981_v27, %v978_v26  ;;  %v984_v29 = vld [vmem:[%s6621_s1 + $0x160] sm:$0xff]  ;;  %v995_v34 = vld [vmem:[%s6632_s5 + $0x30] sm:$0xff] }
  0x45   : > { %v1030_v31 = vpack.c.bf16 %v987_v30, %v984_v29  ;;  %v927_v32 = vld [vmem:[%s813_s29] sm:$0x1] }
  0x46   : > { %3993 = vmatpush3.bf16.msra.mxu0 %v868_v35  ;;  %vm928_vm2 = vcmp.gt.f32.partialorder %v927_v32, 0.5  ;;  %v993_v32 = vld [vmem:[%s6631_s28 + $0x20] sm:$0xff]  ;;  %s6639_s28 = sld [smem:[#allocation9_spill]] }
  0x47   : > { %1062 = vmatpush1.bf16.msra.mxu1 %v1028_v52  ;;  %3994 = vmatprep.subr.bf16.mxu0 %v877_v36  ;;  %v833_v52 = vld [vmem:[%s6625_s26 + $0x68] sm:$0xff] }
  0x48   : > { %4182 = vmatprep.subr.bf16.mxu1 %v4596_v54 }
  0x4a   : > { %1080 = vmatmul.mubr.bf16.vlgmr.msra.gmra.mrb[0].mxu1 %v4897_v53  ;;  %3995 = vmatpush3.bf16.msra.mxu0 %v869_v42 }
  0x4b   : > { %4184 = vmatprep.mubr.msk.bf16.mxu1 %vm4597_vm0, %v4596_v54  ;;  %3996 = vmatprep.subr.bf16.mxu0 %v878_v43 }
  0x4c   : > { %s3985_s29 = sshll.u32 %s6639_s28, 9 }
  0x4e   : > { %3997 = vmatpush3.bf16.msra.mxu0 %v870_v48 }
  0x4f   : > { %3998 = vmatprep.subr.bf16.mxu0 %v879_v49 }
 0x11d   : > { %v1081_v62 = vpop.f32.mrb[0].mxu1 }
 0x11e   : > { %v1083_v63 = vpop.f32.mrb[1].mxu1  ;;  %v1082_v3 = vadd.f32 %v1081_v62, %v1035_v61  ;;  %v851_v61 = vld [vmem:[%s6625_s26 + $0xf8] sm:$0xff]  ;;  %v871_v62 = vpack.c.bf16 %v833_v52, %v832_v50 }
 0x11f   : > { %v1084_v0 = vadd.f32 %v1083_v63, %v1039_v60  ;;  %v1085_v1 = vpop.f32.mrb[2].mxu1  ;;  %v850_v60 = vld [vmem:[%s6625_s26 + $0xf0] sm:$0xff] }
 0x120   : > { %v1086_v2 = vpop.f32.mrb[3].mxu1  ;;  %v4927_v6 = vpack.c.bf16 %v1082_v3, %v1082_v3  ;;  %v880_v63 = vpack.c.bf16 %v851_v61, %v850_v60  ;;  %v835_v1 = vld [vmem:[%s6625_s26 + $0x78] sm:$0xff]  ;;  %3999 = vmatpush3.bf16.msra.mxu0 %v871_v62 }
 0x121   : > { %v4921_v4 = vpack.c.bf16 %v1084_v0, %v1084_v0  ;;  %v834_v0 = vld [vmem:[%s6625_s26 + $0x70] sm:$0xff]  ;;  %v856_v2 = vrot.slane %v819_v33, %v4915_v59  ;;  %v929_v33 = vsel %vm928_vm2, 1, %v4595_v7 }
 0x122   : > { %v872_v3 = vpack.c.bf16 %v835_v1, %v834_v0  ;;  %4000 = vmatprep.subr.bf16.mxu0 %v880_v63  ;;  %v933_v35 = vrot.slane %v929_v33, %v4915_v59  ;;  %v5119_v0 = vsub.s32 2, %v4904_v56  ;;  %v994_v33 = vld [vmem:[%s6632_s5 + $0x28] sm:$0xff] }
 0x123   : > { %1247 = vrot.lane.b32.xlu1 %v4921_v4, %s6587_s2  ;;  %v1135_v5 = vsel %vm1130_vm1, %v4921_v4, 0  ;;  %v863_v9 = vpack.c.bf16 %v856_v2, %v856_v2 }
 0x124   : > { %4183 = vmatpush3.bf16.xpose.msra.mxu1 %v1135_v5  ;;  %v942_v5 = vld [vmem:[%s6621_s1 + $0x10] sm:$0xff]  ;;  %4001 = vmatpush3.bf16.msra.mxu0 %v872_v3  ;;  %vm934_vm4 = vcmp.eq.s32.totalorder %v933_v35, 1  ;;  %v1043_v1 = vrot.slane %v4912_v58, %v5119_v0  ;;  %v1359_v35 = vpack.c.bf16 %v994_v33, %v993_v32 }
 0x125   : > { %4188 = vmatprep.subr.bf16.mxu1 %v4596_v54  ;;  %v1009_v10 = vpack.c.bf16 %v945_v8, %v942_v5  ;;  %4162 = vmatprep.subr.bf16.mxu0 %v4596_v54  ;;  %vm5108_vm5 = vmand %vm926_vm3, %vm934_vm4 }
 0x127   : > { %1244 = vrot.lane.b32.xlu1 %v4927_v6, %s6587_s2  ;;  %915 = vmatmul.mubr.bf16.vlgmr.msra.gmra.mrb[0].mxu0 %v863_v9 }
 0x128   : > { %4163 = vmatpush3.bf16.msra.mxu0 %v1009_v10  ;;  %4178 = vmatprep.mubr.msk.bf16.mxu0 %vm4597_vm0, %v4596_v54 }
 0x129   : > { %4164 = vmatprep.subr.bf16.mxu0 %v4596_v54 }
 0x12b   : > { %4185 = vmatmul.mubr.msk.bf16.vlgmr.msra.gmra.mrb[4].mxu1 %vm1130_vm1, %v4927_v6 }
 0x12c   : > { %4190 = vmatprep.mubr.msk.bf16.mxu1 %vm4597_vm0, %v4596_v54  ;;  %4165 = vmatpush3.bf16.msra.mxu0 %v1012_v13 }
 0x12d   : > { %4166 = vmatprep.subr.bf16.mxu0 %v4596_v54 }
 0x130   : > { %4167 = vmatpush3.bf16.msra.mxu0 %v1015_v16 }
 0x131   : > { %4168 = vmatprep.subr.bf16.mxu0 %v4596_v54 }
 0x134   : > { %4169 = vmatpush3.bf16.msra.mxu0 %v1018_v19 }
 0x135   : > { %4170 = vmatprep.subr.bf16.mxu0 %v4596_v54 }
 0x138   : > { %4171 = vmatpush3.bf16.msra.mxu0 %v1021_v22 }
 0x139   : > { %4172 = vmatprep.subr.bf16.mxu0 %v4596_v54 }
 0x13c   : > { %4173 = vmatpush3.bf16.msra.mxu0 %v1024_v25 }
 0x13d   : > { %4174 = vmatprep.subr.bf16.mxu0 %v4596_v54 }
 0x140   : > { %4175 = vmatpush3.bf16.msra.mxu0 %v1027_v28 }
 0x141   : > { %4176 = vmatprep.subr.bf16.mxu0 %v4596_v54 }
 0x144   : > { %4177 = vmatpush3.bf16.msra.mxu0 %v1030_v31 }
 0x145   : > { %4206 = vmatprep.subr.bf16.mxu0 %v4596_v54 }
 0x147   : > { %4179 = vmatmul.mubr.bf16.vlgmr.msra.gmra.mrb[4].mxu0 %v4897_v53 }
 0x148   : > { %4210 = vmatprep.mubr.msk.bf16.mxu0 %vm4597_vm0, %v4596_v54  ;;  %4207 = vmatpush3.bf16.msra.mxu0 %v1359_v35 }
 0x149   : > { %4208 = vmatprep.subr.bf16.mxu0 %v4596_v54 }
 0x195   : > { %v1248_v11 = vpop.permute.xlu1 %1247 }
 0x196   : > { %v1253_v13 = vsel %vm1130_vm1, %v1248_v11, 0 }
 0x199   : > { %v1245_v58 = vpop.permute.xlu1 %1244 }
 0x1fa   : > { %v4002_v42 = vpop.f32.mrb[0].mxu0 }
 0x1fb   : > { %v4003_v43 = vpop.f32.mrb[1].mxu0 }
 0x1fc   : > { %v5115_v44 = vadd.f32 %v4003_v43, %v4002_v42  ;;  %v4005_v45 = vpop.f32.mrb[2].mxu0 }
 0x1fd   : > { %v4006_v46 = vpop.f32.mrb[3].mxu0  ;;  %v991_v45 = vld [vmem:[%s6632_s5 + $0x10] sm:$0xff] }
 0x1fe   : > { %v1171_v36 = vpop.f32.mrb[4].mxu1  ;;  %v992_v46 = vld [vmem:[%s6632_s5 + $0x18] sm:$0xff] }
 0x1ff   : > { %v1177_v37 = vmul.f32 0.17677669, %v1171_v36  ;;  %v4186_v38 = vpop.f32.mrb[5].mxu1  ;;  %v996_v36 = vld [vmem:[%s6632_s5 + $0x38] sm:$0xff] }
 0x200   : > { %v1174_v39 = vpop.f32.mrb[6].mxu1 }
 0x201   : > { %v4187_v40 = vpop.f32.mrb[7].mxu1  ;;  %v1178_v41 = vsel %vm5108_vm5, %v1177_v37, -1e+30  ;;  %v1360_v37 = vpack.c.bf16 %v996_v36, %v995_v34  ;;  %v989_v39 = vld [vmem:[%s6632_s5] sm:$0xff]  ;;  %v999_v36 = vld [vmem:[%s6632_s5 + $0x50] sm:$0xff] }
 0x202   : > { %v1180_v55 = vsel %vm1179_vm6, %v1178_v41, -inf  ;;  %v990_v40 = vld [vmem:[%s6632_s5 + $0x8] sm:$0xff] }
 0x203   : > { %1181 = vmax.xlane.f32.xlu0 %v1180_v55  ;;  %4209 = vmatpush3.bf16.msra.mxu0 %v1360_v37  ;;  %v1241_v42 = vpack.c.bf16 %v990_v40, %v989_v39  ;;  %v1000_v37 = vld [vmem:[%s6632_s5 + $0x58] sm:$0xff] }
 0x204   : > { %4222 = vmatprep.subr.bf16.mxu0 %v4596_v54 }
 0x21a   : > { %v1122_v50 = vpop.f32.mrb[4].mxu0 }
 0x21b   : > { %v4180_v52 = vpop.f32.mrb[5].mxu0  ;;  %v1123_v2 = vadd.f32 %v1122_v50, %v1043_v1 }
 0x21c   : > { %v1125_v60 = vpop.f32.mrb[6].mxu0 }
 0x21d   : > { %v4181_v61 = vpop.f32.mrb[7].mxu0  ;;  %v5123_v3 = vpack.c.bf16 %v1123_v2, %v1123_v2 }
 0x21f   : > { %v1198_v5 = vsel %vm1196_vm7, %v5123_v3, 0 }
 0x220   : > { %4189 = vmatpush3.bf16.msra.mxu1 %v1198_v5 }
 0x221   : > { %4194 = vmatprep.subr.bf16.mxu1 %v4596_v54 }
 0x290   : > { %v1182_v47 = vpop.xlane.xlu0 %1181 }
 0x291   : > { %v1183_v48 = vsub.f32 %v1178_v41, %v1182_v47  ;;  %v1242_v47 = vpack.c.bf16 %v992_v46, %v991_v45 }
 0x293   : > { %v1184_v49 = vmul.f32 1.442695, %v1183_v48 }
 0x295   : > { %4487 = vpow2.f32 %v1184_v49 }
 0x29f   : > { %v4488_v62 = vpop.eup %4487 }
 0x2a0   : > { %v1186_v63 = vsel %vm1179_vm6, %v4488_v62, 0.0 }
 0x2a1   : > { %1187 = vadd.xlane.f32.xlu0 %v1186_v63 }
 0x32e   : > { %v1188_v8 = vpop.xlane.xlu0 %1187 }
 0x32f   : > { %4489 = vrcp.f32 %v1188_v8 }
 0x339   : > { %v4490_v9 = vpop.eup %4489 }
 0x33a   : > { %v1190_v10 = vmul.f32 %v4490_v9, %v4488_v62 }
 0x33c   : > { %v1191_v12 = vpack.c.bf16 %v1190_v10, %v1190_v10 }
 0x33e   : > { %4191 = vmatmul.mubr.msk.bf16.vlgmr.msra.gmra.mrb[8].mxu1 %vm1179_vm6, %v1191_v12 }
 0x33f   : > { %4195 = vmatpush3.bf16.xpose.msra.mxu1 %v1253_v13  ;;  %4196 = vmatprep.mubr.msk.bf16.mxu1 %vm4597_vm0, %v4596_v54 }
 0x340   : > { %4200 = vmatprep.subr.bf16.mxu1 %v4596_v54 }
 0x346   : > { %4197 = vmatmul.mubr.msk.bf16.vlgmr.msra.gmra.mrb[12].mxu1 %vm1130_vm1, %v1245_v58 }
 0x347   : > { %4202 = vmatprep.mubr.msk.bf16.mxu1 %vm4597_vm0, %v4596_v54 }
 0x411   : > { %v1234_v14 = vpop.f32.mrb[8].mxu1 }
 0x412   : > { %v4192_v15 = vpop.f32.mrb[9].mxu1  ;;  %v1240_v49 = vpack.c.bf16 %v1234_v14, %v1234_v14 }
 0x413   : > { %v1237_v16 = vpop.f32.mrb[10].mxu1 }
 0x414   : > { %v4193_v17 = vpop.f32.mrb[11].mxu1 }
 0x419   : > { %v1289_v18 = vpop.f32.mrb[12].mxu1 }
 0x41a   : > { %v1295_v19 = vmul.f32 0.17677669, %v1289_v18  ;;  %v4198_v20 = vpop.f32.mrb[13].mxu1 }
 0x41b   : > { %v1292_v21 = vpop.f32.mrb[14].mxu1 }
 0x41c   : > { %v4199_v22 = vpop.f32.mrb[15].mxu1  ;;  %v1296_v23 = vsel %vm5108_vm5, %v1295_v19, -1e+30 }
 0x41d   : > { %v1297_v24 = vsel %vm1179_vm6, %v1296_v23, -inf }
 0x41e   : > { %1298 = vmax.xlane.f32.xlu0 %v1297_v24 }
 0x434   : > { %1310 = vrot.lane.b32.xlu0 %v5123_v3, %s6630_s7 }
 0x438   : > { %1449 = vrot.lane.b32.xlu0 %v4921_v4, %s6593_s27 }
 0x43c   : > { %1447 = vrot.lane.b32.xlu0 %v4927_v6, %s6593_s27 }
 0x4ab   : > { %v1299_v25 = vpop.xlane.xlu0 %1298 }
 0x4ac   : > { %v1300_v26 = vsub.f32 %v1296_v23, %v1299_v25 }
 0x4ae   : > { %v1301_v27 = vmul.f32 1.442695, %v1300_v26 }
 0x4af   : > { %v1311_v28 = vpop.permute.xlu0 %1310 }
 0x4b0   : > { %4491 = vpow2.f32 %v1301_v27  ;;  %v1316_v29 = vsel %vm1196_vm7, %v1311_v28, 0  ;;  %v997_v28 = vld [vmem:[%s6632_s5 + $0x40] sm:$0xff] }
 0x4b1   : > { %4201 = vmatpush3.bf16.msra.mxu1 %v1316_v29  ;;  %v998_v29 = vld [vmem:[%s6632_s5 + $0x48] sm:$0xff] }
 0x4b2   : > { %4214 = vmatprep.subr.bf16.mxu1 %v4596_v54 }
 0x4b3   : > { %v1450_v52 = vpop.permute.xlu0 %1449 }
 0x4b4   : > { %v1455_v1 = vsel %vm1130_vm1, %v1450_v52, 0 }
 0x4b7   : > { %v1448_v9 = vpop.permute.xlu0 %1447 }
 0x4ba   : > { %v4492_v30 = vpop.eup %4491 }
 0x4bb   : > { %v1303_v31 = vsel %vm1179_vm6, %v4492_v30, 0.0 }
 0x4bc   : > { %1304 = vadd.xlane.f32.xlu1 %v1303_v31 }
 0x4cd   : > { %1511 = vrot.lane.b32.xlu1 %v5123_v3, %s6593_s27  ;;  %s6636_s27 = smov 64  }
 0x549   : > { %v1305_v38 = vpop.xlane.xlu1 %1304 }
 0x54a   : > { %4493 = vrcp.f32 %v1305_v38  ;;  %v1561_v38 = vpack.c.bf16 %v1000_v37, %v999_v36  ;;  %v1815_v36 = vld [vmem:[%s6633_s8 + $0x70] sm:$0xff]  ;;  %v1816_v37 = vld [vmem:[%s6633_s8 + $0x78] sm:$0xff] }
 0x54d   : > { %v1512_v48 = vpop.permute.xlu1 %1511 }
 0x54e   : > { %v1517_v50 = vsel %vm1196_vm7, %v1512_v48, 0 }
 0x554   : > { %v4494_v41 = vpop.eup %4493 }
 0x555   : > { %v1307_v55 = vmul.f32 %v4494_v41, %v4492_v30  ;;  %v1560_v30 = vpack.c.bf16 %v998_v29, %v997_v28  ;;  %v1809_v29 = vld [vmem:[%s6633_s8 + $0x40] sm:$0xff] }
 0x557   : > { %v1308_v43 = vpack.c.bf16 %v1307_v55, %v1307_v55 }
 0x559   : > { %4203 = vmatmul.mubr.msk.bf16.vlgmr.msra.gmra.mrb[16].mxu1 %vm1179_vm6, %v1308_v43 }
 0x55a   : > { %4215 = vmatpush3.bf16.msra.mxu1 %v1241_v42  ;;  %4218 = vmatprep.mubr.msk.bf16.mxu1 %vm4597_vm0, %v4596_v54 }
 0x55b   : > { %4216 = vmatprep.subr.bf16.mxu1 %v4596_v54 }
 0x55e   : > { %4217 = vmatpush3.bf16.msra.mxu1 %v1242_v47 }
 0x55f   : > { %4228 = vmatprep.subr.bf16.mxu1 %v4596_v54 }
 0x561   : > { %4219 = vmatmul.mubr.msk.bf16.vlgmr.msra.gmra.mrb[20].mxu1 %vm1130_vm1, %v1240_v49 }
 0x562   : > { %4229 = vmatpush3.bf16.msra.mxu1 %v1517_v50  ;;  %4230 = vmatprep.mubr.msk.bf16.mxu1 %vm4597_vm0, %v4596_v54 }
 0x563   : > { %4242 = vmatprep.subr.bf16.mxu1 %v4596_v54 }
 0x62c   : > { %v1352_v60 = vpop.f32.mrb[16].mxu1 }
 0x62d   : > { %v1358_v61 = vpack.c.bf16 %v1352_v60, %v1352_v60  ;;  %v4204_v62 = vpop.f32.mrb[17].mxu1 }
 0x62e   : > { %v1355_v63 = vpop.f32.mrb[18].mxu1 }
 0x62f   : > { %v4205_v2 = vpop.f32.mrb[19].mxu1  ;;  %4211 = vmatmul.mubr.msk.bf16.vlgmr.msra.gmra.mrb[8].mxu0 %vm1130_vm1, %v1358_v61 }
 0x630   : > { %4223 = vmatpush3.bf16.xpose.msra.mxu0 %v1455_v1  ;;  %4224 = vmatprep.mubr.msk.bf16.mxu0 %vm4597_vm0, %v4596_v54 }
 0x631   : > { %4234 = vmatprep.subr.bf16.mxu0 %v4596_v54 }
 0x634   : > { %v1441_v5 = vpop.f32.mrb[20].mxu1 }
 0x635   : > { %v4220_v8 = vpop.f32.mrb[21].mxu1 }
 0x636   : > { %v1444_v10 = vpop.f32.mrb[22].mxu1 }
 0x637   : > { %v4221_v11 = vpop.f32.mrb[23].mxu1  ;;  %4225 = vmatmul.mubr.msk.bf16.vlgmr.msra.gmra.mrb[12].mxu0 %vm1130_vm1, %v1448_v9 }
 0x638   : > { %4238 = vmatprep.mubr.msk.bf16.mxu0 %vm4597_vm0, %v4596_v54  ;;  %4235 = vmatpush3.bf16.msra.mxu0 %v1560_v30  ;;  %v1001_v11 = vld [vmem:[%s6632_s5 + $0x60] sm:$0xff]  ;;  %v1810_v30 = vld [vmem:[%s6633_s8 + $0x48] sm:$0xff] }
 0x639   : > { %4236 = vmatprep.subr.bf16.mxu0 %v4596_v54 }
 0x63c   : > { %4237 = vmatpush3.bf16.msra.mxu0 %v1561_v38  ;;  %v881_v38 = vld [vmem:[%s6634_s3] sm:$0x1] }
 0x63d   : > { %4248 = vmatprep.subr.bf16.mxu0 %v4596_v54 }
 0x702   : > { %v1398_v12 = vpop.f32.mrb[8].mxu0 }
 0x703   : > { %v5194_v13 = vadd.f32 %v1441_v5, %v1398_v12  ;;  %v4212_v58 = vpop.f32.mrb[9].mxu0  ;;  %v1002_v12 = vld [vmem:[%s6632_s5 + $0x68] sm:$0xff] }
 0x704   : > { %v1401_v14 = vpop.f32.mrb[10].mxu0  ;;  %v1719_v58 = vpack.c.bf16 %v1002_v12, %v1001_v11  ;;  %v1876_v11 = vld [vmem:[%s6557_s12 + $0x48] sm:$0xff] }
 0x705   : > { %v4213_v15 = vpop.f32.mrb[11].mxu0 }
 0x706   : > { %v1802_v15 = vld [vmem:[%s6633_s8 + $0x8] sm:$0xff] }
 0x70a   : > { %v1491_v16 = vpop.f32.mrb[12].mxu0 }
 0x70b   : > { %v1497_v17 = vmul.f32 0.17677669, %v1491_v16  ;;  %v4226_v18 = vpop.f32.mrb[13].mxu0 }
 0x70c   : > { %v1494_v19 = vpop.f32.mrb[14].mxu0 }
 0x70d   : > { %v4227_v20 = vpop.f32.mrb[15].mxu0  ;;  %v1498_v21 = vsel %vm5108_vm5, %v1497_v17, -1e+30 }
 0x70e   : > { %v1499_v22 = vsel %vm1179_vm6, %v1498_v21, -inf  ;;  %v1803_v20 = vld [vmem:[%s6633_s8 + $0x10] sm:$0xff] }
 0x70f   : > { %1500 = vmax.xlane.f32.xlu0 %v1499_v22 }
 0x79c   : > { %v1501_v23 = vpop.xlane.xlu0 %1500 }
 0x79d   : > { %v1502_v24 = vsub.f32 %v1498_v21, %v1501_v23  ;;  %v1804_v21 = vld [vmem:[%s6633_s8 + $0x18] sm:$0xff]  ;;  %v1805_v23 = vld [vmem:[%s6633_s8 + $0x20] sm:$0xff] }
 0x79e   : > { %v1819_v22 = vpack.c.bf16 %v1804_v21, %v1803_v20  ;;  %v1826_v21 = vld [vmem:[%s6556_s11] sm:$0x1] }
 0x79f   : > { %v1503_v25 = vmul.f32 1.442695, %v1502_v24  ;;  %v1806_v24 = vld [vmem:[%s6633_s8 + $0x28] sm:$0xff] }
 0x7a1   : > { %4495 = vpow2.f32 %v1503_v25  ;;  %v1820_v25 = vpack.c.bf16 %v1806_v24, %v1805_v23 }
 0x7ab   : > { %v4496_v26 = vpop.eup %4495 }
 0x7ac   : > { %v1505_v27 = vsel %vm1179_vm6, %v4496_v26, 0.0 }
 0x7ad   : > { %1506 = vadd.xlane.f32.xlu1 %v1505_v27  ;;  %v1808_v27 = vld [vmem:[%s6633_s8 + $0x38] sm:$0xff] }
 0x7be   : > { %1608 = vrot.lane.b32.xlu1 %v4921_v4, %s6591_s4 }
 0x7c2   : > { %1606 = vrot.lane.b32.xlu1 %v4927_v6, %s6591_s4 }
 0x83a   : > { %v1507_v31 = vpop.xlane.xlu1 %1506 }
 0x83b   : > { %4497 = vrcp.f32 %v1507_v31  ;;  %v1822_v31 = vpack.c.bf16 %v1810_v30, %v1809_v29 }
 0x83e   : > { %v1609_v4 = vpop.permute.xlu1 %1608 }
 0x83f   : > { %v1614_v6 = vsel %vm1130_vm1, %v1609_v4, 0 }
 0x842   : > { %v1607_v35 = vpop.permute.xlu1 %1606 }
 0x845   : > { %v4498_v32 = vpop.eup %4497 }
 0x846   : > { %v1509_v33 = vmul.f32 %v4498_v32, %v4496_v26  ;;  %v1807_v26 = vld [vmem:[%s6633_s8 + $0x30] sm:$0xff] }
 0x847   : > { %v1821_v28 = vpack.c.bf16 %v1808_v27, %v1807_v26  ;;  %v1811_v32 = vld [vmem:[%s6633_s8 + $0x50] sm:$0xff] }
 0x848   : > { %v1510_v34 = vpack.c.bf16 %v1509_v33, %v1509_v33  ;;  %v1812_v33 = vld [vmem:[%s6633_s8 + $0x58] sm:$0xff] }
 0x849   : > { %v1823_v4 = vpack.c.bf16 %v1812_v33, %v1811_v32 }
 0x84a   : > { %4231 = vmatmul.mubr.msk.bf16.vlgmr.msra.gmra.mrb[24].mxu1 %vm1179_vm6, %v1510_v34  ;;  %v1813_v34 = vld [vmem:[%s6633_s8 + $0x60] sm:$0xff] }
 0x84b   : > { %4243 = vmatpush3.bf16.xpose.msra.mxu1 %v1614_v6  ;;  %4244 = vmatprep.mubr.msk.bf16.mxu1 %vm4597_vm0, %v4596_v54  ;;  %v1814_v6 = vld [vmem:[%s6633_s8 + $0x68] sm:$0xff] }
 0x84c   : > { %4254 = vmatprep.subr.bf16.mxu1 %v4596_v54 }
 0x852   : > { %4245 = vmatmul.mubr.msk.bf16.vlgmr.msra.gmra.mrb[28].mxu1 %vm1130_vm1, %v1607_v35  ;;  %v1824_v35 = vpack.c.bf16 %v1814_v6, %v1813_v34 }
 0x853   : > { %4258 = vmatprep.mubr.msk.bf16.mxu1 %vm4597_vm0, %v4596_v54  ;;  %4255 = vmatpush3.bf16.msra.mxu1 %v1719_v58  ;;  %v1877_v58 = vld [vmem:[%s6557_s12 + $0x50] sm:$0xff] }
 0x854   : > { %4256 = vmatprep.subr.bf16.mxu1 %v4596_v54 }
 0x91d   : > { %v1553_v39 = vpop.f32.mrb[24].mxu1 }
 0x91e   : > { %v1559_v40 = vpack.c.bf16 %v1553_v39, %v1553_v39  ;;  %v4232_v41 = vpop.f32.mrb[25].mxu1  ;;  %v1825_v39 = vpack.c.bf16 %v1816_v37, %v1815_v36 }
 0x91f   : > { %v1556_v55 = vpop.f32.mrb[26].mxu1 }
 0x920   : > { %v4233_v42 = vpop.f32.mrb[27].mxu1  ;;  %4239 = vmatmul.mubr.msk.bf16.vlgmr.msra.gmra.mrb[16].mxu0 %vm1130_vm1, %v1559_v40  ;;  %v917_v40 = vadd.f32 %v5115_v44, %v881_v38  ;;  %v1003_v55 = vld [vmem:[%s6632_s5 + $0x70] sm:$0xff]  ;;  %v1867_v44 = vld [vmem:[%s6557_s12] sm:$0xff] }
 0x921   : > { %4250 = vmatprep.mubr.msk.bf16.mxu0 %vm4597_vm0, %v4596_v54  ;;  %v1004_v42 = vld [vmem:[%s6632_s5 + $0x78] sm:$0xff] }
 0x922   : > { %v5309_v41 = vpack.c.bf16 %v917_v40, %v917_v40 }
 0x925   : > { %v1650_v43 = vpop.f32.mrb[28].mxu1 }
 0x926   : > { %v1656_v45 = vmul.f32 0.17677669, %v1650_v43  ;;  %v4246_v46 = vpop.f32.mrb[29].mxu1  ;;  %v1720_v43 = vpack.c.bf16 %v1004_v42, %v1003_v55 }
 0x927   : > { %v1653_v47 = vpop.f32.mrb[30].mxu1 }
 0x928   : > { %v4247_v48 = vpop.f32.mrb[31].mxu1  ;;  %v1657_v49 = vsel %vm5108_vm5, %v1656_v45, -1e+30  ;;  %4257 = vmatpush3.bf16.msra.mxu1 %v1720_v43  ;;  %v1868_v45 = vld [vmem:[%s6557_s12 + $0x8] sm:$0xff] }
 0x929   : > { %v1658_v50 = vsel %vm1179_vm6, %v1657_v49, -inf  ;;  %4282 = vmatprep.subr.bf16.mxu1 %v4596_v54  ;;  %v1884_v47 = vpack.c.bf16 %v1868_v45, %v1867_v44 }
 0x92a   : > { %1659 = vmax.xlane.f32.xlu0 %v1658_v50  ;;  %v1869_v50 = vld [vmem:[%s6557_s12 + $0x10] sm:$0xff] }
 0x940   : > { %1670 = vrot.lane.b32.xlu0 %v5123_v3, %s6591_s4  ;;  %s6503_s4 = scalar_lea.hbm %s6642_s6, %s3985_s29 }
 0x9b7   : > { %v1660_v52 = vpop.xlane.xlu0 %1659 }
 0x9b8   : > { %v1661_v60 = vsub.f32 %v1657_v49, %v1660_v52  ;;  %v1870_v52 = vld [vmem:[%s6557_s12 + $0x18] sm:$0xff] }
 0x9ba   : > { %v1662_v61 = vmul.f32 1.442695, %v1661_v60 }
 0x9bb   : > { %v1671_v62 = vpop.permute.xlu0 %1670 }
 0x9bc   : > { %4499 = vpow2.f32 %v1662_v61  ;;  %v1676_v63 = vsel %vm1196_vm7, %v1671_v62, 0  ;;  %v1885_v62 = vpack.c.bf16 %v1870_v52, %v1869_v50 }
 0x9bd   : > { %4249 = vmatpush3.bf16.msra.mxu0 %v1676_v63  ;;  %v1871_v63 = vld [vmem:[%s6557_s12 + $0x20] sm:$0xff] }
 0x9be   : > { %4262 = vmatprep.subr.bf16.mxu0 %v4596_v54 }
 0x9c6   : > { %v4500_v1 = vpop.eup %4499 }
 0x9c7   : > { %v1664_v2 = vsel %vm1179_vm6, %v4500_v1, 0.0 }
 0x9c8   : > { %1665 = vadd.xlane.f32.xlu1 %v1664_v2 }
 0x9f3   : > { %v1599_v5 = vpop.f32.mrb[16].mxu0 }
 0x9f4   : > { %v5238_v8 = vadd.f32 %v1599_v5, %v5194_v13  ;;  %v4240_v9 = vpop.f32.mrb[17].mxu0  ;;  %v1801_v13 = vld [vmem:[%s6633_s8] sm:$0xff]  ;;  %v1873_v5 = vld [vmem:[%s6557_s12 + $0x30] sm:$0xff] }
 0x9f5   : > { %v1602_v3 = vpop.f32.mrb[18].mxu0  ;;  %v1818_v18 = vpack.c.bf16 %v1802_v15, %v1801_v13  ;;  %v1874_v9 = vld [vmem:[%s6557_s12 + $0x38] sm:$0xff]  ;;  %v1879_v15 = vld [vmem:[%s6557_s12 + $0x60] sm:$0xff] }
 0x9f6   : > { %v4241_v10 = vpop.f32.mrb[19].mxu0  ;;  %v1887_v3 = vpack.c.bf16 %v1874_v9, %v1873_v5  ;;  %v1970_v5 = vld [vmem:[%s6565_s20 + $0x28] sm:$0xff]  ;;  %v1972_v9 = vld [vmem:[%s6565_s20 + $0x38] sm:$0xff] }
 0x9f7   : > { %v1875_v10 = vld [vmem:[%s6557_s12 + $0x40] sm:$0xff] }
 0x9f8   : > { %v1888_v12 = vpack.c.bf16 %v1876_v11, %v1875_v10  ;;  %v2001_v10 = vpack.c.bf16 %v1972_v9, %v1970_v5  ;;  %v1969_v11 = vld [vmem:[%s6565_s20 + $0x20] sm:$0xff]  ;;  %v2071_v5 = vld [vmem:[%s6567_s22 + $0x10] sm:$0xff]  ;;  %v2072_v9 = vld [vmem:[%s6567_s22 + $0x18] sm:$0xff] }
 0xa55   : > { %v1666_v14 = vpop.xlane.xlu1 %1665 }
 0xa56   : > { %4501 = vrcp.f32 %v1666_v14  ;;  %v1878_v14 = vld [vmem:[%s6557_s12 + $0x58] sm:$0xff] }
 0xa57   : > { %v1889_v13 = vpack.c.bf16 %v1878_v14, %v1877_v58  ;;  %v1974_v58 = vld [vmem:[%s6565_s20 + $0x48] sm:$0xff]  ;;  %v1976_v14 = vld [vmem:[%s6565_s20 + $0x58] sm:$0xff] }
 0xa60   : > { %v4502_v16 = vpop.eup %4501 }
 0xa61   : > { %v1668_v17 = vmul.f32 %v4502_v16, %v4500_v1  ;;  %v1872_v1 = vld [vmem:[%s6557_s12 + $0x28] sm:$0xff] }
 0xa62   : > { %v1886_v2 = vpack.c.bf16 %v1872_v1, %v1871_v63  ;;  %v1880_v16 = vld [vmem:[%s6557_s12 + $0x68] sm:$0xff]  ;;  %v1965_v63 = vld [vmem:[%s6565_s20] sm:$0xff] }
 0xa63   : > { %v1669_v19 = vpack.c.bf16 %v1668_v17, %v1668_v17  ;;  %v1890_v17 = vpack.c.bf16 %v1880_v16, %v1879_v15  ;;  %v2003_v15 = vpack.c.bf16 %v1976_v14, %v1974_v58  ;;  %v2073_v58 = vld [vmem:[%s6567_s22 + $0x20] sm:$0xff]  ;;  %v2074_v14 = vld [vmem:[%s6567_s22 + $0x28] sm:$0xff] }
 0xa65   : > { %4251 = vmatmul.mubr.msk.bf16.vlgmr.msra.gmra.mrb[20].mxu0 %vm1179_vm6, %v1669_v19  ;;  %v1882_v19 = vld [vmem:[%s6557_s12 + $0x78] sm:$0xff] }
 0xa66   : > { %4263 = vmatpush3.bf16.msra.mxu0 %v1818_v18  ;;  %4278 = vmatprep.mubr.msk.bf16.mxu0 %vm4597_vm0, %v4596_v54  ;;  %v1881_v18 = vld [vmem:[%s6557_s12 + $0x70] sm:$0xff] }
 0xa67   : > { %4264 = vmatprep.subr.bf16.mxu0 %v4596_v54  ;;  %v1891_v20 = vpack.c.bf16 %v1882_v19, %v1881_v18 }
 0xa6a   : > { %4265 = vmatpush3.bf16.msra.mxu0 %v1819_v22 }
 0xa6b   : > { %4266 = vmatprep.subr.bf16.mxu0 %v4596_v54 }
 0xa6e   : > { %4267 = vmatpush3.bf16.msra.mxu0 %v1820_v25 }
 0xa6f   : > { %4268 = vmatprep.subr.bf16.mxu0 %v4596_v54 }
 0xa72   : > { %4269 = vmatpush3.bf16.msra.mxu0 %v1821_v28  ;;  %v3780_v28 = vld [vmem:[%s6635_s0] ss:$0 sm:$0xff] }
 0xa73   : > { %4270 = vmatprep.subr.bf16.mxu0 %v4596_v54 }
 0xa76   : > { %4271 = vmatpush3.bf16.msra.mxu0 %v1822_v31 }
 0xa77   : > { %4272 = vmatprep.subr.bf16.mxu0 %v4596_v54 }
 0xa7a   : > { %4273 = vmatpush3.bf16.msra.mxu0 %v1823_v4 }
 0xa7b   : > { %4274 = vmatprep.subr.bf16.mxu0 %v4596_v54 }
 0xa7e   : > { %4275 = vmatpush3.bf16.msra.mxu0 %v1824_v35 }
 0xa7f   : > { %4276 = vmatprep.subr.bf16.mxu0 %v4596_v54 }
 0xa82   : > { %4277 = vmatpush3.bf16.msra.mxu0 %v1825_v39 }
 0xa85   : > { %4279 = vmatmul.mubr.bf16.vlgmr.msra.gmra.mrb[24].mxu0 %v5309_v41 }
 0xa86   : > { %2058 = vmatprep.mubr.bf16.mxu0 %v4595_v7 }
 0xb38   : > { %v1712_v46 = vpop.f32.mrb[20].mxu0 }
 0xb39   : > { %v1718_v48 = vpack.c.bf16 %v1712_v46, %v1712_v46  ;;  %v4252_v49 = vpop.f32.mrb[21].mxu0 }
 0xb3a   : > { %v1715_v60 = vpop.f32.mrb[22].mxu0 }
 0xb3b   : > { %v4253_v61 = vpop.f32.mrb[23].mxu0  ;;  %4259 = vmatmul.mubr.msk.bf16.vlgmr.msra.gmra.mrb[32].mxu1 %vm1130_vm1, %v1718_v48  ;;  %v3782_v48 = vld [vmem:[%s6560_s15] ss:$0 sm:$0xff] }
 0xb3c   : > { %4283 = vmatpush3.bf16.msra.mxu1 %v1884_v47  ;;  %4298 = vmatprep.mubr.msk.bf16.mxu1 %vm4597_vm0, %v4596_v54  ;;  %v1966_v61 = vld [vmem:[%s6565_s20 + $0x8] sm:$0xff] }
 0xb3d   : > { %4284 = vmatprep.subr.bf16.mxu1 %v4596_v54 }
 0xb40   : > { %4285 = vmatpush3.bf16.msra.mxu1 %v1885_v62  ;;  %v1968_v62 = vld [vmem:[%s6565_s20 + $0x18] sm:$0xff] }
 0xb41   : > { %4286 = vmatprep.subr.bf16.mxu1 %v4596_v54  ;;  %v1999_v1 = vpack.c.bf16 %v1968_v62, %v1966_v61  ;;  %v2070_v61 = vld [vmem:[%s6567_s22 + $0x8] sm:$0xff]  ;;  %v2087_v62 = vld [vmem:[%s6567_s22 + $0x90] sm:$0xff] }
 0xb43   : > { %2026 = vmatprep.subr.bf16.mxu0 %v1999_v1 }
 0xb44   : > { %4287 = vmatpush3.bf16.msra.mxu1 %v1886_v2  ;;  %v1967_v2 = vld [vmem:[%s6565_s20 + $0x10] sm:$0xff] }
 0xb45   : > { %4288 = vmatprep.subr.bf16.mxu1 %v4596_v54 }
 0xb48   : > { %4289 = vmatpush3.bf16.msra.mxu1 %v1887_v3  ;;  %v1998_v3 = vpack.c.bf16 %v1967_v2, %v1965_v63  ;;  %v2088_v63 = vld [vmem:[%s6567_s22 + $0x98] sm:$0xff] }
 0xb49   : > { %4290 = vmatprep.subr.bf16.mxu1 %v4596_v54  ;;  %v2112_v2 = vpack.c.bf16 %v2088_v63, %v2087_v62 }
 0xb4a   : > { %2027 = vmatpush1.bf16.msra.mxu0 %v1998_v3  ;;  %v2089_v3 = vld [vmem:[%s6567_s22 + $0xa0] sm:$0xff] }
 0xb4b   : > { %2028 = vmatprep.subr.bf16.mxu0 %v2001_v10  ;;  %v2090_v10 = vld [vmem:[%s6567_s22 + $0xa8] sm:$0xff] }
 0xb4c   : > { %4291 = vmatpush3.bf16.msra.mxu1 %v1888_v12  ;;  %v1971_v12 = vld [vmem:[%s6565_s20 + $0x30] sm:$0xff] }
 0xb4d   : > { %4292 = vmatprep.subr.bf16.mxu1 %v4596_v54 }
 0xb50   : > { %4293 = vmatpush3.bf16.msra.mxu1 %v1889_v13  ;;  %v2000_v13 = vpack.c.bf16 %v1971_v12, %v1969_v11  ;;  %v2104_v11 = vpack.c.bf16 %v2072_v9, %v2071_v5  ;;  %v2113_v12 = vpack.c.bf16 %v2090_v10, %v2089_v3 }
 0xb51   : > { %4294 = vmatprep.subr.bf16.mxu1 %v4596_v54 }
 0xb52   : > { %2029 = vmatpush1.bf16.msra.mxu0 %v2000_v13  ;;  %v2091_v13 = vld [vmem:[%s6567_s22 + $0xb0] sm:$0xff] }
 0xb53   : > { %2030 = vmatprep.subr.bf16.mxu0 %v2003_v15  ;;  %v2092_v15 = vld [vmem:[%s6567_s22 + $0xb8] sm:$0xff] }
 0xb54   : > { %4295 = vmatpush3.bf16.msra.mxu1 %v1890_v17 }
 0xb55   : > { %4296 = vmatprep.subr.bf16.mxu1 %v4596_v54 }
 0xb58   : > { %v1861_v22 = vpop.f32.mrb[24].mxu0  ;;  %4297 = vmatpush3.bf16.msra.mxu1 %v1891_v20  ;;  %v1973_v20 = vld [vmem:[%s6565_s20 + $0x40] sm:$0xff] }
 0xb59   : > { %v1862_v23 = vadd.f32 %v1861_v22, %v1826_v21  ;;  %v4280_v24 = vpop.f32.mrb[25].mxu0  ;;  %v1975_v21 = vld [vmem:[%s6565_s20 + $0x50] sm:$0xff] }
 0xb5a   : > { %v1864_v25 = vpop.f32.mrb[26].mxu0  ;;  %v2002_v22 = vpack.c.bf16 %v1975_v21, %v1973_v20  ;;  %v1980_v24 = vld [vmem:[%s6565_s20 + $0x78] sm:$0xff]  ;;  %v2093_v21 = vld [vmem:[%s6567_s22 + $0xc0] sm:$0xff] }
 0xb5b   : > { %v1883_v26 = vpack.c.bf16 %v1862_v23, %v1862_v23  ;;  %v4281_v27 = vpop.f32.mrb[27].mxu0  ;;  %v1978_v23 = vld [vmem:[%s6565_s20 + $0x68] sm:$0xff]  ;;  %v2076_v20 = vld [vmem:[%s6567_s22 + $0x38] sm:$0xff] }
 0xb5c   : > { %2031 = vmatpush1.bf16.msra.mxu0 %v2002_v22  ;;  %v2005_v25 = vpack.c.bf16 %v1980_v24, %v1978_v23  ;;  %v1979_v27 = vld [vmem:[%s6565_s20 + $0x70] sm:$0xff]  ;;  %v2094_v22 = vld [vmem:[%s6567_s22 + $0xc8] sm:$0xff] }
 0xb5d   : > { %4299 = vmatmul.mubr.bf16.vlgmr.msra.gmra.mrb[36].mxu1 %v1883_v26  ;;  %v1977_v26 = vld [vmem:[%s6565_s20 + $0x60] sm:$0xff]  ;;  %v2115_v24 = vpack.c.bf16 %v2094_v22, %v2093_v21  ;;  %v3789_v21 = vld [vmem:[%s6621_s1 + $0x188] sm:$0xff] }
 0xb5e   : > { %2032 = vmatprep.subr.bf16.mxu0 %v2005_v25  ;;  %v2077_v25 = vld [vmem:[%s6567_s22 + $0x40] sm:$0xff] }
 0xb5f   : > { %v3792_v22 = vld [vmem:[%s6621_s1 + $0x1a0] sm:$0xff] }
 0xc0e   : > { %v1758_v29 = vpop.f32.mrb[32].mxu1 }
 0xc0f   : > { %v1764_v30 = vadd.f32 %v1758_v29, %v5238_v8  ;;  %v4260_v31 = vpop.f32.mrb[33].mxu1  ;;  %v1892_v8 = vld [vmem:[%s6558_s13] sm:$0x1]  ;;  %v1982_v29 = vld [vmem:[%s6565_s20 + $0x88] sm:$0xff] }
 0xc10   : > { %v1761_v32 = vpop.f32.mrb[34].mxu1 }
 0xc11   : > { %v1771_v33 = vadd.f32 %v3780_v28, %v1764_v30  ;;  %v4261_v4 = vpop.f32.mrb[35].mxu1  ;;  %v2004_v28 = vpack.c.bf16 %v1979_v27, %v1977_v26  ;;  %v1984_v30 = vld [vmem:[%s6565_s20 + $0x98] sm:$0xff]  ;;  %v1981_v32 = vld [vmem:[%s6565_s20 + $0x80] sm:$0xff]  ;;  %v2078_v26 = vld [vmem:[%s6567_s22 + $0x48] sm:$0xff] }
 0xc12   : > { %v2007_v31 = vpack.c.bf16 %v1984_v30, %v1982_v29  ;;  %v2095_v27 = vld [vmem:[%s6567_s22 + $0xd0] sm:$0xff]  ;;  %v2107_v29 = vpack.c.bf16 %v2078_v26, %v2077_v25  ;;  %v3791_v25 = vld [vmem:[%s6621_s1 + $0x198] sm:$0xff] }
 0xc13   : > { %v1772_v34 = vadd.f32 %v1771_v33, %v4893_v51  ;;  %v3781_v51 = vld [vmem:[%s6559_s14] ss:$0 sm:$0xff]  ;;  %2033 = vmatpush1.bf16.msra.mxu0 %v2004_v28  ;;  %v1983_v33 = vld [vmem:[%s6565_s20 + $0x90] sm:$0xff]  ;;  %v2096_v28 = vld [vmem:[%s6567_s22 + $0xd8] sm:$0xff] }
 0xc14   : > { %v2006_v4 = vpack.c.bf16 %v1983_v33, %v1981_v32  ;;  %2034 = vmatprep.subr.bf16.mxu0 %v2007_v31  ;;  %v2116_v30 = vpack.c.bf16 %v2096_v28, %v2095_v27  ;;  %v2079_v31 = vld [vmem:[%s6567_s22 + $0x50] sm:$0xff]  ;;  %v2080_v32 = vld [vmem:[%s6567_s22 + $0x58] sm:$0xff]  ;;  %v3793_v27 = vld [vmem:[%s6621_s1 + $0x1a8] sm:$0xff] }
 0xc15   : > { %1775 = vadd.xlane.f32.xlu0 %v1772_v34  ;;  %v2108_v33 = vpack.c.bf16 %v2080_v32, %v2079_v31  ;;  %v3790_v26 = vld [vmem:[%s6621_s1 + $0x190] sm:$0xff] }
 0xc16   : > { %v3798_v31 = vld [vmem:[%s6621_s1 + $0x1d0] sm:$0xff] }
 0xc17   : > { %2035 = vmatpush1.bf16.msra.mxu0 %v2006_v4  ;;  %v3794_v32 = vld [vmem:[%s6621_s1 + $0x1b0] sm:$0xff] }
 0xc30   : > { %v1927_v6 = vpop.f32.mrb[36].mxu1 }
 0xc31   : > { %v4300_v35 = vpop.f32.mrb[37].mxu1  ;;  %v1928_v46 = vadd.f32 %v1927_v6, %v1892_v8  ;;  %v1988_v6 = vld [vmem:[%s6565_s20 + $0xb8] sm:$0xff]  ;;  %v1994_v8 = vld [vmem:[%s6565_s20 + $0xe8] sm:$0xff] }
 0xc32   : > { %v1930_v36 = vpop.f32.mrb[38].mxu1 }
 0xc33   : > { %v4301_v37 = vpop.f32.mrb[39].mxu1  ;;  %v1936_v50 = vrot.slane %v1928_v46, %v4915_v59  ;;  %v1985_v36 = vld [vmem:[%s6565_s20 + $0xa0] sm:$0xff] }
 0xc34   : > { %v1987_v37 = vld [vmem:[%s6565_s20 + $0xb0] sm:$0xff] }
 0xca2   : > { %v1776_v38 = vpop.xlane.xlu0 %1775 }
 0xca3   : > { %v1778_v39 = vmul.f32 0.0078125, %v1776_v38  ;;  %v2008_v38 = vpack.c.bf16 %v1987_v37, %v1985_v36  ;;  %v3783_v36 = vld [vmem:[%s6561_s16] ss:$0 sm:$0xff] }
 0xca5   : > { %v1779_v40 = vsub.f32 %v1772_v34, %v1778_v39  ;;  %v1986_v34 = vld [vmem:[%s6565_s20 + $0xa8] sm:$0xff] }
 0xca6   : > { %v2009_v35 = vpack.c.bf16 %v1988_v6, %v1986_v34  ;;  %v1990_v39 = vld [vmem:[%s6565_s20 + $0xc8] sm:$0xff] }
 0xca7   : > { %v1780_v55 = vmul.f32 %v1779_v40, %v1779_v40 }
 0xca8   : > { %2036 = vmatprep.subr.bf16.mxu0 %v2009_v35 }
 0xca9   : > { %1781 = vadd.xlane.f32.xlu1 %v1780_v55  ;;  %2037 = vmatpush1.bf16.msra.mxu0 %v2008_v38  ;;  %v3784_v38 = vld [vmem:[%s6562_s17] ss:$0 sm:$0xff] }
 0xd36   : > { %v1782_v42 = vpop.xlane.xlu1 %1781 }
 0xd37   : > { %v1783_v43 = vmul.f32 0.0078125, %v1782_v42  ;;  %v1989_v42 = vld [vmem:[%s6565_s20 + $0xc0] sm:$0xff] }
 0xd39   : > { %v1784_v44 = vadd.f32 1e-05, %v1783_v43  ;;  %v1991_v43 = vld [vmem:[%s6565_s20 + $0xd0] sm:$0xff] }
 0xd3b   : > { %4503 = vrsqrt.f32 %v1784_v44  ;;  %v2010_v44 = vpack.c.bf16 %v1991_v43, %v1989_v42  ;;  %v2097_v42 = vld [vmem:[%s6567_s22 + $0xe0] sm:$0xff]  ;;  %v2098_v43 = vld [vmem:[%s6567_s22 + $0xe8] sm:$0xff] }
 0xd45   : > { %v4504_v45 = vpop.eup %4503 }
 0xd46   : > { %v1786_v47 = vmul.f32 %v4504_v45, %v1779_v40  ;;  %v1992_v40 = vld [vmem:[%s6565_s20 + $0xd8] sm:$0xff] }
 0xd47   : > { %v2011_v55 = vpack.c.bf16 %v1992_v40, %v1990_v39  ;;  %v1996_v45 = vld [vmem:[%s6565_s20 + $0xf8] sm:$0xff] }
 0xd48   : > { %v1793_v49 = vmul.f32 %v3781_v51, %v1786_v47  ;;  %v1993_v51 = vld [vmem:[%s6565_s20 + $0xe0] sm:$0xff]  ;;  %v2013_v46 = vpack.c.bf16 %v1996_v45, %v1994_v8  ;;  %v1995_v47 = vld [vmem:[%s6565_s20 + $0xf0] sm:$0xff]  ;;  %v2082_v8 = vld [vmem:[%s6567_s22 + $0x68] sm:$0xff] }
 0xd49   : > { %2038 = vmatprep.subr.bf16.mxu0 %v2011_v55 }
 0xd4a   : > { %v1800_v52 = vadd.f32 %v3782_v48, %v1793_v49  ;;  %2039 = vmatpush1.bf16.msra.mxu0 %v2010_v44  ;;  %v2012_v48 = vpack.c.bf16 %v1995_v47, %v1993_v51  ;;  %v2085_v49 = vld [vmem:[%s6567_s22 + $0x80] sm:$0xff]  ;;  %v2117_v44 = vpack.c.bf16 %v2098_v43, %v2097_v42  ;;  %v2099_v51 = vld [vmem:[%s6567_s22 + $0xf0] sm:$0xff] }
 0xd4b   : > { %2040 = vmatprep.subr.bf16.mxu0 %v2013_v46  ;;  %v2100_v46 = vld [vmem:[%s6567_s22 + $0xf8] sm:$0xff] }
 0xd4c   : > { %v1937_v60 = vadd.f32 %v1936_v50, %v1800_v52  ;;  %v2086_v50 = vld [vmem:[%s6567_s22 + $0x88] sm:$0xff]  ;;  %v2069_v52 = vld [vmem:[%s6567_s22] sm:$0xff]  ;;  %v2118_v47 = vpack.c.bf16 %v2100_v46, %v2099_v51 }
 0xd4d   : > { %v2103_v1 = vpack.c.bf16 %v2070_v61, %v2069_v52  ;;  %v2014_v52 = vld [vmem:[%s6566_s21] sm:$0x3]  ;;  %v3805_v51 = vld [vmem:[%s6621_s1 + $0x208] sm:$0xff] }
 0xd4e   : > { %1940 = vadd.xlane.f32.xlu1 %v1937_v60  ;;  %2041 = vmatpush1.bf16.msra.mxu0 %v2012_v48  ;;  %v2083_v48 = vld [vmem:[%s6567_s22 + $0x70] sm:$0xff]  ;;  %v2023_v61 = vrot.slane %v2014_v52, %v4907_v57 }
 0xddb   : > { %v1941_v16 = vpop.xlane.xlu1 %1940 }
 0xddc   : > { %v1942_v17 = vmul.f32 0.0078125, %v1941_v16  ;;  %v2105_v16 = vpack.c.bf16 %v2074_v14, %v2073_v58  ;;  %v3785_v14 = vld [vmem:[%s6568_s23] ss:$0 sm:$0xff] }
 0xdde   : > { %v5426_v18 = vsub.f32 %v1937_v60, %v1942_v17  ;;  %v2111_v60 = vpack.c.bf16 %v2086_v50, %v2085_v49  ;;  %v2114_v17 = vpack.c.bf16 %v2092_v15, %v2091_v13  ;;  %v2084_v49 = vld [vmem:[%s6567_s22 + $0x78] sm:$0xff] }
 0xddf   : > { %v2110_v50 = vpack.c.bf16 %v2084_v49, %v2083_v48  ;;  %v3810_v48 = vld [vmem:[%s6621_s1 + $0x230] sm:$0xff] }
 0xde0   : > { %v1944_v19 = vmul.f32 %v5426_v18, %v5426_v18  ;;  %4063 = vmatprep.subr.bf16.mxu1 %v2111_v60  ;;  %v2019_v60 = vrot.slane %v2014_v52, %v4915_v59  ;;  %v3809_v52 = vld [vmem:[%s6621_s1 + $0x228] sm:$0xff] }
 0xde1   : > { %4064 = vmatpush3.bf16.msra.mxu1 %v2103_v1 }
 0xde2   : > { %1945 = vadd.xlane.f32.xlu1 %v1944_v19  ;;  %4065 = vmatprep.subr.bf16.mxu1 %v2112_v2  ;;  %v2075_v19 = vld [vmem:[%s6567_s22 + $0x30] sm:$0xff] }
 0xde3   : > { %v2106_v23 = vpack.c.bf16 %v2076_v20, %v2075_v19 }
 0xde5   : > { %4066 = vmatpush3.bf16.msra.mxu1 %v2104_v11 }
 0xde6   : > { %4067 = vmatprep.subr.bf16.mxu1 %v2113_v12 }
 0xde9   : > { %4068 = vmatpush3.bf16.msra.mxu1 %v2105_v16 }
 0xdea   : > { %4069 = vmatprep.subr.bf16.mxu1 %v2114_v17 }
 0xded   : > { %4070 = vmatpush3.bf16.msra.mxu1 %v2106_v23  ;;  %v3788_v23 = vld [vmem:[%s6621_s1 + $0x180] sm:$0xff] }
 0xdee   : > { %4071 = vmatprep.subr.bf16.mxu1 %v2115_v24  ;;  %v2266_v24 = vpack.c.bf16 %v3792_v22, %v3789_v21  ;;  %v2265_v28 = vpack.c.bf16 %v3791_v25, %v3788_v23  ;;  %v3823_v21 = vld [vmem:[%s6621_s1 + $0x298] sm:$0xff]  ;;  %v3825_v23 = vld [vmem:[%s6621_s1 + $0x2a8] sm:$0xff] }
 0xdf0   : > { %2305 = vmatprep.subr.bf16.mxu0 %v2266_v24  ;;  %v3828_v24 = vld [vmem:[%s6621_s1 + $0x2c0] sm:$0xff] }
 0xdf1   : > { %4072 = vmatpush3.bf16.msra.mxu1 %v2107_v29  ;;  %v2267_v29 = vpack.c.bf16 %v3793_v27, %v3790_v26  ;;  %v2284_v25 = vpack.c.bf16 %v3828_v24, %v3825_v23  ;;  %v3824_v26 = vld [vmem:[%s6621_s1 + $0x2a0] sm:$0xff]  ;;  %v3827_v27 = vld [vmem:[%s6621_s1 + $0x2b8] sm:$0xff] }
 0xdf2   : > { %4073 = vmatprep.subr.bf16.mxu1 %v2116_v30  ;;  %v3795_v30 = vld [vmem:[%s6621_s1 + $0x1b8] sm:$0xff] }
 0xdf5   : > { %4074 = vmatpush3.bf16.msra.mxu1 %v2108_v33  ;;  %v2269_v33 = vpack.c.bf16 %v3798_v31, %v3795_v30  ;;  %v3829_v30 = vld [vmem:[%s6621_s1 + $0x2c8] sm:$0xff]  ;;  %v3831_v31 = vld [vmem:[%s6621_s1 + $0x2d8] sm:$0xff] }
 0xdf6   : > { %4075 = vmatprep.subr.bf16.mxu1 %v2117_v44  ;;  %v3800_v44 = vld [vmem:[%s6621_s1 + $0x1e0] sm:$0xff] }
 0xe6f   : > { %v1946_v4 = vpop.xlane.xlu1 %1945 }
 0xe70   : > { %v1947_v34 = vmul.f32 0.0078125, %v1946_v4  ;;  %v3797_v4 = vld [vmem:[%s6621_s1 + $0x1c8] sm:$0xff] }
 0xe72   : > { %v1948_v6 = vadd.f32 1e-05, %v1947_v34  ;;  %v3796_v34 = vld [vmem:[%s6621_s1 + $0x1c0] sm:$0xff] }
 0xe74   : > { %4505 = vrsqrt.f32 %v1948_v6  ;;  %v3799_v6 = vld [vmem:[%s6621_s1 + $0x1d8] sm:$0xff] }
 0xe7e   : > { %v4506_v35 = vpop.eup %4505 }
 0xe7f   : > { %v1950_v37 = vmul.f32 %v4506_v35, %v5426_v18  ;;  %v2081_v18 = vld [vmem:[%s6567_s22 + $0x60] sm:$0xff]  ;;  %v2268_v35 = vpack.c.bf16 %v3797_v4, %v3794_v32  ;;  %v3834_v32 = vld [vmem:[%s6621_s1 + $0x2f0] sm:$0xff] }
 0xe80   : > { %v2109_v45 = vpack.c.bf16 %v2082_v8, %v2081_v18  ;;  %v3803_v18 = vld [vmem:[%s6621_s1 + $0x1f8] sm:$0xff]  ;;  %v3802_v8 = vld [vmem:[%s6621_s1 + $0x1f0] sm:$0xff]  ;;  %v2287_v4 = vpack.c.bf16 %v3834_v32, %v3831_v31 }
 0xe81   : > { %v1957_v39 = vmul.f32 %v3783_v36, %v1950_v37  ;;  %v2270_v36 = vpack.c.bf16 %v3799_v6, %v3796_v34  ;;  %v3801_v37 = vld [vmem:[%s6621_s1 + $0x1e8] sm:$0xff]  ;;  %v2273_v46 = vpack.c.bf16 %v3805_v51, %v3802_v8  ;;  %v3830_v34 = vld [vmem:[%s6621_s1 + $0x2d0] sm:$0xff]  ;;  %v3787_v8 = vld [vmem:[%s6564_s19] ss:$0 sm:$0xff] }
 0xe82   : > { %4076 = vmatpush3.bf16.msra.mxu1 %v2109_v45  ;;  %v2271_v45 = vpack.c.bf16 %v3803_v18, %v3800_v44  ;;  %v3833_v6 = vld [vmem:[%s6621_s1 + $0x2e8] sm:$0xff]  ;;  %v3786_v44 = vld [vmem:[%s6563_s18] ss:$0 sm:$0xff] }
 0xe83   : > { %v1964_v40 = vadd.f32 %v3784_v38, %v1957_v39  ;;  %4077 = vmatprep.subr.bf16.mxu1 %v2118_v47  ;;  %v3804_v38 = vld [vmem:[%s6621_s1 + $0x200] sm:$0xff]  ;;  %v3807_v47 = vld [vmem:[%s6621_s1 + $0x218] sm:$0xff] }
 0xe84   : > { %v2272_v39 = vpack.c.bf16 %v3804_v38, %v3801_v37  ;;  %v2275_v49 = vpack.c.bf16 %v3810_v48, %v3807_v47  ;;  %v3835_v37 = vld [vmem:[%s6621_s1 + $0x2f8] sm:$0xff] }
 0xe85   : > { %v1997_v55 = vpack.c.bf16 %v1964_v40, %v1964_v40 }
 0xe86   : > { %4078 = vmatpush3.bf16.msra.mxu1 %v2110_v50  ;;  %v3806_v50 = vld [vmem:[%s6621_s1 + $0x210] sm:$0xff] }
 0xe87   : > { %2059 = vmatmul.mubr.bf16.vlgmr.msra.gmra.mrb[28].mxu0 %v1997_v55  ;;  %4302 = vmatprep.subr.bf16.mxu1 %v4596_v54 }
 0xe88   : > { %2337 = vmatprep.mubr.bf16.mxu0 %v4595_v7  ;;  %2306 = vmatpush1.bf16.msra.mxu0 %v2265_v28  ;;  %v3826_v28 = vld [vmem:[%s6621_s1 + $0x2b0] sm:$0xff] }
 0xe89   : > { %2307 = vmatprep.subr.bf16.mxu0 %v2269_v33  ;;  %v2285_v33 = vpack.c.bf16 %v3829_v30, %v3826_v28 }
 0xe8c   : > { %2308 = vmatpush1.bf16.msra.mxu0 %v2268_v35  ;;  %v3832_v35 = vld [vmem:[%s6621_s1 + $0x2e0] sm:$0xff] }
 0xe8d   : > { %2309 = vmatprep.subr.bf16.mxu0 %v2272_v39  ;;  %v2288_v38 = vpack.c.bf16 %v3835_v37, %v3832_v35 }
 0xe90   : > { %2310 = vmatpush1.bf16.msra.mxu0 %v2271_v45 }
 0xe91   : > { %2311 = vmatprep.subr.bf16.mxu0 %v2275_v49 }
 0xf5a   : > { %v2060_v62 = vpop.f32.mrb[28].mxu0 }
 0xf5b   : > { %v2061_v63 = vadd.f32 %v2060_v62, %v2019_v60  ;;  %v2062_v1 = vpop.f32.mrb[29].mxu0  ;;  %v3808_v60 = vld [vmem:[%s6621_s1 + $0x220] sm:$0xff]  ;;  %v3811_v62 = vld [vmem:[%s6621_s1 + $0x238] sm:$0xff] }
 0xf5c   : > { %v2063_v2 = vadd.f32 %v2062_v1, %v2023_v61  ;;  %v2064_v5 = vpop.f32.mrb[30].mxu0  ;;  %v2274_v61 = vpack.c.bf16 %v3809_v52, %v3806_v50  ;;  %v3813_v1 = vld [vmem:[%s6621_s1 + $0x248] sm:$0xff] }
 0xf5d   : > { %v2067_v9 = vmax.f32 %v2061_v63, 0.0  ;;  %v2065_v3 = vpop.f32.mrb[31].mxu0  ;;  %v2276_v63 = vpack.c.bf16 %v3811_v62, %v3808_v60 }
 0xf5e   : > { %v2068_v10 = vmax.f32 %v2063_v2, 0.0  ;;  %2312 = vmatpush1.bf16.msra.mxu0 %v2274_v61  ;;  %v3816_v2 = vld [vmem:[%s6621_s1 + $0x260] sm:$0xff]  ;;  %v3815_v3 = vld [vmem:[%s6621_s1 + $0x258] sm:$0xff] }
 0xf5f   : > { %v2101_v12 = vpack.c.bf16 %v2067_v9, %v2067_v9  ;;  %v2278_v5 = vpack.c.bf16 %v3816_v2, %v3813_v1  ;;  %v3812_v9 = vld [vmem:[%s6621_s1 + $0x240] sm:$0xff] }
 0xf60   : > { %v2102_v11 = vpack.c.bf16 %v2068_v10, %v2068_v10  ;;  %v3814_v10 = vld [vmem:[%s6621_s1 + $0x250] sm:$0xff] }
 0xf61   : > { %2313 = vmatprep.subr.bf16.mxu0 %v2278_v5 }
 0xf62   : > { %2158 = vmatprep.mubr.bf16.mxu1 %v2102_v11  ;;  %v2277_v11 = vpack.c.bf16 %v3815_v3, %v3812_v9 }
 0xf63   : > { %2159 = vmatmul.mubr.bf16.vlgmr.msra.gmra.mrb[40].mxu1 %v2101_v12  ;;  %v3817_v12 = vld [vmem:[%s6621_s1 + $0x268] sm:$0xff] }
 0xf64   : > { %4318 = vmatprep.mubr.msk.bf16.mxu1 %vm4597_vm0, %v4596_v54  ;;  %4303 = vmatpush3.bf16.msra.mxu1 %v2267_v29  ;;  %v2283_v29 = vpack.c.bf16 %v3827_v27, %v3824_v26 }
 0xf65   : > { %4304 = vmatprep.subr.bf16.mxu1 %v4596_v54  ;;  %2314 = vmatpush1.bf16.msra.mxu0 %v2277_v11 }
 0xf68   : > { %4305 = vmatpush3.bf16.msra.mxu1 %v2270_v36  ;;  %v2286_v36 = vpack.c.bf16 %v3833_v6, %v3830_v34 }
 0xf69   : > { %4306 = vmatprep.subr.bf16.mxu1 %v4596_v54 }
 0xf6c   : > { %4307 = vmatpush3.bf16.msra.mxu1 %v2273_v46 }
 0xf6d   : > { %4308 = vmatprep.subr.bf16.mxu1 %v4596_v54 }
 0xf70   : > { %4309 = vmatpush3.bf16.msra.mxu1 %v2276_v63 }
 0xf71   : > { %4310 = vmatprep.subr.bf16.mxu1 %v4596_v54 }
0x1036   : > { %v4079_v58 = vpop.f32.mrb[40].mxu1 }
0x1037   : > { %v4080_v13 = vpop.f32.mrb[41].mxu1 }
0x1038   : > { %v4081_v15 = vadd.f32 %v4080_v13, %v4079_v58  ;;  %v4082_v16 = vpop.f32.mrb[42].mxu1  ;;  %v2279_v58 = vpack.c.bf16 %v3817_v12, %v3814_v10  ;;  %v3822_v13 = vld [vmem:[%s6621_s1 + $0x290] sm:$0xff] }
0x1039   : > { %v4083_v17 = vpop.f32.mrb[43].mxu1  ;;  %v3818_v16 = vld [vmem:[%s6621_s1 + $0x270] sm:$0xff] }
0x103a   : > { %v2161_v19 = vadd.f32 %v4081_v15, %v3785_v14  ;;  %v3819_v14 = vld [vmem:[%s6621_s1 + $0x278] sm:$0xff]  ;;  %4311 = vmatpush3.bf16.msra.mxu1 %v2279_v58  ;;  %v3821_v17 = vld [vmem:[%s6621_s1 + $0x288] sm:$0xff] }
0x103b   : > { %v2281_v15 = vpack.c.bf16 %v3822_v13, %v3819_v14  ;;  %4312 = vmatprep.subr.bf16.mxu1 %v4596_v54 }
0x103c   : > { %v2166_v20 = vadd.f32 %v2161_v19, %v1964_v40  ;;  %v3820_v19 = vld [vmem:[%s6621_s1 + $0x280] sm:$0xff] }
0x103d   : > { %2315 = vmatprep.subr.bf16.mxu0 %v2281_v15  ;;  %v2282_v22 = vpack.c.bf16 %v3823_v21, %v3820_v19 }
0x103e   : > { %2169 = vadd.xlane.f32.xlu1 %v2166_v20 }
0x103f   : > { %4313 = vmatpush3.bf16.msra.mxu1 %v2282_v22 }
0x1040   : > { %4314 = vmatprep.subr.bf16.mxu1 %v4596_v54 }
0x1043   : > { %4315 = vmatpush3.bf16.msra.mxu1 %v2285_v33 }
0x1044   : > { %4316 = vmatprep.subr.bf16.mxu1 %v4596_v54 }
0x1047   : > { %4317 = vmatpush3.bf16.msra.mxu1 %v2288_v38 }
0x1048   : > { %4328 = vmatprep.subr.bf16.mxu1 %v4596_v54 }
0x10cb   : > { %v2170_v40 = vpop.xlane.xlu1 %2169 }
0x10cc   : > { %v2171_v55 = vmul.f32 0.0078125, %v2170_v40 }
0x10ce   : > { %v5655_v42 = vsub.f32 %v2166_v20, %v2171_v55  ;;  %v2280_v20 = vpack.c.bf16 %v3821_v17, %v3818_v16 }
0x10d0   : > { %v2173_v43 = vmul.f32 %v5655_v42, %v5655_v42  ;;  %2316 = vmatpush1.bf16.msra.mxu0 %v2280_v20 }
0x10d1   : > { %2317 = vmatprep.subr.bf16.mxu0 %v2284_v25 }
0x10d2   : > { %2174 = vadd.xlane.f32.xlu1 %v2173_v43 }
0x10d4   : > { %2318 = vmatpush1.bf16.msra.mxu0 %v2283_v29 }
0x10d5   : > { %2319 = vmatprep.subr.bf16.mxu0 %v2287_v4 }
0x10d8   : > { %2320 = vmatpush1.bf16.msra.mxu0 %v2286_v36 }
0x10d9   : > { %4322 = vmatprep.subr.bf16.mxu0 %v4596_v54 }
0x115f   : > { %v2175_v39 = vpop.xlane.xlu1 %2174 }
0x1160   : > { %v2176_v40 = vmul.f32 0.0078125, %v2175_v39 }
0x1162   : > { %v2177_v55 = vadd.f32 1e-05, %v2176_v40 }
0x1164   : > { %4507 = vrsqrt.f32 %v2177_v55 }
0x116e   : > { %v4508_v43 = vpop.eup %4507 }
0x116f   : > { %v2179_v18 = vmul.f32 %v4508_v43, %v5655_v42  ;;  %v3836_v42 = vld [vmem:[%s6624_s30 + $0x3] sm:$0x7] }
0x1170   : > { %v2293_v47 = vrot.slane %v3836_v42, %v4915_v59  ;;  %v2301_v48 = vrot.slane %v3836_v42, %v5119_v0  ;;  %v2297_v49 = vrot.slane %v3836_v42, %v4907_v57  ;;  %v3843_v42 = vld [vmem:[%s6632_s5 + $0xb0] sm:$0xff] }
0x1171   : > { %v2186_v45 = vmul.f32 %v3786_v44, %v2179_v18 }
0x1173   : > { %v5775_v51 = vadd.f32 %v3787_v8, %v2186_v45  ;;  %v3841_v45 = vld [vmem:[%s6632_s5 + $0xa0] sm:$0xff] }
0x1175   : > { %v2264_v46 = vpack.c.bf16 %v5775_v51, %v5775_v51 }
0x1177   : > { %2338 = vmatmul.mubr.bf16.vlgmr.msra.gmra.mrb[32].mxu0 %v2264_v46  ;;  %4319 = vmatmul.mubr.bf16.vlgmr.msra.gmra.mrb[44].mxu1 %v2264_v46  ;;  %v3842_v46 = vld [vmem:[%s6632_s5 + $0xa8] sm:$0xff] }
0x1178   : > { %4324 = vmatprep.mubr.msk.bf16.mxu0 %vm4597_vm0, %v4596_v54  ;;  %4330 = vmatprep.mubr.msk.bf16.mxu1 %vm4597_vm0, %v4596_v54 }
0x124a   : > { %v2339_v50 = vpop.f32.mrb[32].mxu0  ;;  %v2380_v52 = vpop.f32.mrb[44].mxu1 }
0x124b   : > { %v2340_v60 = vadd.f32 %v2339_v50, %v2293_v47  ;;  %v2381_v61 = vadd.f32 %v2380_v52, %v2301_v48  ;;  %v2341_v62 = vpop.f32.mrb[33].mxu0  ;;  %v4320_v63 = vpop.f32.mrb[45].mxu1  ;;  %v2614_v47 = vpack.c.bf16 %v3842_v46, %v3841_v45  ;;  %v3844_v48 = vld [vmem:[%s6632_s5 + $0xb8] sm:$0xff]  ;;  %v3837_v52 = vld [vmem:[%s6632_s5 + $0x80] sm:$0xff] }
0x124c   : > { %v2342_v1 = vadd.f32 %v2341_v62, %v2297_v49  ;;  %v2343_v2 = vpop.f32.mrb[34].mxu0  ;;  %v2383_v5 = vpop.f32.mrb[46].mxu1  ;;  %v2615_v49 = vpack.c.bf16 %v3844_v48, %v3843_v42 }
0x124d   : > { %v5789_v9 = vpack.c.bf16 %v2340_v60, %v2340_v60  ;;  %v5791_v3 = vpack.c.bf16 %v2381_v61, %v2381_v61  ;;  %v2344_v10 = vpop.f32.mrb[35].mxu0  ;;  %v4321_v11 = vpop.f32.mrb[47].mxu1  ;;  %v3838_v60 = vld [vmem:[%s6632_s5 + $0x88] sm:$0xff]  ;;  %v3839_v2 = vld [vmem:[%s6632_s5 + $0x90] sm:$0xff]  ;;  %v3840_v5 = vld [vmem:[%s6632_s5 + $0x98] sm:$0xff] }
0x124e   : > { %v5793_v12 = vpack.c.bf16 %v2342_v1, %v2342_v1  ;;  %v2496_v63 = vpack.c.bf16 %v3838_v60, %v3837_v52  ;;  %v2497_v10 = vpack.c.bf16 %v3840_v5, %v3839_v2  ;;  %v3847_v60 = vld [vmem:[%s6632_s5 + $0xd0] sm:$0xff] }
0x124f   : > { %2499 = vrot.lane.b32.xlu0 %v5789_v9, %s6630_s7  ;;  %v2453_v58 = vsel %vm1196_vm7, %v5791_v3, 0 }
0x1250   : > { %4329 = vmatpush3.bf16.msra.mxu1 %v2453_v58  ;;  %2502 = vrot.lane.b32.xlu1 %v5793_v12, %s6630_s7  ;;  %v2392_v14 = vsel %vm1130_vm1, %v5793_v12, 0 }
0x1251   : > { %4323 = vmatpush3.bf16.xpose.msra.mxu0 %v2392_v14  ;;  %4340 = vmatprep.subr.bf16.mxu1 %v4596_v54 }
0x1252   : > { %4334 = vmatprep.subr.bf16.mxu0 %v4596_v54 }
0x1258   : > { %4325 = vmatmul.mubr.msk.bf16.vlgmr.msra.gmra.mrb[36].mxu0 %vm1130_vm1, %v5789_v9 }
0x1259   : > { %4336 = vmatprep.mubr.msk.bf16.mxu0 %vm4597_vm0, %v4596_v54 }
0x12c1   : > { %v2500_v16 = vpop.permute.xlu0 %2499 }
0x12c2   : > { %v2503_v13 = vpop.permute.xlu1 %2502 }
0x12c3   : > { %v2508_v15 = vsel %vm1130_vm1, %v2503_v13, 0 }
0x12c4   : > { %4335 = vmatpush3.bf16.xpose.msra.mxu0 %v2508_v15 }
0x12c5   : > { %4346 = vmatprep.subr.bf16.mxu0 %v4596_v54 }
0x12cb   : > { %4337 = vmatmul.mubr.msk.bf16.vlgmr.msra.gmra.mrb[40].mxu0 %vm1130_vm1, %v2500_v16 }
0x12cc   : > { %4350 = vmatprep.mubr.msk.bf16.mxu0 %vm4597_vm0, %v4596_v54  ;;  %4347 = vmatpush3.bf16.msra.mxu0 %v2614_v47 }
0x12cd   : > { %4348 = vmatprep.subr.bf16.mxu0 %v4596_v54 }
0x12d0   : > { %4349 = vmatpush3.bf16.msra.mxu0 %v2615_v49 }
0x12d1   : > { %4362 = vmatprep.subr.bf16.mxu0 %v4596_v54 }
0x132b   : > { %v2428_v17 = vpop.f32.mrb[36].mxu0 }
0x132c   : > { %v2434_v19 = vmul.f32 0.17677669, %v2428_v17  ;;  %v4326_v20 = vpop.f32.mrb[37].mxu0 }
0x132d   : > { %v2431_v21 = vpop.f32.mrb[38].mxu0 }
0x132e   : > { %v4327_v22 = vpop.f32.mrb[39].mxu0  ;;  %v2435_v23 = vsel %vm5108_vm5, %v2434_v19, -1e+30 }
0x132f   : > { %v2436_v24 = vsel %vm1179_vm6, %v2435_v23, -inf }
0x1330   : > { %2437 = vmax.xlane.f32.xlu1 %v2436_v24 }
0x139e   : > { %v2544_v25 = vpop.f32.mrb[40].mxu0 }
0x139f   : > { %v2550_v26 = vmul.f32 0.17677669, %v2544_v25  ;;  %v4338_v27 = vpop.f32.mrb[41].mxu0 }
0x13a0   : > { %v2547_v28 = vpop.f32.mrb[42].mxu0 }
0x13a1   : > { %v4339_v29 = vpop.f32.mrb[43].mxu0  ;;  %v2551_v30 = vsel %vm5108_vm5, %v2550_v26, -1e+30 }
0x13a2   : > { %v2552_v31 = vsel %vm1179_vm6, %v2551_v30, -inf }
0x13a3   : > { %2553 = vmax.xlane.f32.xlu0 %v2552_v31 }
0x13bd   : > { %v2438_v32 = vpop.xlane.xlu1 %2437 }
0x13be   : > { %v2439_v33 = vsub.f32 %v2435_v23, %v2438_v32 }
0x13c0   : > { %v2440_v4 = vmul.f32 1.442695, %v2439_v33 }
0x13c2   : > { %4509 = vpow2.f32 %v2440_v4 }
0x13cc   : > { %v4510_v34 = vpop.eup %4509 }
0x13cd   : > { %v2442_v6 = vsel %vm1179_vm6, %v4510_v34, 0.0 }
0x13ce   : > { %2443 = vadd.xlane.f32.xlu1 %v2442_v6 }
0x13df   : > { %2565 = vrot.lane.b32.xlu1 %v5791_v3, %s6630_s7  ;;  %s6638_s7 = sld [smem:[#allocation6_spill]] }
0x13e3   : > { %2702 = vrot.lane.b32.xlu1 %v5789_v9, %s6636_s27 }
0x13e5   : > { %s804_s3 = sand.u32 1, %s6638_s7  }
0x13e6   : > { %s3765_s10 = sshll.u32 %s804_s3, 5  ;;  %s3667_s28 = scalar_lea.sflag [#allocation3], %s804_s3 }
0x13e7   : > { %s806_s2 = scalar_lea.vmem [#allocation2], %s3765_s10 }
0x13e8   : > { %s3681_s26 = sshll.u32 %s806_s2, 4  ;;  %s6505_s26 = int_to_ptr.vmem [resolvable:$true] %s3681_s26 }
0x13e9   : > { %s4531_s10 = scalar_lea.vmem %s6505_s26, 512 }
0x13ea   : > { %p4532_p11 = scmp.ne.s32.totalorder %s6505_s26, %s4531_s10 }
0x13ec   : > { %p4533_p12 = pnand %p4532_p11, %p4775_p5 }
0x13ee   : > { %p4534_p13 = pneg %p4533_p12 }
0x1430   : > { %v2554_v35 = vpop.xlane.xlu0 %2553 }
0x1431   : > { %v2555_v36 = vsub.f32 %v2551_v30, %v2554_v35 }
0x1433   : > { %v2556_v37 = vmul.f32 1.442695, %v2555_v36 }
0x1435   : > { %4511 = vpow2.f32 %v2556_v37 }
0x143f   : > { %v4512_v38 = vpop.eup %4511 }
0x1440   : > { %v2558_v39 = vsel %vm1179_vm6, %v4512_v38, 0.0 }
0x1441   : > { %2559 = vadd.xlane.f32.xlu0 %v2558_v39 }
0x1457   : > { %2704 = vrot.lane.b32.xlu0 %v5793_v12, %s6636_s27 }
0x145b   : > { %v2444_v40 = vpop.xlane.xlu1 %2443 }
0x145c   : > { %4513 = vrcp.f32 %v2444_v40 }
0x145f   : > { %v2566_v44 = vpop.permute.xlu1 %2565 }
0x1460   : > { %v2571_v8 = vsel %vm1196_vm7, %v2566_v44, 0 }
0x1463   : > { %v2703_v24 = vpop.permute.xlu1 %2702 }
0x1466   : > { %v4514_v55 = vpop.eup %4513 }
0x1467   : > { %v2446_v43 = vmul.f32 %v4514_v55, %v4510_v34 }
0x1469   : > { %v2447_v18 = vpack.c.bf16 %v2446_v43, %v2446_v43 }
0x146b   : > { %4331 = vmatmul.mubr.msk.bf16.vlgmr.msra.gmra.mrb[48].mxu1 %vm1179_vm6, %v2447_v18  ;;  %v3845_v18 = vld [vmem:[%s6632_s5 + $0xc0] sm:$0xff] }
0x146c   : > { %4341 = vmatpush3.bf16.msra.mxu1 %v2571_v8  ;;  %4342 = vmatprep.mubr.msk.bf16.mxu1 %vm4597_vm0, %v4596_v54 }
0x146d   : > { %4354 = vmatprep.subr.bf16.mxu1 %v4596_v54 }
0x14ce   : > { %v2560_v50 = vpop.xlane.xlu0 %2559 }
0x14cf   : > { %4515 = vrcp.f32 %v2560_v50 }
0x14d2   : > { %v2705_v16 = vpop.permute.xlu0 %2704 }
0x14d3   : > { %v2710_v22 = vsel %vm1130_vm1, %v2705_v16, 0 }
0x14d9   : > { %v4516_v61 = vpop.eup %4515 }
0x14da   : > { %v2562_v62 = vmul.f32 %v4516_v61, %v4512_v38  ;;  %v3848_v61 = vld [vmem:[%s6632_s5 + $0xd8] sm:$0xff] }
0x14dc   : > { %v2563_v1 = vpack.c.bf16 %v2562_v62, %v2562_v62  ;;  %v2816_v62 = vpack.c.bf16 %v3848_v61, %v3847_v60  ;;  %v3886_v60 = vld [vmem:[%s6633_s8 + $0xf8] sm:$0xff] }
0x14de   : > { %4343 = vmatmul.mubr.msk.bf16.vlgmr.msra.gmra.mrb[52].mxu1 %vm1179_vm6, %v2563_v1 }
0x14df   : > { %4355 = vmatpush3.bf16.msra.mxu1 %v2496_v63  ;;  %4358 = vmatprep.mubr.msk.bf16.mxu1 %vm4597_vm0, %v4596_v54 }
0x14e0   : > { %4356 = vmatprep.subr.bf16.mxu1 %v4596_v54 }
0x14e3   : > { %4357 = vmatpush3.bf16.msra.mxu1 %v2497_v10 }
0x14e4   : > { %4368 = vmatprep.subr.bf16.mxu1 %v4596_v54 }
0x153e   : > { %v2489_v11 = vpop.f32.mrb[48].mxu1 }
0x153f   : > { %v2495_v58 = vpack.c.bf16 %v2489_v11, %v2489_v11  ;;  %v4332_v14 = vpop.f32.mrb[49].mxu1 }
0x1540   : > { %v2492_v13 = vpop.f32.mrb[50].mxu1 }
0x1541   : > { %v4333_v15 = vpop.f32.mrb[51].mxu1  ;;  %4359 = vmatmul.mubr.msk.bf16.vlgmr.msra.gmra.mrb[56].mxu1 %vm1130_vm1, %v2495_v58 }
0x1542   : > { %4370 = vmatprep.mubr.msk.bf16.mxu1 %vm4597_vm0, %v4596_v54 }
0x15b1   : > { %v2607_v17 = vpop.f32.mrb[52].mxu1 }
0x15b2   : > { %v2613_v19 = vpack.c.bf16 %v2607_v17, %v2607_v17  ;;  %v4344_v20 = vpop.f32.mrb[53].mxu1 }
0x15b3   : > { %v2610_v21 = vpop.f32.mrb[54].mxu1 }
0x15b4   : > { %v4345_v23 = vpop.f32.mrb[55].mxu1  ;;  %4351 = vmatmul.mubr.msk.bf16.vlgmr.msra.gmra.mrb[44].mxu0 %vm1130_vm1, %v2613_v19 }
0x15b5   : > { %4363 = vmatpush3.bf16.xpose.msra.mxu0 %v2710_v22  ;;  %4364 = vmatprep.mubr.msk.bf16.mxu0 %vm4597_vm0, %v4596_v54 }
0x15b6   : > { %4374 = vmatprep.subr.bf16.mxu0 %v4596_v54 }
0x15bc   : > { %4365 = vmatmul.mubr.msk.bf16.vlgmr.msra.gmra.mrb[48].mxu0 %vm1130_vm1, %v2703_v24 }
0x15bd   : > { %4378 = vmatprep.mubr.msk.bf16.mxu0 %vm4597_vm0, %v4596_v54 }
0x1614   : > { %v2696_v25 = vpop.f32.mrb[56].mxu1 }
0x1615   : > { %v4360_v26 = vpop.f32.mrb[57].mxu1 }
0x1616   : > { %v2699_v27 = vpop.f32.mrb[58].mxu1 }
0x1617   : > { %v4361_v28 = vpop.f32.mrb[59].mxu1 }
0x1687   : > { %v2653_v29 = vpop.f32.mrb[44].mxu0 }
0x1688   : > { %v5875_v30 = vadd.f32 %v2696_v25, %v2653_v29  ;;  %v4352_v31 = vpop.f32.mrb[45].mxu0  ;;  %v3849_v29 = vld [vmem:[%s6632_s5 + $0xe0] sm:$0xff] }
0x1689   : > { %v2656_v32 = vpop.f32.mrb[46].mxu0  ;;  %v3850_v31 = vld [vmem:[%s6632_s5 + $0xe8] sm:$0xff] }
0x168a   : > { %v4353_v33 = vpop.f32.mrb[47].mxu0  ;;  %v2974_v32 = vpack.c.bf16 %v3850_v31, %v3849_v29  ;;  %v3900_v31 = vld [vmem:[%s6557_s12 + $0xe0] sm:$0xff] }
0x168f   : > { %v2746_v4 = vpop.f32.mrb[48].mxu0 }
0x1690   : > { %v2752_v34 = vmul.f32 0.17677669, %v2746_v4  ;;  %v4366_v6 = vpop.f32.mrb[49].mxu0  ;;  %v3872_v4 = vld [vmem:[%s6633_s8 + $0x88] sm:$0xff] }
0x1691   : > { %v2749_v35 = vpop.f32.mrb[50].mxu0 }
0x1692   : > { %v4367_v36 = vpop.f32.mrb[51].mxu0  ;;  %v2753_v37 = vsel %vm5108_vm5, %v2752_v34, -1e+30 }
0x1693   : > { %v2754_v38 = vsel %vm1179_vm6, %v2753_v37, -inf }
0x1694   : > { %2755 = vmax.xlane.f32.xlu1 %v2754_v38  ;;  %v3874_v38 = vld [vmem:[%s6633_s8 + $0x98] sm:$0xff] }
0x16a5   : > { %2863 = vrot.lane.b32.xlu1 %v5793_v12, %s6637_s9  ;;  %v3846_v12 = vld [vmem:[%s6632_s5 + $0xc8] sm:$0xff] }
0x16a9   : > { %2861 = vrot.lane.b32.xlu1 %v5789_v9, %s6637_s9  ;;  %v2815_v9 = vpack.c.bf16 %v3846_v12, %v3845_v18  ;;  %v3878_v18 = vld [vmem:[%s6633_s8 + $0xb8] sm:$0xff] }
0x16ab   : > { %4375 = vmatpush3.bf16.msra.mxu0 %v2815_v9  ;;  %v3879_v9 = vld [vmem:[%s6633_s8 + $0xc0] sm:$0xff] }
0x16ac   : > { %4376 = vmatprep.subr.bf16.mxu0 %v4596_v54 }
0x16af   : > { %4377 = vmatpush3.bf16.msra.mxu0 %v2816_v62  ;;  %v3851_v62 = vld [vmem:[%s6632_s5 + $0xf0] sm:$0xff] }
0x16b0   : > { %4388 = vmatprep.subr.bf16.mxu0 %v4596_v54 }
0x1721   : > { %v2756_v39 = vpop.xlane.xlu1 %2755 }
0x1722   : > { %v2757_v40 = vsub.f32 %v2753_v37, %v2756_v39  ;;  %v3873_v37 = vld [vmem:[%s6633_s8 + $0x90] sm:$0xff] }
0x1723   : > { %v3075_v39 = vpack.c.bf16 %v3874_v38, %v3873_v37 }
0x1724   : > { %v2758_v55 = vmul.f32 1.442695, %v2757_v40  ;;  %v3875_v40 = vld [vmem:[%s6633_s8 + $0xa0] sm:$0xff] }
0x1725   : > { %v2864_v48 = vpop.permute.xlu1 %2863 }
0x1726   : > { %4517 = vpow2.f32 %v2758_v55  ;;  %v2869_v50 = vsel %vm1130_vm1, %v2864_v48, 0  ;;  %v3876_v55 = vld [vmem:[%s6633_s8 + $0xa8] sm:$0xff]  ;;  %v3883_v48 = vld [vmem:[%s6633_s8 + $0xe0] sm:$0xff] }
0x1729   : > { %v2862_v52 = vpop.permute.xlu1 %2861 }
0x1730   : > { %v4518_v43 = vpop.eup %4517 }
0x1731   : > { %v2760_v44 = vsel %vm1179_vm6, %v4518_v43, 0.0 }
0x1732   : > { %2761 = vadd.xlane.f32.xlu0 %v2760_v44  ;;  %v3877_v44 = vld [vmem:[%s6633_s8 + $0xb0] sm:$0xff] }
0x1733   : > { %v3077_v12 = vpack.c.bf16 %v3878_v18, %v3877_v44 }
0x1748   : > { %2766 = vrot.lane.b32.xlu0 %v5791_v3, %s6636_s27  ;;  %s6640_s27 = sld [smem:[#allocation25_spill]] }
0x17bf   : > { %v2762_v8 = vpop.xlane.xlu0 %2761 }
0x17c0   : > { %4519 = vrcp.f32 %v2762_v8  ;;  %v3880_v8 = vld [vmem:[%s6633_s8 + $0xc8] sm:$0xff] }
0x17c3   : > { %v2767_v45 = vpop.permute.xlu0 %2766 }
0x17c4   : > { %v2772_v46 = vsel %vm1196_vm7, %v2767_v45, 0  ;;  %v3078_v45 = vpack.c.bf16 %v3880_v8, %v3879_v9 }
0x17c5   : > { %4369 = vmatpush3.bf16.msra.mxu1 %v2772_v46  ;;  %v3881_v46 = vld [vmem:[%s6633_s8 + $0xd0] sm:$0xff] }
0x17c6   : > { %4382 = vmatprep.subr.bf16.mxu1 %v4596_v54 }
0x17ca   : > { %v4520_v42 = vpop.eup %4519 }
0x17cb   : > { %v2764_v47 = vmul.f32 %v4520_v42, %v4518_v43  ;;  %v3076_v43 = vpack.c.bf16 %v3876_v55, %v3875_v40  ;;  %v3882_v42 = vld [vmem:[%s6633_s8 + $0xd8] sm:$0xff]  ;;  %v3866_v55 = vld [vmem:[%s6635_s0 + $0x1] ss:$0 sm:$0xff] }
0x17cd   : > { %v2765_v49 = vpack.c.bf16 %v2764_v47, %v2764_v47  ;;  %v3079_v47 = vpack.c.bf16 %v3882_v42, %v3881_v46 }
0x17cf   : > { %4371 = vmatmul.mubr.msk.bf16.vlgmr.msra.gmra.mrb[60].mxu1 %vm1179_vm6, %v2765_v49  ;;  %v3884_v49 = vld [vmem:[%s6633_s8 + $0xe8] sm:$0xff] }
0x17d0   : > { %4383 = vmatpush3.bf16.xpose.msra.mxu1 %v2869_v50  ;;  %4384 = vmatprep.mubr.msk.bf16.mxu1 %vm4597_vm0, %v4596_v54  ;;  %v3080_v50 = vpack.c.bf16 %v3884_v49, %v3883_v48 }
0x17d1   : > { %4394 = vmatprep.subr.bf16.mxu1 %v4596_v54 }
0x17d7   : > { %4385 = vmatmul.mubr.msk.bf16.vlgmr.msra.gmra.mrb[64].mxu1 %vm1130_vm1, %v2862_v52  ;;  %v3885_v52 = vld [vmem:[%s6633_s8 + $0xf0] sm:$0xff] }
0x17d8   : > { %4398 = vmatprep.mubr.msk.bf16.mxu1 %vm4597_vm0, %v4596_v54  ;;  %4395 = vmatpush3.bf16.msra.mxu1 %v2974_v32  ;;  %v3081_v61 = vpack.c.bf16 %v3886_v60, %v3885_v52  ;;  %v3901_v32 = vld [vmem:[%s6557_s12 + $0xe8] sm:$0xff] }
0x17d9   : > { %4396 = vmatprep.subr.bf16.mxu1 %v4596_v54 }
0x18a2   : > { %v2808_v63 = vpop.f32.mrb[60].mxu1 }
0x18a3   : > { %v2814_v1 = vpack.c.bf16 %v2808_v63, %v2808_v63  ;;  %v4372_v2 = vpop.f32.mrb[61].mxu1  ;;  %v3852_v63 = vld [vmem:[%s6632_s5 + $0xf8] sm:$0xff] }
0x18a4   : > { %v2811_v5 = vpop.f32.mrb[62].mxu1  ;;  %v3888_v2 = vld [vmem:[%s6557_s12 + $0x80] sm:$0xff] }
0x18a5   : > { %v4373_v10 = vpop.f32.mrb[63].mxu1  ;;  %4379 = vmatmul.mubr.msk.bf16.vlgmr.msra.gmra.mrb[52].mxu0 %vm1130_vm1, %v2814_v1  ;;  %v2975_v1 = vpack.c.bf16 %v3852_v63, %v3851_v62 }
0x18a6   : > { %4390 = vmatprep.mubr.msk.bf16.mxu0 %vm4597_vm0, %v4596_v54 }
0x18a7   : > { %4397 = vmatpush3.bf16.msra.mxu1 %v2975_v1 }
0x18a8   : > { %4422 = vmatprep.subr.bf16.mxu1 %v4596_v54 }
0x18aa   : > { %v2905_v11 = vpop.f32.mrb[64].mxu1 }
0x18ab   : > { %v2911_v58 = vmul.f32 0.17677669, %v2905_v11  ;;  %v4386_v14 = vpop.f32.mrb[65].mxu1 }
0x18ac   : > { %v2908_v13 = vpop.f32.mrb[66].mxu1  ;;  %v3890_v14 = vld [vmem:[%s6557_s12 + $0x90] sm:$0xff] }
0x18ad   : > { %v4387_v15 = vpop.f32.mrb[67].mxu1  ;;  %v2912_v16 = vsel %vm5108_vm5, %v2911_v58, -1e+30  ;;  %v3891_v13 = vld [vmem:[%s6557_s12 + $0x98] sm:$0xff] }
0x18ae   : > { %v2913_v17 = vsel %vm1179_vm6, %v2912_v16, -inf }
0x18af   : > { %2914 = vmax.xlane.f32.xlu0 %v2913_v17  ;;  %v3143_v17 = vpack.c.bf16 %v3891_v13, %v3890_v14  ;;  %v3910_v14 = vld [vmem:[%s6565_s20 + $0x108] sm:$0xff]  ;;  %v3912_v13 = vld [vmem:[%s6565_s20 + $0x118] sm:$0xff] }
0x18c5   : > { %2925 = vrot.lane.b32.xlu0 %v5791_v3, %s6637_s9 }
0x193c   : > { %v2915_v19 = vpop.xlane.xlu0 %2914 }
0x193d   : > { %v2916_v20 = vsub.f32 %v2912_v16, %v2915_v19  ;;  %v3892_v19 = vld [vmem:[%s6557_s12 + $0xa0] sm:$0xff] }
0x193f   : > { %v2917_v21 = vmul.f32 1.442695, %v2916_v20  ;;  %v3893_v20 = vld [vmem:[%s6557_s12 + $0xa8] sm:$0xff] }
0x1940   : > { %v2926_v22 = vpop.permute.xlu0 %2925 }
0x1941   : > { %4521 = vpow2.f32 %v2917_v21  ;;  %v2931_v23 = vsel %vm1196_vm7, %v2926_v22, 0  ;;  %v3144_v21 = vpack.c.bf16 %v3893_v20, %v3892_v19  ;;  %v3894_v22 = vld [vmem:[%s6557_s12 + $0xb0] sm:$0xff]  ;;  %v3914_v19 = vld [vmem:[%s6565_s20 + $0x128] sm:$0xff]  ;;  %v3916_v20 = vld [vmem:[%s6565_s20 + $0x138] sm:$0xff] }
0x1942   : > { %4389 = vmatpush3.bf16.msra.mxu0 %v2931_v23  ;;  %v3895_v23 = vld [vmem:[%s6557_s12 + $0xb8] sm:$0xff] }
0x1943   : > { %4402 = vmatprep.subr.bf16.mxu0 %v4596_v54 }
0x194b   : > { %v4522_v24 = vpop.eup %4521 }
0x194c   : > { %v2919_v53 = vsel %vm1179_vm6, %v4522_v24, 0.0 }
0x194d   : > { %2920 = vadd.xlane.f32.xlu1 %v2919_v53  ;;  %v3896_v53 = vld [vmem:[%s6557_s12 + $0xc0] sm:$0xff] }
0x1978   : > { %v2854_v25 = vpop.f32.mrb[52].mxu0 }
0x1979   : > { %v5923_v26 = vadd.f32 %v2854_v25, %v5875_v30  ;;  %v4380_v27 = vpop.f32.mrb[53].mxu0  ;;  %v3871_v30 = vld [vmem:[%s6633_s8 + $0x80] sm:$0xff]  ;;  %v3897_v25 = vld [vmem:[%s6557_s12 + $0xc8] sm:$0xff] }
0x197a   : > { %v2857_v3 = vpop.f32.mrb[54].mxu0  ;;  %v3074_v35 = vpack.c.bf16 %v3872_v4, %v3871_v30  ;;  %v3146_v27 = vpack.c.bf16 %v3897_v25, %v3896_v53  ;;  %v3902_v30 = vld [vmem:[%s6557_s12 + $0xf0] sm:$0xff]  ;;  %v3903_v4 = vld [vmem:[%s6557_s12 + $0xf8] sm:$0xff]  ;;  %v3918_v53 = vld [vmem:[%s6565_s20 + $0x148] sm:$0xff] }
0x197b   : > { %v4381_v28 = vpop.f32.mrb[55].mxu0  ;;  %v3898_v3 = vld [vmem:[%s6557_s12 + $0xd0] sm:$0xff]  ;;  %v3920_v25 = vld [vmem:[%s6565_s20 + $0x158] sm:$0xff] }
0x197c   : > { %v3899_v28 = vld [vmem:[%s6557_s12 + $0xd8] sm:$0xff] }
0x197d   : > { %v3147_v29 = vpack.c.bf16 %v3899_v28, %v3898_v3  ;;  %v3265_v3 = vpack.c.bf16 %v3920_v25, %v3918_v53  ;;  %v3965_v53 = vld [vmem:[%s6567_s22 + $0x1b8] sm:$0xff] }
0x19da   : > { %v2921_v33 = vpop.xlane.xlu1 %2920 }
0x19db   : > { %4523 = vrcp.f32 %v2921_v33  ;;  %v3148_v33 = vpack.c.bf16 %v3901_v32, %v3900_v31 }
0x19e5   : > { %v4524_v34 = vpop.eup %4523 }
0x19e6   : > { %v2923_v6 = vmul.f32 %v4524_v34, %v4522_v24  ;;  %v3145_v24 = vpack.c.bf16 %v3895_v23, %v3894_v22  ;;  %v3149_v34 = vpack.c.bf16 %v3903_v4, %v3902_v30  ;;  %v3263_v22 = vpack.c.bf16 %v3916_v20, %v3914_v19  ;;  %v3913_v23 = vld [vmem:[%s6565_s20 + $0x120] sm:$0xff]  ;;  %v3919_v30 = vld [vmem:[%s6565_s20 + $0x150] sm:$0xff]  ;;  %v3963_v19 = vld [vmem:[%s6567_s22 + $0x1a8] sm:$0xff] }
0x19e8   : > { %v2924_v36 = vpack.c.bf16 %v2923_v6, %v2923_v6  ;;  %v3887_v6 = vld [vmem:[%s6556_s11 + $0x1] sm:$0x1] }
0x19ea   : > { %4391 = vmatmul.mubr.msk.bf16.vlgmr.msra.gmra.mrb[56].mxu0 %vm1179_vm6, %v2924_v36 }
0x19eb   : > { %4403 = vmatpush3.bf16.msra.mxu0 %v3074_v35  ;;  %4418 = vmatprep.mubr.msk.bf16.mxu0 %vm4597_vm0, %v4596_v54 }
0x19ec   : > { %4404 = vmatprep.subr.bf16.mxu0 %v4596_v54 }
0x19ef   : > { %4405 = vmatpush3.bf16.msra.mxu0 %v3075_v39 }
0x19f0   : > { %4406 = vmatprep.subr.bf16.mxu0 %v4596_v54 }
0x19f3   : > { %4407 = vmatpush3.bf16.msra.mxu0 %v3076_v43 }
0x19f4   : > { %4408 = vmatprep.subr.bf16.mxu0 %v4596_v54 }
0x19f7   : > { %4409 = vmatpush3.bf16.msra.mxu0 %v3077_v12 }
0x19f8   : > { %4410 = vmatprep.subr.bf16.mxu0 %v4596_v54 }
0x19fb   : > { %4411 = vmatpush3.bf16.msra.mxu0 %v3078_v45 }
0x19fc   : > { %4412 = vmatprep.subr.bf16.mxu0 %v4596_v54 }
0x19ff   : > { %4413 = vmatpush3.bf16.msra.mxu0 %v3079_v47 }
0x1a00   : > { %4414 = vmatprep.subr.bf16.mxu0 %v4596_v54 }
0x1a03   : > { %4415 = vmatpush3.bf16.msra.mxu0 %v3080_v50 }
0x1a04   : > { %4416 = vmatprep.subr.bf16.mxu0 %v4596_v54 }
0x1a07   : > { %4417 = vmatpush3.bf16.msra.mxu0 %v3081_v61 }
0x1a0a   : > { %4419 = vmatmul.mubr.bf16.vlgmr.msra.gmra.mrb[60].mxu0 %v5309_v41  ;;  %v3889_v41 = vld [vmem:[%s6557_s12 + $0x88] sm:$0xff] }
0x1a0b   : > { %3321 = vmatprep.mubr.bf16.mxu0 %v4595_v7  ;;  %v3142_v10 = vpack.c.bf16 %v3889_v41, %v3888_v2  ;;  %v3870_v41 = vld [vmem:[%s6560_s15 + $0x1] ss:$0 sm:$0xff] }
0x1abd   : > { %v2967_v5 = vpop.f32.mrb[56].mxu0 }
0x1abe   : > { %v2973_v11 = vpack.c.bf16 %v2967_v5, %v2967_v5  ;;  %v4392_v58 = vpop.f32.mrb[57].mxu0 }
0x1abf   : > { %v2970_v15 = vpop.f32.mrb[58].mxu0 }
0x1ac0   : > { %v4393_v16 = vpop.f32.mrb[59].mxu0  ;;  %4399 = vmatmul.mubr.msk.bf16.vlgmr.msra.gmra.mrb[68].mxu1 %vm1130_vm1, %v2973_v11  ;;  %v3909_v15 = vld [vmem:[%s6565_s20 + $0x100] sm:$0xff] }
0x1ac1   : > { %4423 = vmatpush3.bf16.msra.mxu1 %v3142_v10  ;;  %4438 = vmatprep.mubr.msk.bf16.mxu1 %vm4597_vm0, %v4596_v54  ;;  %v3261_v16 = vpack.c.bf16 %v3912_v13, %v3910_v14 }
0x1ac2   : > { %4424 = vmatprep.subr.bf16.mxu1 %v4596_v54 }
0x1ac3   : > { %3289 = vmatprep.subr.bf16.mxu0 %v3261_v16  ;;  %v3945_v16 = vld [vmem:[%s6567_s22 + $0x118] sm:$0xff] }
0x1ac5   : > { %4425 = vmatpush3.bf16.msra.mxu1 %v3143_v17  ;;  %v3911_v17 = vld [vmem:[%s6565_s20 + $0x110] sm:$0xff] }
0x1ac6   : > { %4426 = vmatprep.subr.bf16.mxu1 %v4596_v54 }
0x1ac9   : > { %4427 = vmatpush3.bf16.msra.mxu1 %v3144_v21  ;;  %v3260_v21 = vpack.c.bf16 %v3911_v17, %v3909_v15  ;;  %v3944_v15 = vld [vmem:[%s6567_s22 + $0x110] sm:$0xff]  ;;  %v3962_v17 = vld [vmem:[%s6567_s22 + $0x1a0] sm:$0xff] }
0x1aca   : > { %4428 = vmatprep.subr.bf16.mxu1 %v4596_v54  ;;  %v3368_v20 = vpack.c.bf16 %v3945_v16, %v3944_v15 }
0x1acb   : > { %3290 = vmatpush1.bf16.msra.mxu0 %v3260_v21  ;;  %v3377_v21 = vpack.c.bf16 %v3963_v19, %v3962_v17 }
0x1acc   : > { %3291 = vmatprep.subr.bf16.mxu0 %v3263_v22  ;;  %v3946_v22 = vld [vmem:[%s6567_s22 + $0x120] sm:$0xff] }
0x1acd   : > { %4429 = vmatpush3.bf16.msra.mxu1 %v3145_v24  ;;  %v3915_v24 = vld [vmem:[%s6565_s20 + $0x130] sm:$0xff] }
0x1ace   : > { %4430 = vmatprep.subr.bf16.mxu1 %v4596_v54 }
0x1ad1   : > { %4431 = vmatpush3.bf16.msra.mxu1 %v3146_v27  ;;  %v3262_v27 = vpack.c.bf16 %v3915_v24, %v3913_v23  ;;  %v3947_v23 = vld [vmem:[%s6567_s22 + $0x128] sm:$0xff]  ;;  %v3964_v24 = vld [vmem:[%s6567_s22 + $0x1b0] sm:$0xff] }
0x1ad2   : > { %4432 = vmatprep.subr.bf16.mxu1 %v4596_v54  ;;  %v3369_v25 = vpack.c.bf16 %v3947_v23, %v3946_v22 }
0x1ad3   : > { %3292 = vmatpush1.bf16.msra.mxu0 %v3262_v27  ;;  %v3378_v27 = vpack.c.bf16 %v3965_v53, %v3964_v24 }
0x1ad4   : > { %3293 = vmatprep.subr.bf16.mxu0 %v3265_v3  ;;  %v3948_v3 = vld [vmem:[%s6567_s22 + $0x130] sm:$0xff] }
0x1ad5   : > { %4433 = vmatpush3.bf16.msra.mxu1 %v3147_v29 }
0x1ad6   : > { %4434 = vmatprep.subr.bf16.mxu1 %v4596_v54 }
0x1ad9   : > { %4435 = vmatpush3.bf16.msra.mxu1 %v3148_v33  ;;  %v3917_v33 = vld [vmem:[%s6565_s20 + $0x140] sm:$0xff] }
0x1ada   : > { %4436 = vmatprep.subr.bf16.mxu1 %v4596_v54  ;;  %v3264_v4 = vpack.c.bf16 %v3919_v30, %v3917_v33 }
0x1adc   : > { %3294 = vmatpush1.bf16.msra.mxu0 %v3264_v4  ;;  %v3950_v4 = vld [vmem:[%s6567_s22 + $0x140] sm:$0xff] }
0x1add   : > { %v3118_v35 = vpop.f32.mrb[60].mxu0  ;;  %4437 = vmatpush3.bf16.msra.mxu1 %v3149_v34  ;;  %v3922_v34 = vld [vmem:[%s6565_s20 + $0x168] sm:$0xff] }
0x1ade   : > { %v3119_v36 = vadd.f32 %v3887_v6, %v3118_v35  ;;  %v4420_v37 = vpop.f32.mrb[61].mxu0  ;;  %v3924_v6 = vld [vmem:[%s6565_s20 + $0x178] sm:$0xff] }
0x1adf   : > { %v3121_v38 = vpop.f32.mrb[62].mxu0  ;;  %v3267_v35 = vpack.c.bf16 %v3924_v6, %v3922_v34  ;;  %v3923_v37 = vld [vmem:[%s6565_s20 + $0x170] sm:$0xff]  ;;  %v3951_v34 = vld [vmem:[%s6567_s22 + $0x148] sm:$0xff] }
0x1ae0   : > { %v3141_v39 = vpack.c.bf16 %v3119_v36, %v3119_v36  ;;  %v4421_v40 = vpop.f32.mrb[63].mxu0  ;;  %v3921_v36 = vld [vmem:[%s6565_s20 + $0x160] sm:$0xff]  ;;  %v3968_v6 = vld [vmem:[%s6567_s22 + $0x1d0] sm:$0xff] }
0x1ae1   : > { %v3266_v38 = vpack.c.bf16 %v3923_v37, %v3921_v36  ;;  %3295 = vmatprep.subr.bf16.mxu0 %v3267_v35  ;;  %v3928_v40 = vld [vmem:[%s6565_s20 + $0x198] sm:$0xff]  ;;  %v3371_v36 = vpack.c.bf16 %v3951_v34, %v3950_v4  ;;  %v3463_v34 = vld [vmem:[%s6569_s24 + $0x10] sm:$0xff] }
0x1ae2   : > { %4439 = vmatmul.mubr.bf16.vlgmr.msra.gmra.mrb[72].mxu1 %v3141_v39  ;;  %v3926_v39 = vld [vmem:[%s6565_s20 + $0x188] sm:$0xff]  ;;  %v3969_v35 = vld [vmem:[%s6567_s22 + $0x1d8] sm:$0xff] }
0x1ae3   : > { %3296 = vmatpush1.bf16.msra.mxu0 %v3266_v38  ;;  %v3380_v37 = vpack.c.bf16 %v3969_v35, %v3968_v6  ;;  %v3952_v38 = vld [vmem:[%s6567_s22 + $0x150] sm:$0xff]  ;;  %v3470_v35 = vld [vmem:[%s6569_s24 + $0x48] sm:$0xff] }
0x1ae4   : > { %v3467_v6 = vld [vmem:[%s6569_s24 + $0x30] sm:$0xff] }
0x1b93   : > { %v3013_v43 = vpop.f32.mrb[68].mxu1 }
0x1b94   : > { %v3019_v44 = vadd.f32 %v3013_v43, %v5923_v26  ;;  %v4400_v54 = vpop.f32.mrb[69].mxu1  ;;  %v3904_v26 = vld [vmem:[%s6558_s13 + $0x1] sm:$0x1] }
0x1b95   : > { %v3016_v18 = vpop.f32.mrb[70].mxu1  ;;  %v3925_v43 = vld [vmem:[%s6565_s20 + $0x180] sm:$0xff] }
0x1b96   : > { %v3026_v12 = vadd.f32 %v3866_v55, %v3019_v44  ;;  %v4401_v9 = vpop.f32.mrb[71].mxu1  ;;  %v3269_v55 = vpack.c.bf16 %v3928_v40, %v3926_v39  ;;  %v3927_v44 = vld [vmem:[%s6565_s20 + $0x190] sm:$0xff]  ;;  %v3930_v18 = vld [vmem:[%s6565_s20 + $0x1a8] sm:$0xff]  ;;  %v3953_v39 = vld [vmem:[%s6567_s22 + $0x158] sm:$0xff] }
0x1b97   : > { %v3268_v54 = vpack.c.bf16 %v3927_v44, %v3925_v43  ;;  %v3372_v40 = vpack.c.bf16 %v3953_v39, %v3952_v38  ;;  %v3472_v38 = vld [vmem:[%s6569_s24 + $0x58] sm:$0xff] }
0x1b98   : > { %v3027_v8 = vadd.f32 %v3026_v12, %v5775_v51  ;;  %v3869_v51 = vld [vmem:[%s6559_s14 + $0x1] ss:$0 sm:$0xff]  ;;  %3297 = vmatprep.subr.bf16.mxu0 %v3269_v55  ;;  %v3932_v12 = vld [vmem:[%s6565_s20 + $0x1b8] sm:$0xff] }
0x1b99   : > { %3298 = vmatpush1.bf16.msra.mxu0 %v3268_v54  ;;  %v3271_v9 = vpack.c.bf16 %v3932_v12, %v3930_v18  ;;  %v3907_v18 = vld [vmem:[%s6561_s16 + $0x1] ss:$0 sm:$0xff]  ;;  %v3476_v39 = vld [vmem:[%s6569_s24 + $0x78] sm:$0xff] }
0x1b9a   : > { %3032 = vadd.xlane.f32.xlu1 %v3027_v8 }
0x1b9b   : > { %3299 = vmatprep.subr.bf16.mxu0 %v3271_v9  ;;  %v3908_v9 = vld [vmem:[%s6562_s17 + $0x1] ss:$0 sm:$0xff] }
0x1bb5   : > { %v3186_v45 = vpop.f32.mrb[72].mxu1 }
0x1bb6   : > { %v4440_v46 = vpop.f32.mrb[73].mxu1  ;;  %v3187_v1 = vadd.f32 %v3904_v26, %v3186_v45  ;;  %v3931_v45 = vld [vmem:[%s6565_s20 + $0x1b0] sm:$0xff] }
0x1bb7   : > { %v3189_v42 = vpop.f32.mrb[74].mxu1 }
0x1bb8   : > { %v4441_v47 = vpop.f32.mrb[75].mxu1  ;;  %v3195_v10 = vrot.slane %v3187_v1, %v4915_v59  ;;  %v3934_v42 = vld [vmem:[%s6565_s20 + $0x1c8] sm:$0xff]  ;;  %v3958_v1 = vld [vmem:[%s6567_s22 + $0x180] sm:$0xff] }
0x1bb9   : > { %v3936_v47 = vld [vmem:[%s6565_s20 + $0x1d8] sm:$0xff] }
0x1c27   : > { %v3033_v48 = vpop.xlane.xlu1 %3032 }
0x1c28   : > { %v3034_v49 = vmul.f32 0.0078125, %v3033_v48  ;;  %v3273_v48 = vpack.c.bf16 %v3936_v47, %v3934_v42  ;;  %v3970_v42 = vld [vmem:[%s6567_s22 + $0x1e0] sm:$0xff]  ;;  %v3971_v47 = vld [vmem:[%s6567_s22 + $0x1e8] sm:$0xff] }
0x1c2a   : > { %v3035_v50 = vsub.f32 %v3027_v8, %v3034_v49  ;;  %v3929_v8 = vld [vmem:[%s6565_s20 + $0x1a0] sm:$0xff] }
0x1c2b   : > { %v3270_v46 = vpack.c.bf16 %v3931_v45, %v3929_v8  ;;  %v3933_v49 = vld [vmem:[%s6565_s20 + $0x1c0] sm:$0xff] }
0x1c2c   : > { %v3036_v52 = vmul.f32 %v3035_v50, %v3035_v50 }
0x1c2d   : > { %3300 = vmatpush1.bf16.msra.mxu0 %v3270_v46 }
0x1c2e   : > { %3037 = vadd.xlane.f32.xlu1 %v3036_v52  ;;  %3301 = vmatprep.subr.bf16.mxu0 %v3273_v48  ;;  %v3381_v48 = vpack.c.bf16 %v3971_v47, %v3970_v42  ;;  %v3480_v42 = vld [vmem:[%s6569_s24 + $0x98] sm:$0xff] }
0x1c2f   : > { %v3484_v47 = vld [vmem:[%s6569_s24 + $0xb8] sm:$0xff] }
0x1cbb   : > { %v3038_v60 = vpop.xlane.xlu1 %3037 }
0x1cbc   : > { %v3039_v61 = vmul.f32 0.0078125, %v3038_v60  ;;  %v3938_v60 = vld [vmem:[%s6565_s20 + $0x1e8] sm:$0xff] }
0x1cbe   : > { %v3040_v62 = vadd.f32 1e-05, %v3039_v61  ;;  %v3940_v61 = vld [vmem:[%s6565_s20 + $0x1f8] sm:$0xff] }
0x1cbf   : > { %v3275_v26 = vpack.c.bf16 %v3940_v61, %v3938_v60  ;;  %v3973_v60 = vld [vmem:[%s6567_s22 + $0x1f8] sm:$0xff] }
0x1cc0   : > { %4525 = vrsqrt.f32 %v3040_v62  ;;  %v3937_v62 = vld [vmem:[%s6565_s20 + $0x1e0] sm:$0xff] }
0x1cca   : > { %v4526_v63 = vpop.eup %4525 }
0x1ccb   : > { %v3042_v2 = vmul.f32 %v4526_v63, %v3035_v50  ;;  %v3935_v50 = vld [vmem:[%s6565_s20 + $0x1d0] sm:$0xff] }
0x1ccc   : > { %v3272_v52 = vpack.c.bf16 %v3935_v50, %v3933_v49  ;;  %v3939_v63 = vld [vmem:[%s6565_s20 + $0x1f0] sm:$0xff]  ;;  %v3955_v49 = vld [vmem:[%s6567_s22 + $0x168] sm:$0xff] }
0x1ccd   : > { %v3049_v5 = vmul.f32 %v3869_v51, %v3042_v2  ;;  %v3274_v51 = vpack.c.bf16 %v3939_v63, %v3937_v62  ;;  %v3959_v2 = vld [vmem:[%s6567_s22 + $0x188] sm:$0xff]  ;;  %v3956_v62 = vld [vmem:[%s6567_s22 + $0x170] sm:$0xff] }
0x1cce   : > { %3302 = vmatpush1.bf16.msra.mxu0 %v3272_v52  ;;  %v3972_v52 = vld [vmem:[%s6567_s22 + $0x1f0] sm:$0xff] }
0x1ccf   : > { %v3056_v11 = vadd.f32 %v3870_v41, %v3049_v5  ;;  %3303 = vmatprep.subr.bf16.mxu0 %v3275_v26  ;;  %v3942_v41 = vld [vmem:[%s6567_s22 + $0x100] sm:$0xff]  ;;  %v3375_v5 = vpack.c.bf16 %v3959_v2, %v3958_v1  ;;  %v3382_v61 = vpack.c.bf16 %v3973_v60, %v3972_v52  ;;  %v3957_v26 = vld [vmem:[%s6567_s22 + $0x178] sm:$0xff] }
0x1cd0   : > { %v3374_v63 = vpack.c.bf16 %v3957_v26, %v3956_v62  ;;  %v3477_v60 = vld [vmem:[%s6569_s24 + $0x80] sm:$0xff]  ;;  %v3479_v62 = vld [vmem:[%s6569_s24 + $0x90] sm:$0xff] }
0x1cd1   : > { %v3196_v58 = vadd.f32 %v3195_v10, %v3056_v11  ;;  %v3943_v10 = vld [vmem:[%s6567_s22 + $0x108] sm:$0xff]  ;;  %v3960_v11 = vld [vmem:[%s6567_s22 + $0x190] sm:$0xff]  ;;  %4140 = vmatprep.subr.bf16.mxu1 %v3375_v5 }
0x1cd2   : > { %3304 = vmatpush1.bf16.msra.mxu0 %v3274_v51  ;;  %v3367_v14 = vpack.c.bf16 %v3943_v10, %v3942_v41  ;;  %v3941_v51 = vld [vmem:[%s6566_s21 + $0x2] sm:$0x3] }
0x1cd3   : > { %3201 = vadd.xlane.f32.xlu1 %v3196_v58  ;;  %v3282_v1 = vrot.slane %v3941_v51, %v4915_v59  ;;  %v3286_v2 = vrot.slane %v3941_v51, %v4907_v57 }
0x1cd4   : > { %4141 = vmatpush3.bf16.msra.mxu1 %v3367_v14 }
0x1d60   : > { %v3202_v28 = vpop.xlane.xlu1 %3201 }
0x1d61   : > { %v3203_v29 = vmul.f32 0.0078125, %v3202_v28  ;;  %v3949_v28 = vld [vmem:[%s6567_s22 + $0x138] sm:$0xff] }
0x1d62   : > { %v3370_v33 = vpack.c.bf16 %v3949_v28, %v3948_v3  ;;  %v3464_v3 = vld [vmem:[%s6569_s24 + $0x18] sm:$0xff] }
0x1d63   : > { %v6105_v31 = vsub.f32 %v3196_v58, %v3203_v29  ;;  %v3961_v58 = vld [vmem:[%s6567_s22 + $0x198] sm:$0xff]  ;;  %v3966_v29 = vld [vmem:[%s6567_s22 + $0x1c0] sm:$0xff] }
0x1d64   : > { %v3376_v13 = vpack.c.bf16 %v3961_v58, %v3960_v11 }
0x1d65   : > { %v3205_v32 = vmul.f32 %v6105_v31, %v6105_v31 }
0x1d66   : > { %4142 = vmatprep.subr.bf16.mxu1 %v3376_v13 }
0x1d67   : > { %3206 = vadd.xlane.f32.xlu1 %v3205_v32  ;;  %4143 = vmatpush3.bf16.msra.mxu1 %v3368_v20  ;;  %v3967_v32 = vld [vmem:[%s6567_s22 + $0x1c8] sm:$0xff]  ;;  %v3975_v20 = vld [vmem:[%s6568_s23 + $0x1] ss:$0 sm:$0xff] }
0x1d68   : > { %4144 = vmatprep.subr.bf16.mxu1 %v3377_v21  ;;  %v3379_v30 = vpack.c.bf16 %v3967_v32, %v3966_v29  ;;  %v3468_v29 = vld [vmem:[%s6569_s24 + $0x38] sm:$0xff]  ;;  %v3461_v32 = vld [vmem:[%s6569_s24] sm:$0xff] }
0x1d6b   : > { %4145 = vmatpush3.bf16.msra.mxu1 %v3369_v25 }
0x1d6c   : > { %4146 = vmatprep.subr.bf16.mxu1 %v3378_v27  ;;  %v3462_v27 = vld [vmem:[%s6569_s24 + $0x8] sm:$0xff] }
0x1d6f   : > { %4147 = vmatpush3.bf16.msra.mxu1 %v3370_v33  ;;  %v3465_v33 = vld [vmem:[%s6569_s24 + $0x20] sm:$0xff] }
0x1d70   : > { %4148 = vmatprep.subr.bf16.mxu1 %v3379_v30  ;;  %v3529_v30 = vpack.c.bf16 %v3468_v29, %v3464_v3  ;;  %v3526_v4 = vpack.c.bf16 %v3465_v33, %v3461_v32  ;;  %v3499_v3 = vld [vmem:[%s6569_s24 + $0x130] sm:$0xff]  ;;  %v3502_v29 = vld [vmem:[%s6569_s24 + $0x148] sm:$0xff]  ;;  %v3504_v33 = vld [vmem:[%s6569_s24 + $0x158] sm:$0xff] }
0x1d71   : > { %v3506_v32 = vld [vmem:[%s6569_s24 + $0x168] sm:$0xff] }
0x1d73   : > { %4149 = vmatpush3.bf16.msra.mxu1 %v3371_v36  ;;  %v3528_v36 = vpack.c.bf16 %v3467_v6, %v3463_v34  ;;  %v3501_v34 = vld [vmem:[%s6569_s24 + $0x140] sm:$0xff] }
0x1d74   : > { %4150 = vmatprep.subr.bf16.mxu1 %v3380_v37  ;;  %v3474_v37 = vld [vmem:[%s6569_s24 + $0x68] sm:$0xff]  ;;  %v3505_v6 = vld [vmem:[%s6569_s24 + $0x160] sm:$0xff] }
0x1d77   : > { %4151 = vmatpush3.bf16.msra.mxu1 %v3372_v40  ;;  %v3531_v40 = vpack.c.bf16 %v3474_v37, %v3470_v35  ;;  %v3503_v37 = vld [vmem:[%s6569_s24 + $0x150] sm:$0xff] }
0x1d78   : > { %4152 = vmatprep.subr.bf16.mxu1 %v3381_v48  ;;  %v3537_v48 = vpack.c.bf16 %v3484_v47, %v3480_v42  ;;  %v3518_v42 = vld [vmem:[%s6569_s24 + $0x1c8] sm:$0xff] }
0x1df4   : > { %v3207_v55 = vpop.xlane.xlu1 %3206 }
0x1df5   : > { %v3208_v43 = vmul.f32 0.0078125, %v3207_v55  ;;  %v3533_v55 = vpack.c.bf16 %v3476_v39, %v3472_v38  ;;  %v3507_v38 = vld [vmem:[%s6569_s24 + $0x170] sm:$0xff] }
0x1df6   : > { %v3548_v39 = vpack.c.bf16 %v3507_v38, %v3503_v37 }
0x1df7   : > { %v3209_v44 = vadd.f32 1e-05, %v3208_v43  ;;  %v3469_v43 = vld [vmem:[%s6569_s24 + $0x40] sm:$0xff] }
0x1df9   : > { %4527 = vrsqrt.f32 %v3209_v44  ;;  %v3473_v44 = vld [vmem:[%s6569_s24 + $0x60] sm:$0xff] }
0x1e03   : > { %v4528_v54 = vpop.eup %4527 }
0x1e04   : > { %v3211_v12 = vmul.f32 %v4528_v54, %v6105_v31  ;;  %v3954_v31 = vld [vmem:[%s6567_s22 + $0x160] sm:$0xff]  ;;  %v3471_v54 = vld [vmem:[%s6569_s24 + $0x50] sm:$0xff] }
0x1e05   : > { %v3373_v50 = vpack.c.bf16 %v3955_v49, %v3954_v31 }
0x1e06   : > { %v3218_v8 = vmul.f32 %v3907_v18, %v3211_v12  ;;  %v3530_v18 = vpack.c.bf16 %v3473_v44, %v3469_v43  ;;  %v3475_v12 = vld [vmem:[%s6569_s24 + $0x70] sm:$0xff]  ;;  %v3512_v43 = vld [vmem:[%s6569_s24 + $0x198] sm:$0xff] }
0x1e07   : > { %4153 = vmatpush3.bf16.msra.mxu1 %v3373_v50 }
0x1e08   : > { %v3225_v45 = vadd.f32 %v3908_v9, %v3218_v8  ;;  %4154 = vmatprep.subr.bf16.mxu1 %v3382_v61  ;;  %v3478_v9 = vld [vmem:[%s6569_s24 + $0x88] sm:$0xff]  ;;  %v3481_v61 = vld [vmem:[%s6569_s24 + $0xa0] sm:$0xff] }
0x1e09   : > { %v3482_v8 = vld [vmem:[%s6569_s24 + $0xa8] sm:$0xff]  ;;  %v3534_v26 = vpack.c.bf16 %v3481_v61, %v3477_v60  ;;  %v3517_v61 = vld [vmem:[%s6569_s24 + $0x1c0] sm:$0xff] }
0x1e0a   : > { %v3259_v46 = vpack.c.bf16 %v3225_v45, %v3225_v45 }
0x1e0b   : > { %4155 = vmatpush3.bf16.msra.mxu1 %v3374_v63  ;;  %v3483_v63 = vld [vmem:[%s6569_s24 + $0xb0] sm:$0xff] }
0x1e0c   : > { %3322 = vmatmul.mubr.bf16.vlgmr.msra.gmra.mrb[64].mxu0 %v3259_v46  ;;  %3621 = vmatprep.subr.bf16.mxu1 %v3529_v30  ;;  %v3535_v46 = vpack.c.bf16 %v3482_v8, %v3478_v9  ;;  %v3536_v51 = vpack.c.bf16 %v3483_v63, %v3479_v62  ;;  %v3547_v30 = vpack.c.bf16 %v3506_v32, %v3502_v29  ;;  %v3521_v62 = vld [vmem:[%s6569_s24 + $0x1e0] sm:$0xff] }
0x1e0d   : > { %3612 = vmatprep.mubr.bf16.mxu0 %v4595_v7  ;;  %v3554_v63 = vpack.c.bf16 %v3521_v62, %v3517_v61 }
0x1edf   : > { %v3323_v41 = vpop.f32.mrb[64].mxu0 }
0x1ee0   : > { %v3324_v5 = vadd.f32 %v3323_v41, %v3282_v1  ;;  %v3325_v10 = vpop.f32.mrb[65].mxu0  ;;  %v3486_v1 = vld [vmem:[%s6569_s24 + $0xc8] sm:$0xff]  ;;  %v3488_v41 = vld [vmem:[%s6569_s24 + $0xd8] sm:$0xff] }
0x1ee1   : > { %v3326_v11 = vadd.f32 %v3325_v10, %v3286_v2  ;;  %v3327_v58 = vpop.f32.mrb[66].mxu0  ;;  %v3490_v2 = vld [vmem:[%s6569_s24 + $0xe8] sm:$0xff]  ;;  %v3492_v10 = vld [vmem:[%s6569_s24 + $0xf8] sm:$0xff] }
0x1ee2   : > { %v3330_v14 = vmax.f32 %v3324_v5, 0.0  ;;  %v3328_v13 = vpop.f32.mrb[67].mxu0  ;;  %v3539_v5 = vpack.c.bf16 %v3490_v2, %v3486_v1  ;;  %v3489_v58 = vld [vmem:[%s6569_s24 + $0xe0] sm:$0xff] }
0x1ee3   : > { %v3331_v15 = vmax.f32 %v3326_v11, 0.0  ;;  %v3485_v11 = vld [vmem:[%s6569_s24 + $0xc0] sm:$0xff] }
0x1ee4   : > { %v3365_v17 = vpack.c.bf16 %v3330_v14, %v3330_v14  ;;  %v3541_v14 = vpack.c.bf16 %v3492_v10, %v3488_v41  ;;  %v3538_v13 = vpack.c.bf16 %v3489_v58, %v3485_v11  ;;  %v3978_v11 = vld [vmem:[%s6563_s18 + $0x1] ss:$0 sm:$0xff] }
0x1ee5   : > { %v3366_v16 = vpack.c.bf16 %v3331_v15, %v3331_v15  ;;  %v3487_v15 = vld [vmem:[%s6569_s24 + $0xd0] sm:$0xff] }
0x1ee7   : > { %3423 = vmatprep.mubr.bf16.mxu1 %v3366_v16  ;;  %v3491_v16 = vld [vmem:[%s6569_s24 + $0xf0] sm:$0xff] }
0x1ee8   : > { %3424 = vmatmul.mubr.bf16.vlgmr.msra.gmra.mrb[76].mxu1 %v3365_v17  ;;  %v3540_v17 = vpack.c.bf16 %v3491_v16, %v3487_v15 }
0x1ee9   : > { %3653 = vmatprep.mubr.bf16.mxu1 %v4595_v7  ;;  %v3466_v7 = vld [vmem:[%s6569_s24 + $0x28] sm:$0xff]  ;;  %3622 = vmatpush1.bf16.msra.mxu1 %v3528_v36  ;;  %v3546_v36 = vpack.c.bf16 %v3505_v6, %v3501_v34 }
0x1eea   : > { %v3527_v28 = vpack.c.bf16 %v3466_v7, %v3462_v27  ;;  %3623 = vmatprep.subr.bf16.mxu1 %v3533_v55  ;;  %v3495_v7 = vld [vmem:[%s6569_s24 + $0x110] sm:$0xff]  ;;  %v3514_v55 = vld [vmem:[%s6569_s24 + $0x1a8] sm:$0xff] }
0x1eec   : > { %3580 = vmatprep.subr.bf16.mxu0 %v3527_v28  ;;  %v3544_v28 = vpack.c.bf16 %v3499_v3, %v3495_v7 }
0x1eed   : > { %3581 = vmatpush1.bf16.msra.mxu0 %v3526_v4  ;;  %v3508_v4 = vld [vmem:[%s6569_s24 + $0x178] sm:$0xff] }
0x1eee   : > { %3582 = vmatprep.subr.bf16.mxu0 %v3531_v40  ;;  %v3549_v35 = vpack.c.bf16 %v3508_v4, %v3504_v33  ;;  %v3510_v40 = vld [vmem:[%s6569_s24 + $0x188] sm:$0xff] }
0x1eef   : > { %v3551_v44 = vpack.c.bf16 %v3514_v55, %v3510_v40 }
0x1ef1   : > { %3583 = vmatpush1.bf16.msra.mxu0 %v3530_v18  ;;  %v3509_v18 = vld [vmem:[%s6569_s24 + $0x180] sm:$0xff] }
0x1ef2   : > { %3584 = vmatprep.subr.bf16.mxu0 %v3535_v46  ;;  %v3515_v46 = vld [vmem:[%s6569_s24 + $0x1b0] sm:$0xff] }
0x1ef5   : > { %3585 = vmatpush1.bf16.msra.mxu0 %v3534_v26  ;;  %v3519_v26 = vld [vmem:[%s6569_s24 + $0x1d0] sm:$0xff] }
0x1ef6   : > { %3586 = vmatprep.subr.bf16.mxu0 %v3539_v5 }
0x1ef9   : > { %3587 = vmatpush1.bf16.msra.mxu0 %v3538_v13 }
0x1fbb   : > { %v4156_v19 = vpop.f32.mrb[76].mxu1 }
0x1fbc   : > { %v4157_v21 = vpop.f32.mrb[77].mxu1 }
0x1fbd   : > { %v4158_v22 = vadd.f32 %v4157_v21, %v4156_v19  ;;  %v4159_v23 = vpop.f32.mrb[78].mxu1  ;;  %v3494_v19 = vld [vmem:[%s6569_s24 + $0x108] sm:$0xff]  ;;  %v3496_v21 = vld [vmem:[%s6569_s24 + $0x118] sm:$0xff] }
0x1fbe   : > { %v4160_v24 = vpop.f32.mrb[79].mxu1  ;;  %v3500_v23 = vld [vmem:[%s6569_s24 + $0x138] sm:$0xff] }
0x1fbf   : > { %v3426_v53 = vadd.f32 %v4158_v22, %v3975_v20  ;;  %v3498_v20 = vld [vmem:[%s6569_s24 + $0x128] sm:$0xff]  ;;  %v3493_v24 = vld [vmem:[%s6569_s24 + $0x100] sm:$0xff] }
0x1fc0   : > { %v3543_v22 = vpack.c.bf16 %v3498_v20, %v3494_v19  ;;  %v3574_v19 = vsub.s32 3, %v4904_v56 }
0x1fc1   : > { %v3431_v25 = vadd.f32 %v3426_v53, %v3225_v45  ;;  %v3532_v45 = vpack.c.bf16 %v3475_v12, %v3471_v54  ;;  %v3497_v53 = vld [vmem:[%s6569_s24 + $0x120] sm:$0xff]  ;;  %v3516_v54 = vld [vmem:[%s6569_s24 + $0x1b8] sm:$0xff] }
0x1fc2   : > { %v3542_v27 = vpack.c.bf16 %v3497_v53, %v3493_v24  ;;  %3588 = vmatprep.subr.bf16.mxu0 %v3543_v22  ;;  %v3513_v12 = vld [vmem:[%s6569_s24 + $0x1a0] sm:$0xff]  ;;  %v3553_v9 = vpack.c.bf16 %v3516_v54, %v3512_v43 }
0x1fc3   : > { %3436 = vadd.xlane.f32.xlu0 %v3431_v25  ;;  %3624 = vmatpush1.bf16.msra.mxu1 %v3532_v45  ;;  %v3550_v8 = vpack.c.bf16 %v3513_v12, %v3509_v18  ;;  %v3511_v45 = vld [vmem:[%s6569_s24 + $0x190] sm:$0xff] }
0x1fc4   : > { %3625 = vmatprep.subr.bf16.mxu1 %v3537_v48  ;;  %3589 = vmatpush1.bf16.msra.mxu0 %v3542_v27  ;;  %v3552_v47 = vpack.c.bf16 %v3515_v46, %v3511_v45  ;;  %v3522_v48 = vld [vmem:[%s6569_s24 + $0x1e8] sm:$0xff] }
0x1fc5   : > { %3590 = vmatprep.subr.bf16.mxu0 %v3547_v30 }
0x1fc7   : > { %3626 = vmatpush1.bf16.msra.mxu1 %v3536_v51  ;;  %v3523_v51 = vld [vmem:[%s6569_s24 + $0x1f0] sm:$0xff] }
0x1fc8   : > { %3627 = vmatprep.subr.bf16.mxu1 %v3541_v14  ;;  %3591 = vmatpush1.bf16.msra.mxu0 %v3546_v36  ;;  %v3556_v1 = vpack.c.bf16 %v3523_v51, %v3519_v26  ;;  %v3979_v14 = vld [vmem:[%s6564_s19 + $0x1] ss:$0 sm:$0xff] }
0x1fc9   : > { %3592 = vmatprep.subr.bf16.mxu0 %v3551_v44 }
0x1fcb   : > { %3628 = vmatpush1.bf16.msra.mxu1 %v3540_v17  ;;  %v3558_v17 = vld [vmem:[%s6640_s27] sm:$0xf]  ;;  %s4601_s27 = smov [#allocation2]  }
0x1fcc   : > { %3593 = vmatpush1.bf16.msra.mxu0 %v3550_v8  ;;  %v3563_v20 = vrot.slane %v3558_v17, %v4915_v59  ;;  %v3575_v22 = vrot.slane %v3558_v17, %v3574_v19  ;;  %s4535_s29 = sshll.u32 %s4601_s27, 4  ;;  %s4536_s29 = int_to_ptr.vmem [resolvable:$false] %s4535_s29 }
0x1fcd   : > { %s4537_s25 = scalar_lea.vmem %s4536_s29, 1024  ;;  %p4538_p0 = scmp.lt.s32.totalorder %s6505_s26, %s4536_s29 }
0x1fce   : > { %p4539_p1 = scmp.lt.s32.totalorder %s4537_s25, %s4531_s10 }
0x1fd0   : > { %p4540_p2 = por %p4539_p1, %p4538_p0 }
0x1fd2   : > { %p4541_p3 = pnand %p4540_p2, %p4534_p13 }
0x2050   : > { %v3437_v31 = vpop.xlane.xlu0 %3436 }
0x2051   : > { %v3438_v49 = vmul.f32 0.0078125, %v3437_v31  ;;  %v3520_v31 = vld [vmem:[%s6569_s24 + $0x1d8] sm:$0xff] }
0x2053   : > { %v6348_v50 = vsub.f32 %v3431_v25, %v3438_v49  ;;  %v3545_v25 = vpack.c.bf16 %v3500_v23, %v3496_v21  ;;  %v3524_v49 = vld [vmem:[%s6569_s24 + $0x1f8] sm:$0xff]  ;;  %v3567_v21 = vrot.slane %v3558_v17, %v4907_v57 }
0x2054   : > { %v3557_v60 = vpack.c.bf16 %v3524_v49, %v3520_v31 }
0x2055   : > { %v3440_v52 = vmul.f32 %v6348_v50, %v6348_v50  ;;  %3629 = vmatprep.subr.bf16.mxu1 %v3545_v25 }
0x2056   : > { %3630 = vmatpush1.bf16.msra.mxu1 %v3544_v28 }
0x2057   : > { %3441 = vadd.xlane.f32.xlu1 %v3440_v52  ;;  %3631 = vmatprep.subr.bf16.mxu1 %v3549_v35  ;;  %v3555_v52 = vpack.c.bf16 %v3522_v48, %v3518_v42 }
0x2059   : > { %3594 = vmatprep.subr.bf16.mxu0 %v3555_v52 }
0x205a   : > { %3632 = vmatpush1.bf16.msra.mxu1 %v3548_v39  ;;  %3595 = vmatpush1.bf16.msra.mxu0 %v3554_v63 }
0x205b   : > { %3633 = vmatprep.subr.bf16.mxu1 %v3553_v9 }
0x205e   : > { %3634 = vmatpush1.bf16.msra.mxu1 %v3552_v47 }
0x205f   : > { %3635 = vmatprep.subr.bf16.mxu1 %v3557_v60 }
0x2062   : > { %3636 = vmatpush1.bf16.msra.mxu1 %v3556_v1 }
0x20e4   : > { %v3442_v2 = vpop.xlane.xlu1 %3441 }
0x20e5   : > { %v3443_v41 = vmul.f32 0.0078125, %v3442_v2 }
0x20e7   : > { %v3444_v5 = vadd.f32 1e-05, %v3443_v41 }
0x20e9   : > { %4529 = vrsqrt.f32 %v3444_v5 }
0x20f3   : > { %v4530_v10 = vpop.eup %4529 }
0x20f4   : > { %v3446_v58 = vmul.f32 %v4530_v10, %v6348_v50  ;;  %v3571_v50 = vrot.slane %v3558_v17, %v5119_v0 }
0x20f6   : > { %v3453_v13 = vmul.f32 %v3978_v11, %v3446_v58 }
0x20f8   : > { %v3460_v15 = vadd.f32 %v3979_v14, %v3453_v13 }
0x20fa   : > { %v3525_v16 = vpack.c.bf16 %v3460_v15, %v3460_v15 }
0x20fc   : > { %3613 = vmatmul.mubr.bf16.vlgmr.msra.gmra.mrb[68].mxu0 %v3525_v16  ;;  %3654 = vmatmul.mubr.bf16.vlgmr.msra.gmra.mrb[80].mxu1 %v3525_v16 }
0x21cf   : > { %v3614_v23 = vpop.f32.mrb[68].mxu0  ;;  %v3655_v24 = vpop.f32.mrb[80].mxu1 }
0x21d0   : > { %v3615_v53 = vadd.f32 %v3614_v23, %v3563_v20  ;;  %v3656_v25 = vadd.f32 %v3655_v24, %v3571_v50  ;;  %v3616_v27 = vpop.f32.mrb[69].mxu0  ;;  %v3657_v7 = vpop.f32.mrb[81].mxu1 }
0x21d1   : > { %v3617_v3 = vadd.f32 %v3616_v27, %v3567_v21  ;;  %v3658_v28 = vadd.f32 %v3657_v7, %v3575_v22  ;;  %v3618_v56 = vpop.f32.mrb[70].mxu0  ;;  %v3659_v29 = vpop.f32.mrb[82].mxu1 }
0x21d2   : > { %3662 = vst [vmem:[%s806_s2] sm:$0xff] %v3615_v53  ;;  %3664 = vst [vmem:[%s806_s2 + $0x10] sm:$0xff] %v3656_v25  ;;  %v3619_v57 = vpop.f32.mrb[71].mxu0  ;;  %v3660_v59 = vpop.f32.mrb[83].mxu1 }
0x21d3   : > { %3663 = vst [vmem:[%s806_s2 + $0x8] sm:$0xff] %v3617_v3  ;;  %3665 = vst [vmem:[%s806_s2 + $0x18] sm:$0xff] %v3658_v28 }
0x21d4   : > { %4544 = shalt.err (!%p4541_p3)
}
0x21d5   : > { %s4545_s3 = scalar_lea.hbm %s6503_s4, 512  ;;  %s4549_s27 = scalar_lea.hbm %s6642_s6, 1024 }
0x21d6   : > { %p4546_p4 = scmp.ne.s32.totalorder %s6503_s4, %s4545_s3  ;;  %p4550_p9 = scmp.lt.u32.totalorder %s6503_s4, %s6642_s6 }
0x21d7   : > { %p4551_p10 = scmp.lt.u32.totalorder %s4549_s27, %s4545_s3  ;;  %p4553_p12 = scmp.lt.u32.totalorder %s4545_s3, %s6503_s4 }
0x21d8   : > { %p4547_p7 = pnand %p4546_p4, %p4775_p5 }
0x21d9   : > { %p4552_p11 = por %p4551_p10, %p4550_p9 }
0x21da   : > { %p4548_p8 = pneg %p4547_p7 }
0x21db   : > { %p4554_p13 = por %p4553_p12, %p4552_p11 }
0x21dd   : > { %p4555_p0 = pnand %p4554_p13, %p4548_p8 }
0x21df   : > { %4558 = shalt.err (!%p4555_p0)
}
0x21e0   : > { %4442 = dma.vmem_to_hbm [thread:$0]  (%p4775_p5), %s6505_s26, 512, %s6503_s4, %s3667_s28  }
0x21e1 PF: > { %s6643_s10 = sld [smem:[#allocation8_spill]]  ;;  %s6644_s25 = sld [smem:[#allocation5_spill]] }
0x21e7   : > { %p4448_p1 = scmp.ge.s32.totalorder %s6643_s10, 2  ;;  %s3693_s9 = sand.u32 1, %s6644_s25  }
0x21e8   : > { %s3694_s0 = scalar_lea.sflag [#allocation3], %s3693_s9 }
0x21e9   : > { %p4445_p2 = pnand %p4448_p1, %p4779_p6 }
0x21eb   : > { %4576 = dma.done.wait (!%p4445_p2), %s3694_s0, 512  }
0x21ec   : > { %4578 = vsyncadd (!%p4445_p2), %s3694_s0, 4294966784  ;;  %s6646_s28 = sld [smem:[#allocation10_spill]]  ;;  %s6647_s27 = sld [smem:[#allocation6_spill]] }
0x21ed   : > { %s6648_s3 = sld [smem:[#allocation7_spill]]  ;;  %s6649_s7 = sld [smem:[#allocation11_spill]] }
0x21f2   : > { %p36_p3 = scmp.ge.s32.totalorder %s6646_s28, 4  }
0x21f4   :  { %38 = sbr.rel (!%p36_p3) target bundleno = 17 (0x11), region = 183 }
0x21fb   :  { %3699 = vsyncpa [#allocation3], 1 }
0x21fc   :  { %3701 = vsyncpa [#allocation3 + $0x1], 1 }

// kernel: image_to_text_forward.2
= control target key start
LH: loop header
LB: loop body
LE: loop exit
PB: predicated region body
PF: predicated region fallthrough
CT: control target
= control target key end

     0   :  { %s5195_s0 = inlined_call_operand.vmem [shape: f32[2,16,192], index: 0, kind: input, shape index: {}]   ;;  %s5196_s1 = inlined_call_operand.hbm [shape: f32[192,256], index: 1, kind: input, shape index: {}]   ;;  %s5197_s2 = inlined_call_operand.vmem [shape: f32[1,256], index: 2, kind: input, shape index: {}]   ;;  %s5198_s3 = inlined_call_operand.vmem [shape: f32[1,256], index: 3, kind: input, shape index: {}]   ;;  %s5199_s4 = inlined_call_operand.vmem [shape: f32[17,256], index: 4, kind: input, shape index: {}]   ;;  %s5200_s5 = inlined_call_operand.vmem [shape: f32[256,768], index: 5, kind: input, shape index: {}]   ;;  %s5201_s6 = inlined_call_operand.vmem [shape: f32[1,768], index: 6, kind: input, shape index: {}]   ;;  %s5202_s7 = inlined_call_operand.vmem [shape: f32[256,256], index: 7, kind: input, shape index: {}]   ;;  %s5203_s8 = inlined_call_operand.vmem [shape: f32[1,256], index: 8, kind: input, shape index: {}]   ;;  %s5204_s9 = inlined_call_operand.vmem [shape: f32[1,256], index: 9, kind: input, shape index: {}]   ;;  %s5205_s10 = inlined_call_operand.vmem [shape: f32[1,256], index: 10, kind: input, shape index: {}]   ;;  %s5206_s11 = inlined_call_operand.vmem [shape: f32[256,512], index: 11, kind: input, shape index: {}]   ;;  %s5207_s12 = inlined_call_operand.vmem [shape: f32[1,512], index: 12, kind: input, shape index: {}]   ;;  %s5208_s13 = inlined_call_operand.hbm [shape: f32[512,256], index: 13, kind: input, shape index: {}]   ;;  %s5209_s14 = inlined_call_operand.vmem [shape: f32[1,256], index: 14, kind: input, shape index: {}]   ;;  %s5210_s15 = inlined_call_operand.vmem [shape: f32[1,256], index: 15, kind: input, shape index: {}]   ;;  %s5211_s16 = inlined_call_operand.vmem [shape: f32[1,256], index: 16, kind: input, shape index: {}]   ;;  %s5212_s17 = inlined_call_operand.vmem [shape: f32[2,1,256], index: 17, kind: output, shape index: {}]  }
   0x1   :  { %5217 = sst [smem:[#allocation9_spill]] %s5195_s0 }
   0x2   :  { %5218 = sst [smem:[#allocation10_spill]] %s5196_s1 }
   0x3   :  { %5219 = sst [smem:[#allocation11_spill]] %s5211_s16 }
   0x4   :  { %5220 = sst [smem:[#allocation12_spill]] %s5212_s17 }
   0x5   :  { %22 = vsyncpa [#allocation3], 0 }
   0x6   :  { %23 = vsyncpa [#allocation5], 0  ;;  %s3549_s24 = smov 0  }
   0x7 LB: > { %5221 = sst [smem:[#allocation8_spill]] %s3450_s24  ;;  %s3555_s25 = sadd.s32 4294967295, %s3450_s24   ;;  %s3450_s24 = sphi %s3549_s24, %s29_s24  }
   0x8   : > { %p3136_p0 = scmp.ge.s32.totalorder %s3450_s24, 1  ;;  %p422_p1 = scmp.lt.s32.totalorder %s3450_s24, 3 }
   0x9   : > { %s3452_s26 = smov [#allocation2]   ;;  %p5214_p3 = scmp.eq.s32.totalorder %s3555_s25, 0 }
   0xa   : > { %s434_s27 = sshll.u32 %s3452_s26, 4  ;;  %p3559_p2 = pnand %p3136_p0, %p422_p1  ;;  %s435_s27 = int_to_ptr.vmem [resolvable:$true] %s434_s27 }
   0xb   : > { %s3453_s29 = smov [#allocation4]   ;;  %s5224_s1 = sld [smem:[#allocation10_spill]] }
   0xc   : > { %s5222_s28 = scalar_select %p3559_p2, 1, 0 }
   0xd   : > { %p3298_p4 = pneg %p3559_p2  ;;  %s480_s0 = sshll.u32 %s3453_s29, 4  ;;  %s3572_s0 = int_to_ptr.vmem [resolvable:$true] %s480_s0 }
   0xf   : > { %p3568_p5 = pnand %p5214_p3, %p3298_p4 }
  0x11   : > { %s3380_s20 = scalar_lea.hbm %s5224_s1, 6144  ;;  %p3382_p7 = pneg %p3568_p5 }
  0x12   : > { %p3381_p6 = scmp.ne.s32.totalorder %s5224_s1, %s3380_s20  ;;  %p3387_p10 = scmp.lt.u32.totalorder %s3380_s20, %s5224_s1 }
  0x14   : > { %p3383_p8 = pnand %p3382_p7, %p3381_p6 }
  0x16   : > { %p3384_p9 = pneg %p3383_p8 }
  0x18   : > { %p3389_p11 = pnand %p3387_p10, %p3384_p9 }
  0x1a   : > { %3392 = shalt.err (!%p3389_p11)
}
  0x1b   : > { %s3393_s29 = scalar_lea.vmem %s435_s27, 6144  ;;  %p3401_p1 = scmp.lt.s32.totalorder %s435_s27, %s435_s27 }
  0x1c   : > { %p3394_p12 = scmp.ne.s32.totalorder %s435_s27, %s3393_s29  ;;  %p3402_p4 = scmp.lt.s32.totalorder %s3393_s29, %s3393_s29 }
  0x1e   : > { %p3396_p13 = pnand %p3394_p12, %p3382_p7  ;;  %p3403_p3 = por %p3402_p4, %p3401_p1 }
  0x20   : > { %p3397_p0 = pneg %p3396_p13 }
  0x22   : > { %p3404_p2 = pnand %p3403_p3, %p3397_p0 }
  0x24   : > { %3407 = shalt.err (!%p3404_p2)
}
  0x25   : > { %s3454_s18 = smov 256   ;;  %s3455_s19 = smov 16  }
  0x26   : > { %3301 = dma.hbm_to_vmem [thread:$0]  (!%p3568_p5), %s5224_s1, 6144, %s435_s27, [#allocation3], %s3454_s18, %s3454_s18, %s3455_s19  }
  0x27   : > { %s3408_s26 = scalar_lea.hbm %s5208_s13, 16384 }
  0x28   : > { %p3409_p6 = scmp.ne.s32.totalorder %s5208_s13, %s3408_s26  ;;  %p3415_p8 = scmp.lt.u32.totalorder %s3408_s26, %s5208_s13 }
  0x2a   : > { %p3411_p2 = pnand %p3409_p6, %p3382_p7 }
  0x2c   : > { %p3412_p3 = pneg %p3411_p2 }
  0x2e   : > { %p3417_p9 = pnand %p3415_p8, %p3412_p3 }
  0x30   : > { %3420 = shalt.err (!%p3417_p9)
}
  0x31   : > { %s3421_s27 = scalar_lea.vmem %s3572_s0, 16384  ;;  %p3429_p13 = scmp.lt.s32.totalorder %s3572_s0, %s3572_s0 }
  0x32   : > { %p3422_p10 = scmp.ne.s32.totalorder %s3572_s0, %s3421_s27  ;;  %p3430_p0 = scmp.lt.s32.totalorder %s3421_s27, %s3421_s27 }
  0x34   : > { %p3424_p11 = pnand %p3422_p10, %p3382_p7  ;;  %p3431_p1 = por %p3430_p0, %p3429_p13 }
  0x36   : > { %p3425_p12 = pneg %p3424_p11 }
  0x38   : > { %p3432_p4 = pnand %p3431_p1, %p3425_p12 }
  0x3a   : > { %3435 = shalt.err (!%p3432_p4)
}
  0x3b   : > { %3304 = dma.hbm_to_vmem [thread:$0]  (!%p3568_p5), %s5208_s13, 16384, %s3572_s0, [#allocation5], %s3454_s18, %s3454_s18, %s3455_s19  }
  0x3c   : > { %p5225_p6 = scmp.ne.s32.totalorder %s5222_s28, 0 }
  0x3d   : > { %p5226_p2 = scmp.eq.s32.totalorder (!%p5225_p6), %s3555_s25, 0 }
  0x3e   : > { %513 = sbr.rel (%p5225_p6) target bundleno = 3869 (0xf1d), region = 88 }
  0x45   : > { %3441 = dma.done.wait (%p5226_p2), [#allocation3], 6144   ;;  %p5227_p7 = pmov %p5226_p2 }
  0x46   : > { %p5228_p3 = pmov %p5226_p2 }
  0x47   : > { %3443 = vsyncadd (%p5227_p7), [#allocation3], 4294961152 }
  0x48   : > { %3445 = dma.done.wait (%p5228_p3), [#allocation5], 16384   ;;  %p5229_p8 = pmov %p5226_p2 }
  0x49   : > { %v583_v0 = vld [vmem:[#allocation2 + $0x8] sm:$0xff]  ;;  %v585_v1 = vld [vmem:[#allocation2 + $0x18] sm:$0xff]  ;;  %v582_v2 = vld [vmem:[#allocation2] sm:$0xff]  ;;  %p568_p5 = scmp.lt.s32.totalorder %s3555_s25, 1  ;;  %s5230_s30 = sld [smem:[#allocation9_spill]]  ;;  %vm668_vm0 = vcmask 523264  }
  0x4a   : > { %3447 = vsyncadd (%p5229_p8), [#allocation5], 4294950912  ;;  %v633_v3 = vpack.c.bf16 %v585_v1, %v583_v0  ;;  %v584_v4 = vld [vmem:[#allocation2 + $0x10] sm:$0xff]  ;;  %v587_v5 = vld [vmem:[#allocation2 + $0x28] sm:$0xff]  ;;  %s3456_s21 = smov 64   ;;  %vm1393_vm1 = vcmask 1040384  }
  0x4b   : > { %v589_v6 = vld [vmem:[#allocation2 + $0x38] sm:$0xff]  ;;  %v632_v7 = vpack.c.bf16 %v584_v4, %v582_v2  ;;  %v586_v9 = vld [vmem:[#allocation2 + $0x20] sm:$0xff]  ;;  %v588_v10 = vld [vmem:[#allocation2 + $0x30] sm:$0xff]  ;;  %s5235_s25 = smov (!%p568_p5, %s3555_s25), 1  ;;  %vm1348_vm2 = vcmask 138240   ;;  %vm1355_vm3 = vcmask 131072  }
  0x4c   : > { %v635_v8 = vpack.c.bf16 %v589_v6, %v587_v5  ;;  %v591_v11 = vld [vmem:[#allocation2 + $0x48] sm:$0xff]  ;;  %672 = vmatprep.subr.bf16.mxu0 %v633_v3  ;;  %v593_v12 = vld [vmem:[#allocation2 + $0x58] sm:$0xff]  ;;  %v634_v13 = vpack.c.bf16 %v588_v10, %v586_v9  ;;  %v590_v15 = vld [vmem:[#allocation2 + $0x40] sm:$0xff]  ;;  %s3173_s24 = sshll.u32 %s5235_s25, 5  ;;  %s3145_s0 = sshll.u32 %s5235_s25, 1 }
  0x4d   : > { %673 = vmatpush1.bf16.msra.mxu0 %v632_v7  ;;  %v637_v14 = vpack.c.bf16 %v593_v12, %v591_v11  ;;  %v592_v16 = vld [vmem:[#allocation2 + $0x50] sm:$0xff]  ;;  %v595_v17 = vld [vmem:[#allocation2 + $0x68] sm:$0xff]  ;;  %v597_v18 = vld [vmem:[#allocation2 + $0x78] sm:$0xff]  ;;  %s5232_s20 = sld [smem:[#allocation12_spill]] }
  0x4e   : > { %674 = vmatprep.subr.bf16.mxu0 %v635_v8  ;;  %v636_v19 = vpack.c.bf16 %v592_v16, %v590_v15  ;;  %v639_v20 = vpack.c.bf16 %v597_v18, %v595_v17  ;;  %v594_v21 = vld [vmem:[#allocation2 + $0x60] sm:$0xff]  ;;  %v596_v22 = vld [vmem:[#allocation2 + $0x70] sm:$0xff]  ;;  %v599_v23 = vld [vmem:[#allocation2 + $0x88] sm:$0xff] }
  0x4f   : > { %v601_v24 = vld [vmem:[#allocation2 + $0x98] sm:$0xff]  ;;  %v638_v25 = vpack.c.bf16 %v596_v22, %v594_v21  ;;  %v598_v27 = vld [vmem:[#allocation2 + $0x80] sm:$0xff]  ;;  %v600_v28 = vld [vmem:[#allocation2 + $0x90] sm:$0xff]  ;;  %s3639_s18 = scalar_lea.vmem %s5230_s30, %s3173_s24 }
  0x50   : > { %v641_v26 = vpack.c.bf16 %v601_v24, %v599_v23  ;;  %v603_v29 = vld [vmem:[#allocation2 + $0xa8] sm:$0xff]  ;;  %v605_v30 = vld [vmem:[#allocation2 + $0xb8] sm:$0xff]  ;;  %v602_v31 = vld [vmem:[#allocation2 + $0xa0] sm:$0xff]  ;;  %v640_v32 = vpack.c.bf16 %v600_v28, %v598_v27 }
  0x51   : > { %675 = vmatpush1.bf16.msra.mxu0 %v634_v13  ;;  %v604_v33 = vld [vmem:[#allocation2 + $0xb0] sm:$0xff]  ;;  %v579_v34 = vld [vmem:[%s3639_s18 + $0x8] sm:$0xff]  ;;  %v581_v35 = vld [vmem:[%s3639_s18 + $0x18] sm:$0xff]  ;;  %v643_v36 = vpack.c.bf16 %v605_v30, %v603_v29 }
  0x52   : > { %676 = vmatprep.subr.bf16.mxu0 %v637_v14  ;;  %v607_v37 = vld [vmem:[#allocation2 + $0xc8] sm:$0xff]  ;;  %v631_v38 = vpack.c.bf16 %v581_v35, %v579_v34  ;;  %v746_v40 = vld [vmem:[%s5200_s5 + $0x38] sm:$0xff]  ;;  %v739_v43 = vld [vmem:[%s5200_s5] sm:$0xff]  ;;  %v642_v46 = vpack.c.bf16 %v604_v33, %v602_v31 }
  0x53   : > { %v740_v39 = vld [vmem:[%s5200_s5 + $0x8] sm:$0xff]  ;;  %v609_v41 = vld [vmem:[#allocation2 + $0xd8] sm:$0xff]  ;;  %v745_v44 = vld [vmem:[%s5200_s5 + $0x30] sm:$0xff]  ;;  %s576_s22 = scalar_lea.vmem %s5232_s20, %s3145_s0 }
  0x54   : > { %v1002_v42 = vpack.c.bf16 %v746_v40, %v740_v39  ;;  %3146 = vmatprep.mubr.msk.bf16.mxu0 %vm668_vm0, %v631_v38  ;;  %v1001_v45 = vpack.c.bf16 %v745_v44, %v739_v43  ;;  %v752_v47 = vld [vmem:[%s5200_s5 + $0x68] sm:$0xff]  ;;  %v758_v48 = vld [vmem:[%s5200_s5 + $0x98] sm:$0xff]  ;;  %v751_v49 = vld [vmem:[%s5200_s5 + $0x60] sm:$0xff]  ;;  %v645_v50 = vpack.c.bf16 %v609_v41, %v607_v37 }
  0x55   : > { %677 = vmatpush1.bf16.msra.mxu0 %v636_v19  ;;  %v606_v51 = vld [vmem:[#allocation2 + $0xc0] sm:$0xff]  ;;  %v608_v52 = vld [vmem:[#allocation2 + $0xd0] sm:$0xff]  ;;  %v1008_v53 = vpack.c.bf16 %v758_v48, %v752_v47  ;;  %v611_v55 = vld [vmem:[#allocation2 + $0xe8] sm:$0xff] }
  0x56   : > { %678 = vmatprep.subr.bf16.mxu0 %v639_v20  ;;  %1128 = vmatprep.subr.bf16.mxu1 %v1002_v42  ;;  %v757_v54 = vld [vmem:[%s5200_s5 + $0x90] sm:$0xff]  ;;  %v613_v56 = vld [vmem:[#allocation2 + $0xf8] sm:$0xff]  ;;  %v764_v58 = vld [vmem:[%s5200_s5 + $0xc8] sm:$0xff]  ;;  %v644_v62 = vpack.c.bf16 %v608_v52, %v606_v51 }
  0x57   : > { %1129 = vmatpush1.bf16.msra.mxu1 %v1001_v45  ;;  %v1007_v57 = vpack.c.bf16 %v757_v54, %v751_v49  ;;  %v770_v59 = vld [vmem:[%s5200_s5 + $0xf8] sm:$0xff]  ;;  %v763_v60 = vld [vmem:[%s5200_s5 + $0xc0] sm:$0xff]  ;;  %v769_v61 = vld [vmem:[%s5200_s5 + $0xf0] sm:$0xff]  ;;  %v647_v2 = vpack.c.bf16 %v613_v56, %v611_v55 }
  0x58   : > { %1130 = vmatprep.subr.bf16.mxu1 %v1008_v53  ;;  %v610_v63 = vld [vmem:[#allocation2 + $0xe0] sm:$0xff]  ;;  %v612_v0 = vld [vmem:[#allocation2 + $0xf0] sm:$0xff]  ;;  %v1014_v1 = vpack.c.bf16 %v770_v59, %v764_v58  ;;  %v615_v3 = vld [vmem:[#allocation2 + $0x108] sm:$0xff]  ;;  %v1013_v4 = vpack.c.bf16 %v769_v61, %v763_v60 }
  0x59   : > { %679 = vmatpush1.bf16.msra.mxu0 %v638_v25  ;;  %v776_v5 = vld [vmem:[%s5200_s5 + $0x128] sm:$0xff]  ;;  %v782_v6 = vld [vmem:[%s5200_s5 + $0x158] sm:$0xff]  ;;  %v775_v9 = vld [vmem:[%s5200_s5 + $0x120] sm:$0xff]  ;;  %v646_v11 = vpack.c.bf16 %v612_v0, %v610_v63 }
  0x5a   : > { %680 = vmatprep.subr.bf16.mxu0 %v641_v26  ;;  %v617_v7 = vld [vmem:[#allocation2 + $0x118] sm:$0xff]  ;;  %v1020_v8 = vpack.c.bf16 %v782_v6, %v776_v5  ;;  %v781_v10 = vld [vmem:[%s5200_s5 + $0x150] sm:$0xff]  ;;  %v788_v12 = vld [vmem:[%s5200_s5 + $0x188] sm:$0xff] }
  0x5b   : > { %1131 = vmatpush1.bf16.msra.mxu1 %v1007_v57  ;;  %v794_v13 = vld [vmem:[%s5200_s5 + $0x1b8] sm:$0xff]  ;;  %v649_v14 = vpack.c.bf16 %v617_v7, %v615_v3  ;;  %v614_v15 = vld [vmem:[#allocation2 + $0x100] sm:$0xff]  ;;  %v616_v16 = vld [vmem:[#allocation2 + $0x110] sm:$0xff]  ;;  %v1019_v18 = vpack.c.bf16 %v781_v10, %v775_v9 }
  0x5c   : > { %1132 = vmatprep.subr.bf16.mxu1 %v1014_v1  ;;  %v619_v17 = vld [vmem:[#allocation2 + $0x128] sm:$0xff]  ;;  %v621_v19 = vld [vmem:[#allocation2 + $0x138] sm:$0xff]  ;;  %v1026_v20 = vpack.c.bf16 %v794_v13, %v788_v12  ;;  %v787_v21 = vld [vmem:[%s5200_s5 + $0x180] sm:$0xff]  ;;  %v648_v25 = vpack.c.bf16 %v616_v16, %v614_v15 }
  0x5d   : > { %681 = vmatpush1.bf16.msra.mxu0 %v640_v32  ;;  %v793_v22 = vld [vmem:[%s5200_s5 + $0x1b0] sm:$0xff]  ;;  %v800_v23 = vld [vmem:[%s5200_s5 + $0x1e8] sm:$0xff]  ;;  %v806_v24 = vld [vmem:[%s5200_s5 + $0x218] sm:$0xff]  ;;  %v651_v26 = vpack.c.bf16 %v621_v19, %v619_v17 }
  0x5e   : > { %682 = vmatprep.subr.bf16.mxu0 %v643_v36  ;;  %v618_v27 = vld [vmem:[#allocation2 + $0x120] sm:$0xff]  ;;  %v620_v28 = vld [vmem:[#allocation2 + $0x130] sm:$0xff]  ;;  %v623_v29 = vld [vmem:[#allocation2 + $0x148] sm:$0xff]  ;;  %v1025_v30 = vpack.c.bf16 %v793_v22, %v787_v21  ;;  %v1032_v32 = vpack.c.bf16 %v806_v24, %v800_v23 }
  0x5f   : > { %1133 = vmatpush1.bf16.msra.mxu1 %v1013_v4  ;;  %v625_v31 = vld [vmem:[#allocation2 + $0x158] sm:$0xff]  ;;  %v799_v33 = vld [vmem:[%s5200_s5 + $0x1e0] sm:$0xff]  ;;  %v805_v34 = vld [vmem:[%s5200_s5 + $0x210] sm:$0xff]  ;;  %v650_v37 = vpack.c.bf16 %v620_v28, %v618_v27 }
  0x60   : > { %1134 = vmatprep.subr.bf16.mxu1 %v1020_v8  ;;  %v812_v35 = vld [vmem:[%s5200_s5 + $0x248] sm:$0xff]  ;;  %v818_v36 = vld [vmem:[%s5200_s5 + $0x278] sm:$0xff]  ;;  %v653_v38 = vpack.c.bf16 %v625_v31, %v623_v29  ;;  %v622_v39 = vld [vmem:[#allocation2 + $0x140] sm:$0xff]  ;;  %v1031_v42 = vpack.c.bf16 %v805_v34, %v799_v33 }
  0x61   : > { %683 = vmatpush1.bf16.msra.mxu0 %v642_v46  ;;  %v624_v40 = vld [vmem:[#allocation2 + $0x150] sm:$0xff]  ;;  %v627_v41 = vld [vmem:[#allocation2 + $0x168] sm:$0xff]  ;;  %v629_v43 = vld [vmem:[#allocation2 + $0x178] sm:$0xff]  ;;  %v1038_v44 = vpack.c.bf16 %v818_v36, %v812_v35 }
  0x62   : > { %684 = vmatprep.subr.bf16.mxu0 %v645_v50  ;;  %v811_v45 = vld [vmem:[%s5200_s5 + $0x240] sm:$0xff]  ;;  %v817_v46 = vld [vmem:[%s5200_s5 + $0x270] sm:$0xff]  ;;  %v824_v47 = vld [vmem:[%s5200_s5 + $0x2a8] sm:$0xff]  ;;  %v652_v49 = vpack.c.bf16 %v624_v40, %v622_v39  ;;  %v655_v50 = vpack.c.bf16 %v629_v43, %v627_v41 }
  0x63   : > { %1135 = vmatpush1.bf16.msra.mxu1 %v1019_v18  ;;  %v830_v48 = vld [vmem:[%s5200_s5 + $0x2d8] sm:$0xff]  ;;  %v626_v51 = vld [vmem:[#allocation2 + $0x160] sm:$0xff]  ;;  %v628_v52 = vld [vmem:[#allocation2 + $0x170] sm:$0xff]  ;;  %v1037_v54 = vpack.c.bf16 %v817_v46, %v811_v45 }
  0x64   : > { %1136 = vmatprep.subr.bf16.mxu1 %v1026_v20  ;;  %v742_v53 = vld [vmem:[%s5200_s5 + $0x18] sm:$0xff]  ;;  %v748_v55 = vld [vmem:[%s5200_s5 + $0x48] sm:$0xff]  ;;  %v1044_v56 = vpack.c.bf16 %v830_v48, %v824_v47  ;;  %v823_v57 = vld [vmem:[%s5200_s5 + $0x2a0] sm:$0xff]  ;;  %v654_v61 = vpack.c.bf16 %v628_v52, %v626_v51 }
  0x65   : > { %685 = vmatpush1.bf16.msra.mxu0 %v644_v62  ;;  %v829_v58 = vld [vmem:[%s5200_s5 + $0x2d0] sm:$0xff]  ;;  %v836_v59 = vld [vmem:[%s5200_s5 + $0x308] sm:$0xff]  ;;  %v842_v60 = vld [vmem:[%s5200_s5 + $0x338] sm:$0xff]  ;;  %v1004_v0 = vpack.c.bf16 %v748_v55, %v742_v53 }
  0x66   : > { %686 = vmatprep.subr.bf16.mxu0 %v647_v2  ;;  %v578_v62 = vld [vmem:[%s3639_s18] sm:$0xff]  ;;  %v580_v63 = vld [vmem:[%s3639_s18 + $0x10] sm:$0xff]  ;;  %v754_v3 = vld [vmem:[%s5200_s5 + $0x78] sm:$0xff]  ;;  %v1043_v4 = vpack.c.bf16 %v829_v58, %v823_v57  ;;  %v1050_v6 = vpack.c.bf16 %v842_v60, %v836_v59 }
  0x67   : > { %1137 = vmatpush1.bf16.msra.mxu1 %v1025_v30  ;;  %v741_v1 = vld [vmem:[%s5200_s5 + $0x10] sm:$0xff]  ;;  %v747_v2 = vld [vmem:[%s5200_s5 + $0x40] sm:$0xff]  ;;  %v760_v5 = vld [vmem:[%s5200_s5 + $0xa8] sm:$0xff]  ;;  %v630_v9 = vpack.c.bf16 %v580_v63, %v578_v62 }
  0x68   : > { %1138 = vmatprep.subr.bf16.mxu1 %v1032_v32  ;;  %v835_v7 = vld [vmem:[%s5200_s5 + $0x300] sm:$0xff]  ;;  %v841_v8 = vld [vmem:[%s5200_s5 + $0x330] sm:$0xff]  ;;  %v848_v10 = vld [vmem:[%s5200_s5 + $0x368] sm:$0xff]  ;;  %v1003_v12 = vpack.c.bf16 %v747_v2, %v741_v1  ;;  %v1010_v13 = vpack.c.bf16 %v760_v5, %v754_v3 }
  0x69   : > { %687 = vmatpush1.bf16.msra.mxu0 %v646_v11  ;;  %v854_v11 = vld [vmem:[%s5200_s5 + $0x398] sm:$0xff]  ;;  %v759_v15 = vld [vmem:[%s5200_s5 + $0xa0] sm:$0xff]  ;;  %v1049_v17 = vpack.c.bf16 %v841_v8, %v835_v7  ;;  %v772_v18 = vld [vmem:[%s5200_s5 + $0x108] sm:$0xff] }
  0x6a   : > { %688 = vmatprep.subr.bf16.mxu0 %v649_v14  ;;  %v753_v14 = vld [vmem:[%s5200_s5 + $0x70] sm:$0xff]  ;;  %v766_v16 = vld [vmem:[%s5200_s5 + $0xd8] sm:$0xff]  ;;  %v1056_v19 = vpack.c.bf16 %v854_v11, %v848_v10  ;;  %v847_v20 = vld [vmem:[%s5200_s5 + $0x360] sm:$0xff] }
  0x6b   : > { %1139 = vmatpush1.bf16.msra.mxu1 %v1031_v42  ;;  %v853_v21 = vld [vmem:[%s5200_s5 + $0x390] sm:$0xff]  ;;  %v860_v22 = vld [vmem:[%s5200_s5 + $0x3c8] sm:$0xff]  ;;  %v866_v23 = vld [vmem:[%s5200_s5 + $0x3f8] sm:$0xff]  ;;  %v1009_v24 = vpack.c.bf16 %v759_v15, %v753_v14 }
  0x6c   : > { %1140 = vmatprep.subr.bf16.mxu1 %v1038_v44  ;;  %v771_v27 = vld [vmem:[%s5200_s5 + $0x100] sm:$0xff]  ;;  %v778_v28 = vld [vmem:[%s5200_s5 + $0x138] sm:$0xff]  ;;  %v1055_v29 = vpack.c.bf16 %v853_v21, %v847_v20  ;;  %v784_v30 = vld [vmem:[%s5200_s5 + $0x168] sm:$0xff]  ;;  %v1062_v31 = vpack.c.bf16 %v866_v23, %v860_v22 }
  0x6d   : > { %689 = vmatpush1.bf16.msra.mxu0 %v648_v25  ;;  %v1016_v25 = vpack.c.bf16 %v772_v18, %v766_v16  ;;  %v859_v32 = vld [vmem:[%s5200_s5 + $0x3c0] sm:$0xff]  ;;  %v865_v33 = vld [vmem:[%s5200_s5 + $0x3f0] sm:$0xff]  ;;  %v872_v34 = vld [vmem:[%s5200_s5 + $0x428] sm:$0xff] }
  0x6e   : > { %690 = vmatprep.subr.bf16.mxu0 %v651_v26  ;;  %v765_v26 = vld [vmem:[%s5200_s5 + $0xd0] sm:$0xff]  ;;  %v878_v35 = vld [vmem:[%s5200_s5 + $0x458] sm:$0xff]  ;;  %v783_v39 = vld [vmem:[%s5200_s5 + $0x160] sm:$0xff]  ;;  %v1061_v41 = vpack.c.bf16 %v865_v33, %v859_v32 }
  0x6f   : > { %1141 = vmatpush1.bf16.msra.mxu1 %v1037_v54  ;;  %v1015_v36 = vpack.c.bf16 %v771_v27, %v765_v26  ;;  %v790_v40 = vld [vmem:[%s5200_s5 + $0x198] sm:$0xff]  ;;  %v796_v42 = vld [vmem:[%s5200_s5 + $0x1c8] sm:$0xff]  ;;  %v1068_v43 = vpack.c.bf16 %v878_v35, %v872_v34  ;;  %v871_v44 = vld [vmem:[%s5200_s5 + $0x420] sm:$0xff] }
  0x70   : > { %1142 = vmatprep.subr.bf16.mxu1 %v1044_v56  ;;  %v877_v45 = vld [vmem:[%s5200_s5 + $0x450] sm:$0xff]  ;;  %v884_v46 = vld [vmem:[%s5200_s5 + $0x488] sm:$0xff]  ;;  %v890_v47 = vld [vmem:[%s5200_s5 + $0x4b8] sm:$0xff] }
  0x71   : > { %691 = vmatpush1.bf16.msra.mxu0 %v650_v37  ;;  %v1022_v37 = vpack.c.bf16 %v784_v30, %v778_v28  ;;  %v795_v51 = vld [vmem:[%s5200_s5 + $0x1c0] sm:$0xff]  ;;  %v802_v52 = vld [vmem:[%s5200_s5 + $0x1f8] sm:$0xff]  ;;  %v1067_v53 = vpack.c.bf16 %v877_v45, %v871_v44  ;;  %v808_v54 = vld [vmem:[%s5200_s5 + $0x228] sm:$0xff]  ;;  %v1074_v55 = vpack.c.bf16 %v890_v47, %v884_v46 }
  0x72   : > { %692 = vmatprep.subr.bf16.mxu0 %v653_v38  ;;  %v777_v38 = vld [vmem:[%s5200_s5 + $0x130] sm:$0xff]  ;;  %v883_v56 = vld [vmem:[%s5200_s5 + $0x480] sm:$0xff]  ;;  %v896_v58 = vld [vmem:[%s5200_s5 + $0x4e8] sm:$0xff] }
  0x73   : > { %1143 = vmatpush1.bf16.msra.mxu1 %v1043_v4  ;;  %v1021_v48 = vpack.c.bf16 %v783_v39, %v777_v38  ;;  %v889_v57 = vld [vmem:[%s5200_s5 + $0x4b0] sm:$0xff]  ;;  %v902_v59 = vld [vmem:[%s5200_s5 + $0x518] sm:$0xff]  ;;  %v807_v63 = vld [vmem:[%s5200_s5 + $0x220] sm:$0xff] }
  0x74   : > { %1144 = vmatprep.subr.bf16.mxu1 %v1050_v6  ;;  %v801_v62 = vld [vmem:[%s5200_s5 + $0x1f0] sm:$0xff]  ;;  %v1073_v1 = vpack.c.bf16 %v889_v57, %v883_v56  ;;  %v820_v2 = vld [vmem:[%s5200_s5 + $0x288] sm:$0xff]  ;;  %v1080_v3 = vpack.c.bf16 %v902_v59, %v896_v58  ;;  %v895_v4 = vld [vmem:[%s5200_s5 + $0x4e0] sm:$0xff] }
  0x75   : > { %693 = vmatpush1.bf16.msra.mxu0 %v652_v49  ;;  %v1028_v49 = vpack.c.bf16 %v796_v42, %v790_v40  ;;  %v901_v5 = vld [vmem:[%s5200_s5 + $0x510] sm:$0xff]  ;;  %v1033_v6 = vpack.c.bf16 %v807_v63, %v801_v62  ;;  %v826_v11 = vld [vmem:[%s5200_s5 + $0x2b8] sm:$0xff]  ;;  %v831_v16 = vld [vmem:[%s5200_s5 + $0x2e0] sm:$0xff] }
  0x76   : > { %694 = vmatprep.subr.bf16.mxu0 %v655_v50  ;;  %v789_v50 = vld [vmem:[%s5200_s5 + $0x190] sm:$0xff]  ;;  %v1079_v10 = vpack.c.bf16 %v901_v5, %v895_v4  ;;  %v844_v18 = vld [vmem:[%s5200_s5 + $0x348] sm:$0xff]  ;;  %v843_v22 = vld [vmem:[%s5200_s5 + $0x340] sm:$0xff] }
  0x77   : > { %1145 = vmatpush1.bf16.msra.mxu1 %v1049_v17  ;;  %v1027_v60 = vpack.c.bf16 %v795_v51, %v789_v50  ;;  %v813_v8 = vld [vmem:[%s5200_s5 + $0x250] sm:$0xff]  ;;  %v838_v17 = vld [vmem:[%s5200_s5 + $0x318] sm:$0xff]  ;;  %v855_v28 = vld [vmem:[%s5200_s5 + $0x3a0] sm:$0xff] }
  0x78   : > { %1146 = vmatprep.subr.bf16.mxu1 %v1056_v19  ;;  %v825_v15 = vld [vmem:[%s5200_s5 + $0x2b0] sm:$0xff]  ;;  %v1052_v20 = vpack.c.bf16 %v844_v18, %v838_v17  ;;  %v850_v23 = vld [vmem:[%s5200_s5 + $0x378] sm:$0xff]  ;;  %v868_v30 = vld [vmem:[%s5200_s5 + $0x408] sm:$0xff]  ;;  %v658_v17 = vlaneseq }
  0x79   : > { %695 = vmatpush1.bf16.msra.mxu0 %v654_v61  ;;  %v1034_v61 = vpack.c.bf16 %v808_v54, %v802_v52  ;;  %v1045_v19 = vpack.c.bf16 %v831_v16, %v825_v15  ;;  %v837_v21 = vld [vmem:[%s5200_s5 + $0x310] sm:$0xff]  ;;  %v867_v34 = vld [vmem:[%s5200_s5 + $0x400] sm:$0xff]  ;;  %v874_v35 = vld [vmem:[%s5200_s5 + $0x438] sm:$0xff] }
  0x7a   : > { %1179 = vmatprep.subr.bf16.mxu0 %v1004_v0  ;;  %v814_v0 = vld [vmem:[%s5200_s5 + $0x258] sm:$0xff]  ;;  %v849_v27 = vld [vmem:[%s5200_s5 + $0x370] sm:$0xff]  ;;  %v879_v40 = vld [vmem:[%s5200_s5 + $0x460] sm:$0xff]  ;;  %v4037_v18 = vshrl.u32 %v658_v17, 7  ;;  %vm3056_vm4 = vcmp.lt.s32.totalorder %v658_v17, 256 }
  0x7b   : > { %1147 = vmatpush1.bf16.msra.mxu1 %v1055_v29  ;;  %v1040_v7 = vpack.c.bf16 %v820_v2, %v814_v0  ;;  %v862_v29 = vld [vmem:[%s5200_s5 + $0x3d8] sm:$0xff]  ;;  %v861_v33 = vld [vmem:[%s5200_s5 + $0x3d0] sm:$0xff]  ;;  %v892_v42 = vld [vmem:[%s5200_s5 + $0x4c8] sm:$0xff] }
  0x7c   : > { %705 = vmatmul.mubr.bf16.vlgmr.msra.gmra.mrb[0].mxu0 %v630_v9  ;;  %1148 = vmatprep.subr.bf16.mxu1 %v1062_v31  ;;  %v819_v9 = vld [vmem:[%s5200_s5 + $0x280] sm:$0xff]  ;;  %v1057_v31 = vpack.c.bf16 %v855_v28, %v849_v27  ;;  %v1064_v32 = vpack.c.bf16 %v868_v30, %v862_v29  ;;  %v873_v39 = vld [vmem:[%s5200_s5 + $0x430] sm:$0xff]  ;;  %v898_v47 = vld [vmem:[%s5200_s5 + $0x4f8] sm:$0xff] }
  0x7d   : > { %1180 = vmatpush1.bf16.msra.mxu0 %v1003_v12  ;;  %v832_v12 = vld [vmem:[%s5200_s5 + $0x2e8] sm:$0xff]  ;;  %v885_v45 = vld [vmem:[%s5200_s5 + $0x490] sm:$0xff]  ;;  %v891_v46 = vld [vmem:[%s5200_s5 + $0x4c0] sm:$0xff] }
  0x7e   : > { %1181 = vmatprep.subr.bf16.mxu0 %v1010_v13  ;;  %v1039_v13 = vpack.c.bf16 %v819_v9, %v813_v8  ;;  %v1046_v14 = vpack.c.bf16 %v832_v12, %v826_v11  ;;  %v897_v51 = vld [vmem:[%s5200_s5 + $0x4f0] sm:$0xff]  ;;  %v903_v52 = vld [vmem:[%s5200_s5 + $0x520] sm:$0xff]  ;;  %v908_v54 = vld [vmem:[%s5200_s5 + $0x548] sm:$0xff] }
  0x7f   : > { %1149 = vmatpush1.bf16.msra.mxu1 %v1061_v41  ;;  %v886_v41 = vld [vmem:[%s5200_s5 + $0x498] sm:$0xff]  ;;  %v907_v57 = vld [vmem:[%s5200_s5 + $0x540] sm:$0xff]  ;;  %v913_v58 = vld [vmem:[%s5200_s5 + $0x570] sm:$0xff] }
  0x80   : > { %1150 = vmatprep.subr.bf16.mxu1 %v1068_v43  ;;  %v1069_v43 = vpack.c.bf16 %v879_v40, %v873_v39  ;;  %v1076_v44 = vpack.c.bf16 %v892_v42, %v886_v41  ;;  %v910_v59 = vld [vmem:[%s5200_s5 + $0x558] sm:$0xff]  ;;  %v909_v62 = vld [vmem:[%s5200_s5 + $0x550] sm:$0xff]  ;;  %v915_v0 = vld [vmem:[%s5200_s5 + $0x580] sm:$0xff] }
  0x81   : > { %1182 = vmatpush1.bf16.msra.mxu0 %v1009_v24  ;;  %v856_v24 = vld [vmem:[%s5200_s5 + $0x3a8] sm:$0xff]  ;;  %v919_v5 = vld [vmem:[%s5200_s5 + $0x5a0] sm:$0xff]  ;;  %v922_v8 = vld [vmem:[%s5200_s5 + $0x5b8] sm:$0xff] }
  0x82   : > { %1183 = vmatprep.subr.bf16.mxu0 %v1016_v25  ;;  %v1051_v25 = vpack.c.bf16 %v843_v22, %v837_v21  ;;  %v1058_v26 = vpack.c.bf16 %v856_v24, %v850_v23  ;;  %v920_v2 = vld [vmem:[%s5200_s5 + $0x5a8] sm:$0xff]  ;;  %v921_v11 = vld [vmem:[%s5200_s5 + $0x5b0] sm:$0xff]  ;;  %v927_v12 = vld [vmem:[%s5200_s5 + $0x5e0] sm:$0xff]  ;;  %v4046_v21 = vsub.s32 0, %v4037_v18 }
  0x83   : > { %1151 = vmatpush1.bf16.msra.mxu1 %v1067_v53  ;;  %v1081_v53 = vpack.c.bf16 %v903_v52, %v897_v51  ;;  %v928_v9 = vld [vmem:[%s5200_s5 + $0x5e8] sm:$0xff]  ;;  %v750_v15 = vld [vmem:[%s5200_s5 + $0x58] sm:$0xff]  ;;  %v715_v22 = vld [vmem:[%s5198_s3] sm:$0x3] }
  0x84   : > { %1152 = vmatprep.subr.bf16.mxu1 %v1074_v55  ;;  %v914_v55 = vld [vmem:[%s5200_s5 + $0x578] sm:$0xff]  ;;  %v732_v28 = vld [vmem:[%s5199_s4 + $0x28] sm:$0x1]  ;;  %v743_v41 = vld [vmem:[%s5200_s5 + $0x20] sm:$0xff] }
  0x85   : > { %1184 = vmatpush1.bf16.msra.mxu0 %v1015_v36  ;;  %v880_v36 = vld [vmem:[%s5200_s5 + $0x468] sm:$0xff]  ;;  %v1086_v56 = vpack.c.bf16 %v914_v55, %v908_v54  ;;  %v749_v42 = vld [vmem:[%s5200_s5 + $0x50] sm:$0xff]  ;;  %v731_v52 = vld [vmem:[%s5199_s4 + $0x20] sm:$0x1] }
  0x86   : > { %1185 = vmatprep.subr.bf16.mxu0 %v1022_v37  ;;  %v1063_v37 = vpack.c.bf16 %v867_v34, %v861_v33  ;;  %v1070_v38 = vpack.c.bf16 %v880_v36, %v874_v35  ;;  %v728_v33 = vld [vmem:[%s5199_s4 + $0x8] sm:$0xff]  ;;  %v730_v36 = vld [vmem:[%s5199_s4 + $0x18] sm:$0xff]  ;;  %v755_v55 = vld [vmem:[%s5200_s5 + $0x80] sm:$0xff] }
  0x87   : > { %1153 = vmatpush1.bf16.msra.mxu1 %v1073_v1  ;;  %v1087_v1 = vpack.c.bf16 %v915_v0, %v909_v62  ;;  %v767_v62 = vld [vmem:[%s5200_s5 + $0xe0] sm:$0xff]  ;;  %v780_v0 = vld [vmem:[%s5200_s5 + $0x148] sm:$0xff] }
  0x88   : > { %1154 = vmatprep.subr.bf16.mxu1 %v1080_v3  ;;  %v926_v3 = vld [vmem:[%s5200_s5 + $0x5d8] sm:$0xff] }
  0x89   : > { %1186 = vmatpush1.bf16.msra.mxu0 %v1021_v48  ;;  %v904_v48 = vld [vmem:[%s5200_s5 + $0x528] sm:$0xff]  ;;  %v1092_v4 = vpack.c.bf16 %v926_v3, %v920_v2 }
  0x8a   : > { %1187 = vmatprep.subr.bf16.mxu0 %v1028_v49  ;;  %v1075_v49 = vpack.c.bf16 %v891_v46, %v885_v45  ;;  %v1082_v50 = vpack.c.bf16 %v904_v48, %v898_v47  ;;  %v756_v45 = vld [vmem:[%s5200_s5 + $0x88] sm:$0xff]  ;;  %v762_v46 = vld [vmem:[%s5200_s5 + $0xb8] sm:$0xff]  ;;  %v720_v48 = vrot.slane %v715_v22, %v4046_v21 }
  0x8b   : > { %1155 = vmatpush1.bf16.msra.mxu1 %v1079_v10  ;;  %v1094_v10 = vpack.c.bf16 %v928_v9, %v922_v8  ;;  %v1012_v54 = vpack.c.bf16 %v762_v46, %v756_v45  ;;  %v798_v8 = vld [vmem:[%s5200_s5 + $0x1d8] sm:$0xff]  ;;  %v852_v45 = vld [vmem:[%s5200_s5 + $0x388] sm:$0xff] }
  0x8c   : > { %1156 = vmatprep.subr.bf16.mxu1 %v1086_v56  ;;  %v761_v56 = vld [vmem:[%s5200_s5 + $0xb0] sm:$0xff]  ;;  %v858_v46 = vld [vmem:[%s5200_s5 + $0x3b8] sm:$0xff] }
  0x8d   : > { %1188 = vmatpush1.bf16.msra.mxu0 %v1027_v60  ;;  %v1085_v60 = vpack.c.bf16 %v913_v58, %v907_v57  ;;  %v768_v57 = vld [vmem:[%s5200_s5 + $0xe8] sm:$0xff]  ;;  %v774_v58 = vld [vmem:[%s5200_s5 + $0x118] sm:$0xff] }
  0x8e   : > { %1189 = vmatprep.subr.bf16.mxu0 %v1034_v61  ;;  %v916_v61 = vld [vmem:[%s5200_s5 + $0x588] sm:$0xff] }
  0x8f   : > { %v1088_v63 = vpack.c.bf16 %v916_v61, %v910_v59  ;;  %1157 = vmatpush1.bf16.msra.mxu1 %v1085_v60  ;;  %v4119_v59 = vadd.f32 %v731_v52, %v720_v48  ;;  %v1011_v60 = vpack.c.bf16 %v761_v56, %v755_v55  ;;  %v1018_v61 = vpack.c.bf16 %v774_v58, %v768_v57  ;;  %v857_v52 = vld [vmem:[%s5200_s5 + $0x3b0] sm:$0xff]  ;;  %v870_v55 = vld [vmem:[%s5200_s5 + $0x418] sm:$0xff]  ;;  %v863_v58 = vld [vmem:[%s5200_s5 + $0x3e0] sm:$0xff] }
  0x90   : > { %1158 = vmatprep.subr.bf16.mxu1 %v1092_v4 }
  0x91   : > { %1190 = vmatpush1.bf16.msra.mxu0 %v1033_v6  ;;  %v925_v6 = vld [vmem:[%s5200_s5 + $0x5d0] sm:$0xff]  ;;  %v4137_v2 = vpack.c.bf16 %v4119_v59, %v4119_v59 }
  0x92   : > { %1191 = vmatprep.subr.bf16.mxu0 %v1040_v7  ;;  %v1091_v7 = vpack.c.bf16 %v925_v6, %v919_v5  ;;  %v779_v5 = vld [vmem:[%s5200_s5 + $0x140] sm:$0xff]  ;;  %v785_v6 = vld [vmem:[%s5200_s5 + $0x170] sm:$0xff] }
  0x93   : > { %v1023_v9 = vpack.c.bf16 %v785_v6, %v779_v5  ;;  %v894_v5 = vld [vmem:[%s5200_s5 + $0x4d8] sm:$0xff] }
  0x94   : > { %1159 = vmatpush1.bf16.msra.mxu1 %v1091_v7  ;;  %v792_v7 = vld [vmem:[%s5200_s5 + $0x1a8] sm:$0xff] }
  0x95   : > { %1192 = vmatpush1.bf16.msra.mxu0 %v1039_v13  ;;  %v1093_v13 = vpack.c.bf16 %v927_v12, %v921_v11  ;;  %v791_v11 = vld [vmem:[%s5200_s5 + $0x1a0] sm:$0xff]  ;;  %v797_v12 = vld [vmem:[%s5200_s5 + $0x1d0] sm:$0xff] }
  0x96   : > { %1193 = vmatprep.subr.bf16.mxu0 %v1046_v14  ;;  %v744_v14 = vld [vmem:[%s5200_s5 + $0x28] sm:$0xff] }
  0x97   : > { %v1006_v16 = vpack.c.bf16 %v750_v15, %v744_v14  ;;  %v810_v14 = vld [vmem:[%s5200_s5 + $0x238] sm:$0xff]  ;;  %v1029_v15 = vpack.c.bf16 %v797_v12, %v791_v11 }
  0x98   : > { %v906_v11 = vld [vmem:[%s5200_s5 + $0x538] sm:$0xff] }
  0x99   : > { %1194 = vmatpush1.bf16.msra.mxu0 %v1045_v19  ;;  %1230 = vmatprep.subr.bf16.mxu1 %v1006_v16  ;;  %v4040_v19 = vsub.s32 1, %v4037_v18 }
  0x9a   : > { %1195 = vmatprep.subr.bf16.mxu0 %v1052_v20  ;;  %v656_v20 = vld [vmem:[%s5197_s2] sm:$0x3] }
  0x9b   : > { %v665_v23 = vrot.slane %v656_v20, %v4040_v19  ;;  %v661_v24 = vrot.slane %v656_v20, %v4046_v21  ;;  %v803_v20 = vld [vmem:[%s5200_s5 + $0x200] sm:$0xff] }
  0x9d   : > { %1196 = vmatpush1.bf16.msra.mxu0 %v1051_v25 }
  0x9e   : > { %1197 = vmatprep.subr.bf16.mxu0 %v1058_v26  ;;  %v724_v26 = vrot.slane %v715_v22, %v4040_v19  ;;  %v809_v22 = vld [vmem:[%s5200_s5 + $0x230] sm:$0xff] }
  0xa0   : > { %v4069_v39 = vadd.f32 %v732_v28, %v724_v26  ;;  %v821_v28 = vld [vmem:[%s5200_s5 + $0x290] sm:$0xff] }
  0xa1   : > { %1198 = vmatpush1.bf16.msra.mxu0 %v1057_v31  ;;  %v729_v31 = vld [vmem:[%s5199_s4 + $0x10] sm:$0xff] }
  0xa2   : > { %1199 = vmatprep.subr.bf16.mxu0 %v1064_v32  ;;  %v4096_v51 = vpack.c.bf16 %v4069_v39, %v4069_v39 }
  0xa5   : > { %1200 = vmatpush1.bf16.msra.mxu0 %v1063_v37  ;;  %v727_v37 = vld [vmem:[%s5199_s4] sm:$0xff] }
  0xa6   : > { %1201 = vmatprep.subr.bf16.mxu0 %v1070_v38 }
  0xa9   : > { %1202 = vmatpush1.bf16.msra.mxu0 %v1069_v43 }
  0xaa   : > { %1203 = vmatprep.subr.bf16.mxu0 %v1076_v44 }
  0xad   : > { %1204 = vmatpush1.bf16.msra.mxu0 %v1075_v49 }
  0xae   : > { %1205 = vmatprep.subr.bf16.mxu0 %v1082_v50  ;;  %v1005_v50 = vpack.c.bf16 %v749_v42, %v743_v41  ;;  %v839_v41 = vld [vmem:[%s5200_s5 + $0x320] sm:$0xff]  ;;  %v845_v42 = vld [vmem:[%s5200_s5 + $0x350] sm:$0xff] }
  0xaf   : > { %v1053_v48 = vpack.c.bf16 %v845_v42, %v839_v41 }
  0xb1   : > { %1206 = vmatpush1.bf16.msra.mxu0 %v1081_v53 }
  0xb2   : > { %1207 = vmatprep.subr.bf16.mxu0 %v1088_v63  ;;  %v773_v63 = vld [vmem:[%s5200_s5 + $0x110] sm:$0xff] }
  0xb3   : > { %v1017_v3 = vpack.c.bf16 %v773_v63, %v767_v62  ;;  %v882_v62 = vld [vmem:[%s5200_s5 + $0x478] sm:$0xff] }
  0xb5   : > { %1208 = vmatpush1.bf16.msra.mxu0 %v1087_v1  ;;  %v786_v1 = vld [vmem:[%s5200_s5 + $0x178] sm:$0xff] }
  0xb6   : > { %1209 = vmatprep.subr.bf16.mxu0 %v1094_v10  ;;  %v1024_v4 = vpack.c.bf16 %v786_v1, %v780_v0  ;;  %v1030_v10 = vpack.c.bf16 %v798_v8, %v792_v7  ;;  %v875_v1 = vld [vmem:[%s5200_s5 + $0x440] sm:$0xff] }
  0xb7   : > { %v887_v8 = vld [vmem:[%s5200_s5 + $0x4a0] sm:$0xff] }
  0xb9   : > { %1210 = vmatpush1.bf16.msra.mxu0 %v1093_v13  ;;  %v804_v13 = vld [vmem:[%s5200_s5 + $0x208] sm:$0xff] }
  0xba   : > { %v1036_v16 = vpack.c.bf16 %v810_v14, %v804_v13  ;;  %v899_v14 = vld [vmem:[%s5200_s5 + $0x500] sm:$0xff] }
 0x14f   : > { %v706_v25 = vpop.f32.mrb[0].mxu0 }
 0x150   : > { %v708_v27 = vpop.f32.mrb[1].mxu0  ;;  %v707_v32 = vadd.f32 %v706_v25, %v661_v24  ;;  %v1035_v25 = vpack.c.bf16 %v809_v22, %v803_v20  ;;  %v918_v20 = vld [vmem:[%s5200_s5 + $0x598] sm:$0xff] }
 0x151   : > { %v709_v29 = vadd.f32 %v708_v27, %v665_v23  ;;  %v710_v30 = vpop.f32.mrb[2].mxu0  ;;  %v815_v27 = vld [vmem:[%s5200_s5 + $0x260] sm:$0xff] }
 0x152   : > { %v711_v34 = vadd.f32 %v710_v30, %v661_v24  ;;  %v712_v35 = vpop.f32.mrb[3].mxu0  ;;  %v4089_v47 = vadd.f32 %v727_v37, %v707_v32  ;;  %v822_v24 = vld [vmem:[%s5200_s5 + $0x298] sm:$0xff] }
 0x153   : > { %v713_v38 = vadd.f32 %v712_v35, %v665_v23  ;;  %v4079_v43 = vadd.f32 %v728_v33, %v709_v29  ;;  %v816_v23 = vld [vmem:[%s5200_s5 + $0x268] sm:$0xff]  ;;  %v834_v30 = vld [vmem:[%s5200_s5 + $0x2f8] sm:$0xff]  ;;  %v827_v33 = vld [vmem:[%s5200_s5 + $0x2c0] sm:$0xff] }
 0x154   : > { %v4071_v40 = vadd.f32 %v729_v31, %v711_v34  ;;  %v1042_v26 = vpack.c.bf16 %v822_v24, %v816_v23  ;;  %v828_v29 = vld [vmem:[%s5200_s5 + $0x2c8] sm:$0xff]  ;;  %v1041_v31 = vpack.c.bf16 %v821_v28, %v815_v27  ;;  %v833_v34 = vld [vmem:[%s5200_s5 + $0x2f0] sm:$0xff]  ;;  %v911_v24 = vld [vmem:[%s5200_s5 + $0x560] sm:$0xff] }
 0x155   : > { %v4081_v44 = vadd.f32 %v730_v36, %v713_v38  ;;  %v1048_v32 = vpack.c.bf16 %v834_v30, %v828_v29  ;;  %v840_v35 = vld [vmem:[%s5200_s5 + $0x328] sm:$0xff]  ;;  %v846_v36 = vld [vmem:[%s5200_s5 + $0x358] sm:$0xff]  ;;  %v1047_v37 = vpack.c.bf16 %v833_v34, %v827_v33  ;;  %v923_v30 = vld [vmem:[%s5200_s5 + $0x5c0] sm:$0xff]  ;;  %v1108_v33 = vsub.s32 2, %v4037_v18 }
 0x156   : > { %v4103_v53 = vpack.c.bf16 %v4071_v40, %v4089_v47  ;;  %v1054_v38 = vpack.c.bf16 %v846_v36, %v840_v35  ;;  %v930_v27 = vld [vmem:[%s5200_s5 + $0x5f8] sm:$0xff]  ;;  %v931_v34 = vld [vmem:[%s5201_s6] sm:$0x3f]  ;;  %v1112_v35 = vsub.s32 3, %v4037_v18 }
 0x157   : > { %v998_v49 = vpack.c.bf16 %v4081_v44, %v4079_v43  ;;  %v1101_v36 = vrot.slane %v931_v34, %v4046_v21 }
 0x159   : > { %1160 = vmatprep.mubr.bf16.mxu1 %v998_v49  ;;  %1211 = vmatprep.mubr.bf16.mxu0 %v998_v49 }
 0x15a   : > { %1161 = vmatmul.mubr.bf16.vlgmr.msra.gmra.mrb[0].mxu1 %v4103_v53  ;;  %1212 = vmatmul.mubr.bf16.vlgmr.msra.gmra.mrb[4].mxu0 %v4103_v53 }
 0x15b   : > { %1231 = vmatpush1.bf16.msra.mxu1 %v1005_v50  ;;  %1170 = vmatprep.mubr.bf16.mxu1 %v4096_v51  ;;  %v851_v50 = vld [vmem:[%s5200_s5 + $0x380] sm:$0xff] }
 0x15c   : > { %1232 = vmatprep.subr.bf16.mxu1 %v1012_v54  ;;  %1221 = vmatprep.mubr.bf16.mxu0 %v4096_v51  ;;  %v864_v54 = vld [vmem:[%s5200_s5 + $0x3e8] sm:$0xff]  ;;  %v1059_v56 = vpack.c.bf16 %v857_v52, %v851_v50 }
 0x15d   : > { %v1066_v57 = vpack.c.bf16 %v870_v55, %v864_v54 }
 0x15f   : > { %1233 = vmatpush1.bf16.msra.mxu1 %v1011_v60  ;;  %v869_v60 = vld [vmem:[%s5200_s5 + $0x410] sm:$0xff] }
 0x160   : > { %1234 = vmatprep.subr.bf16.mxu1 %v1018_v61  ;;  %v876_v61 = vld [vmem:[%s5200_s5 + $0x448] sm:$0xff]  ;;  %v1065_v63 = vpack.c.bf16 %v869_v60, %v863_v58 }
 0x161   : > { %v1072_v0 = vpack.c.bf16 %v882_v62, %v876_v61 }
 0x162   : > { %1171 = vmatmul.mubr.bf16.gmra.mrb[4].mxu1 %v4137_v2  ;;  %1222 = vmatmul.mubr.bf16.gmra.mrb[8].mxu0 %v4137_v2 }
 0x163   : > { %1235 = vmatpush1.bf16.msra.mxu1 %v1017_v3  ;;  %1262 = vmatprep.mubr.bf16.mxu1 %v998_v49  ;;  %v1060_v49 = vpack.c.bf16 %v858_v46, %v852_v45  ;;  %v881_v3 = vld [vmem:[%s5200_s5 + $0x470] sm:$0xff] }
 0x164   : > { %1236 = vmatprep.subr.bf16.mxu1 %v1024_v4  ;;  %v888_v4 = vld [vmem:[%s5200_s5 + $0x4a8] sm:$0xff]  ;;  %v1071_v6 = vpack.c.bf16 %v881_v3, %v875_v1 }
 0x165   : > { %v1078_v7 = vpack.c.bf16 %v894_v5, %v888_v4 }
 0x167   : > { %1237 = vmatpush1.bf16.msra.mxu1 %v1023_v9  ;;  %v893_v9 = vld [vmem:[%s5200_s5 + $0x4d0] sm:$0xff] }
 0x168   : > { %1238 = vmatprep.subr.bf16.mxu1 %v1030_v10  ;;  %v900_v10 = vld [vmem:[%s5200_s5 + $0x508] sm:$0xff]  ;;  %v1077_v12 = vpack.c.bf16 %v893_v9, %v887_v8 }
 0x169   : > { %v1084_v13 = vpack.c.bf16 %v906_v11, %v900_v10 }
 0x16b   : > { %1239 = vmatpush1.bf16.msra.mxu1 %v1029_v15  ;;  %v905_v15 = vld [vmem:[%s5200_s5 + $0x530] sm:$0xff] }
 0x16c   : > { %1240 = vmatprep.subr.bf16.mxu1 %v1036_v16  ;;  %v912_v16 = vld [vmem:[%s5200_s5 + $0x568] sm:$0xff]  ;;  %v1083_v22 = vpack.c.bf16 %v905_v15, %v899_v14 }
 0x16d   : > { %v1090_v23 = vpack.c.bf16 %v918_v20, %v912_v16  ;;  %v1116_v16 = vsub.s32 4, %v4037_v18  ;;  %v1120_v20 = vsub.s32 5, %v4037_v18 }
 0x16f   : > { %1241 = vmatpush1.bf16.msra.mxu1 %v1035_v25  ;;  %v917_v25 = vld [vmem:[%s5200_s5 + $0x590] sm:$0xff] }
 0x170   : > { %1242 = vmatprep.subr.bf16.mxu1 %v1042_v26  ;;  %v924_v26 = vld [vmem:[%s5200_s5 + $0x5c8] sm:$0xff]  ;;  %v1089_v28 = vpack.c.bf16 %v917_v25, %v911_v24  ;;  %v4333_v24 = vrot.slane %v931_v34, %v1120_v20 }
 0x171   : > { %v1096_v29 = vpack.c.bf16 %v930_v27, %v924_v26 }
 0x173   : > { %1243 = vmatpush1.bf16.msra.mxu1 %v1041_v31  ;;  %v929_v31 = vld [vmem:[%s5200_s5 + $0x5f0] sm:$0xff] }
 0x174   : > { %1244 = vmatprep.subr.bf16.mxu1 %v1048_v32  ;;  %v1095_v32 = vpack.c.bf16 %v929_v31, %v923_v30 }
 0x177   : > { %1245 = vmatpush1.bf16.msra.mxu1 %v1047_v37  ;;  %v1109_v37 = vrot.slane %v931_v34, %v1108_v33 }
 0x178   : > { %1246 = vmatprep.subr.bf16.mxu1 %v1054_v38 }
 0x17b   : > { %1247 = vmatpush1.bf16.msra.mxu1 %v1053_v48 }
 0x17c   : > { %1248 = vmatprep.subr.bf16.mxu1 %v1060_v49 }
 0x17f   : > { %1249 = vmatpush1.bf16.msra.mxu1 %v1059_v56 }
 0x180   : > { %1250 = vmatprep.subr.bf16.mxu1 %v1066_v57 }
 0x183   : > { %1251 = vmatpush1.bf16.msra.mxu1 %v1065_v63 }
 0x184   : > { %1252 = vmatprep.subr.bf16.mxu1 %v1072_v0 }
 0x187   : > { %1253 = vmatpush1.bf16.msra.mxu1 %v1071_v6 }
 0x188   : > { %1254 = vmatprep.subr.bf16.mxu1 %v1078_v7 }
 0x18b   : > { %1255 = vmatpush1.bf16.msra.mxu1 %v1077_v12 }
 0x18c   : > { %1256 = vmatprep.subr.bf16.mxu1 %v1084_v13 }
 0x18f   : > { %1257 = vmatpush1.bf16.msra.mxu1 %v1083_v22  ;;  %v1117_v22 = vrot.slane %v931_v34, %v1116_v16 }
 0x190   : > { %1258 = vmatprep.subr.bf16.mxu1 %v1090_v23 }
 0x193   : > { %1259 = vmatpush1.bf16.msra.mxu1 %v1089_v28 }
 0x194   : > { %1260 = vmatprep.subr.bf16.mxu1 %v1096_v29 }
 0x197   : > { %1261 = vmatpush1.bf16.msra.mxu1 %v1095_v32 }
 0x19a   : > { %1263 = vmatmul.mubr.bf16.vlgmr.msra.gmra.mrb[8].mxu1 %v4103_v53  ;;  %v4303_v53 = vrot.slane %v931_v34, %v4040_v19 }
 0x19b   : > { %1272 = vmatprep.mubr.bf16.mxu1 %v4096_v51  ;;  %v4307_v51 = vrot.slane %v931_v34, %v1112_v35 }
 0x1a2   : > { %1273 = vmatmul.mubr.bf16.gmra.mrb[12].mxu1 %v4137_v2 }
 0x22d   : > { %v1162_v38 = vpop.f32.mrb[0].mxu1  ;;  %v1213_v41 = vpop.f32.mrb[4].mxu0 }
 0x22e   : > { %v1164_v2 = vpop.f32.mrb[1].mxu1  ;;  %v1215_v42 = vpop.f32.mrb[5].mxu0  ;;  %v1163_v48 = vadd.f32 %v1162_v38, %v1101_v36  ;;  %v1214_v49 = vadd.f32 %v1213_v41, %v1109_v37  ;;  %v3457_v41 = vmov 0  }
 0x22f   : > { %v1166_v45 = vpop.f32.mrb[2].mxu1  ;;  %v1217_v46 = vpop.f32.mrb[6].mxu0  ;;  %v1165_v56 = vadd.f32 %v1164_v2, %v4303_v53  ;;  %v1216_v57 = vadd.f32 %v1215_v42, %v4307_v51  ;;  %v4347_v2 = vsel %vm1393_vm1, 65535, %v3457_v41 }
 0x230   : > { %v1167_v50 = vadd.f32 %v1166_v45, %v1101_v36  ;;  %v1218_v52 = vadd.f32 %v1217_v46, %v1109_v37  ;;  %v1168_v54 = vpop.f32.mrb[3].mxu1  ;;  %v1219_v55 = vpop.f32.mrb[7].mxu0 }
 0x231   : > { %v1169_v58 = vadd.f32 %v1168_v54, %v4303_v53  ;;  %v1220_v60 = vadd.f32 %v1219_v55, %v4307_v51 }
 0x232   : > { %v1283_v61 = vpack.c.bf16 %v1218_v52, %v1214_v49  ;;  %v1281_v62 = vpack.c.bf16 %v1167_v50, %v1163_v48 }
 0x233   : > { %v4313_v63 = vpack.c.bf16 %v1169_v58, %v1165_v56  ;;  %v4315_v0 = vpack.c.bf16 %v1220_v60, %v1216_v57 }
 0x234   : > { %1465 = vrot.lane.b32.xlu0 %v1283_v61, %s3456_s21  ;;  %3282 = vmatprep.subr.msk.bf16.mxu0 %vm668_vm0, %v1283_v61  ;;  %v1292_v1 = vsel %vm668_vm0, %v1283_v61, 0 }
 0x235   : > { %1459 = vrot.lane.b32.xlu1 %v1281_v62, %s3456_s21  ;;  %3210 = vmatprep.mubr.msk.bf16.mxu0 %vm668_vm0, %v1281_v62  ;;  %v1223_v3 = vpop.f32.mrb[8].mxu0  ;;  %v1172_v4 = vpop.f32.mrb[4].mxu1 }
 0x236   : > { %v1224_v5 = vadd.f32 %v1223_v3, %v1109_v37  ;;  %3207 = vmatpush3.bf16.xpose.msra.mxu0 %v1292_v1  ;;  %v4322_v6 = vpop.f32.mrb[9].mxu0  ;;  %v1173_v7 = vadd.f32 %v1172_v4, %v1101_v36  ;;  %v4324_v8 = vpop.f32.mrb[5].mxu1 }
 0x237   : > { %v1227_v9 = vpop.f32.mrb[10].mxu0  ;;  %v1176_v10 = vpop.f32.mrb[6].mxu1 }
 0x238   : > { %v1284_v11 = vpack.c.bf16 %v1224_v5, %v1224_v5  ;;  %v1228_v12 = vpop.f32.mrb[11].mxu0  ;;  %v1282_v13 = vpack.c.bf16 %v1173_v7, %v1173_v7  ;;  %v1177_v14 = vpop.f32.mrb[7].mxu1 }
 0x23a   : > { %1467 = vrot.lane.b32.xlu0 %v1284_v11, %s3456_s21  ;;  %3283 = vmatprep.subr.msk.bf16.mxu0 %vm668_vm0, %v1284_v11  ;;  %v1295_v15 = vsel %vm668_vm0, %v1284_v11, 0 }
 0x23b   : > { %1461 = vrot.lane.b32.xlu1 %v1282_v13, %s3456_s21 }
 0x23e   : > { %3209 = vmatpush3.bf16.xpose.msra.mxu0 %v1295_v15 }
 0x245   : > { %3211 = vmatmul.mubr.msk.bf16.vlgmr.msra.gmra.mrb[12].mxu0 %vm668_vm0, %v1282_v13 }
 0x26d   : > { %v1264_v23 = vpop.f32.mrb[8].mxu1 }
 0x26e   : > { %v1266_v25 = vpop.f32.mrb[9].mxu1  ;;  %v1265_v27 = vadd.f32 %v1264_v23, %v1117_v22 }
 0x26f   : > { %v1268_v26 = vpop.f32.mrb[10].mxu1  ;;  %v1267_v30 = vadd.f32 %v1266_v25, %v4333_v24 }
 0x270   : > { %v1269_v28 = vadd.f32 %v1268_v26, %v1117_v22  ;;  %v1270_v29 = vpop.f32.mrb[11].mxu1 }
 0x271   : > { %v1271_v31 = vadd.f32 %v1270_v29, %v4333_v24 }
 0x272   : > { %v4337_v32 = vpack.c.bf16 %v1269_v28, %v1265_v27 }
 0x273   : > { %v4339_v36 = vpack.c.bf16 %v1271_v31, %v1267_v30 }
 0x274   : > { %3214 = vmatprep.subr.bf16.mxu0 %v4337_v32 }
 0x275   : > { %3215 = vmatpush3.bf16.msra.mxu0 %v4337_v32  ;;  %v1274_v37 = vpop.f32.mrb[12].mxu1 }
 0x276   : > { %v1275_v34 = vadd.f32 %v1274_v37, %v1117_v22  ;;  %v4343_v38 = vpop.f32.mrb[13].mxu1 }
 0x277   : > { %v1278_v42 = vpop.f32.mrb[14].mxu1 }
 0x278   : > { %v1386_v45 = vpack.c.bf16 %v1275_v34, %v1275_v34  ;;  %v1279_v46 = vpop.f32.mrb[15].mxu1 }
 0x27a   : > { %v1397_v48 = vand.u32 %v4347_v2, %v1386_v45 }
 0x27c   : > { %3216 = vmatprep.subr.bf16.mxu0 %v1397_v48 }
 0x27d   : > { %3217 = vmatpush3.bf16.msra.mxu0 %v1397_v48 }
 0x2a6   : > { %v1466_v49 = vpop.permute.xlu0 %1465 }
 0x2a7   : > { %v1476_v50 = vsel %vm668_vm0, %v1466_v49, 0  ;;  %v1460_v52 = vpop.permute.xlu1 %1459  ;;  %3284 = vmatprep.subr.msk.bf16.mxu1 %vm668_vm0, %v1466_v49 }
 0x2a8   : > { %3226 = vmatprep.mubr.msk.bf16.mxu1 %vm668_vm0, %v1460_v52  ;;  %3223 = vmatpush3.bf16.xpose.msra.mxu1 %v1476_v50 }
 0x2ac   : > { %v1468_v54 = vpop.permute.xlu0 %1467 }
 0x2ad   : > { %v1479_v55 = vsel %vm668_vm0, %v1468_v54, 0  ;;  %3285 = vmatprep.subr.msk.bf16.mxu1 %vm668_vm0, %v1468_v54  ;;  %v1462_v56 = vpop.permute.xlu1 %1461 }
 0x2b0   : > { %3225 = vmatpush3.bf16.xpose.msra.mxu1 %v1479_v55 }
 0x2b7   : > { %3227 = vmatmul.mubr.msk.bf16.vlgmr.msra.gmra.mrb[16].mxu1 %vm668_vm0, %v1462_v56 }
 0x318   : > { %v4356_v57 = vpop.f32.mrb[12].mxu0 }
 0x319   : > { %v4358_v58 = vpop.f32.mrb[13].mxu0 }
 0x31a   : > { %v3213_v60 = vpop.f32.mrb[14].mxu0 }
 0x31b   : > { %v4360_v61 = vpop.f32.mrb[15].mxu0  ;;  %v1226_v60 = vadd.f32 %v4322_v6, %v4307_v51  ;;  %v1175_v6 = vadd.f32 %v4324_v8, %v4303_v53 }
 0x38a   : > { %v3228_v62 = vpop.f32.mrb[16].mxu1 }
 0x38b   : > { %v1515_v1 = vpop.f32.mrb[17].mxu1  ;;  %v1531_v7 = vmul.f32 0.125, %v3228_v62 }
 0x38c   : > { %v1529_v3 = vmul.f32 0.125, %v1515_v1  ;;  %v3229_v4 = vpop.f32.mrb[18].mxu1 }
 0x38d   : > { %v1518_v5 = vpop.f32.mrb[19].mxu1  ;;  %v1538_v12 = vsel %vm1355_vm3, %v1531_v7, -inf  ;;  %v1766_v4 = vsel %vm668_vm0, %v4315_v0, 0 }
 0x38e   : > { %v1530_v9 = vmul.f32 0.125, %v1518_v5  ;;  %v1532_v10 = vsel %vm1348_vm2, %v1529_v3, -inf  ;;  %v1277_v5 = vadd.f32 %v4343_v38, %v4333_v24 }
 0x38f   : > { %1533 = vmax.xlane.f32.xlu0 %v1532_v10 }
 0x390   : > { %v1535_v11 = vsel %vm1348_vm2, %v1530_v9, -inf }
 0x391   : > { %1536 = vmax.xlane.f32.xlu1 %v1535_v11 }
 0x393   : > { %1539 = vmax.xlane.f32.xlu0 %v1538_v12 }
 0x41c   : > { %v1534_v13 = vpop.xlane.xlu0 %1533 }
 0x41d   : > { %v1541_v15 = vsub.f32 %v1529_v3, %v1534_v13  ;;  %v1758_v3 = vpack.c.bf16 %v1226_v60, %v1226_v60  ;;  %v1346_v60 = vmul.f32 0.125, %v4360_v61 }
 0x41e   : > { %v1537_v14 = vpop.xlane.xlu1 %1536 }
 0x41f   : > { %v1542_v16 = vsub.f32 %v1530_v9, %v1537_v14  ;;  %v1544_v25 = vmul.f32 1.442695, %v1541_v15  ;;  %v1769_v51 = vsel %vm668_vm0, %v1758_v3, 0  ;;  %v1756_v9 = vpack.c.bf16 %v1175_v6, %v1175_v6 }
 0x420   : > { %v1540_v20 = vpop.xlane.xlu0 %1539 }
 0x421   : > { %v1546_v22 = vmul.f32 1.442695, %v1542_v16  ;;  %v1543_v23 = vsub.f32 %v1531_v7, %v1540_v20  ;;  %v4389_v7 = vpack.c.bf16 %v1277_v5, %v1277_v5 }
 0x423   : > { %3324 = vpow2.f32 %v1546_v22  ;;  %v1548_v26 = vmul.f32 1.442695, %v1543_v23  ;;  %v1866_v10 = vand.u32 %v4389_v7, %v4347_v2 }
 0x425   : > { %3326 = vpow2.f32 %v1548_v26 }
 0x426   : > { %3328 = vpow2.f32 %v1544_v25 }
 0x42d   : > { %v3325_v27 = vpop.eup %3324 }
 0x42e   : > { %v1553_v28 = vsel %vm1348_vm2, %v3325_v27, 0.0 }
 0x42f   : > { %v3327_v29 = vpop.eup %3326  ;;  %1554 = vadd.xlane.f32.xlu1 %v1553_v28 }
 0x430   : > { %v1556_v30 = vsel %vm1355_vm3, %v3327_v29, 0.0  ;;  %v3329_v31 = vpop.eup %3328 }
 0x431   : > { %1557 = vadd.xlane.f32.xlu0 %v1556_v30  ;;  %v1550_v37 = vsel %vm1348_vm2, %v3329_v31, 0.0 }
 0x435   : > { %1551 = vadd.xlane.f32.xlu0 %v1550_v37 }
 0x440   : > { %1569 = vrot.lane.b32.xlu1 %v4337_v32, %s3456_s21 }
 0x44b   : > { %1571 = vrot.lane.b32.xlu0 %v1386_v45, %s3456_s21 }
 0x4bc   : > { %v1555_v34 = vpop.xlane.xlu1 %1554 }
 0x4be   : > { %v1558_v42 = vpop.xlane.xlu0 %1557 }
 0x4bf   : > { %3330 = vrcp.f32 %v1558_v42 }
 0x4c0   : > { %v1570_v46 = vpop.permute.xlu1 %1569  ;;  %3332 = vrcp.f32 %v1555_v34 }
 0x4c1   : > { %3230 = vmatprep.subr.bf16.mxu1 %v1570_v46 }
 0x4c2   : > { %v1552_v48 = vpop.xlane.xlu0 %1551  ;;  %3231 = vmatpush3.bf16.msra.mxu1 %v1570_v46 }
 0x4c3   : > { %3334 = vrcp.f32 %v1552_v48 }
 0x4c6   : > { %v1572_v49 = vpop.permute.xlu0 %1571 }
 0x4c7   : > { %v1581_v50 = vand.u32 %v1572_v49, %v4347_v2 }
 0x4c9   : > { %3232 = vmatprep.subr.bf16.mxu1 %v1581_v50  ;;  %v3331_v52 = vpop.eup %3330 }
 0x4ca   : > { %3233 = vmatpush3.bf16.msra.mxu1 %v1581_v50  ;;  %v3333_v54 = vpop.eup %3332  ;;  %v1564_v45 = vmul.f32 %v3331_v52, %v3327_v29 }
 0x4cb   : > { %3286 = vmatprep.subr.msk.bf16.mxu1 %vm668_vm0, %v4315_v0  ;;  %v1563_v56 = vmul.f32 %v3333_v54, %v3325_v27 }
 0x4cc   : > { %v1566_v1 = vpack.c.bf16 %v1564_v45, %v1564_v45  ;;  %v1345_v45 = vmul.f32 0.125, %v4358_v58 }
 0x4cd   : > { %v3335_v32 = vpop.eup %3334 }
 0x4ce   : > { %v1562_v55 = vmul.f32 %v3335_v32, %v3329_v31 }
 0x4d0   : > { %v1565_v62 = vpack.c.bf16 %v1563_v56, %v1562_v55  ;;  %v1347_v55 = vmul.f32 0.125, %v4356_v57  ;;  %v1349_v56 = vsel %vm1348_vm2, %v1345_v45, -inf }
 0x4d2   : > { %3234 = vmatprep.mubr.msk.bf16.mxu1 %vm1348_vm2, %v1565_v62  ;;  %v1356_v62 = vsel %vm1355_vm3, %v1347_v55, -inf }
 0x4d3   : > { %3235 = vmatmul.mubr.msk.bf16.vlgmr.msra.gmra.mrb[20].mxu1 %vm1348_vm2, %v1566_v1 }
 0x4d4   : > { %3239 = vmatpush3.bf16.xpose.msra.mxu1 %v1766_v4  ;;  %3242 = vmatprep.mubr.msk.bf16.mxu1 %vm668_vm0, %v4313_v63 }
 0x4d5   : > { %3287 = vmatprep.subr.msk.bf16.mxu1 %vm668_vm0, %v1758_v3 }
 0x4dc   : > { %3241 = vmatpush3.bf16.xpose.msra.mxu1 %v1769_v51 }
 0x4dd   : > { %3246 = vmatprep.subr.bf16.mxu1 %v4339_v36 }
 0x4e3   : > { %3243 = vmatmul.mubr.msk.bf16.vlgmr.msra.gmra.mrb[24].mxu1 %vm668_vm0, %v1756_v9 }
 0x4e4   : > { %3247 = vmatpush3.bf16.msra.mxu1 %v4339_v36 }
 0x4e5   : > { %3248 = vmatprep.subr.bf16.mxu1 %v1866_v10 }
 0x4e8   : > { %3249 = vmatpush3.bf16.msra.mxu1 %v1866_v10 }
 0x5a6   : > { %v4395_v24 = vpop.f32.mrb[20].mxu1 }
 0x5a7   : > { %v4397_v38 = vpop.f32.mrb[21].mxu1 }
 0x5a8   : > { %v3237_v11 = vpop.f32.mrb[22].mxu1 }
 0x5a9   : > { %v4399_v53 = vpop.f32.mrb[23].mxu1 }
 0x5aa   : > { %v1631_v8 = vpack.c.bf16 %v4399_v53, %v4397_v38  ;;  %v935_v38 = vld [vmem:[%s5202_s7 + $0x18] sm:$0xff]  ;;  %v932_v53 = vld [vmem:[%s5202_s7] sm:$0xff] }
 0x5b6   : > { %v3244_v12 = vpop.f32.mrb[24].mxu1 }
 0x5b7   : > { %v1805_v13 = vpop.f32.mrb[25].mxu1  ;;  %v1821_v20 = vmul.f32 0.125, %v3244_v12 }
 0x5b8   : > { %v1819_v14 = vmul.f32 0.125, %v1805_v13  ;;  %v3245_v15 = vpop.f32.mrb[26].mxu1 }
 0x5b9   : > { %v1808_v16 = vpop.f32.mrb[27].mxu1  ;;  %v1828_v26 = vsel %vm1355_vm3, %v1821_v20, -inf }
 0x5ba   : > { %v1820_v22 = vmul.f32 0.125, %v1808_v16  ;;  %v1822_v23 = vsel %vm1348_vm2, %v1819_v14, -inf }
 0x5bb   : > { %1823 = vmax.xlane.f32.xlu1 %v1822_v23 }
 0x5bc   : > { %v1825_v25 = vsel %vm1348_vm2, %v1820_v22, -inf }
 0x5bd   : > { %1826 = vmax.xlane.f32.xlu0 %v1825_v25 }
 0x5bf   : > { %1829 = vmax.xlane.f32.xlu1 %v1828_v26 }
 0x648   : > { %v1824_v27 = vpop.xlane.xlu1 %1823 }
 0x649   : > { %v1831_v28 = vsub.f32 %v1819_v14, %v1824_v27 }
 0x64a   : > { %v1827_v29 = vpop.xlane.xlu0 %1826 }
 0x64b   : > { %v1834_v30 = vmul.f32 1.442695, %v1831_v28  ;;  %v1832_v31 = vsub.f32 %v1820_v22, %v1827_v29 }
 0x64c   : > { %v1830_v37 = vpop.xlane.xlu1 %1829 }
 0x64d   : > { %3336 = vpow2.f32 %v1834_v30  ;;  %v1836_v34 = vmul.f32 1.442695, %v1832_v31  ;;  %v1833_v42 = vsub.f32 %v1821_v20, %v1830_v37 }
 0x64f   : > { %3338 = vpow2.f32 %v1836_v34  ;;  %v1838_v46 = vmul.f32 1.442695, %v1833_v42 }
 0x651   : > { %3340 = vpow2.f32 %v1838_v46 }
 0x657   : > { %v3337_v48 = vpop.eup %3336 }
 0x658   : > { %v1840_v49 = vsel %vm1348_vm2, %v3337_v48, 0.0 }
 0x659   : > { %v3339_v50 = vpop.eup %3338  ;;  %1841 = vadd.xlane.f32.xlu0 %v1840_v49 }
 0x65a   : > { %v1843_v52 = vsel %vm1348_vm2, %v3339_v50, 0.0 }
 0x65b   : > { %v3341_v54 = vpop.eup %3340  ;;  %1844 = vadd.xlane.f32.xlu1 %v1843_v52 }
 0x65c   : > { %v1846_v32 = vsel %vm1355_vm3, %v3341_v54, 0.0 }
 0x65d   : > { %1847 = vadd.xlane.f32.xlu0 %v1846_v32 }
 0x66c   : > { %1997 = vrot.lane.b32.xlu1 %v4315_v0, %s3456_s21  ;;  %v1352_v0 = vsel %vm1348_vm2, %v1346_v60, -inf }
 0x670   : > { %1991 = vrot.lane.b32.xlu1 %v4313_v63, %s3456_s21 }
 0x673   : > { %1999 = vrot.lane.b32.xlu0 %v1758_v3, %s3456_s21 }
 0x674   : > { %1993 = vrot.lane.b32.xlu1 %v1756_v9, %s3456_s21 }
 0x692   : > { %1350 = vmax.xlane.f32.xlu0 %v1349_v56 }
 0x696   : > { %1357 = vmax.xlane.f32.xlu0 %v1356_v62 }
 0x698   : > { %1353 = vmax.xlane.f32.xlu1 %v1352_v0 }
 0x6e6   : > { %v1842_v63 = vpop.xlane.xlu0 %1841 }
 0x6e7   : > { %3342 = vrcp.f32 %v1842_v63 }
 0x6e8   : > { %v1845_v1 = vpop.xlane.xlu1 %1844 }
 0x6e9   : > { %3344 = vrcp.f32 %v1845_v1 }
 0x6ea   : > { %v1848_v3 = vpop.xlane.xlu0 %1847 }
 0x6eb   : > { %3346 = vrcp.f32 %v1848_v3 }
 0x6ec   : > { %v1998_v58 = vpop.permute.xlu1 %1997 }
 0x6ed   : > { %3288 = vmatprep.subr.msk.bf16.mxu1 %vm668_vm0, %v1998_v58  ;;  %v2008_v11 = vsel %vm668_vm0, %v1998_v58, 0  ;;  %v949_v58 = vld [vmem:[%s5202_s7 + $0x88] sm:$0xff] }
 0x6ee   : > { %v2000_v13 = vpop.permute.xlu0 %1999 }
 0x6ef   : > { %v2011_v14 = vsel %vm668_vm0, %v2000_v13, 0 }
 0x6f0   : > { %v1992_v12 = vpop.permute.xlu1 %1991 }
 0x6f1   : > { %v3343_v57 = vpop.eup %3342 }
 0x6f2   : > { %v1852_v5 = vmul.f32 %v3343_v57, %v3337_v48  ;;  %v951_v57 = vld [vmem:[%s5202_s7 + $0x98] sm:$0xff] }
 0x6f3   : > { %v3345_v4 = vpop.eup %3344 }
 0x6f4   : > { %v1853_v51 = vmul.f32 %v3345_v4, %v3339_v50  ;;  %v1994_v15 = vpop.permute.xlu1 %1993  ;;  %v1634_v4 = vpack.c.bf16 %v951_v57, %v949_v58  ;;  %v956_v57 = vld [vmem:[%s5202_s7 + $0xc0] sm:$0xff] }
 0x6f5   : > { %v3347_v61 = vpop.eup %3346 }
 0x6f6   : > { %v1854_v6 = vmul.f32 %v3347_v61, %v3341_v54  ;;  %v1855_v9 = vpack.c.bf16 %v1853_v51, %v1852_v5  ;;  %1647 = vmatprep.subr.bf16.mxu0 %v1634_v4  ;;  %v958_v4 = vld [vmem:[%s5202_s7 + $0xd0] sm:$0xff] }
 0x6f8   : > { %3250 = vmatprep.mubr.msk.bf16.mxu1 %vm1348_vm2, %v1855_v9  ;;  %v1856_v10 = vpack.c.bf16 %v1854_v6, %v1854_v6 }
 0x6fa   : > { %3251 = vmatmul.mubr.msk.bf16.vlgmr.msra.gmra.mrb[28].mxu1 %vm1348_vm2, %v1856_v10 }
 0x6fb   : > { %3255 = vmatpush3.bf16.xpose.msra.mxu1 %v2008_v11  ;;  %3258 = vmatprep.mubr.msk.bf16.mxu1 %vm668_vm0, %v1992_v12 }
 0x6fc   : > { %3289 = vmatprep.subr.msk.bf16.mxu1 %vm668_vm0, %v2000_v13 }
 0x703   : > { %3257 = vmatpush3.bf16.xpose.msra.mxu1 %v2011_v14 }
 0x70a   : > { %3259 = vmatmul.mubr.msk.bf16.vlgmr.msra.gmra.mrb[32].mxu1 %vm668_vm0, %v1994_v15 }
 0x71f   : > { %v1351_v16 = vpop.xlane.xlu0 %1350 }
 0x720   : > { %v1359_v28 = vsub.f32 %v1345_v45, %v1351_v16 }
 0x722   : > { %v1362_v31 = vmul.f32 1.442695, %v1359_v28 }
 0x723   : > { %v1358_v29 = vpop.xlane.xlu0 %1357 }
 0x724   : > { %v1361_v37 = vsub.f32 %v1347_v55, %v1358_v29  ;;  %3348 = vpow2.f32 %v1362_v31 }
 0x725   : > { %v1354_v26 = vpop.xlane.xlu1 %1353 }
 0x726   : > { %v1360_v30 = vsub.f32 %v1346_v60, %v1354_v26  ;;  %v1366_v42 = vmul.f32 1.442695, %v1361_v37 }
 0x728   : > { %v1364_v34 = vmul.f32 1.442695, %v1360_v30 }
 0x72a   : > { %3350 = vpow2.f32 %v1364_v34  ;;  %v948_v34 = vld [vmem:[%s5202_s7 + $0x80] sm:$0xff] }
 0x72b   : > { %3352 = vpow2.f32 %v1366_v42  ;;  %v950_v42 = vld [vmem:[%s5202_s7 + $0x90] sm:$0xff] }
 0x72e   : > { %v3349_v60 = vpop.eup %3348 }
 0x72f   : > { %v1368_v0 = vsel %vm1348_vm2, %v3349_v60, 0.0 }
 0x734   : > { %v3351_v62 = vpop.eup %3350 }
 0x735   : > { %v3353_v63 = vpop.eup %3352  ;;  %v1371_v1 = vsel %vm1348_vm2, %v3351_v62, 0.0 }
 0x736   : > { %v1374_v3 = vsel %vm1355_vm3, %v3353_v63, 0.0 }
 0x7cd   : > { %v4429_v20 = vpop.f32.mrb[28].mxu1 }
 0x7ce   : > { %v4431_v22 = vpop.f32.mrb[29].mxu1 }
 0x7cf   : > { %v3253_v23 = vpop.f32.mrb[30].mxu1 }
 0x7d0   : > { %v4433_v25 = vpop.f32.mrb[31].mxu1 }
 0x7d1   : > { %v1916_v27 = vpack.c.bf16 %v4433_v25, %v4431_v22 }
 0x7dd   : > { %v3260_v46 = vpop.f32.mrb[32].mxu1 }
 0x7de   : > { %v2047_v48 = vpop.f32.mrb[33].mxu1  ;;  %v2063_v54 = vmul.f32 0.125, %v3260_v46 }
 0x7df   : > { %v2061_v49 = vmul.f32 0.125, %v2047_v48  ;;  %v3261_v50 = vpop.f32.mrb[34].mxu1 }
 0x7e0   : > { %v2050_v52 = vpop.f32.mrb[35].mxu1  ;;  %v2070_v55 = vsel %vm1355_vm3, %v2063_v54, -inf  ;;  %v953_v50 = vld [vmem:[%s5202_s7 + $0xa8] sm:$0xff] }
 0x7e1   : > { %v2062_v32 = vmul.f32 0.125, %v2050_v52  ;;  %v2064_v56 = vsel %vm1348_vm2, %v2061_v49, -inf  ;;  %v955_v52 = vld [vmem:[%s5202_s7 + $0xb8] sm:$0xff] }
 0x7e2   : > { %2065 = vmax.xlane.f32.xlu0 %v2064_v56  ;;  %v1633_v56 = vpack.c.bf16 %v950_v42, %v948_v34  ;;  %v940_v42 = vld [vmem:[%s5202_s7 + $0x40] sm:$0xff] }
 0x7e3   : > { %v2067_v45 = vsel %vm1348_vm2, %v2062_v32, -inf }
 0x7e4   : > { %2068 = vmax.xlane.f32.xlu1 %v2067_v45 }
 0x7e6   : > { %2071 = vmax.xlane.f32.xlu0 %v2070_v55 }
 0x7e8   : > { %1369 = vadd.xlane.f32.xlu1 %v1368_v0  ;;  %v1636_v0 = vpack.c.bf16 %v955_v52, %v953_v50  ;;  %v947_v50 = vld [vmem:[%s5202_s7 + $0x78] sm:$0xff] }
 0x7ea   : > { %1372 = vadd.xlane.f32.xlu0 %v1371_v1  ;;  %v959_v1 = vld [vmem:[%s5202_s7 + $0xd8] sm:$0xff] }
 0x7ec   : > { %1375 = vadd.xlane.f32.xlu1 %v1374_v3 }
 0x86f   : > { %v2066_v5 = vpop.xlane.xlu0 %2065 }
 0x870   : > { %v2073_v51 = vsub.f32 %v2061_v49, %v2066_v5  ;;  %v961_v5 = vld [vmem:[%s5202_s7 + $0xe8] sm:$0xff] }
 0x871   : > { %v2069_v61 = vpop.xlane.xlu1 %2068 }
 0x872   : > { %v2076_v6 = vmul.f32 1.442695, %v2073_v51  ;;  %v2074_v9 = vsub.f32 %v2062_v32, %v2069_v61  ;;  %v963_v51 = vld [vmem:[%s5202_s7 + $0xf8] sm:$0xff]  ;;  %v1637_v61 = vpack.c.bf16 %v958_v4, %v956_v57 }
 0x873   : > { %v2072_v10 = vpop.xlane.xlu0 %2071 }
 0x874   : > { %v2078_v11 = vmul.f32 1.442695, %v2074_v9  ;;  %v2075_v12 = vsub.f32 %v2063_v54, %v2072_v10  ;;  %3354 = vpow2.f32 %v2076_v6  ;;  %v1640_v6 = vpack.c.bf16 %v963_v51, %v961_v5  ;;  %v960_v9 = vld [vmem:[%s5202_s7 + $0xe0] sm:$0xff]  ;;  %v962_v10 = vld [vmem:[%s5202_s7 + $0xf0] sm:$0xff] }
 0x875   : > { %v1370_v13 = vpop.xlane.xlu1 %1369 }
 0x876   : > { %3356 = vpow2.f32 %v2078_v11  ;;  %v2080_v14 = vmul.f32 1.442695, %v2075_v12  ;;  %v1639_v11 = vpack.c.bf16 %v962_v10, %v960_v9  ;;  %v1632_v12 = vpack.c.bf16 %v4395_v24, %v4395_v24  ;;  %v934_v24 = vld [vmem:[%s5202_s7 + $0x10] sm:$0xff] }
 0x877   : > { %3358 = vrcp.f32 %v1370_v13  ;;  %v1373_v15 = vpop.xlane.xlu0 %1372  ;;  %v939_v13 = vld [vmem:[%s5202_s7 + $0x38] sm:$0xff] }
 0x878   : > { %3360 = vpow2.f32 %v2080_v14  ;;  %v1449_v14 = vpack.c.bf16 %v934_v24, %v932_v53 }
 0x879   : > { %3362 = vrcp.f32 %v1373_v15  ;;  %v1376_v16 = vpop.xlane.xlu1 %1375 }
 0x87a   : > { %3364 = vrcp.f32 %v1376_v16  ;;  %v936_v16 = vld [vmem:[%s5202_s7 + $0x20] sm:$0xff] }
 0x87e   : > { %v4449_v23 = vpop.eup %3354 }
 0x87f   : > { %v2082_v45 = vsel %vm1348_vm2, %v4449_v23, 0.0 }
 0x880   : > { %v4451_v26 = vpop.eup %3356 }
 0x881   : > { %v3359_v28 = vpop.eup %3358  ;;  %v2085_v29 = vsel %vm1348_vm2, %v4451_v26, 0.0 }
 0x882   : > { %v4455_v30 = vpop.eup %3360  ;;  %2086 = vadd.xlane.f32.xlu1 %v2085_v29  ;;  %v1380_v48 = vmul.f32 %v3359_v28, %v3349_v60  ;;  %v952_v60 = vld [vmem:[%s5202_s7 + $0xa0] sm:$0xff]  ;;  %v938_v28 = vld [vmem:[%s5202_s7 + $0x30] sm:$0xff]  ;;  %v941_v29 = vld [vmem:[%s5202_s7 + $0x48] sm:$0xff] }
 0x883   : > { %v3363_v31 = vpop.eup %3362  ;;  %v2088_v37 = vsel %vm1355_vm3, %v4455_v30, 0.0 }
 0x884   : > { %v3365_v46 = vpop.eup %3364  ;;  %2089 = vadd.xlane.f32.xlu0 %v2088_v37  ;;  %v1381_v49 = vmul.f32 %v3363_v31, %v3351_v62  ;;  %v954_v62 = vld [vmem:[%s5202_s7 + $0xb0] sm:$0xff]  ;;  %v943_v31 = vld [vmem:[%s5202_s7 + $0x58] sm:$0xff]  ;;  %v1451_v37 = vpack.c.bf16 %v938_v28, %v936_v16 }
 0x885   : > { %v1382_v54 = vmul.f32 %v3365_v46, %v3353_v63  ;;  %v957_v63 = vld [vmem:[%s5202_s7 + $0xc8] sm:$0xff]  ;;  %v1635_v3 = vpack.c.bf16 %v954_v62, %v952_v60  ;;  %v1454_v34 = vpack.c.bf16 %v943_v31, %v941_v29  ;;  %v942_v46 = vld [vmem:[%s5202_s7 + $0x50] sm:$0xff]  ;;  %v972_v29 = vld [vmem:[%s5202_s7 + $0x140] sm:$0xff] }
 0x886   : > { %v1383_v32 = vpack.c.bf16 %v1381_v49, %v1380_v48  ;;  %v1638_v58 = vpack.c.bf16 %v959_v1, %v957_v63  ;;  %v1453_v48 = vpack.c.bf16 %v942_v46, %v940_v42  ;;  %v945_v49 = vld [vmem:[%s5202_s7 + $0x68] sm:$0xff]  ;;  %v974_v31 = vld [vmem:[%s5202_s7 + $0x150] sm:$0xff] }
 0x887   : > { %v1384_v55 = vpack.c.bf16 %v1382_v54, %v1382_v54  ;;  %v1456_v52 = vpack.c.bf16 %v947_v50, %v945_v49  ;;  %v944_v54 = vld [vmem:[%s5202_s7 + $0x60] sm:$0xff]  ;;  %v1922_v42 = vpack.c.bf16 %v974_v31, %v972_v29  ;;  %v978_v50 = vld [vmem:[%s5202_s7 + $0x170] sm:$0xff] }
 0x888   : > { %3218 = vmatprep.mubr.msk.bf16.mxu0 %vm1348_vm2, %v1383_v32  ;;  %2083 = vadd.xlane.f32.xlu0 %v2082_v45  ;;  %v946_v32 = vld [vmem:[%s5202_s7 + $0x70] sm:$0xff]  ;;  %v965_v45 = vld [vmem:[%s5202_s7 + $0x108] sm:$0xff]  ;;  %v976_v49 = vld [vmem:[%s5202_s7 + $0x160] sm:$0xff] }
 0x889   : > { %3219 = vmatmul.mubr.msk.bf16.vlgmr.msra.gmra.mrb[16].mxu0 %vm1348_vm2, %v1384_v55  ;;  %v967_v55 = vld [vmem:[%s5202_s7 + $0x118] sm:$0xff] }
 0x88a   : > { %1648 = vmatpush1.bf16.msra.mxu0 %v1633_v56  ;;  %1679 = vmatprep.mubr.bf16.mxu0 %v3457_v41  ;;  %v1455_v56 = vpack.c.bf16 %v946_v32, %v944_v54  ;;  %v983_v54 = vld [vmem:[%s5202_s7 + $0x198] sm:$0xff]  ;;  %v1924_v32 = vpack.c.bf16 %v978_v50, %v976_v49 }
 0x88b   : > { %1649 = vmatprep.subr.bf16.mxu0 %v1636_v0  ;;  %v1919_v0 = vpack.c.bf16 %v967_v55, %v965_v45  ;;  %v980_v45 = vld [vmem:[%s5202_s7 + $0x180] sm:$0xff]  ;;  %v982_v55 = vld [vmem:[%s5202_s7 + $0x190] sm:$0xff] }
 0x88e   : > { %1650 = vmatpush1.bf16.msra.mxu0 %v1635_v3 }
 0x88f   : > { %1651 = vmatprep.subr.bf16.mxu0 %v1638_v58 }
 0x892   : > { %1652 = vmatpush1.bf16.msra.mxu0 %v1637_v61 }
 0x893   : > { %2101 = vrot.lane.b32.xlu1 %v4339_v36, %s3456_s21  ;;  %1653 = vmatprep.subr.bf16.mxu0 %v1640_v6  ;;  %v933_v36 = vld [vmem:[%s5202_s7 + $0x8] sm:$0xff] }
 0x896   : > { %1654 = vmatpush1.bf16.msra.mxu0 %v1639_v11 }
 0x899   : > { %3155 = vmatmul.mubr.msk.bf16.vlgmr.msra.gmra.mrb[20].mxu0 %vm668_vm0, %v1631_v8  ;;  %v937_v8 = vld [vmem:[%s5202_s7 + $0x28] sm:$0xff] }
 0x89a   : > { %1689 = vmatprep.mubr.bf16.mxu0 %v3457_v41  ;;  %v1452_v15 = vpack.c.bf16 %v939_v13, %v937_v8  ;;  %v968_v8 = vld [vmem:[%s5202_s7 + $0x120] sm:$0xff]  ;;  %v970_v13 = vld [vmem:[%s5202_s7 + $0x130] sm:$0xff] }
 0x89b   : > { %v1920_v16 = vpack.c.bf16 %v970_v13, %v968_v8 }
 0x89e   : > { %2103 = vrot.lane.b32.xlu0 %v4389_v7, %s3456_s21  ;;  %v1450_v7 = vpack.c.bf16 %v935_v38, %v933_v36  ;;  %s5231_s21 = sld [smem:[#allocation11_spill]] }
 0x8a0   : > { %1704 = vmatprep.subr.bf16.mxu0 %v1450_v7 }
 0x8a1   : > { %3156 = vmatmul.mubr.msk.bf16.gmra.mrb[24].mxu0 %vm668_vm0, %v1632_v12  ;;  %v966_v12 = vld [vmem:[%s5202_s7 + $0x110] sm:$0xff] }
 0x8a2   : > { %1736 = vmatprep.mubr.bf16.mxu0 %v3457_v41  ;;  %1705 = vmatpush1.bf16.msra.mxu0 %v1449_v14  ;;  %v973_v14 = vld [vmem:[%s5202_s7 + $0x148] sm:$0xff] }
 0x8a3   : > { %1706 = vmatprep.subr.bf16.mxu0 %v1452_v15  ;;  %v975_v15 = vld [vmem:[%s5202_s7 + $0x158] sm:$0xff] }
 0x8a4   : > { %v1923_v28 = vpack.c.bf16 %v975_v15, %v973_v14 }
 0x8a6   : > { %1707 = vmatpush1.bf16.msra.mxu0 %v1451_v37  ;;  %v977_v37 = vld [vmem:[%s5202_s7 + $0x168] sm:$0xff] }
 0x8a7   : > { %1708 = vmatprep.subr.bf16.mxu0 %v1454_v34  ;;  %v979_v34 = vld [vmem:[%s5202_s7 + $0x178] sm:$0xff] }
 0x8aa   : > { %1709 = vmatpush1.bf16.msra.mxu0 %v1453_v48  ;;  %v1925_v48 = vpack.c.bf16 %v979_v34, %v977_v37 }
 0x8ab   : > { %1710 = vmatprep.subr.bf16.mxu0 %v1456_v52  ;;  %v981_v52 = vld [vmem:[%s5202_s7 + $0x188] sm:$0xff] }
 0x8ae   : > { %1711 = vmatpush1.bf16.msra.mxu0 %v1455_v56  ;;  %v2166_v56 = vpack.c.bf16 %v983_v54, %v981_v52 }
 0x8af   : > { %1932 = vmatprep.subr.bf16.mxu0 %v1919_v0  ;;  %v985_v0 = vld [vmem:[%s5202_s7 + $0x1a8] sm:$0xff] }
 0x90f   : > { %v2087_v60 = vpop.xlane.xlu1 %2086 }
 0x911   : > { %v2090_v62 = vpop.xlane.xlu0 %2089 }
 0x912   : > { %3366 = vrcp.f32 %v2090_v62  ;;  %v2165_v62 = vpack.c.bf16 %v982_v55, %v980_v45 }
 0x913   : > { %v2102_v63 = vpop.permute.xlu1 %2101  ;;  %3368 = vrcp.f32 %v2087_v60  ;;  %v987_v60 = vld [vmem:[%s5202_s7 + $0x1b8] sm:$0xff] }
 0x914   : > { %3262 = vmatprep.subr.bf16.mxu1 %v2102_v63 }
 0x915   : > { %v2084_v1 = vpop.xlane.xlu0 %2083  ;;  %3263 = vmatpush3.bf16.msra.mxu1 %v2102_v63  ;;  %v2168_v63 = vpack.c.bf16 %v987_v60, %v985_v0 }
 0x916   : > { %3370 = vrcp.f32 %v2084_v1  ;;  %v984_v1 = vld [vmem:[%s5202_s7 + $0x1a0] sm:$0xff] }
 0x919   : > { %v2104_v3 = vpop.permute.xlu0 %2103 }
 0x91a   : > { %v2113_v58 = vand.u32 %v2104_v3, %v4347_v2  ;;  %v964_v2 = vld [vmem:[%s5202_s7 + $0x100] sm:$0xff]  ;;  %v986_v3 = vld [vmem:[%s5202_s7 + $0x1b0] sm:$0xff] }
 0x91b   : > { %v1918_v53 = vpack.c.bf16 %v966_v12, %v964_v2  ;;  %v995_v2 = vld [vmem:[%s5202_s7 + $0x1f8] sm:$0xff] }
 0x91c   : > { %3264 = vmatprep.subr.bf16.mxu1 %v2113_v58  ;;  %v3367_v57 = vpop.eup %3366 }
 0x91d   : > { %3265 = vmatpush3.bf16.msra.mxu1 %v2113_v58  ;;  %v3369_v4 = vpop.eup %3368  ;;  %v2096_v51 = vmul.f32 %v3367_v57, %v4455_v30  ;;  %v989_v58 = vld [vmem:[%s5202_s7 + $0x1c8] sm:$0xff]  ;;  %v991_v57 = vld [vmem:[%s5202_s7 + $0x1d8] sm:$0xff] }
 0x91e   : > { %v2095_v6 = vmul.f32 %v3369_v4, %v4451_v26  ;;  %v971_v26 = vld [vmem:[%s5202_s7 + $0x138] sm:$0xff]  ;;  %v2167_v4 = vpack.c.bf16 %v986_v3, %v984_v1 }
 0x91f   : > { %v2098_v10 = vpack.c.bf16 %v2096_v51, %v2096_v51  ;;  %v2170_v51 = vpack.c.bf16 %v991_v57, %v989_v58 }
 0x920   : > { %v3371_v5 = vpop.eup %3370 }
 0x921   : > { %v2094_v61 = vmul.f32 %v3371_v5, %v4449_v23  ;;  %v969_v23 = vld [vmem:[%s5202_s7 + $0x128] sm:$0xff] }
 0x922   : > { %v1921_v24 = vpack.c.bf16 %v971_v26, %v969_v23 }
 0x923   : > { %v2097_v9 = vpack.c.bf16 %v2095_v6, %v2094_v61  ;;  %v988_v61 = vld [vmem:[%s5202_s7 + $0x1c0] sm:$0xff]  ;;  %v990_v6 = vld [vmem:[%s5202_s7 + $0x1d0] sm:$0xff] }
 0x924   : > { %v2169_v25 = vpack.c.bf16 %v990_v6, %v988_v61 }
 0x925   : > { %3266 = vmatprep.mubr.msk.bf16.mxu1 %vm1348_vm2, %v2097_v9 }
 0x926   : > { %3267 = vmatmul.mubr.msk.bf16.vlgmr.msra.gmra.mrb[36].mxu1 %vm1348_vm2, %v2098_v10 }
 0x95c   : > { %v3220_v11 = vpop.f32.mrb[16].mxu0 }
 0x95d   : > { %v1433_v30 = vpop.f32.mrb[17].mxu0  ;;  %v1448_v46 = vpack.c.bf16 %v3220_v11, %v3220_v11  ;;  %v993_v11 = vld [vmem:[%s5202_s7 + $0x1e8] sm:$0xff] }
 0x95e   : > { %v3221_v36 = vpop.f32.mrb[18].mxu0  ;;  %v2172_v12 = vpack.c.bf16 %v995_v2, %v993_v11  ;;  %v2355_v11 = vld [vmem:[%s5206_s11 + $0x38] sm:$0xff]  ;;  %v2348_v2 = vld [vmem:[%s5206_s11] sm:$0xff] }
 0x95f   : > { %v1436_v38 = vpop.f32.mrb[19].mxu0 }
 0x960   : > { %v1447_v7 = vpack.c.bf16 %v1436_v38, %v1433_v30  ;;  %v992_v30 = vld [vmem:[%s5202_s7 + $0x1e0] sm:$0xff] }
 0x962   : > { %3157 = vmatmul.mubr.msk.bf16.vlgmr.msra.gmra.mrb[20].mxu0 %vm668_vm0, %v1447_v7 }
 0x963   : > { %1933 = vmatpush1.bf16.msra.mxu0 %v1918_v53  ;;  %1746 = vmatprep.mubr.bf16.mxu0 %v3457_v41 }
 0x964   : > { %1934 = vmatprep.subr.bf16.mxu0 %v1921_v24 }
 0x967   : > { %1935 = vmatpush1.bf16.msra.mxu0 %v1920_v16 }
 0x968   : > { %1936 = vmatprep.subr.bf16.mxu0 %v1923_v28 }
 0x96a   : > { %3158 = vmatmul.mubr.msk.bf16.gmra.mrb[28].mxu0 %vm668_vm0, %v1448_v46 }
 0x96b   : > { %1937 = vmatpush1.bf16.msra.mxu0 %v1922_v42  ;;  %1964 = vmatprep.mubr.bf16.mxu0 %v3457_v41 }
 0x96c   : > { %1938 = vmatprep.subr.bf16.mxu0 %v1925_v48  ;;  %v996_v48 = vld [vmem:[%s5203_s8] sm:$0x3] }
 0x96d   : > { %v2244_v49 = vrot.slane %v996_v48, %v4040_v19 }
 0x96f   : > { %1939 = vmatpush1.bf16.msra.mxu0 %v1924_v32 }
 0x970   : > { %2179 = vmatprep.subr.bf16.mxu0 %v2166_v56 }
 0x972   : > { %3163 = vmatmul.mubr.msk.bf16.vlgmr.msra.gmra.mrb[20].mxu0 %vm668_vm0, %v1916_v27  ;;  %v1917_v27 = vpack.c.bf16 %v4429_v20, %v4429_v20  ;;  %v994_v20 = vld [vmem:[%s5202_s7 + $0x1f0] sm:$0xff] }
 0x973   : > { %1974 = vmatprep.mubr.bf16.mxu0 %v3457_v41  ;;  %2180 = vmatpush1.bf16.msra.mxu0 %v2165_v62  ;;  %v2171_v23 = vpack.c.bf16 %v994_v20, %v992_v30 }
 0x974   : > { %v1691_v5 = vpop.f32.mrb[24].mxu0  ;;  %2181 = vmatprep.subr.bf16.mxu0 %v2168_v63 }
 0x975   : > { %v1693_v9 = vpop.f32.mrb[25].mxu0 }
 0x976   : > { %v1695_v10 = vpop.f32.mrb[26].mxu0 }
 0x977   : > { %v1696_v22 = vpop.f32.mrb[27].mxu0  ;;  %2182 = vmatpush1.bf16.msra.mxu0 %v2167_v4 }
 0x978   : > { %2183 = vmatprep.subr.bf16.mxu0 %v2170_v51 }
 0x97a   : > { %3164 = vmatmul.mubr.msk.bf16.gmra.mrb[32].mxu0 %vm668_vm0, %v1917_v27 }
 0x97b   : > { %2184 = vmatpush1.bf16.msra.mxu0 %v2169_v25  ;;  %2211 = vmatprep.mubr.bf16.mxu0 %v3457_v41  ;;  %v2349_v25 = vld [vmem:[%s5206_s11 + $0x8] sm:$0xff] }
 0x97c   : > { %2185 = vmatprep.subr.bf16.mxu0 %v2172_v12  ;;  %v2352_v12 = vld [vmem:[%s5206_s11 + $0x20] sm:$0xff] }
 0x97d   : > { %v2480_v20 = vpack.c.bf16 %v2352_v12, %v2348_v2  ;;  %v2386_v2 = vld [vmem:[%s5206_s11 + $0x130] sm:$0xff]  ;;  %v2389_v12 = vld [vmem:[%s5206_s11 + $0x148] sm:$0xff] }
 0x97f   : > { %2186 = vmatpush1.bf16.msra.mxu0 %v2171_v23  ;;  %v2350_v23 = vld [vmem:[%s5206_s11 + $0x10] sm:$0xff] }
 0x9f9   : > { %v3268_v26 = vpop.f32.mrb[36].mxu1 }
 0x9fa   : > { %v2149_v36 = vpop.f32.mrb[37].mxu1  ;;  %v2164_v24 = vpack.c.bf16 %v3268_v26, %v3268_v26  ;;  %v2354_v26 = vld [vmem:[%s5206_s11 + $0x30] sm:$0xff] }
 0x9fb   : > { %v3269_v38 = vpop.f32.mrb[38].mxu1 }
 0x9fc   : > { %v2152_v53 = vpop.f32.mrb[39].mxu1  ;;  %v2482_v38 = vpack.c.bf16 %v2354_v26, %v2350_v23  ;;  %v2395_v23 = vld [vmem:[%s5206_s11 + $0x178] sm:$0xff] }
 0x9fd   : > { %v2163_v7 = vpack.c.bf16 %v2152_v53, %v2149_v36  ;;  %v2357_v36 = vld [vmem:[%s5206_s11 + $0x48] sm:$0xff] }
 0x9fe   : > { %v2361_v53 = vld [vmem:[%s5206_s11 + $0x68] sm:$0xff] }
 0x9ff   : > { %3169 = vmatmul.mubr.msk.bf16.vlgmr.msra.gmra.mrb[20].mxu0 %vm668_vm0, %v2163_v7  ;;  %v2359_v7 = vld [vmem:[%s5206_s11 + $0x58] sm:$0xff] }
 0xa00   : > { %2221 = vmatprep.mubr.bf16.mxu0 %v3457_v41  ;;  %v2240_v41 = vrot.slane %v996_v48, %v4046_v21  ;;  %v2371_v48 = vld [vmem:[%s5206_s11 + $0xb8] sm:$0xff] }
 0xa07   : > { %3170 = vmatmul.mubr.msk.bf16.gmra.mrb[36].mxu0 %vm668_vm0, %v2164_v24  ;;  %v2363_v24 = vld [vmem:[%s5206_s11 + $0x78] sm:$0xff] }
 0xa3d   : > { %v1748_v8 = vpop.f32.mrb[28].mxu0 }
 0xa3e   : > { %v1749_v13 = vadd.f32 %v1748_v8, %v1691_v5  ;;  %v1750_v14 = vpop.f32.mrb[29].mxu0  ;;  %v2485_v8 = vpack.c.bf16 %v2361_v53, %v2357_v36  ;;  %v2388_v53 = vld [vmem:[%s5206_s11 + $0x140] sm:$0xff] }
 0xa3f   : > { %v1751_v15 = vadd.f32 %v1750_v14, %v1693_v9  ;;  %v1752_v16 = vpop.f32.mrb[30].mxu0  ;;  %v2356_v14 = vld [vmem:[%s5206_s11 + $0x40] sm:$0xff] }
 0xa40   : > { %v1753_v28 = vpop.f32.mrb[31].mxu0  ;;  %v2358_v16 = vld [vmem:[%s5206_s11 + $0x50] sm:$0xff] }
 0xa4d   : > { %v1976_v29 = vpop.f32.mrb[32].mxu0 }
 0xa4e   : > { %v1987_v31 = vadd.f32 %v1976_v29, %v1749_v13  ;;  %v1978_v37 = vpop.f32.mrb[33].mxu0  ;;  %v2487_v13 = vpack.c.bf16 %v2363_v24, %v2359_v7  ;;  %v2362_v29 = vld [vmem:[%s5206_s11 + $0x70] sm:$0xff]  ;;  %v2392_v7 = vld [vmem:[%s5206_s11 + $0x160] sm:$0xff] }
 0xa4f   : > { %v1988_v34 = vadd.f32 %v1978_v37, %v1751_v15  ;;  %v1980_v42 = vpop.f32.mrb[34].mxu0  ;;  %v2360_v15 = vld [vmem:[%s5206_s11 + $0x60] sm:$0xff]  ;;  %v2369_v37 = vld [vmem:[%s5206_s11 + $0xa8] sm:$0xff]  ;;  %v2390_v24 = vld [vmem:[%s5206_s11 + $0x150] sm:$0xff] }
 0xa50   : > { %v1981_v46 = vpop.f32.mrb[35].mxu0  ;;  %v2484_v28 = vpack.c.bf16 %v2360_v15, %v2356_v14  ;;  %v2397_v14 = vld [vmem:[%s5206_s11 + $0x188] sm:$0xff] }
 0xa51   : > { %v2367_v46 = vld [vmem:[%s5206_s11 + $0x98] sm:$0xff]  ;;  %v2401_v15 = vld [vmem:[%s5206_s11 + $0x1a8] sm:$0xff] }
 0xad2   : > { %v2213_v50 = vpop.f32.mrb[20].mxu0 }
 0xad3   : > { %v2247_v52 = vadd.f32 %v2240_v41, %v2213_v50  ;;  %v2215_v54 = vpop.f32.mrb[21].mxu0  ;;  %v2368_v50 = vld [vmem:[%s5206_s11 + $0xa0] sm:$0xff] }
 0xad4   : > { %v2248_v32 = vadd.f32 %v2244_v49, %v2215_v54  ;;  %v2217_v56 = vpop.f32.mrb[22].mxu0  ;;  %v2370_v54 = vld [vmem:[%s5206_s11 + $0xb0] sm:$0xff] }
 0xad5   : > { %v4691_v45 = vadd.f32 %v2247_v52, %v4089_v47  ;;  %v2249_v55 = vadd.f32 %v2240_v41, %v2217_v56  ;;  %v2219_v0 = vpop.f32.mrb[23].mxu0  ;;  %v2366_v52 = vld [vmem:[%s5206_s11 + $0x90] sm:$0xff]  ;;  %v2373_v56 = vld [vmem:[%s5206_s11 + $0xc8] sm:$0xff] }
 0xad6   : > { %v4694_v60 = vadd.f32 %v2248_v32, %v4079_v43  ;;  %v2250_v62 = vadd.f32 %v2244_v49, %v2219_v0  ;;  %v2375_v0 = vld [vmem:[%s5206_s11 + $0xd8] sm:$0xff] }
 0xad7   : > { %v4697_v63 = vadd.f32 %v2249_v55, %v4071_v40  ;;  %v2377_v55 = vld [vmem:[%s5206_s11 + $0xe8] sm:$0xff] }
 0xad8   : > { %v4700_v1 = vadd.f32 %v2250_v62, %v4081_v44  ;;  %v2261_v3 = vadd.f32 %v4694_v60, %v4691_v45  ;;  %v2490_v62 = vpack.c.bf16 %v2370_v54, %v2366_v52  ;;  %v2407_v52 = vld [vmem:[%s5206_s11 + $0x1d8] sm:$0xff] }
 0xad9   : > { %v2411_v54 = vld [vmem:[%s5206_s11 + $0x1f8] sm:$0xff] }
 0xada   : > { %2262 = vadd.xlane.f32.xlu1 %v2261_v3  ;;  %v2223_v58 = vpop.f32.mrb[36].mxu0  ;;  %v2264_v47 = vadd.f32 %v4700_v1, %v4697_v63  ;;  %v2493_v3 = vpack.c.bf16 %v2377_v55, %v2373_v56 }
 0xadb   : > { %v2234_v57 = vadd.f32 %v2223_v58, %v1987_v31  ;;  %v2225_v4 = vpop.f32.mrb[37].mxu0  ;;  %v2365_v31 = vld [vmem:[%s5206_s11 + $0x88] sm:$0xff]  ;;  %v2379_v58 = vld [vmem:[%s5206_s11 + $0xf8] sm:$0xff] }
 0xadc   : > { %v2235_v5 = vadd.f32 %v2225_v4, %v1988_v34  ;;  %2265 = vadd.xlane.f32.xlu0 %v2264_v47  ;;  %v2227_v43 = vpop.f32.mrb[38].mxu0  ;;  %v2486_v34 = vpack.c.bf16 %v2362_v29, %v2358_v16  ;;  %v2489_v42 = vpack.c.bf16 %v2369_v37, %v2365_v31  ;;  %v2372_v47 = vld [vmem:[%s5206_s11 + $0xc0] sm:$0xff]  ;;  %v2495_v4 = vpack.c.bf16 %v2379_v58, %v2375_v0  ;;  %v2399_v16 = vld [vmem:[%s5206_s11 + $0x198] sm:$0xff] }
 0xadd   : > { %v2251_v51 = vadd.f32 %v2240_v41, %v2234_v57  ;;  %v2228_v61 = vpop.f32.mrb[39].mxu0  ;;  %v2364_v41 = vld [vmem:[%s5206_s11 + $0x80] sm:$0xff]  ;;  %v2378_v43 = vld [vmem:[%s5206_s11 + $0xf0] sm:$0xff]  ;;  %v2500_v29 = vpack.c.bf16 %v2392_v7, %v2388_v53  ;;  %v2505_v37 = vpack.c.bf16 %v2401_v15, %v2397_v14  ;;  %v2511_v58 = vpack.c.bf16 %v2411_v54, %v2407_v52 }
 0xade   : > { %v2252_v40 = vadd.f32 %v2244_v49, %v2235_v5  ;;  %v2491_v49 = vpack.c.bf16 %v2371_v48, %v2367_v46  ;;  %v2488_v32 = vpack.c.bf16 %v2368_v50, %v2364_v41  ;;  %v2376_v57 = vld [vmem:[%s5206_s11 + $0xe0] sm:$0xff]  ;;  %v2374_v5 = vld [vmem:[%s5206_s11 + $0xd0] sm:$0xff]  ;;  %v2385_v61 = vld [vmem:[%s5206_s11 + $0x128] sm:$0xff] }
 0xadf   : > { %v4707_v6 = vadd.f32 %v2251_v51, %v4119_v59  ;;  %v2353_v59 = vld [vmem:[%s5206_s11 + $0x28] sm:$0xff]  ;;  %v2398_v46 = vld [vmem:[%s5206_s11 + $0x190] sm:$0xff]  ;;  %v2404_v0 = vld [vmem:[%s5206_s11 + $0x1c0] sm:$0xff] }
 0xae0   : > { %v4710_v44 = vadd.f32 %v2252_v40, %v4069_v39  ;;  %v2351_v39 = vld [vmem:[%s5206_s11 + $0x18] sm:$0xff]  ;;  %v2481_v27 = vpack.c.bf16 %v2353_v59, %v2349_v25  ;;  %v2381_v51 = vld [vmem:[%s5206_s11 + $0x108] sm:$0xff]  ;;  %v2380_v59 = vld [vmem:[%s5206_s11 + $0x100] sm:$0xff] }
 0xae1   : > { %v2267_v9 = vsel %vm1393_vm1, %v4707_v6, 0.0  ;;  %v2483_v30 = vpack.c.bf16 %v2355_v11, %v2351_v39  ;;  %v2383_v40 = vld [vmem:[%s5206_s11 + $0x118] sm:$0xff]  ;;  %v2497_v25 = vpack.c.bf16 %v2385_v61, %v2381_v51  ;;  %v2384_v39 = vld [vmem:[%s5206_s11 + $0x120] sm:$0xff]  ;;  %v2402_v41 = vld [vmem:[%s5206_s11 + $0x1b0] sm:$0xff] }
 0xae2   : > { %v2268_v10 = vsel %vm1393_vm1, %v4710_v44, 0.0  ;;  %2566 = vmatprep.subr.bf16.mxu1 %v2481_v27  ;;  %v2382_v27 = vld [vmem:[%s5206_s11 + $0x110] sm:$0xff]  ;;  %v2496_v26 = vpack.c.bf16 %v2384_v39, %v2380_v59  ;;  %v2409_v50 = vld [vmem:[%s5206_s11 + $0x1e8] sm:$0xff]  ;;  %v2506_v56 = vpack.c.bf16 %v2402_v41, %v2398_v46 }
 0xae3   : > { %v2269_v22 = vadd.f32 %v2268_v10, %v2267_v9  ;;  %2617 = vmatprep.subr.bf16.mxu0 %v2483_v30  ;;  %2567 = vmatpush1.bf16.msra.mxu1 %v2480_v20  ;;  %v2387_v9 = vld [vmem:[%s5206_s11 + $0x138] sm:$0xff]  ;;  %v2492_v10 = vpack.c.bf16 %v2376_v57, %v2372_v47  ;;  %v2393_v30 = vld [vmem:[%s5206_s11 + $0x168] sm:$0xff]  ;;  %v2498_v36 = vpack.c.bf16 %v2386_v2, %v2382_v27  ;;  %v2410_v47 = vld [vmem:[%s5206_s11 + $0x1f0] sm:$0xff] }
 0xae4   : > { %2618 = vmatpush1.bf16.msra.mxu0 %v2482_v38  ;;  %2568 = vmatprep.subr.bf16.mxu1 %v2485_v8  ;;  %v2499_v11 = vpack.c.bf16 %v2387_v9, %v2383_v40  ;;  %v2391_v20 = vld [vmem:[%s5206_s11 + $0x158] sm:$0xff]  ;;  %v2501_v38 = vpack.c.bf16 %v2393_v30, %v2389_v12  ;;  %v2413_v57 = vld [vmem:[%s5206_s11 + $0x208] sm:$0xff]  ;;  %v2412_v9 = vld [vmem:[%s5206_s11 + $0x200] sm:$0xff] }
 0xae5   : > { %2270 = vadd.xlane.f32.xlu1 %v2269_v22  ;;  %2619 = vmatprep.subr.bf16.mxu0 %v2487_v13  ;;  %v2494_v22 = vpack.c.bf16 %v2378_v43, %v2374_v5  ;;  %v2503_v8 = vpack.c.bf16 %v2395_v23, %v2391_v20  ;;  %v2394_v13 = vld [vmem:[%s5206_s11 + $0x170] sm:$0xff]  ;;  %v2415_v5 = vld [vmem:[%s5206_s11 + $0x218] sm:$0xff]  ;;  %v2421_v39 = vld [vmem:[%s5206_s11 + $0x248] sm:$0xff] }
 0xae6   : > { %v2502_v31 = vpack.c.bf16 %v2394_v13, %v2390_v24  ;;  %v2419_v43 = vld [vmem:[%s5206_s11 + $0x238] sm:$0xff]  ;;  %v2418_v59 = vld [vmem:[%s5206_s11 + $0x230] sm:$0xff]  ;;  %v2425_v27 = vld [vmem:[%s5206_s11 + $0x268] sm:$0xff] }
 0xae7   : > { %2569 = vmatpush1.bf16.msra.mxu1 %v2484_v28  ;;  %v2403_v28 = vld [vmem:[%s5206_s11 + $0x1b8] sm:$0xff]  ;;  %v2517_v20 = vpack.c.bf16 %v2425_v27, %v2421_v39  ;;  %v2420_v23 = vld [vmem:[%s5206_s11 + $0x240] sm:$0xff]  ;;  %v2426_v53 = vld [vmem:[%s5206_s11 + $0x270] sm:$0xff] }
 0xae8   : > { %2620 = vmatpush1.bf16.msra.mxu0 %v2486_v34  ;;  %2570 = vmatprep.subr.bf16.mxu1 %v2489_v42  ;;  %v2396_v34 = vld [vmem:[%s5206_s11 + $0x180] sm:$0xff]  ;;  %v2507_v48 = vpack.c.bf16 %v2403_v28, %v2399_v16  ;;  %v2427_v2 = vld [vmem:[%s5206_s11 + $0x278] sm:$0xff]  ;;  %v2438_v39 = vld [vmem:[%s5206_s11 + $0x2d0] sm:$0xff] }
 0xae9   : > { %2621 = vmatprep.subr.bf16.mxu0 %v2491_v49  ;;  %v2400_v42 = vld [vmem:[%s5206_s11 + $0x1a0] sm:$0xff]  ;;  %v2405_v49 = vld [vmem:[%s5206_s11 + $0x1c8] sm:$0xff]  ;;  %v2442_v27 = vld [vmem:[%s5206_s11 + $0x2f0] sm:$0xff] }
 0xaea   : > { %v2509_v55 = vpack.c.bf16 %v2409_v50, %v2405_v49 }
 0xaeb   : > { %2571 = vmatpush1.bf16.msra.mxu1 %v2488_v32  ;;  %v2504_v32 = vpack.c.bf16 %v2400_v42, %v2396_v34 }
 0xaec   : > { %2622 = vmatpush1.bf16.msra.mxu0 %v2490_v62  ;;  %2572 = vmatprep.subr.bf16.mxu1 %v2493_v3  ;;  %v2408_v62 = vld [vmem:[%s5206_s11 + $0x1e0] sm:$0xff]  ;;  %v2406_v3 = vld [vmem:[%s5206_s11 + $0x1d0] sm:$0xff] }
 0xaed   : > { %2623 = vmatprep.subr.bf16.mxu0 %v2495_v4  ;;  %v2417_v4 = vld [vmem:[%s5206_s11 + $0x228] sm:$0xff]  ;;  %v2508_v51 = vpack.c.bf16 %v2408_v62, %v2404_v0  ;;  %v2510_v61 = vpack.c.bf16 %v2410_v47, %v2406_v3  ;;  %v2435_v0 = vld [vmem:[%s5206_s11 + $0x2b8] sm:$0xff]  ;;  %v2428_v62 = vld [vmem:[%s5206_s11 + $0x280] sm:$0xff] }
 0xaee   : > { %v2513_v40 = vpack.c.bf16 %v2417_v4, %v2413_v57  ;;  %v2432_v3 = vld [vmem:[%s5206_s11 + $0x2a0] sm:$0xff]  ;;  %v2430_v57 = vld [vmem:[%s5206_s11 + $0x290] sm:$0xff] }
 0xaef   : > { %2573 = vmatpush1.bf16.msra.mxu1 %v2492_v10  ;;  %v2416_v10 = vld [vmem:[%s5206_s11 + $0x220] sm:$0xff]  ;;  %v2520_v47 = vpack.c.bf16 %v2432_v3, %v2428_v62  ;;  %v2434_v4 = vld [vmem:[%s5206_s11 + $0x2b0] sm:$0xff] }
 0xaf0   : > { %2624 = vmatpush1.bf16.msra.mxu0 %v2494_v22  ;;  %2574 = vmatprep.subr.bf16.mxu1 %v2497_v25  ;;  %v2414_v22 = vld [vmem:[%s5206_s11 + $0x210] sm:$0xff]  ;;  %v2515_v25 = vpack.c.bf16 %v2419_v43, %v2415_v5  ;;  %v2512_v12 = vpack.c.bf16 %v2416_v10, %v2412_v9  ;;  %v2522_v5 = vpack.c.bf16 %v2434_v4, %v2430_v57  ;;  %v2437_v43 = vld [vmem:[%s5206_s11 + $0x2c8] sm:$0xff]  ;;  %v2443_v9 = vld [vmem:[%s5206_s11 + $0x2f8] sm:$0xff] }
 0xaf1   : > { %2625 = vmatprep.subr.bf16.mxu0 %v2499_v11  ;;  %v2423_v11 = vld [vmem:[%s5206_s11 + $0x258] sm:$0xff]  ;;  %v2514_v30 = vpack.c.bf16 %v2418_v59, %v2414_v22  ;;  %v2436_v10 = vld [vmem:[%s5206_s11 + $0x2c0] sm:$0xff]  ;;  %v2462_v62 = vld [vmem:[%s5206_s11 + $0x390] sm:$0xff] }
 0xaf2   : > { %v2440_v22 = vld [vmem:[%s5206_s11 + $0x2e0] sm:$0xff]  ;;  %v2466_v3 = vld [vmem:[%s5206_s11 + $0x3b0] sm:$0xff]  ;;  %v2473_v57 = vld [vmem:[%s5206_s11 + $0x3e8] sm:$0xff] }
 0xaf3   : > { %2575 = vmatpush1.bf16.msra.mxu1 %v2496_v26  ;;  %v2424_v26 = vld [vmem:[%s5206_s11 + $0x260] sm:$0xff]  ;;  %v2524_v59 = vpack.c.bf16 %v2440_v22, %v2436_v10  ;;  %v2471_v4 = vld [vmem:[%s5206_s11 + $0x3d8] sm:$0xff]  ;;  %v2474_v22 = vld [vmem:[%s5206_s11 + $0x3f0] sm:$0xff] }
 0xaf4   : > { %2626 = vmatpush1.bf16.msra.mxu0 %v2498_v36  ;;  %2576 = vmatprep.subr.bf16.mxu1 %v2501_v38  ;;  %v2519_v36 = vpack.c.bf16 %v2427_v2, %v2423_v11  ;;  %v2422_v38 = vld [vmem:[%s5206_s11 + $0x250] sm:$0xff]  ;;  %v2516_v7 = vpack.c.bf16 %v2424_v26, %v2420_v23  ;;  %v2526_v11 = vpack.c.bf16 %v2442_v27, %v2438_v39  ;;  %v2445_v2 = vld [vmem:[%s5206_s11 + $0x308] sm:$0xff]  ;;  %v2451_v23 = vld [vmem:[%s5206_s11 + $0x338] sm:$0xff] }
 0xaf5   : > { %2627 = vmatprep.subr.bf16.mxu0 %v2503_v8  ;;  %v2518_v24 = vpack.c.bf16 %v2426_v53, %v2422_v38  ;;  %v2444_v26 = vld [vmem:[%s5206_s11 + $0x300] sm:$0xff]  ;;  %v2683_v39 = vld [vmem:[#allocation4 + $0x18] sm:$0xff]  ;;  %v2745_v27 = vld [vmem:[#allocation4 + $0x208] sm:$0xff] }
 0xaf7   : > { %2577 = vmatpush1.bf16.msra.mxu1 %v2500_v29 }
 0xaf8   : > { %2628 = vmatpush1.bf16.msra.mxu0 %v2502_v31  ;;  %2578 = vmatprep.subr.bf16.mxu1 %v2505_v37 }
 0xaf9   : > { %2629 = vmatprep.subr.bf16.mxu0 %v2507_v48 }
 0xafb   : > { %2579 = vmatpush1.bf16.msra.mxu1 %v2504_v32 }
 0xafc   : > { %2630 = vmatpush1.bf16.msra.mxu0 %v2506_v56  ;;  %2580 = vmatprep.subr.bf16.mxu1 %v2509_v55  ;;  %v2431_v56 = vld [vmem:[%s5206_s11 + $0x298] sm:$0xff] }
 0xafd   : > { %2631 = vmatprep.subr.bf16.mxu0 %v2511_v58  ;;  %v2523_v58 = vpack.c.bf16 %v2435_v0, %v2431_v56  ;;  %v2464_v56 = vld [vmem:[%s5206_s11 + $0x3a0] sm:$0xff] }
 0xaff   : > { %2581 = vmatpush1.bf16.msra.mxu1 %v2508_v51  ;;  %v2441_v51 = vld [vmem:[%s5206_s11 + $0x2e8] sm:$0xff] }
 0xb00   : > { %2632 = vmatpush1.bf16.msra.mxu0 %v2510_v61  ;;  %2582 = vmatprep.subr.bf16.mxu1 %v2513_v40  ;;  %v2439_v61 = vld [vmem:[%s5206_s11 + $0x2d8] sm:$0xff]  ;;  %v2525_v40 = vpack.c.bf16 %v2441_v51, %v2437_v43 }
 0xb01   : > { %2633 = vmatprep.subr.bf16.mxu0 %v2515_v25  ;;  %v2527_v25 = vpack.c.bf16 %v2443_v9, %v2439_v61  ;;  %v2468_v61 = vld [vmem:[%s5206_s11 + $0x3c0] sm:$0xff]  ;;  %v2470_v9 = vld [vmem:[%s5206_s11 + $0x3d0] sm:$0xff] }
 0xb03   : > { %2583 = vmatpush1.bf16.msra.mxu1 %v2512_v12  ;;  %v2449_v12 = vld [vmem:[%s5206_s11 + $0x328] sm:$0xff] }
 0xb04   : > { %2634 = vmatpush1.bf16.msra.mxu0 %v2514_v30  ;;  %2584 = vmatprep.subr.bf16.mxu1 %v2517_v20  ;;  %v2447_v30 = vld [vmem:[%s5206_s11 + $0x318] sm:$0xff]  ;;  %v2529_v20 = vpack.c.bf16 %v2449_v12, %v2445_v2 }
 0xb05   : > { %2635 = vmatprep.subr.bf16.mxu0 %v2519_v36  ;;  %v2448_v36 = vld [vmem:[%s5206_s11 + $0x320] sm:$0xff]  ;;  %v2531_v38 = vpack.c.bf16 %v2451_v23, %v2447_v30  ;;  %v2747_v2 = vld [vmem:[#allocation4 + $0x218] sm:$0xff] }
 0xb06   : > { %v2528_v53 = vpack.c.bf16 %v2448_v36, %v2444_v26  ;;  %v2849_v12 = vpack.c.bf16 %v2747_v2, %v2745_v27 }
 0xb07   : > { %2585 = vmatpush1.bf16.msra.mxu1 %v2516_v7  ;;  %v2446_v7 = vld [vmem:[%s5206_s11 + $0x310] sm:$0xff] }
 0xb08   : > { %2636 = vmatpush1.bf16.msra.mxu0 %v2518_v24  ;;  %v2450_v24 = vld [vmem:[%s5206_s11 + $0x330] sm:$0xff] }
 0xb09   : > { %2637 = vmatprep.subr.bf16.mxu0 %v2523_v58  ;;  %v2469_v58 = vld [vmem:[%s5206_s11 + $0x3c8] sm:$0xff] }
 0xb0a   : > { %v2541_v43 = vpack.c.bf16 %v2473_v57, %v2469_v58  ;;  %v2749_v58 = vld [vmem:[#allocation4 + $0x228] sm:$0xff] }
 0xb0c   : > { %2638 = vmatpush1.bf16.msra.mxu0 %v2522_v5  ;;  %v2475_v5 = vld [vmem:[%s5206_s11 + $0x3f8] sm:$0xff] }
 0xb0d   : > { %2639 = vmatprep.subr.bf16.mxu0 %v2527_v25  ;;  %v2543_v51 = vpack.c.bf16 %v2475_v5, %v2471_v4  ;;  %v2542_v25 = vpack.c.bf16 %v2474_v22, %v2470_v9  ;;  %v2684_v5 = vld [vmem:[#allocation4 + $0x20] sm:$0xff]  ;;  %v2750_v9 = vld [vmem:[#allocation4 + $0x230] sm:$0xff]  ;;  %v2691_v22 = vld [vmem:[#allocation4 + $0x58] sm:$0xff] }
 0xb10   : > { %2640 = vmatpush1.bf16.msra.mxu0 %v2526_v11 }
 0xb11   : > { %2641 = vmatprep.subr.bf16.mxu0 %v2531_v38 }
 0xb67   : > { %v2263_v8 = vpop.xlane.xlu1 %2262 }
 0xb68   : > { %v2273_v13 = vmul.f32 0.00390625, %v2263_v8  ;;  %v2530_v8 = vpack.c.bf16 %v2450_v24, %v2446_v7 }
 0xb69   : > { %v2266_v14 = vpop.xlane.xlu0 %2265 }
 0xb6a   : > { %v4957_v15 = vsub.f32 %v4691_v45, %v2273_v13  ;;  %v4960_v16 = vsub.f32 %v4694_v60, %v2273_v13  ;;  %v2274_v28 = vmul.f32 0.00390625, %v2266_v14  ;;  %v2453_v13 = vld [vmem:[%s5206_s11 + $0x348] sm:$0xff]  ;;  %2642 = vmatpush1.bf16.msra.mxu0 %v2530_v8  ;;  %v2260_v8 = vld [vmem:[%s5205_s10] sm:$0x3] }
 0xb6b   : > { %v2457_v14 = vld [vmem:[%s5206_s11 + $0x368] sm:$0xff] }
 0xb6c   : > { %v4963_v29 = vsub.f32 %v4697_v63, %v2274_v28  ;;  %v4966_v31 = vsub.f32 %v4700_v1, %v2274_v28  ;;  %v2282_v37 = vmul.f32 %v4957_v15, %v4957_v15  ;;  %v2283_v34 = vmul.f32 %v4960_v16, %v4960_v16  ;;  %v2455_v28 = vld [vmem:[%s5206_s11 + $0x358] sm:$0xff] }
 0xb6e   : > { %v2288_v42 = vadd.f32 %v2283_v34, %v2282_v37  ;;  %v2284_v45 = vmul.f32 %v4963_v29, %v4963_v29  ;;  %v2285_v60 = vmul.f32 %v4966_v31, %v4966_v31  ;;  %v2533_v37 = vpack.c.bf16 %v2457_v14, %v2453_v13  ;;  %v2459_v34 = vld [vmem:[%s5206_s11 + $0x378] sm:$0xff] }
 0xb70   : > { %2289 = vadd.xlane.f32.xlu0 %v2288_v42  ;;  %v2291_v46 = vadd.f32 %v2285_v60, %v2284_v45  ;;  %v2452_v42 = vld [vmem:[%s5206_s11 + $0x340] sm:$0xff]  ;;  %v2535_v60 = vpack.c.bf16 %v2459_v34, %v2455_v28 }
 0xb71   : > { %v2456_v45 = vld [vmem:[%s5206_s11 + $0x360] sm:$0xff] }
 0xb72   : > { %2292 = vadd.xlane.f32.xlu1 %v2291_v46  ;;  %v2271_v63 = vpop.xlane.xlu1 %2270  ;;  %v2532_v46 = vpack.c.bf16 %v2456_v45, %v2452_v42  ;;  %2643 = vmatprep.subr.bf16.mxu0 %v2535_v60  ;;  %v2335_v60 = vrot.slane %v2260_v8, %v4046_v21 }
 0xb73   : > { %v2275_v48 = vmul.f32 0.00390625, %v2271_v63  ;;  %v2454_v63 = vld [vmem:[%s5206_s11 + $0x350] sm:$0xff] }
 0xb75   : > { %v4977_v1 = vsub.f32 %v4707_v6, %v2275_v48  ;;  %v4980_v41 = vsub.f32 %v4710_v44, %v2275_v48  ;;  %v2429_v6 = vld [vmem:[%s5206_s11 + $0x288] sm:$0xff]  ;;  %v2458_v48 = vld [vmem:[%s5206_s11 + $0x370] sm:$0xff] }
 0xb76   : > { %v2433_v44 = vld [vmem:[%s5206_s11 + $0x2a8] sm:$0xff] }
 0xb77   : > { %v2286_v49 = vmul.f32 %v4977_v1, %v4977_v1  ;;  %v2287_v50 = vmul.f32 %v4980_v41, %v4980_v41  ;;  %v2521_v55 = vpack.c.bf16 %v2433_v44, %v2429_v6  ;;  %v2467_v6 = vld [vmem:[%s5206_s11 + $0x3b8] sm:$0xff]  ;;  %v2460_v44 = vld [vmem:[%s5206_s11 + $0x380] sm:$0xff] }
 0xb78   : > { %v2536_v0 = vpack.c.bf16 %v2464_v56, %v2460_v44  ;;  %v2744_v44 = vld [vmem:[#allocation4 + $0x200] sm:$0xff]  ;;  %v2685_v56 = vld [vmem:[#allocation4 + $0x28] sm:$0xff] }
 0xb79   : > { %v2294_v52 = vsel %vm1393_vm1, %v2286_v49, 0.0  ;;  %v2295_v54 = vsel %vm1393_vm1, %v2287_v50, 0.0  ;;  %2586 = vmatprep.subr.bf16.mxu1 %v2521_v55  ;;  %v2534_v49 = vpack.c.bf16 %v2458_v48, %v2454_v63  ;;  %v2461_v50 = vld [vmem:[%s5206_s11 + $0x388] sm:$0xff] }
 0xb7a   : > { %v2296_v32 = vadd.f32 %v2295_v54, %v2294_v52  ;;  %2587 = vmatpush1.bf16.msra.mxu1 %v2520_v47  ;;  %v2465_v52 = vld [vmem:[%s5206_s11 + $0x3a8] sm:$0xff]  ;;  %v2463_v54 = vld [vmem:[%s5206_s11 + $0x398] sm:$0xff]  ;;  %v2538_v47 = vpack.c.bf16 %v2466_v3, %v2462_v62 }
 0xb7b   : > { %2588 = vmatprep.subr.bf16.mxu1 %v2525_v40  ;;  %2644 = vmatpush1.bf16.msra.mxu0 %v2534_v49  ;;  %v2539_v55 = vpack.c.bf16 %v2467_v6, %v2463_v54  ;;  %v2472_v40 = vld [vmem:[%s5206_s11 + $0x3e0] sm:$0xff]  ;;  %v2682_v6 = vld [vmem:[#allocation4 + $0x10] sm:$0xff]  ;;  %v2687_v3 = vld [vmem:[#allocation4 + $0x38] sm:$0xff] }
 0xb7c   : > { %2297 = vadd.xlane.f32.xlu0 %v2296_v32  ;;  %v2537_v32 = vpack.c.bf16 %v2465_v52, %v2461_v50  ;;  %v2540_v10 = vpack.c.bf16 %v2472_v40, %v2468_v61  ;;  %v2748_v40 = vld [vmem:[#allocation4 + $0x220] sm:$0xff] }
 0xb7d   : > { %2645 = vmatprep.subr.bf16.mxu0 %v2539_v55 }
 0xb7e   : > { %2589 = vmatpush1.bf16.msra.mxu1 %v2524_v59  ;;  %v2681_v59 = vld [vmem:[#allocation4 + $0x8] sm:$0xff] }
 0xb7f   : > { %2590 = vmatprep.subr.bf16.mxu1 %v2529_v20  ;;  %2646 = vmatpush1.bf16.msra.mxu0 %v2538_v47  ;;  %v2817_v11 = vpack.c.bf16 %v2683_v39, %v2681_v59  ;;  %v2751_v47 = vld [vmem:[#allocation4 + $0x238] sm:$0xff] }
 0xb80   : > { %2647 = vmatprep.subr.bf16.mxu0 %v2543_v51  ;;  %v2819_v51 = vpack.c.bf16 %v2687_v3, %v2685_v56  ;;  %v2851_v61 = vpack.c.bf16 %v2751_v47, %v2749_v58  ;;  %v2755_v59 = vld [vmem:[#allocation4 + $0x258] sm:$0xff]  ;;  %v2698_v56 = vld [vmem:[#allocation4 + $0x90] sm:$0xff]  ;;  %v2701_v3 = vld [vmem:[#allocation4 + $0xa8] sm:$0xff] }
 0xb81   : > { %v2703_v58 = vld [vmem:[#allocation4 + $0xb8] sm:$0xff]  ;;  %v2765_v47 = vld [vmem:[#allocation4 + $0x2a8] sm:$0xff] }
 0xb82   : > { %2591 = vmatpush1.bf16.msra.mxu1 %v2528_v53  ;;  %v2259_v53 = vld [vmem:[%s5204_s9] sm:$0x3] }
 0xb83   : > { %2592 = vmatprep.subr.bf16.mxu1 %v2533_v37  ;;  %2648 = vmatpush1.bf16.msra.mxu0 %v2542_v25  ;;  %v2318_v13 = vrot.slane %v2259_v53, %v4046_v21  ;;  %v2322_v14 = vrot.slane %v2259_v53, %v4040_v19  ;;  %v2753_v25 = vld [vmem:[#allocation4 + $0x248] sm:$0xff]  ;;  %v2752_v53 = vld [vmem:[#allocation4 + $0x240] sm:$0xff] }
 0xb84   : > { %2939 = vmatprep.subr.bf16.mxu0 %v2849_v12  ;;  %v2850_v12 = vpack.c.bf16 %v2750_v9, %v2748_v40  ;;  %v2766_v40 = vld [vmem:[#allocation4 + $0x2b0] sm:$0xff]  ;;  %v2705_v9 = vld [vmem:[#allocation4 + $0xc8] sm:$0xff] }
 0xb86   : > { %2593 = vmatpush1.bf16.msra.mxu1 %v2532_v46  ;;  %v2339_v46 = vrot.slane %v2260_v8, %v4040_v19 }
 0xb87   : > { %2594 = vmatprep.subr.bf16.mxu1 %v2537_v32  ;;  %v2680_v32 = vld [vmem:[#allocation4] sm:$0xff] }
 0xb88   : > { %v2816_v4 = vpack.c.bf16 %v2682_v6, %v2680_v32  ;;  %v2763_v32 = vld [vmem:[#allocation4 + $0x298] sm:$0xff] }
 0xb8a   : > { %2595 = vmatpush1.bf16.msra.mxu1 %v2536_v0 }
 0xb8b   : > { %2596 = vmatprep.subr.bf16.mxu1 %v2541_v43  ;;  %v2686_v43 = vld [vmem:[#allocation4 + $0x30] sm:$0xff] }
 0xb8c   : > { %v2818_v27 = vpack.c.bf16 %v2686_v43, %v2684_v5  ;;  %v2702_v5 = vld [vmem:[#allocation4 + $0xb0] sm:$0xff]  ;;  %v2827_v43 = vpack.c.bf16 %v2703_v58, %v2701_v3 }
 0xb8e   : > { %2597 = vmatpush1.bf16.msra.mxu1 %v2540_v10  ;;  %v2689_v10 = vld [vmem:[#allocation4 + $0x48] sm:$0xff] }
 0xb8f   : > { %2892 = vmatprep.subr.bf16.mxu1 %v2817_v11 }
 0xbfd   : > { %v2290_v30 = vpop.xlane.xlu0 %2289 }
 0xbfe   : > { %v2299_v20 = vmul.f32 0.00390625, %v2290_v30  ;;  %v2821_v30 = vpack.c.bf16 %v2691_v22, %v2689_v10  ;;  %v2707_v10 = vld [vmem:[#allocation4 + $0xd8] sm:$0xff]  ;;  %v2769_v22 = vld [vmem:[#allocation4 + $0x2c8] sm:$0xff] }
 0xbff   : > { %v2293_v23 = vpop.xlane.xlu1 %2292 }
 0xc00   : > { %v2302_v26 = vadd.f32 1e-05, %v2299_v20  ;;  %v2300_v36 = vmul.f32 0.00390625, %v2293_v23  ;;  %v2853_v20 = vpack.c.bf16 %v2755_v59, %v2753_v25  ;;  %v2771_v25 = vld [vmem:[#allocation4 + $0x2d8] sm:$0xff] }
 0xc02   : > { %3372 = vrsqrt.f32 %v2302_v26  ;;  %v2303_v38 = vadd.f32 1e-05, %v2300_v36  ;;  %v2688_v36 = vld [vmem:[#allocation4 + $0x40] sm:$0xff] }
 0xc04   : > { %3374 = vrsqrt.f32 %v2303_v38  ;;  %v2690_v38 = vld [vmem:[#allocation4 + $0x50] sm:$0xff] }
 0xc09   : > { %v2298_v7 = vpop.xlane.xlu0 %2297 }
 0xc0a   : > { %v2301_v24 = vmul.f32 0.00390625, %v2298_v7  ;;  %v2754_v7 = vld [vmem:[#allocation4 + $0x250] sm:$0xff] }
 0xc0c   : > { %v3373_v28 = vpop.eup %3372  ;;  %v2304_v37 = vadd.f32 1e-05, %v2301_v24  ;;  %v2693_v24 = vld [vmem:[#allocation4 + $0x68] sm:$0xff] }
 0xc0d   : > { %v2308_v34 = vmul.f32 %v3373_v28, %v4957_v15  ;;  %v2309_v42 = vmul.f32 %v3373_v28, %v4960_v16  ;;  %v2746_v15 = vld [vmem:[#allocation4 + $0x210] sm:$0xff] }
 0xc0e   : > { %v3375_v45 = vpop.eup %3374  ;;  %3376 = vrsqrt.f32 %v2304_v37  ;;  %v2759_v37 = vld [vmem:[#allocation4 + $0x278] sm:$0xff] }
 0xc0f   : > { %v2310_v63 = vmul.f32 %v3375_v45, %v4963_v29  ;;  %v2311_v48 = vmul.f32 %v3375_v45, %v4966_v31  ;;  %v2326_v49 = vmul.f32 %v2322_v14, %v2309_v42  ;;  %v2325_v50 = vmul.f32 %v2318_v13, %v2308_v34  ;;  %v2692_v45 = vld [vmem:[#allocation4 + $0x60] sm:$0xff] }
 0xc10   : > { %v2848_v31 = vpack.c.bf16 %v2746_v15, %v2744_v44  ;;  %v2820_v34 = vpack.c.bf16 %v2690_v38, %v2688_v36  ;;  %v2852_v42 = vpack.c.bf16 %v2754_v7, %v2752_v53  ;;  %v2696_v15 = vld [vmem:[#allocation4 + $0x80] sm:$0xff]  ;;  %v2773_v36 = vld [vmem:[#allocation4 + $0x2e8] sm:$0xff]  ;;  %v2775_v38 = vld [vmem:[#allocation4 + $0x2f8] sm:$0xff] }
 0xc11   : > { %v2328_v52 = vmul.f32 %v2322_v14, %v2311_v48  ;;  %v2327_v54 = vmul.f32 %v2318_v13, %v2310_v63  ;;  %v2343_v16 = vadd.f32 %v2339_v46, %v2326_v49  ;;  %v2342_v0 = vadd.f32 %v2335_v60, %v2325_v50  ;;  %v2756_v48 = vld [vmem:[#allocation4 + $0x260] sm:$0xff]  ;;  %v2758_v49 = vld [vmem:[#allocation4 + $0x270] sm:$0xff]  ;;  %v2697_v50 = vld [vmem:[#allocation4 + $0x88] sm:$0xff] }
 0xc12   : > { %v2854_v44 = vpack.c.bf16 %v2758_v49, %v2756_v48  ;;  %v2712_v48 = vld [vmem:[#allocation4 + $0x100] sm:$0xff]  ;;  %v2714_v49 = vld [vmem:[#allocation4 + $0x110] sm:$0xff] }
 0xc13   : > { %v2345_v55 = vadd.f32 %v2339_v46, %v2328_v52  ;;  %v2344_v62 = vadd.f32 %v2335_v60, %v2327_v54  ;;  %v2699_v52 = vld [vmem:[#allocation4 + $0x98] sm:$0xff]  ;;  %v2761_v54 = vld [vmem:[#allocation4 + $0x288] sm:$0xff] }
 0xc15   : > { %v2477_v57 = vpack.c.bf16 %v2345_v55, %v2343_v16  ;;  %v2476_v29 = vpack.c.bf16 %v2344_v62, %v2342_v0  ;;  %v2825_v16 = vpack.c.bf16 %v2699_v52, %v2697_v50  ;;  %v2857_v55 = vpack.c.bf16 %v2763_v32, %v2761_v54  ;;  %v2760_v0 = vld [vmem:[#allocation4 + $0x280] sm:$0xff]  ;;  %v2762_v62 = vld [vmem:[#allocation4 + $0x290] sm:$0xff] }
 0xc16   : > { %v2776_v54 = vld [vmem:[#allocation4 + $0x300] sm:$0xff]  ;;  %v2778_v32 = vld [vmem:[#allocation4 + $0x310] sm:$0xff] }
 0xc17   : > { %2598 = vmatprep.mubr.bf16.mxu1 %v2477_v57  ;;  %2649 = vmatprep.mubr.bf16.mxu0 %v2477_v57  ;;  %v2767_v57 = vld [vmem:[#allocation4 + $0x2b8] sm:$0xff] }
 0xc18   : > { %v3377_v39 = vpop.eup %3376  ;;  %2599 = vmatmul.mubr.bf16.vlgmr.msra.gmra.mrb[40].mxu1 %v2476_v29  ;;  %2650 = vmatmul.mubr.bf16.vlgmr.msra.gmra.mrb[40].mxu0 %v2476_v29  ;;  %v2824_v29 = vpack.c.bf16 %v2698_v56, %v2696_v15  ;;  %v2781_v15 = vld [vmem:[#allocation4 + $0x328] sm:$0xff]  ;;  %v2783_v56 = vld [vmem:[#allocation4 + $0x338] sm:$0xff] }
 0xc19   : > { %v2313_v11 = vmul.f32 %v3377_v39, %v4980_v41  ;;  %v2312_v2 = vmul.f32 %v3377_v39, %v4977_v1  ;;  %2893 = vmatpush1.bf16.msra.mxu1 %v2816_v4  ;;  %2940 = vmatpush1.bf16.msra.mxu0 %v2848_v31  ;;  %v2695_v1 = vld [vmem:[#allocation4 + $0x78] sm:$0xff]  ;;  %v2757_v41 = vld [vmem:[#allocation4 + $0x268] sm:$0xff]  ;;  %v2856_v4 = vpack.c.bf16 %v2762_v62, %v2760_v0  ;;  %v2700_v31 = vld [vmem:[#allocation4 + $0xa0] sm:$0xff] }
 0xc1a   : > { %2894 = vmatprep.subr.bf16.mxu1 %v2819_v51  ;;  %2941 = vmatprep.subr.bf16.mxu0 %v2851_v61  ;;  %v2823_v63 = vpack.c.bf16 %v2695_v1, %v2693_v24  ;;  %v2859_v51 = vpack.c.bf16 %v2767_v57, %v2765_v47  ;;  %v2764_v61 = vld [vmem:[#allocation4 + $0x2a0] sm:$0xff]  ;;  %v2826_v59 = vpack.c.bf16 %v2702_v5, %v2700_v31  ;;  %v2710_v1 = vld [vmem:[#allocation4 + $0xf0] sm:$0xff]  ;;  %v2785_v31 = vld [vmem:[#allocation4 + $0x348] sm:$0xff] }
 0xc1b   : > { %v2330_v23 = vmul.f32 %v2322_v14, %v2313_v11  ;;  %v2329_v26 = vmul.f32 %v2318_v13, %v2312_v2  ;;  %v2858_v39 = vpack.c.bf16 %v2766_v40, %v2764_v61  ;;  %v2706_v11 = vld [vmem:[#allocation4 + $0xd0] sm:$0xff]  ;;  %v2829_v2 = vpack.c.bf16 %v2707_v10, %v2705_v9  ;;  %v2708_v24 = vld [vmem:[#allocation4 + $0xe0] sm:$0xff]  ;;  %v2787_v5 = vld [vmem:[#allocation4 + $0x358] sm:$0xff] }
 0xc1c   : > { %v2716_v0 = vld [vmem:[#allocation4 + $0x120] sm:$0xff]  ;;  %v2718_v62 = vld [vmem:[#allocation4 + $0x130] sm:$0xff]  ;;  %v2867_v58 = vpack.c.bf16 %v2783_v56, %v2781_v15  ;;  %v2869_v10 = vpack.c.bf16 %v2787_v5, %v2785_v31 }
 0xc1d   : > { %v5148_v8 = vadd.f32 %v2339_v46, %v2330_v23  ;;  %v5150_v28 = vadd.f32 %v2335_v60, %v2329_v26  ;;  %2895 = vmatpush1.bf16.msra.mxu1 %v2818_v27  ;;  %2942 = vmatpush1.bf16.msra.mxu0 %v2850_v12  ;;  %v2694_v46 = vld [vmem:[#allocation4 + $0x70] sm:$0xff]  ;;  %v2855_v60 = vpack.c.bf16 %v2759_v37, %v2757_v41  ;;  %v2704_v27 = vld [vmem:[#allocation4 + $0xc0] sm:$0xff]  ;;  %v2709_v23 = vld [vmem:[#allocation4 + $0xe8] sm:$0xff] }
 0xc1e   : > { %2896 = vmatprep.subr.bf16.mxu1 %v2821_v30  ;;  %2943 = vmatprep.subr.bf16.mxu0 %v2853_v20  ;;  %v2822_v6 = vpack.c.bf16 %v2694_v46, %v2692_v45  ;;  %v2861_v12 = vpack.c.bf16 %v2771_v25, %v2769_v22  ;;  %v2768_v30 = vld [vmem:[#allocation4 + $0x2c0] sm:$0xff]  ;;  %v2770_v20 = vld [vmem:[#allocation4 + $0x2d0] sm:$0xff]  ;;  %v2711_v26 = vld [vmem:[#allocation4 + $0xf8] sm:$0xff]  ;;  %v2828_v53 = vpack.c.bf16 %v2706_v11, %v2704_v27 }
 0xc1f   : > { %v2479_v14 = vpack.c.bf16 %v5148_v8, %v5148_v8  ;;  %v2478_v13 = vpack.c.bf16 %v5150_v28, %v5150_v28  ;;  %v2860_v7 = vpack.c.bf16 %v2770_v20, %v2768_v30  ;;  %v2831_v41 = vpack.c.bf16 %v2711_v26, %v2709_v23  ;;  %v2777_v45 = vld [vmem:[#allocation4 + $0x308] sm:$0xff]  ;;  %v2779_v46 = vld [vmem:[#allocation4 + $0x318] sm:$0xff]  ;;  %v2780_v47 = vld [vmem:[#allocation4 + $0x320] sm:$0xff] }
 0xc20   : > { %v2863_v37 = vpack.c.bf16 %v2775_v38, %v2773_v36  ;;  %v2865_v52 = vpack.c.bf16 %v2779_v46, %v2777_v45  ;;  %v2782_v57 = vld [vmem:[#allocation4 + $0x330] sm:$0xff]  ;;  %v2720_v61 = vld [vmem:[#allocation4 + $0x140] sm:$0xff]  ;;  %v2789_v27 = vld [vmem:[#allocation4 + $0x368] sm:$0xff] }
 0xc21   : > { %2608 = vmatprep.mubr.bf16.mxu1 %v2479_v14  ;;  %2659 = vmatprep.mubr.bf16.mxu0 %v2479_v14  ;;  %v2772_v14 = vld [vmem:[#allocation4 + $0x2e0] sm:$0xff]  ;;  %v2722_v40 = vld [vmem:[#allocation4 + $0x150] sm:$0xff]  ;;  %v2791_v11 = vld [vmem:[#allocation4 + $0x378] sm:$0xff] }
 0xc22   : > { %2609 = vmatmul.mubr.bf16.gmra.mrb[44].mxu1 %v2478_v13  ;;  %2660 = vmatmul.mubr.bf16.gmra.mrb[44].mxu0 %v2478_v13  ;;  %v2774_v13 = vld [vmem:[#allocation4 + $0x2f0] sm:$0xff]  ;;  %v2784_v22 = vld [vmem:[#allocation4 + $0x340] sm:$0xff]  ;;  %v2871_v26 = vpack.c.bf16 %v2791_v11, %v2789_v27 }
 0xc23   : > { %2897 = vmatpush1.bf16.msra.mxu1 %v2820_v34  ;;  %2944 = vmatpush1.bf16.msra.mxu0 %v2852_v42  ;;  %v2713_v34 = vld [vmem:[#allocation4 + $0x108] sm:$0xff]  ;;  %v2715_v42 = vld [vmem:[#allocation4 + $0x118] sm:$0xff]  ;;  %v2786_v25 = vld [vmem:[#allocation4 + $0x350] sm:$0xff] }
 0xc24   : > { %2898 = vmatprep.subr.bf16.mxu1 %v2823_v63  ;;  %2945 = vmatprep.subr.bf16.mxu0 %v2855_v60  ;;  %v2830_v63 = vpack.c.bf16 %v2710_v1, %v2708_v24  ;;  %v2862_v60 = vpack.c.bf16 %v2774_v13, %v2772_v14  ;;  %v2833_v50 = vpack.c.bf16 %v2715_v42, %v2713_v34  ;;  %v2724_v30 = vld [vmem:[#allocation4 + $0x160] sm:$0xff]  ;;  %v2726_v20 = vld [vmem:[#allocation4 + $0x170] sm:$0xff]  ;;  %v2793_v24 = vld [vmem:[#allocation4 + $0x388] sm:$0xff] }
 0xc25   : > { %v2788_v36 = vld [vmem:[#allocation4 + $0x360] sm:$0xff]  ;;  %v2790_v38 = vld [vmem:[#allocation4 + $0x370] sm:$0xff]  ;;  %v2795_v1 = vld [vmem:[#allocation4 + $0x398] sm:$0xff] }
 0xc26   : > { %v2728_v14 = vld [vmem:[#allocation4 + $0x180] sm:$0xff]  ;;  %v2730_v13 = vld [vmem:[#allocation4 + $0x190] sm:$0xff]  ;;  %v2873_v42 = vpack.c.bf16 %v2795_v1, %v2793_v24 }
 0xc27   : > { %2899 = vmatpush1.bf16.msra.mxu1 %v2822_v6  ;;  %2946 = vmatpush1.bf16.msra.mxu0 %v2854_v44  ;;  %v2717_v6 = vld [vmem:[#allocation4 + $0x128] sm:$0xff]  ;;  %v2719_v44 = vld [vmem:[#allocation4 + $0x138] sm:$0xff]  ;;  %v2792_v45 = vld [vmem:[#allocation4 + $0x380] sm:$0xff] }
 0xc28   : > { %2900 = vmatprep.subr.bf16.mxu1 %v2825_v16  ;;  %2947 = vmatprep.subr.bf16.mxu0 %v2857_v55  ;;  %v2832_v16 = vpack.c.bf16 %v2714_v49, %v2712_v48  ;;  %v2864_v55 = vpack.c.bf16 %v2778_v32, %v2776_v54  ;;  %v2835_v3 = vpack.c.bf16 %v2719_v44, %v2717_v6  ;;  %v2794_v46 = vld [vmem:[#allocation4 + $0x390] sm:$0xff]  ;;  %v2797_v48 = vld [vmem:[#allocation4 + $0x3a8] sm:$0xff]  ;;  %v2799_v49 = vld [vmem:[#allocation4 + $0x3b8] sm:$0xff] }
 0xc29   : > { %v2875_v32 = vpack.c.bf16 %v2799_v49, %v2797_v48  ;;  %v2732_v6 = vld [vmem:[#allocation4 + $0x1a0] sm:$0xff]  ;;  %v2734_v44 = vld [vmem:[#allocation4 + $0x1b0] sm:$0xff] }
 0xc2a   : > { %v2796_v15 = vld [vmem:[#allocation4 + $0x3a0] sm:$0xff]  ;;  %v2842_v56 = vpack.c.bf16 %v2734_v44, %v2732_v6 }
 0xc2b   : > { %2901 = vmatpush1.bf16.msra.mxu1 %v2824_v29  ;;  %2948 = vmatpush1.bf16.msra.mxu0 %v2856_v4  ;;  %v2721_v29 = vld [vmem:[#allocation4 + $0x148] sm:$0xff]  ;;  %v2723_v4 = vld [vmem:[#allocation4 + $0x158] sm:$0xff]  ;;  %v2800_v5 = vld [vmem:[#allocation4 + $0x3c0] sm:$0xff] }
 0xc2c   : > { %2902 = vmatprep.subr.bf16.mxu1 %v2827_v43  ;;  %2949 = vmatprep.subr.bf16.mxu0 %v2859_v51  ;;  %v2834_v43 = vpack.c.bf16 %v2718_v62, %v2716_v0  ;;  %v2866_v51 = vpack.c.bf16 %v2782_v57, %v2780_v47  ;;  %v2837_v9 = vpack.c.bf16 %v2723_v4, %v2721_v29  ;;  %v2737_v0 = vld [vmem:[#allocation4 + $0x1c8] sm:$0xff]  ;;  %v2739_v62 = vld [vmem:[#allocation4 + $0x1d8] sm:$0xff]  ;;  %v2736_v57 = vld [vmem:[#allocation4 + $0x1c0] sm:$0xff] }
 0xc2d   : > { %v2803_v47 = vld [vmem:[#allocation4 + $0x3d8] sm:$0xff]  ;;  %v2738_v29 = vld [vmem:[#allocation4 + $0x1d0] sm:$0xff]  ;;  %v2804_v11 = vld [vmem:[#allocation4 + $0x3e0] sm:$0xff] }
 0xc2e   : > { %v2844_v31 = vpack.c.bf16 %v2738_v29, %v2736_v57 }
 0xc2f   : > { %2903 = vmatpush1.bf16.msra.mxu1 %v2826_v59  ;;  %2950 = vmatpush1.bf16.msra.mxu0 %v2858_v39  ;;  %v2725_v59 = vld [vmem:[#allocation4 + $0x168] sm:$0xff]  ;;  %v2727_v39 = vld [vmem:[#allocation4 + $0x178] sm:$0xff] }
 0xc30   : > { %2904 = vmatprep.subr.bf16.mxu1 %v2829_v2  ;;  %2951 = vmatprep.subr.bf16.mxu0 %v2861_v12  ;;  %v2836_v2 = vpack.c.bf16 %v2722_v40, %v2720_v61  ;;  %v2868_v12 = vpack.c.bf16 %v2786_v25, %v2784_v22  ;;  %v2839_v23 = vpack.c.bf16 %v2727_v39, %v2725_v59  ;;  %v2741_v61 = vld [vmem:[#allocation4 + $0x1e8] sm:$0xff]  ;;  %v2743_v40 = vld [vmem:[#allocation4 + $0x1f8] sm:$0xff]  ;;  %v2740_v25 = vld [vmem:[#allocation4 + $0x1e0] sm:$0xff] }
 0xc31   : > { %v2807_v22 = vld [vmem:[#allocation4 + $0x3f8] sm:$0xff]  ;;  %v2742_v59 = vld [vmem:[#allocation4 + $0x1f0] sm:$0xff] }
 0xc32   : > { %v2846_v27 = vpack.c.bf16 %v2742_v59, %v2740_v25 }
 0xc33   : > { %2905 = vmatpush1.bf16.msra.mxu1 %v2828_v53  ;;  %2952 = vmatpush1.bf16.msra.mxu0 %v2860_v7  ;;  %v2729_v53 = vld [vmem:[#allocation4 + $0x188] sm:$0xff]  ;;  %v2731_v7 = vld [vmem:[#allocation4 + $0x198] sm:$0xff] }
 0xc34   : > { %2906 = vmatprep.subr.bf16.mxu1 %v2831_v41  ;;  %2953 = vmatprep.subr.bf16.mxu0 %v2863_v37  ;;  %v2838_v41 = vpack.c.bf16 %v2726_v20, %v2724_v30  ;;  %v2870_v37 = vpack.c.bf16 %v2790_v38, %v2788_v36  ;;  %v2841_v34 = vpack.c.bf16 %v2731_v7, %v2729_v53  ;;  %v2544_v30 = vld [vmem:[%s5207_s12] sm:$0xf] }
 0xc35   : > { %v2549_v20 = vrot.slane %v2544_v30, %v4046_v21  ;;  %v2561_v36 = vrot.slane %v2544_v30, %v1112_v35 }
 0xc37   : > { %2907 = vmatpush1.bf16.msra.mxu1 %v2830_v63  ;;  %2954 = vmatpush1.bf16.msra.mxu0 %v2862_v60  ;;  %v2733_v63 = vld [vmem:[#allocation4 + $0x1a8] sm:$0xff]  ;;  %v2735_v60 = vld [vmem:[#allocation4 + $0x1b8] sm:$0xff] }
 0xc38   : > { %2908 = vmatprep.subr.bf16.mxu1 %v2833_v50  ;;  %2955 = vmatprep.subr.bf16.mxu0 %v2865_v52  ;;  %v2840_v50 = vpack.c.bf16 %v2730_v13, %v2728_v14  ;;  %v2872_v52 = vpack.c.bf16 %v2794_v46, %v2792_v45  ;;  %v2843_v54 = vpack.c.bf16 %v2735_v60, %v2733_v63 }
 0xc3b   : > { %2909 = vmatpush1.bf16.msra.mxu1 %v2832_v16  ;;  %2956 = vmatpush1.bf16.msra.mxu0 %v2864_v55  ;;  %v2798_v16 = vld [vmem:[#allocation4 + $0x3b0] sm:$0xff] }
 0xc3c   : > { %2910 = vmatprep.subr.bf16.mxu1 %v2835_v3  ;;  %2957 = vmatprep.subr.bf16.mxu0 %v2867_v58  ;;  %v2874_v55 = vpack.c.bf16 %v2798_v16, %v2796_v15  ;;  %v2801_v3 = vld [vmem:[#allocation4 + $0x3c8] sm:$0xff]  ;;  %v2845_v58 = vpack.c.bf16 %v2739_v62, %v2737_v0 }
 0xc3d   : > { %v2877_v4 = vpack.c.bf16 %v2803_v47, %v2801_v3 }
 0xc3f   : > { %2911 = vmatpush1.bf16.msra.mxu1 %v2834_v43  ;;  %2958 = vmatpush1.bf16.msra.mxu0 %v2866_v51  ;;  %v2802_v43 = vld [vmem:[#allocation4 + $0x3d0] sm:$0xff] }
 0xc40   : > { %2912 = vmatprep.subr.bf16.mxu1 %v2837_v9  ;;  %2959 = vmatprep.subr.bf16.mxu0 %v2869_v10  ;;  %v2876_v51 = vpack.c.bf16 %v2802_v43, %v2800_v5  ;;  %v2805_v9 = vld [vmem:[#allocation4 + $0x3e8] sm:$0xff]  ;;  %v2847_v10 = vpack.c.bf16 %v2743_v40, %v2741_v61 }
 0xc41   : > { %v2879_v39 = vpack.c.bf16 %v2807_v22, %v2805_v9 }
 0xc43   : > { %2913 = vmatpush1.bf16.msra.mxu1 %v2836_v2  ;;  %2960 = vmatpush1.bf16.msra.mxu0 %v2868_v12  ;;  %v2806_v2 = vld [vmem:[#allocation4 + $0x3f0] sm:$0xff] }
 0xc44   : > { %2914 = vmatprep.subr.bf16.mxu1 %v2839_v23  ;;  %2961 = vmatprep.subr.bf16.mxu0 %v2871_v26  ;;  %v2878_v12 = vpack.c.bf16 %v2806_v2, %v2804_v11  ;;  %v2557_v23 = vrot.slane %v2544_v30, %v1108_v33  ;;  %v2553_v26 = vrot.slane %v2544_v30, %v4040_v19 }
 0xc47   : > { %2915 = vmatpush1.bf16.msra.mxu1 %v2838_v41  ;;  %2962 = vmatpush1.bf16.msra.mxu0 %v2870_v37 }
 0xc48   : > { %2916 = vmatprep.subr.bf16.mxu1 %v2841_v34  ;;  %2963 = vmatprep.subr.bf16.mxu0 %v2873_v42 }
 0xc4b   : > { %2917 = vmatpush1.bf16.msra.mxu1 %v2840_v50  ;;  %2964 = vmatpush1.bf16.msra.mxu0 %v2872_v52 }
 0xc4c   : > { %2918 = vmatprep.subr.bf16.mxu1 %v2843_v54  ;;  %2965 = vmatprep.subr.bf16.mxu0 %v2875_v32 }
 0xc4f   : > { %2919 = vmatpush1.bf16.msra.mxu1 %v2842_v56  ;;  %2966 = vmatpush1.bf16.msra.mxu0 %v2874_v55 }
 0xc50   : > { %2920 = vmatprep.subr.bf16.mxu1 %v2845_v58  ;;  %2967 = vmatprep.subr.bf16.mxu0 %v2877_v4 }
 0xc53   : > { %2921 = vmatpush1.bf16.msra.mxu1 %v2844_v31  ;;  %2968 = vmatpush1.bf16.msra.mxu0 %v2876_v51 }
 0xc54   : > { %2922 = vmatprep.subr.bf16.mxu1 %v2847_v10  ;;  %2969 = vmatprep.subr.bf16.mxu0 %v2879_v39 }
 0xc57   : > { %2923 = vmatpush1.bf16.msra.mxu1 %v2846_v27  ;;  %2970 = vmatpush1.bf16.msra.mxu0 %v2878_v12 }
 0xceb   : > { %v2600_v38 = vpop.f32.mrb[40].mxu1  ;;  %v2651_v53 = vpop.f32.mrb[40].mxu0 }
 0xcec   : > { %v2601_v7 = vadd.f32 %v2600_v38, %v2549_v20  ;;  %v2652_v24 = vadd.f32 %v2651_v53, %v2557_v23  ;;  %v2602_v1 = vpop.f32.mrb[41].mxu1  ;;  %v2653_v41 = vpop.f32.mrb[41].mxu0 }
 0xced   : > { %v2603_v37 = vadd.f32 %v2602_v1, %v2553_v26  ;;  %v2654_v14 = vadd.f32 %v2653_v41, %v2561_v36  ;;  %v2604_v13 = vpop.f32.mrb[42].mxu1  ;;  %v2655_v34 = vpop.f32.mrb[42].mxu0 }
 0xcee   : > { %v2605_v42 = vadd.f32 %v2604_v13, %v2549_v20  ;;  %v2656_v45 = vadd.f32 %v2655_v34, %v2557_v23  ;;  %v2606_v46 = vpop.f32.mrb[43].mxu1  ;;  %v2657_v63 = vpop.f32.mrb[43].mxu0  ;;  %v2668_v48 = vmax.f32 %v2601_v7, 0.0  ;;  %v2670_v49 = vmax.f32 %v2652_v24, 0.0 }
 0xcef   : > { %v2607_v33 = vadd.f32 %v2606_v46, %v2553_v26  ;;  %v2658_v60 = vadd.f32 %v2657_v63, %v2561_v36  ;;  %v2669_v52 = vmax.f32 %v2603_v37, 0.0  ;;  %v2671_v54 = vmax.f32 %v2654_v14, 0.0 }
 0xcf0   : > { %v2672_v50 = vmax.f32 %v2605_v42, 0.0  ;;  %v2674_v35 = vmax.f32 %v2656_v45, 0.0 }
 0xcf1   : > { %v2673_v32 = vmax.f32 %v2607_v33, 0.0  ;;  %v2675_v6 = vmax.f32 %v2658_v60, 0.0 }
 0xcf2   : > { %v2808_v44 = vpack.c.bf16 %v2672_v50, %v2668_v48  ;;  %v2810_v15 = vpack.c.bf16 %v2674_v35, %v2670_v49 }
 0xcf3   : > { %v2809_v56 = vpack.c.bf16 %v2673_v32, %v2669_v52  ;;  %v2811_v16 = vpack.c.bf16 %v2675_v6, %v2671_v54 }
 0xcf5   : > { %v2610_v55 = vpop.f32.mrb[44].mxu1  ;;  %v2661_v0 = vpop.f32.mrb[44].mxu0  ;;  %2924 = vmatprep.mubr.bf16.mxu1 %v2809_v56  ;;  %2971 = vmatprep.mubr.bf16.mxu0 %v2811_v16 }
 0xcf6   : > { %v2611_v62 = vadd.f32 %v2610_v55, %v2549_v20  ;;  %v2662_v3 = vadd.f32 %v2661_v0, %v2557_v23  ;;  %v2612_v58 = vpop.f32.mrb[45].mxu1  ;;  %v2663_v47 = vpop.f32.mrb[45].mxu0  ;;  %2925 = vmatmul.mubr.bf16.vlgmr.msra.gmra.mrb[48].mxu1 %v2808_v44  ;;  %2972 = vmatmul.mubr.bf16.vlgmr.msra.gmra.mrb[48].mxu0 %v2810_v15  ;;  %v2880_v20 = vld [vmem:[%s5209_s14] sm:$0x3] }
 0xcf7   : > { %v2613_v57 = vadd.f32 %v2612_v58, %v2553_v26  ;;  %v2664_v29 = vadd.f32 %v2663_v47, %v2561_v36  ;;  %v2614_v4 = vpop.f32.mrb[46].mxu1  ;;  %v2665_v31 = vpop.f32.mrb[46].mxu0  ;;  %v2885_v36 = vrot.slane %v2880_v20, %v4046_v21  ;;  %v2889_v38 = vrot.slane %v2880_v20, %v4040_v19  ;;  %v2988_v55 = vld [vmem:[%s5210_s15] sm:$0x3] }
 0xcf8   : > { %v2676_v5 = vmax.f32 %v2611_v62, 0.0  ;;  %v2678_v43 = vmax.f32 %v2662_v3, 0.0  ;;  %v2615_v51 = vpop.f32.mrb[47].mxu1  ;;  %v2666_v61 = vpop.f32.mrb[47].mxu0  ;;  %v2989_v0 = vld [vmem:[%s5231_s21] sm:$0x3]  ;;  %v3014_v58 = vrot.slane %v2988_v55, %v4046_v21  ;;  %v3018_v47 = vrot.slane %v2988_v55, %v4040_v19 }
 0xcf9   : > { %v2677_v40 = vmax.f32 %v2613_v57, 0.0  ;;  %v2679_v9 = vmax.f32 %v2664_v29, 0.0  ;;  %v3458_v62 = vmov 1966171168   ;;  %v3027_v29 = vrot.slane %v2989_v0, %v4046_v21 }
 0xcfa   : > { %v2812_v25 = vpack.c.bf16 %v2676_v5, %v2676_v5  ;;  %v2814_v59 = vpack.c.bf16 %v2678_v43, %v2678_v43  ;;  %v3040_v3 = vunpack.c.l.s4 %v3458_v62  ;;  %v3031_v4 = vrot.slane %v2989_v0, %v4040_v19 }
 0xcfb   : > { %v2813_v10 = vpack.c.bf16 %v2677_v40, %v2677_v40  ;;  %v2815_v22 = vpack.c.bf16 %v2679_v9, %v2679_v9 }
 0xcfc   : > { %v3041_v31 = vunpack.c.0.s8 %v3040_v3 }
 0xcfd   : > { %2930 = vmatprep.mubr.bf16.mxu1 %v2813_v10  ;;  %2977 = vmatprep.mubr.bf16.mxu0 %v2815_v22 }
 0xcfe   : > { %2931 = vmatmul.mubr.bf16.gmra.mrb[52].mxu1 %v2812_v25  ;;  %2978 = vmatmul.mubr.bf16.gmra.mrb[52].mxu0 %v2814_v59  ;;  %v3044_v40 = vsub.s32 %v3041_v31, %v4037_v18 }
 0xdc9   : > { %v2926_v39 = vpop.f32.mrb[48].mxu1  ;;  %v2973_v27 = vpop.f32.mrb[48].mxu0 }
 0xdca   : > { %v2927_v11 = vpop.f32.mrb[49].mxu1  ;;  %v2974_v2 = vpop.f32.mrb[49].mxu0 }
 0xdcb   : > { %v2928_v12 = vpop.f32.mrb[50].mxu1  ;;  %v2975_v30 = vpop.f32.mrb[50].mxu0 }
 0xdcc   : > { %v2929_v23 = vpop.f32.mrb[51].mxu1  ;;  %v2976_v26 = vpop.f32.mrb[51].mxu0 }
 0xdd1   : > { %v2932_v53 = vpop.f32.mrb[52].mxu1  ;;  %v2979_v7 = vpop.f32.mrb[52].mxu0 }
 0xdd2   : > { %v2933_v24 = vadd.f32 %v2932_v53, %v2885_v36  ;;  %v2934_v1 = vpop.f32.mrb[53].mxu1  ;;  %v2981_v41 = vpop.f32.mrb[53].mxu0 }
 0xdd3   : > { %v2935_v37 = vadd.f32 %v2934_v1, %v2889_v38  ;;  %v2936_v14 = vpop.f32.mrb[54].mxu1  ;;  %v2983_v13 = vpop.f32.mrb[54].mxu0 }
 0xdd4   : > { %v2980_v34 = vadd.f32 %v2979_v7, %v2933_v24  ;;  %v2937_v42 = vpop.f32.mrb[55].mxu1  ;;  %v2984_v45 = vpop.f32.mrb[55].mxu0 }
 0xdd5   : > { %v2982_v46 = vadd.f32 %v2981_v41, %v2935_v37 }
 0xdd6   : > { %v2986_v63 = vadd.f32 %v2980_v34, %v5150_v28 }
 0xdd7   : > { %v2987_v33 = vadd.f32 %v2982_v46, %v5148_v8 }
 0xdd8   : > { %v2990_v60 = vsel %vm1393_vm1, %v2986_v63, 0.0 }
 0xdd9   : > { %v2991_v48 = vsel %vm1393_vm1, %v2987_v33, 0.0 }
 0xdda   : > { %v2992_v49 = vadd.f32 %v2991_v48, %v2990_v60 }
 0xddc   : > { %2993 = vadd.xlane.f32.xlu1 %v2992_v49 }
 0xe69   : > { %v2994_v50 = vpop.xlane.xlu1 %2993 }
 0xe6a   : > { %v2995_v35 = vmul.f32 0.00390625, %v2994_v50 }
 0xe6c   : > { %v2996_v52 = vsub.f32 %v2986_v63, %v2995_v35  ;;  %v2997_v54 = vsub.f32 %v2987_v33, %v2995_v35 }
 0xe6e   : > { %v2998_v32 = vmul.f32 %v2996_v52, %v2996_v52  ;;  %v2999_v6 = vmul.f32 %v2997_v54, %v2997_v54 }
 0xe70   : > { %v3000_v44 = vsel %vm1393_vm1, %v2998_v32, 0.0  ;;  %v3001_v15 = vsel %vm1393_vm1, %v2999_v6, 0.0 }
 0xe71   : > { %v3002_v56 = vadd.f32 %v3001_v15, %v3000_v44 }
 0xe73   : > { %3003 = vadd.xlane.f32.xlu0 %v3002_v56 }
 0xf00   : > { %v3004_v28 = vpop.xlane.xlu0 %3003 }
 0xf01   : > { %v3005_v8 = vmul.f32 0.00390625, %v3004_v28 }
 0xf03   : > { %v3006_v16 = vadd.f32 1e-05, %v3005_v8 }
 0xf05   : > { %3378 = vrsqrt.f32 %v3006_v16 }
 0xf0f   : > { %v3379_v57 = vpop.eup %3378 }
 0xf10   : > { %v3008_v5 = vmul.f32 %v3379_v57, %v2996_v52  ;;  %v3009_v43 = vmul.f32 %v3379_v57, %v2997_v54 }
 0xf12   : > { %v3021_v51 = vmul.f32 %v3014_v58, %v3008_v5  ;;  %v3022_v61 = vmul.f32 %v3018_v47, %v3009_v43 }
 0xf14   : > { %v3034_v9 = vadd.f32 %v3027_v29, %v3021_v51  ;;  %v3035_v10 = vadd.f32 %v3031_v4, %v3022_v61 }
 0xf16   : > { %v3038_v22 = vcombine.low %v3034_v9, %v3035_v10 }
 0xf18   : > { %v3045_v25 = vrot.slane %v3038_v22, %v3044_v40 }
 0xf1a   : > { %v3052_v21 = vrot.slane %v3045_v25, %v3044_v40 }
 0xf1c   : > { %3058 = vst.msk [vmem:[%s576_s22] sm:$0x3] %vm3056_vm4, %v3052_v21 }
 0xf1d PF: > { %s5233_s23 = sld [smem:[#allocation8_spill]] }
 0xf23   : > { %s29_s24 = sadd.s32 1, %s5233_s23  }
 0xf24   : > { %p26_p9 = scmp.ge.s32.totalorder %s29_s24, 4  }
 0xf26   :  { %28 = sbr.rel (!%p26_p9) target bundleno = 7 (0x7), region = 127 }
 0xf2d   :  { %3078 = vsyncpa [#allocation3], 1 }
 0xf2e   :  { %3080 = vsyncpa [#allocation3 + $0x1], 1 }
 0xf2f   :  { %3081 = vsyncpa [#allocation5], 1 }

</bundles_post_ra>
